<compile_context>
chip_gen: v6e
topology: v6e:2x2x1
jax: 0.10.0
libtpu: 0.0.40
codegen_flags: <defaults>
</compile_context>

<pallas_src>
import functools

import jax
import jax.numpy as jnp
from jax.experimental import pallas as pl
from jax.experimental.pallas import tpu as pltpu

# ---- dimensions implied by Nerf.__init__ defaults ----
HP_L = 5
DIM = 256
HALF = DIM // 2                        # 128
INPUT_SIZE = 3 + 3 * 2 * HP_L          # 33
DIR_SIZE = 24
LANE = 128                             # lane width used for padded K / padded radiance
OUT_WIDTH = DIM + LANE                 # 384: fused (density | radiance_pad) output slab
N_HIDDEN_FIRST = 3                     # first_block hidden Linear(256,256) layers (i=1..3)
N_HIDDEN_SECOND = 4                    # second_block hidden Linear(256,256) layers (i=4..7)
N_HIDDEN = N_HIDDEN_FIRST + N_HIDDEN_SECOND   # 7


def nerf_kernel(pos_ref, dir_ref,
                w0w4p_ref, b0_ref,           # (128,512) bf16, (1,256) f32
                wh_ref, bh_ref,              # (7,256,256) bf16, (7,1,256) f32
                w4y_ref, b4_ref,             # (256,256) bf16, (1,256) f32
                wdd_ref, wdy_ref, bd_ref,    # (128,256), (256,256) bf16, (1,256) f32
                wf_ref, bf_ref,              # (256,128) bf16, (1,128) f32
                wc_ref, bc_ref,              # (128,128) bf16 (cols 4.. zero), (1,128) f32
                out_ref):                    # (BM, 384) f32: [density | radiance_pad]
    def mm(x, w):
        # bf16 x bf16 multiply, f32 accumulation on the MXU. Operands are
        # already bf16 (cast once per layer, not per dot).
        return jnp.dot(x, w, preferred_element_type=jnp.float32)

    pos = pos_ref[...]     # (BM, 128) bf16; columns >= 33 are zero
    dirv = dir_ref[...]    # (BM, 128) bf16; columns >= 24 are zero

    # ---- fused position projection: one (128,512) weight push ----
    #   lanes [:256]  -> first_block input layer Linear(33,256)
    #   lanes [256:]  -> position half of second_block Linear(289,256)
    pos_out = mm(pos, w0w4p_ref[...])                               # (BM, 512) f32

    # ---- first_block: Linear(33,256)+ReLU, 3 x [Linear(256,256)+ReLU] ----
    y = jnp.maximum(pos_out[:, :DIM] + b0_ref[...], 0.0).astype(jnp.bfloat16)
    for i in range(N_HIDDEN_FIRST):
        y = jnp.maximum(mm(y, wh_ref[i]) + bh_ref[i], 0.0).astype(jnp.bfloat16)

    # ---- second_block: Linear(289,256) on concat((y, position)) -> split matmul, NO ReLU ----
    z = (mm(y, w4y_ref[...]) + pos_out[:, DIM:] + b4_ref[...]).astype(jnp.bfloat16)
    for i in range(N_HIDDEN_FIRST, N_HIDDEN):
        z = jnp.maximum(mm(z, wh_ref[i]) + bh_ref[i], 0.0).astype(jnp.bfloat16)

    # ---- direction_layer: Linear(280,256) on concat((direction, y)) -> split matmul ----
    density = jnp.maximum(
        mm(dirv, wdd_ref[...]) + mm(z, wdy_ref[...]) + bd_ref[...], 0.0)
    out_ref[:, :DIM] = density                                      # f32 density

    # ---- head: final_layer + ReLU, color_output (padded 4->128 lanes) + Sigmoid ----
    h = jnp.maximum(mm(density.astype(jnp.bfloat16), wf_ref[...]) + bf_ref[...],
                    0.0).astype(jnp.bfloat16)
    out_ref[:, DIM:] = jax.nn.sigmoid(mm(h, wc_ref[...]) + bc_ref[...])


def _resident(shape):
    """BlockSpec covering the whole array with a constant index_map:
    the block never changes across the ray grid, so it is DMA'd once."""
    ndim = len(shape)

    def index_map(i):
        return (0,) * ndim

    return pl.BlockSpec(shape, index_map)


def _round_up(x, m):
    return ((x + m - 1) // m) * m


@functools.partial(jax.jit, static_argnames=("block_rays",))
def nerf_forward(direction, position, kparams, *, block_rays=512):
    """direction: (R,24) or (24,); position: (R,33) or (33,).
    kparams: output of prepare_params(). Returns (density (R,256), radiance (R,4))."""
    single = position.ndim == 1
    if single:
        position = position[None]
        direction = direction[None]
    R = position.shape[0]
    # Clamp the ray tile to the (8-aligned) batch so small batches aren't
    # padded to a full 512-row block; large batches use the full block.
    bm = min(block_rays, _round_up(R, 8))
    Rp = _round_up(R, bm)

    # Lane-dense, zero-padded, bf16 ray tiles (padding rows/cols contribute
    # nothing because the matching weight rows are zero). Casting here makes
    # the in-kernel operands already MXU-native.
    pos_pad = jnp.zeros((Rp, LANE), jnp.bfloat16).at[:R, :INPUT_SIZE].set(
        position.astype(jnp.bfloat16))
    dir_pad = jnp.zeros((Rp, LANE), jnp.bfloat16).at[:R, :DIR_SIZE].set(
        direction.astype(jnp.bfloat16))

    ray_in = pl.BlockSpec((bm, LANE), lambda i: (i, 0))
    in_specs = [ray_in, ray_in] + [_resident(p.shape) for p in kparams]
    out_specs = pl.BlockSpec((bm, OUT_WIDTH), lambda i: (i, 0))

    out = pl.pallas_call(
        nerf_kernel,
        grid=(Rp // bm,),
        in_specs=in_specs,
        out_specs=out_specs,
        out_shape=jax.ShapeDtypeStruct((Rp, OUT_WIDTH), jnp.float32),
        compiler_params=pltpu.CompilerParams(
            dimension_semantics=("parallel",)),
    )(pos_pad, dir_pad, *kparams)

    density = out[:R, :DIM]
    radiance = out[:R, DIM:DIM + 4]
    if single:
        return density[0], radiance[0]
    return density, radiance


def init_params(key):
    """Deterministic PyTorch-default-style init. Logical (PyTorch-shaped) f32
    params; weights stored pre-transposed as (in_features, out_features)."""
    def linear(k, fan_in, fan_out):
        k1, k2 = jax.random.split(k)
        bound = 1.0 / (fan_in ** 0.5)
        w = jax.random.uniform(k1, (fan_in, fan_out), jnp.float32, -bound, bound)
        b = jax.random.uniform(k2, (fan_out,), jnp.float32, -bound, bound)
        return w, b

    keys = jax.random.split(key, 12)
    w0, b0 = linear(keys[0], INPUT_SIZE, DIM)
    wh_list, bh_list = [], []
    for i in range(N_HIDDEN):
        w, b = linear(keys[1 + i], DIM, DIM)
        wh_list.append(w)
        bh_list.append(b)
    wh = jnp.stack(wh_list)                              # (7,256,256)
    bh = jnp.stack(bh_list)                              # (7,256)
    w4, b4 = linear(keys[8], DIM + INPUT_SIZE, DIM)      # concat order: (y, position)
    wd, bd = linear(keys[9], DIM + DIR_SIZE, DIM)        # concat order: (direction, y)
    wf, bfin = linear(keys[10], DIM, HALF)
    wc, bc = linear(keys[11], HALF, 4)
    return dict(w0=w0, b0=b0, wh=wh, bh=bh, w4=w4, b4=b4,
                wd=wd, bd=bd, wf=wf, bf=bfin, wc=wc, bc=bc)


def prepare_params(params):
    """Split the concat weights, zero-pad ragged dims to 128 lanes, fuse the two
    position weights into one (128,512) matrix, cast weights to bf16 (biases
    stay f32). Kernel-argument order."""
    def pad_cast(w, rows=None, cols=None):
        r, c = w.shape
        rows = rows or r
        cols = cols or c
        out = jnp.zeros((rows, cols), jnp.bfloat16)
        return out.at[:r, :c].set(w.astype(jnp.bfloat16))

    w0p = pad_cast(params["w0"], rows=LANE)               # (128,256)
    w4p = pad_cast(params["w4"][DIM:], rows=LANE)         # (128,256)
    w0w4p = jnp.concatenate([w0p, w4p], axis=1)           # (128,512) fused pos weight
    wh = params["wh"].astype(jnp.bfloat16)                # (7,256,256)
    w4y = params["w4"][:DIM].astype(jnp.bfloat16)         # (256,256)
    wdd = pad_cast(params["wd"][:DIR_SIZE], rows=LANE)    # (128,256)
    wdy = params["wd"][DIR_SIZE:].astype(jnp.bfloat16)    # (256,256)
    wf = params["wf"].astype(jnp.bfloat16)                # (256,128)
    wcp = pad_cast(params["wc"], cols=LANE)               # (128,128)

    b0 = params["b0"].reshape(1, DIM)
    bh = params["bh"].reshape(N_HIDDEN, 1, DIM)
    b4 = params["b4"].reshape(1, DIM)
    bd = params["bd"].reshape(1, DIM)
    bfin = params["bf"].reshape(1, HALF)
    bcp = jnp.zeros((1, LANE), jnp.float32).at[:, :4].set(params["bc"])
    return (w0w4p, b0, wh, bh, w4y, b4, wdd, wdy, bd, wf, bfin, wcp, bcp)


def nerf_reference(direction, position, params):
    """Pure-JAX mirror of the PyTorch forward (batched over rays), using the same
    precision recipe as the kernel: bf16 matmul operands, f32 accumulation."""
    def lin(x, w, b):
        return jnp.dot(x.astype(jnp.bfloat16), w.astype(jnp.bfloat16),
                       preferred_element_type=jnp.float32) + b

    p = params
    y = jax.nn.relu(lin(position, p["w0"], p["b0"]))
    for i in range(N_HIDDEN_FIRST):
        y = jax.nn.relu(lin(y, p["wh"][i], p["bh"][i]))
    y = lin(jnp.concatenate([y, position], axis=-1), p["w4"], p["b4"])
    for i in range(N_HIDDEN_FIRST, N_HIDDEN):
        y = jax.nn.relu(lin(y, p["wh"][i], p["bh"][i]))
    y = lin(jnp.concatenate([direction, y], axis=-1), p["wd"], p["bd"])
    density = jax.nn.relu(y)
    h = jax.nn.relu(lin(density, p["wf"], p["bf"]))
    radiance = jax.nn.sigmoid(lin(h, p["wc"], p["bc"]))
    return density, radiance


if __name__ == "__main__":
    key = jax.random.PRNGKey(0)
    k_params, k_dir, k_pos = jax.random.split(key, 3)

    params = init_params(k_params)
    kparams = prepare_params(params)

    NUM_RAYS = 1024                   # block_rays=512 -> 2 grid steps (keeps both v7x TCs busy)
    direction = jax.random.normal(k_dir, (NUM_RAYS, DIR_SIZE), jnp.float32)
    position = jax.random.normal(k_pos, (NUM_RAYS, INPUT_SIZE), jnp.float32)

    density, radiance = nerf_forward(direction, position, kparams, block_rays=512)
    density = jax.block_until_ready(density)
    radiance = jax.block_until_ready(radiance)

    ref_density, ref_radiance = nerf_reference(direction, position, params)
    assert density.shape == (NUM_RAYS, DIM) and radiance.shape == (NUM_RAYS, 4)
    assert jnp.allclose(density, ref_density, rtol=1e-2, atol=1e-2), \
        float(jnp.max(jnp.abs(density - ref_density)))
    assert jnp.allclose(radiance, ref_radiance, rtol=1e-2, atol=1e-2), \
        float(jnp.max(jnp.abs(radiance - ref_radiance)))

    print("KERNEL_OK")
</pallas_src>

<mosaic_0001>
module attributes {stable_mosaic.version = 11 : i64} {
  func.func @nerf_kernel(%arg0: i32, %arg1: memref<512x128xbf16, #tpu.memory_space<vmem>>, %arg2: memref<512x128xbf16, #tpu.memory_space<vmem>>, %arg3: memref<128x512xbf16, #tpu.memory_space<vmem>>, %arg4: memref<1x256xf32, #tpu.memory_space<vmem>>, %arg5: memref<7x256x256xbf16, #tpu.memory_space<vmem>>, %arg6: memref<7x1x256xf32, #tpu.memory_space<vmem>>, %arg7: memref<256x256xbf16, #tpu.memory_space<vmem>>, %arg8: memref<1x256xf32, #tpu.memory_space<vmem>>, %arg9: memref<128x256xbf16, #tpu.memory_space<vmem>>, %arg10: memref<256x256xbf16, #tpu.memory_space<vmem>>, %arg11: memref<1x256xf32, #tpu.memory_space<vmem>>, %arg12: memref<256x128xbf16, #tpu.memory_space<vmem>>, %arg13: memref<1x128xf32, #tpu.memory_space<vmem>>, %arg14: memref<128x128xbf16, #tpu.memory_space<vmem>>, %arg15: memref<1x128xf32, #tpu.memory_space<vmem>>, %arg16: memref<512x384xf32, #tpu.memory_space<vmem>>) attributes {dimension_semantics = [#tpu.dimension_semantics<parallel>], iteration_bounds = array<i64: 2>, scalar_prefetch = 0 : i64, scratch_operands = 0 : i64, tpu.core_type = #tpu.core_type<tc>, window_params = [{transform_indices = @transform_0, window_bounds = array<i64: 512, 128>}, {transform_indices = @transform_1, window_bounds = array<i64: 512, 128>}, {pipeline_mode = #tpu.pipeline_mode<synchronous>, transform_indices = @transform_2, window_bounds = array<i64: 128, 512>}, {pipeline_mode = #tpu.pipeline_mode<synchronous>, transform_indices = @transform_3, window_bounds = array<i64: 1, 256>}, {pipeline_mode = #tpu.pipeline_mode<synchronous>, transform_indices = @transform_4, window_bounds = array<i64: 7, 256, 256>}, {pipeline_mode = #tpu.pipeline_mode<synchronous>, transform_indices = @transform_5, window_bounds = array<i64: 7, 1, 256>}, {pipeline_mode = #tpu.pipeline_mode<synchronous>, transform_indices = @transform_6, window_bounds = array<i64: 256, 256>}, {pipeline_mode = #tpu.pipeline_mode<synchronous>, transform_indices = @transform_7, window_bounds = array<i64: 1, 256>}, {pipeline_mode = #tpu.pipeline_mode<synchronous>, transform_indices = @transform_8, window_bounds = array<i64: 128, 256>}, {pipeline_mode = #tpu.pipeline_mode<synchronous>, transform_indices = @transform_9, window_bounds = array<i64: 256, 256>}, {pipeline_mode = #tpu.pipeline_mode<synchronous>, transform_indices = @transform_10, window_bounds = array<i64: 1, 256>}, {pipeline_mode = #tpu.pipeline_mode<synchronous>, transform_indices = @transform_11, window_bounds = array<i64: 256, 128>}, {pipeline_mode = #tpu.pipeline_mode<synchronous>, transform_indices = @transform_12, window_bounds = array<i64: 1, 128>}, {pipeline_mode = #tpu.pipeline_mode<synchronous>, transform_indices = @transform_13, window_bounds = array<i64: 128, 128>}, {pipeline_mode = #tpu.pipeline_mode<synchronous>, transform_indices = @transform_14, window_bounds = array<i64: 1, 128>}, {transform_indices = @transform_15, window_bounds = array<i64: 512, 384>}]} {
    %c0 = arith.constant 0 : index
    %c0_0 = arith.constant 0 : index
    %0 = vector.load %arg1[%c0, %c0_0] : memref<512x128xbf16, #tpu.memory_space<vmem>>, vector<512x128xbf16>
    %c0_1 = arith.constant 0 : index
    %c0_2 = arith.constant 0 : index
    %1 = vector.load %arg2[%c0_1, %c0_2] : memref<512x128xbf16, #tpu.memory_space<vmem>>, vector<512x128xbf16>
    %c0_3 = arith.constant 0 : index
    %c0_4 = arith.constant 0 : index
    %2 = vector.load %arg3[%c0_3, %c0_4] : memref<128x512xbf16, #tpu.memory_space<vmem>>, vector<128x512xbf16>
    %cst = arith.constant dense<0.000000e+00> : vector<512x512xf32>
    %3 = tpu.matmul %0, %2, %cst {dimension_numbers = #tpu.dot_dimension_numbers<[1], [0], [0], [1], [0, 0, 1, 1], [], []>} : vector<512x128xbf16>, vector<128x512xbf16>, vector<512x512xf32> -> vector<512x512xf32>
    %4 = vector.extract_strided_slice %3 {offsets = [0, 0], sizes = [512, 256], strides = [1, 1]} : vector<512x512xf32> to vector<512x256xf32>
    %c0_5 = arith.constant 0 : index
    %c0_6 = arith.constant 0 : index
    %5 = vector.load %arg4[%c0_5, %c0_6] : memref<1x256xf32, #tpu.memory_space<vmem>>, vector<1x256xf32>
    %6 = vector.broadcast %5 : vector<1x256xf32> to vector<512x256xf32>
    %7 = arith.addf %4, %6 : vector<512x256xf32>
    %cst_7 = arith.constant 0.000000e+00 : f32
    %8 = vector.broadcast %cst_7 : f32 to vector<512x256xf32>
    %9 = arith.maximumf %7, %8 : vector<512x256xf32>
    %10 = arith.truncf %9 : vector<512x256xf32> to vector<512x256xbf16>
    %c0_8 = arith.constant 0 : index
    %c0_9 = arith.constant 0 : index
    %c0_10 = arith.constant 0 : index
    %11 = vector.load %arg5[%c0_8, %c0_9, %c0_10] : memref<7x256x256xbf16, #tpu.memory_space<vmem>>, vector<1x256x256xbf16>
    %12 = vector.shape_cast %11 : vector<1x256x256xbf16> to vector<256x256xbf16>
    %cst_11 = arith.constant dense<0.000000e+00> : vector<512x256xf32>
    %13 = tpu.matmul %10, %12, %cst_11 {dimension_numbers = #tpu.dot_dimension_numbers<[1], [0], [0], [1], [0, 0, 1, 1], [], []>} : vector<512x256xbf16>, vector<256x256xbf16>, vector<512x256xf32> -> vector<512x256xf32>
    %c0_12 = arith.constant 0 : index
    %c0_13 = arith.constant 0 : index
    %c0_14 = arith.constant 0 : index
    %14 = vector.load %arg6[%c0_12, %c0_13, %c0_14] : memref<7x1x256xf32, #tpu.memory_space<vmem>>, vector<1x1x256xf32>
    %15 = vector.shape_cast %14 : vector<1x1x256xf32> to vector<1x256xf32>
    %16 = vector.broadcast %15 : vector<1x256xf32> to vector<512x256xf32>
    %17 = arith.addf %13, %16 : vector<512x256xf32>
    %cst_15 = arith.constant 0.000000e+00 : f32
    %18 = vector.broadcast %cst_15 : f32 to vector<512x256xf32>
    %19 = arith.maximumf %17, %18 : vector<512x256xf32>
    %20 = arith.truncf %19 : vector<512x256xf32> to vector<512x256xbf16>
    %c1 = arith.constant 1 : index
    %c0_16 = arith.constant 0 : index
    %c0_17 = arith.constant 0 : index
    %21 = vector.load %arg5[%c1, %c0_16, %c0_17] : memref<7x256x256xbf16, #tpu.memory_space<vmem>>, vector<1x256x256xbf16>
    %22 = vector.shape_cast %21 : vector<1x256x256xbf16> to vector<256x256xbf16>
    %cst_18 = arith.constant dense<0.000000e+00> : vector<512x256xf32>
    %23 = tpu.matmul %20, %22, %cst_18 {dimension_numbers = #tpu.dot_dimension_numbers<[1], [0], [0], [1], [0, 0, 1, 1], [], []>} : vector<512x256xbf16>, vector<256x256xbf16>, vector<512x256xf32> -> vector<512x256xf32>
    %c1_19 = arith.constant 1 : index
    %c0_20 = arith.constant 0 : index
    %c0_21 = arith.constant 0 : index
    %24 = vector.load %arg6[%c1_19, %c0_20, %c0_21] : memref<7x1x256xf32, #tpu.memory_space<vmem>>, vector<1x1x256xf32>
    %25 = vector.shape_cast %24 : vector<1x1x256xf32> to vector<1x256xf32>
    %26 = vector.broadcast %25 : vector<1x256xf32> to vector<512x256xf32>
    %27 = arith.addf %23, %26 : vector<512x256xf32>
    %cst_22 = arith.constant 0.000000e+00 : f32
    %28 = vector.broadcast %cst_22 : f32 to vector<512x256xf32>
    %29 = arith.maximumf %27, %28 : vector<512x256xf32>
    %30 = arith.truncf %29 : vector<512x256xf32> to vector<512x256xbf16>
    %c2 = arith.constant 2 : index
    %c0_23 = arith.constant 0 : index
    %c0_24 = arith.constant 0 : index
    %31 = vector.load %arg5[%c2, %c0_23, %c0_24] : memref<7x256x256xbf16, #tpu.memory_space<vmem>>, vector<1x256x256xbf16>
    %32 = vector.shape_cast %31 : vector<1x256x256xbf16> to vector<256x256xbf16>
    %cst_25 = arith.constant dense<0.000000e+00> : vector<512x256xf32>
    %33 = tpu.matmul %30, %32, %cst_25 {dimension_numbers = #tpu.dot_dimension_numbers<[1], [0], [0], [1], [0, 0, 1, 1], [], []>} : vector<512x256xbf16>, vector<256x256xbf16>, vector<512x256xf32> -> vector<512x256xf32>
    %c2_26 = arith.constant 2 : index
    %c0_27 = arith.constant 0 : index
    %c0_28 = arith.constant 0 : index
    %34 = vector.load %arg6[%c2_26, %c0_27, %c0_28] : memref<7x1x256xf32, #tpu.memory_space<vmem>>, vector<1x1x256xf32>
    %35 = vector.shape_cast %34 : vector<1x1x256xf32> to vector<1x256xf32>
    %36 = vector.broadcast %35 : vector<1x256xf32> to vector<512x256xf32>
    %37 = arith.addf %33, %36 : vector<512x256xf32>
    %cst_29 = arith.constant 0.000000e+00 : f32
    %38 = vector.broadcast %cst_29 : f32 to vector<512x256xf32>
    %39 = arith.maximumf %37, %38 : vector<512x256xf32>
    %40 = arith.truncf %39 : vector<512x256xf32> to vector<512x256xbf16>
    %c0_30 = arith.constant 0 : index
    %c0_31 = arith.constant 0 : index
    %41 = vector.load %arg7[%c0_30, %c0_31] : memref<256x256xbf16, #tpu.memory_space<vmem>>, vector<256x256xbf16>
    %cst_32 = arith.constant dense<0.000000e+00> : vector<512x256xf32>
    %42 = tpu.matmul %40, %41, %cst_32 {dimension_numbers = #tpu.dot_dimension_numbers<[1], [0], [0], [1], [0, 0, 1, 1], [], []>} : vector<512x256xbf16>, vector<256x256xbf16>, vector<512x256xf32> -> vector<512x256xf32>
    %43 = vector.extract_strided_slice %3 {offsets = [0, 256], sizes = [512, 256], strides = [1, 1]} : vector<512x512xf32> to vector<512x256xf32>
    %44 = arith.addf %42, %43 : vector<512x256xf32>
    %c0_33 = arith.constant 0 : index
    %c0_34 = arith.constant 0 : index
    %45 = vector.load %arg8[%c0_33, %c0_34] : memref<1x256xf32, #tpu.memory_space<vmem>>, vector<1x256xf32>
    %46 = vector.broadcast %45 : vector<1x256xf32> to vector<512x256xf32>
    %47 = arith.addf %44, %46 : vector<512x256xf32>
    %48 = arith.truncf %47 : vector<512x256xf32> to vector<512x256xbf16>
    %c3 = arith.constant 3 : index
    %c0_35 = arith.constant 0 : index
    %c0_36 = arith.constant 0 : index
    %49 = vector.load %arg5[%c3, %c0_35, %c0_36] : memref<7x256x256xbf16, #tpu.memory_space<vmem>>, vector<1x256x256xbf16>
    %50 = vector.shape_cast %49 : vector<1x256x256xbf16> to vector<256x256xbf16>
    %cst_37 = arith.constant dense<0.000000e+00> : vector<512x256xf32>
    %51 = tpu.matmul %48, %50, %cst_37 {dimension_numbers = #tpu.dot_dimension_numbers<[1], [0], [0], [1], [0, 0, 1, 1], [], []>} : vector<512x256xbf16>, vector<256x256xbf16>, vector<512x256xf32> -> vector<512x256xf32>
    %c3_38 = arith.constant 3 : index
    %c0_39 = arith.constant 0 : index
    %c0_40 = arith.constant 0 : index
    %52 = vector.load %arg6[%c3_38, %c0_39, %c0_40] : memref<7x1x256xf32, #tpu.memory_space<vmem>>, vector<1x1x256xf32>
    %53 = vector.shape_cast %52 : vector<1x1x256xf32> to vector<1x256xf32>
    %54 = vector.broadcast %53 : vector<1x256xf32> to vector<512x256xf32>
    %55 = arith.addf %51, %54 : vector<512x256xf32>
    %cst_41 = arith.constant 0.000000e+00 : f32
    %56 = vector.broadcast %cst_41 : f32 to vector<512x256xf32>
    %57 = arith.maximumf %55, %56 : vector<512x256xf32>
    %58 = arith.truncf %57 : vector<512x256xf32> to vector<512x256xbf16>
    %c4 = arith.constant 4 : index
    %c0_42 = arith.constant 0 : index
    %c0_43 = arith.constant 0 : index
    %59 = vector.load %arg5[%c4, %c0_42, %c0_43] : memref<7x256x256xbf16, #tpu.memory_space<vmem>>, vector<1x256x256xbf16>
    %60 = vector.shape_cast %59 : vector<1x256x256xbf16> to vector<256x256xbf16>
    %cst_44 = arith.constant dense<0.000000e+00> : vector<512x256xf32>
    %61 = tpu.matmul %58, %60, %cst_44 {dimension_numbers = #tpu.dot_dimension_numbers<[1], [0], [0], [1], [0, 0, 1, 1], [], []>} : vector<512x256xbf16>, vector<256x256xbf16>, vector<512x256xf32> -> vector<512x256xf32>
    %c4_45 = arith.constant 4 : index
    %c0_46 = arith.constant 0 : index
    %c0_47 = arith.constant 0 : index
    %62 = vector.load %arg6[%c4_45, %c0_46, %c0_47] : memref<7x1x256xf32, #tpu.memory_space<vmem>>, vector<1x1x256xf32>
    %63 = vector.shape_cast %62 : vector<1x1x256xf32> to vector<1x256xf32>
    %64 = vector.broadcast %63 : vector<1x256xf32> to vector<512x256xf32>
    %65 = arith.addf %61, %64 : vector<512x256xf32>
    %cst_48 = arith.constant 0.000000e+00 : f32
    %66 = vector.broadcast %cst_48 : f32 to vector<512x256xf32>
    %67 = arith.maximumf %65, %66 : vector<512x256xf32>
    %68 = arith.truncf %67 : vector<512x256xf32> to vector<512x256xbf16>
    %c5 = arith.constant 5 : index
    %c0_49 = arith.constant 0 : index
    %c0_50 = arith.constant 0 : index
    %69 = vector.load %arg5[%c5, %c0_49, %c0_50] : memref<7x256x256xbf16, #tpu.memory_space<vmem>>, vector<1x256x256xbf16>
    %70 = vector.shape_cast %69 : vector<1x256x256xbf16> to vector<256x256xbf16>
    %cst_51 = arith.constant dense<0.000000e+00> : vector<512x256xf32>
    %71 = tpu.matmul %68, %70, %cst_51 {dimension_numbers = #tpu.dot_dimension_numbers<[1], [0], [0], [1], [0, 0, 1, 1], [], []>} : vector<512x256xbf16>, vector<256x256xbf16>, vector<512x256xf32> -> vector<512x256xf32>
    %c5_52 = arith.constant 5 : index
    %c0_53 = arith.constant 0 : index
    %c0_54 = arith.constant 0 : index
    %72 = vector.load %arg6[%c5_52, %c0_53, %c0_54] : memref<7x1x256xf32, #tpu.memory_space<vmem>>, vector<1x1x256xf32>
    %73 = vector.shape_cast %72 : vector<1x1x256xf32> to vector<1x256xf32>
    %74 = vector.broadcast %73 : vector<1x256xf32> to vector<512x256xf32>
    %75 = arith.addf %71, %74 : vector<512x256xf32>
    %cst_55 = arith.constant 0.000000e+00 : f32
    %76 = vector.broadcast %cst_55 : f32 to vector<512x256xf32>
    %77 = arith.maximumf %75, %76 : vector<512x256xf32>
    %78 = arith.truncf %77 : vector<512x256xf32> to vector<512x256xbf16>
    %c6 = arith.constant 6 : index
    %c0_56 = arith.constant 0 : index
    %c0_57 = arith.constant 0 : index
    %79 = vector.load %arg5[%c6, %c0_56, %c0_57] : memref<7x256x256xbf16, #tpu.memory_space<vmem>>, vector<1x256x256xbf16>
    %80 = vector.shape_cast %79 : vector<1x256x256xbf16> to vector<256x256xbf16>
    %cst_58 = arith.constant dense<0.000000e+00> : vector<512x256xf32>
    %81 = tpu.matmul %78, %80, %cst_58 {dimension_numbers = #tpu.dot_dimension_numbers<[1], [0], [0], [1], [0, 0, 1, 1], [], []>} : vector<512x256xbf16>, vector<256x256xbf16>, vector<512x256xf32> -> vector<512x256xf32>
    %c6_59 = arith.constant 6 : index
    %c0_60 = arith.constant 0 : index
    %c0_61 = arith.constant 0 : index
    %82 = vector.load %arg6[%c6_59, %c0_60, %c0_61] : memref<7x1x256xf32, #tpu.memory_space<vmem>>, vector<1x1x256xf32>
    %83 = vector.shape_cast %82 : vector<1x1x256xf32> to vector<1x256xf32>
    %84 = vector.broadcast %83 : vector<1x256xf32> to vector<512x256xf32>
    %85 = arith.addf %81, %84 : vector<512x256xf32>
    %cst_62 = arith.constant 0.000000e+00 : f32
    %86 = vector.broadcast %cst_62 : f32 to vector<512x256xf32>
    %87 = arith.maximumf %85, %86 : vector<512x256xf32>
    %88 = arith.truncf %87 : vector<512x256xf32> to vector<512x256xbf16>
    %c0_63 = arith.constant 0 : index
    %c0_64 = arith.constant 0 : index
    %89 = vector.load %arg9[%c0_63, %c0_64] : memref<128x256xbf16, #tpu.memory_space<vmem>>, vector<128x256xbf16>
    %cst_65 = arith.constant dense<0.000000e+00> : vector<512x256xf32>
    %90 = tpu.matmul %1, %89, %cst_65 {dimension_numbers = #tpu.dot_dimension_numbers<[1], [0], [0], [1], [0, 0, 1, 1], [], []>} : vector<512x128xbf16>, vector<128x256xbf16>, vector<512x256xf32> -> vector<512x256xf32>
    %c0_66 = arith.constant 0 : index
    %c0_67 = arith.constant 0 : index
    %91 = vector.load %arg10[%c0_66, %c0_67] : memref<256x256xbf16, #tpu.memory_space<vmem>>, vector<256x256xbf16>
    %cst_68 = arith.constant dense<0.000000e+00> : vector<512x256xf32>
    %92 = tpu.matmul %88, %91, %cst_68 {dimension_numbers = #tpu.dot_dimension_numbers<[1], [0], [0], [1], [0, 0, 1, 1], [], []>} : vector<512x256xbf16>, vector<256x256xbf16>, vector<512x256xf32> -> vector<512x256xf32>
    %93 = arith.addf %90, %92 : vector<512x256xf32>
    %c0_69 = arith.constant 0 : index
    %c0_70 = arith.constant 0 : index
    %94 = vector.load %arg11[%c0_69, %c0_70] : memref<1x256xf32, #tpu.memory_space<vmem>>, vector<1x256xf32>
    %95 = vector.broadcast %94 : vector<1x256xf32> to vector<512x256xf32>
    %96 = arith.addf %93, %95 : vector<512x256xf32>
    %cst_71 = arith.constant 0.000000e+00 : f32
    %97 = vector.broadcast %cst_71 : f32 to vector<512x256xf32>
    %98 = arith.maximumf %96, %97 : vector<512x256xf32>
    %c0_72 = arith.constant 0 : index
    %c0_73 = arith.constant 0 : index
    %99 = vector.load %arg16[%c0_72, %c0_73] : memref<512x384xf32, #tpu.memory_space<vmem>>, vector<512x256xf32>
    tpu.vector_store %arg16[%c0_72, %c0_73], %98 {strides = array<i32>} : memref<512x384xf32, #tpu.memory_space<vmem>>, vector<512x256xf32>,
    %100 = arith.truncf %98 : vector<512x256xf32> to vector<512x256xbf16>
    %c0_74 = arith.constant 0 : index
    %c0_75 = arith.constant 0 : index
    %101 = vector.load %arg12[%c0_74, %c0_75] : memref<256x128xbf16, #tpu.memory_space<vmem>>, vector<256x128xbf16>
    %cst_76 = arith.constant dense<0.000000e+00> : vector<512x128xf32>
    %102 = tpu.matmul %100, %101, %cst_76 {dimension_numbers = #tpu.dot_dimension_numbers<[1], [0], [0], [1], [0, 0, 1, 1], [], []>} : vector<512x256xbf16>, vector<256x128xbf16>, vector<512x128xf32> -> vector<512x128xf32>
    %c0_77 = arith.constant 0 : index
    %c0_78 = arith.constant 0 : index
    %103 = vector.load %arg13[%c0_77, %c0_78] : memref<1x128xf32, #tpu.memory_space<vmem>>, vector<1x128xf32>
    %104 = vector.broadcast %103 : vector<1x128xf32> to vector<512x128xf32>
    %105 = arith.addf %102, %104 : vector<512x128xf32>
    %cst_79 = arith.constant 0.000000e+00 : f32
    %106 = vector.broadcast %cst_79 : f32 to vector<512x128xf32>
    %107 = arith.maximumf %105, %106 : vector<512x128xf32>
    %108 = arith.truncf %107 : vector<512x128xf32> to vector<512x128xbf16>
    %c0_80 = arith.constant 0 : index
    %c0_81 = arith.constant 0 : index
    %109 = vector.load %arg14[%c0_80, %c0_81] : memref<128x128xbf16, #tpu.memory_space<vmem>>, vector<128x128xbf16>
    %cst_82 = arith.constant dense<0.000000e+00> : vector<512x128xf32>
    %110 = tpu.matmul %108, %109, %cst_82 {dimension_numbers = #tpu.dot_dimension_numbers<[1], [0], [0], [1], [0, 0, 1, 1], [], []>} : vector<512x128xbf16>, vector<128x128xbf16>, vector<512x128xf32> -> vector<512x128xf32>
    %c0_83 = arith.constant 0 : index
    %c0_84 = arith.constant 0 : index
    %111 = vector.load %arg15[%c0_83, %c0_84] : memref<1x128xf32, #tpu.memory_space<vmem>>, vector<1x128xf32>
    %112 = vector.broadcast %111 : vector<1x128xf32> to vector<512x128xf32>
    %113 = arith.addf %110, %112 : vector<512x128xf32>
    %114 = arith.negf %113 : vector<512x128xf32>
    %115 = math.exp %114 : vector<512x128xf32>
    %cst_85 = arith.constant 1.000000e+00 : f32
    %116 = vector.broadcast %cst_85 : f32 to vector<512x128xf32>
    %117 = arith.addf %116, %115 : vector<512x128xf32>
    %118 = arith.divf %116, %117 : vector<512x128xf32>
    %c0_86 = arith.constant 0 : index
    %c256 = arith.constant 256 : index
    %119 = vector.load %arg16[%c0_86, %c256] : memref<512x384xf32, #tpu.memory_space<vmem>>, vector<512x128xf32>
    tpu.vector_store %arg16[%c0_86, %c256], %118 {strides = array<i32>} : memref<512x384xf32, #tpu.memory_space<vmem>>, vector<512x128xf32>,
    return
  }
  func.func @transform_0(%arg0: i32) -> (i32, i32) {
    %c0_i32 = arith.constant 0 : i32
    %c0_i32_0 = arith.constant 0 : i32
    return %arg0, %c0_i32 : i32, i32
  }
  func.func @transform_1(%arg0: i32) -> (i32, i32) {
    %c0_i32 = arith.constant 0 : i32
    %c0_i32_0 = arith.constant 0 : i32
    return %arg0, %c0_i32 : i32, i32
  }
  func.func @transform_2(%arg0: i32) -> (i32, i32) {
    %c0_i32 = arith.constant 0 : i32
    %c0_i32_0 = arith.constant 0 : i32
    %c0_i32_1 = arith.constant 0 : i32
    return %c0_i32, %c0_i32_0 : i32, i32
  }
  func.func @transform_3(%arg0: i32) -> (i32, i32) {
    %c0_i32 = arith.constant 0 : i32
    %c0_i32_0 = arith.constant 0 : i32
    %c0_i32_1 = arith.constant 0 : i32
    return %c0_i32, %c0_i32_0 : i32, i32
  }
  func.func @transform_4(%arg0: i32) -> (i32, i32, i32) {
    %c0_i32 = arith.constant 0 : i32
    %c0_i32_0 = arith.constant 0 : i32
    %c0_i32_1 = arith.constant 0 : i32
    %c0_i32_2 = arith.constant 0 : i32
    return %c0_i32, %c0_i32_0, %c0_i32_1 : i32, i32, i32
  }
  func.func @transform_5(%arg0: i32) -> (i32, i32, i32) {
    %c0_i32 = arith.constant 0 : i32
    %c0_i32_0 = arith.constant 0 : i32
    %c0_i32_1 = arith.constant 0 : i32
    %c0_i32_2 = arith.constant 0 : i32
    return %c0_i32, %c0_i32_0, %c0_i32_1 : i32, i32, i32
  }
  func.func @transform_6(%arg0: i32) -> (i32, i32) {
    %c0_i32 = arith.constant 0 : i32
    %c0_i32_0 = arith.constant 0 : i32
    %c0_i32_1 = arith.constant 0 : i32
    return %c0_i32, %c0_i32_0 : i32, i32
  }
  func.func @transform_7(%arg0: i32) -> (i32, i32) {
    %c0_i32 = arith.constant 0 : i32
    %c0_i32_0 = arith.constant 0 : i32
    %c0_i32_1 = arith.constant 0 : i32
    return %c0_i32, %c0_i32_0 : i32, i32
  }
  func.func @transform_8(%arg0: i32) -> (i32, i32) {
    %c0_i32 = arith.constant 0 : i32
    %c0_i32_0 = arith.constant 0 : i32
    %c0_i32_1 = arith.constant 0 : i32
    return %c0_i32, %c0_i32_0 : i32, i32
  }
  func.func @transform_9(%arg0: i32) -> (i32, i32) {
    %c0_i32 = arith.constant 0 : i32
    %c0_i32_0 = arith.constant 0 : i32
    %c0_i32_1 = arith.constant 0 : i32
    return %c0_i32, %c0_i32_0 : i32, i32
  }
  func.func @transform_10(%arg0: i32) -> (i32, i32) {
    %c0_i32 = arith.constant 0 : i32
    %c0_i32_0 = arith.constant 0 : i32
    %c0_i32_1 = arith.constant 0 : i32
    return %c0_i32, %c0_i32_0 : i32, i32
  }
  func.func @transform_11(%arg0: i32) -> (i32, i32) {
    %c0_i32 = arith.constant 0 : i32
    %c0_i32_0 = arith.constant 0 : i32
    %c0_i32_1 = arith.constant 0 : i32
    return %c0_i32, %c0_i32_0 : i32, i32
  }
  func.func @transform_12(%arg0: i32) -> (i32, i32) {
    %c0_i32 = arith.constant 0 : i32
    %c0_i32_0 = arith.constant 0 : i32
    %c0_i32_1 = arith.constant 0 : i32
    return %c0_i32, %c0_i32_0 : i32, i32
  }
  func.func @transform_13(%arg0: i32) -> (i32, i32) {
    %c0_i32 = arith.constant 0 : i32
    %c0_i32_0 = arith.constant 0 : i32
    %c0_i32_1 = arith.constant 0 : i32
    return %c0_i32, %c0_i32_0 : i32, i32
  }
  func.func @transform_14(%arg0: i32) -> (i32, i32) {
    %c0_i32 = arith.constant 0 : i32
    %c0_i32_0 = arith.constant 0 : i32
    %c0_i32_1 = arith.constant 0 : i32
    return %c0_i32, %c0_i32_0 : i32, i32
  }
  func.func @transform_15(%arg0: i32) -> (i32, i32) {
    %c0_i32 = arith.constant 0 : i32
    %c0_i32_0 = arith.constant 0 : i32
    return %arg0, %c0_i32 : i32, i32
  }
}

</mosaic_0001>

<bundles_post_ra>
// kernel: nerf_forward.1
= control target key start
LH: loop header
LB: loop body
LE: loop exit
PB: predicated region body
PF: predicated region fallthrough
CT: control target
= control target key end

     0   :  { %s12915_s18 = smov 0   ;;  %s16811_s0 = inlined_call_operand.vmem [shape: bf16[1024,128], index: 0, kind: input, shape index: {}]   ;;  %s16812_s1 = inlined_call_operand.vmem [shape: bf16[1024,128], index: 1, kind: input, shape index: {}]   ;;  %s16813_s2 = inlined_call_operand.vmem [shape: bf16[128,512], index: 2, kind: input, shape index: {}]   ;;  %s16814_s3 = inlined_call_operand.vmem [shape: f32[1,256], index: 3, kind: input, shape index: {}]   ;;  %s16815_s4 = inlined_call_operand.vmem [shape: bf16[7,256,256], index: 4, kind: input, shape index: {}]   ;;  %s16816_s5 = inlined_call_operand.vmem [shape: f32[7,1,256], index: 5, kind: input, shape index: {}]   ;;  %s16817_s6 = inlined_call_operand.vmem [shape: bf16[256,256], index: 6, kind: input, shape index: {}]   ;;  %s16818_s7 = inlined_call_operand.vmem [shape: f32[1,256], index: 7, kind: input, shape index: {}]   ;;  %s16819_s8 = inlined_call_operand.vmem [shape: bf16[128,256], index: 8, kind: input, shape index: {}]   ;;  %s16820_s9 = inlined_call_operand.vmem [shape: bf16[256,256], index: 9, kind: input, shape index: {}]   ;;  %s16821_s10 = inlined_call_operand.vmem [shape: f32[1,256], index: 10, kind: input, shape index: {}]   ;;  %s16822_s11 = inlined_call_operand.vmem [shape: bf16[256,128], index: 11, kind: input, shape index: {}]   ;;  %s16823_s12 = inlined_call_operand.vmem [shape: f32[1,128], index: 12, kind: input, shape index: {}]   ;;  %s16824_s13 = inlined_call_operand.vmem [shape: bf16[128,128], index: 13, kind: input, shape index: {}]   ;;  %s16825_s14 = inlined_call_operand.vmem [shape: f32[1,128], index: 14, kind: input, shape index: {}]   ;;  %s16826_s15 = inlined_call_operand.vmem [shape: f32[1024,384], index: 15, kind: output, shape index: {}]  }
   0x1 LB: > { %s11121_s19 = sadd.s32 4294967295, %s12832_s18   ;;  %p11125_p0 = scmp.ge.s32.totalorder %s12832_s18, 1  ;;  %s12832_s18 = sphi %s12915_s18, %s25_s18  }
   0x2   : > { %p449_p1 = scmp.lt.s32.totalorder %s12832_s18, 3 }
   0x4   : > { %p450_p2 = pnand %p11125_p0, %p449_p1 }
   0x6   : > { %453 = sbr.rel (%p450_p2) target bundleno = 2844 (0xb1c), region = 80 }
   0xb   : > { %v11968_v0 = vld [vmem:[%s16813_s2 + $0xe4] ss:$16 sps:$4 sm:$0xff]   ;;  %s11126_s22 = sshll.u32 %s11121_s19, 6  ;;  %v11970_v1 = vld [vmem:[%s16813_s2 + $0xe0] ss:$16 sps:$4 sm:$0xff]   ;;  %v16827_v2 = vmov 0  }
   0xc   : > { %1067 = vmatprep.mubr.bf16.mxu0 %v16827_v2  ;;  %p504_p3 = scmp.lt.s32.totalorder %s11126_s22, 127  ;;  %1307 = vmatprep.mubr.bf16.mxu1 %v16827_v2  ;;  %v11971_v3 = vld [vmem:[%s16813_s2 + $0xc4] ss:$16 sps:$4 sm:$0xff]   ;;  %v11973_v4 = vld [vmem:[%s16813_s2 + $0xc0] ss:$16 sps:$4 sm:$0xff]  }
   0xd   : > { %1035 = vmatprep.subr.bf16.mxu0 %v11968_v0  ;;  %11942 = vmatprep.subr.bf16.mxu1 %v11968_v0  ;;  %v11974_v5 = vld [vmem:[%s16813_s2 + $0xa4] ss:$16 sps:$4 sm:$0xff]   ;;  %v11976_v6 = vld [vmem:[%s16813_s2 + $0xa0] ss:$16 sps:$4 sm:$0xff]   ;;  %v12026_v22 = vld [vmem:[%s16813_s2 + $0xe8] ss:$16 sps:$4 sm:$0xff]  }
   0xe   : > { %1036 = vmatpush1.bf16.msra.mxu0 %v11970_v1  ;;  %s17025_s22 = smov (!%p504_p3, %s11126_s22), 127  ;;  %11950 = vmatpush1.bf16.msra.mxu1 %v11970_v1  ;;  %v11977_v7 = vld [vmem:[%s16813_s2 + $0x84] ss:$16 sps:$4 sm:$0xff]   ;;  %v11979_v8 = vld [vmem:[%s16813_s2 + $0x80] ss:$16 sps:$4 sm:$0xff]  }
   0xf   : > { %1037 = vmatprep.subr.bf16.mxu0 %v11971_v3  ;;  %11943 = vmatprep.subr.bf16.mxu1 %v11971_v3  ;;  %s11127_s16 = sshll.u32 %s17025_s22, 2  ;;  %v11980_v9 = vld [vmem:[%s16813_s2 + $0x64] ss:$16 sps:$4 sm:$0xff]   ;;  %v11982_v10 = vld [vmem:[%s16813_s2 + $0x60] ss:$16 sps:$4 sm:$0xff]   ;;  %s11958_s26 = smul.u32 24, %s17025_s22 }
  0x10   : > { %s12954_s25 = scalar_lea.vmem %s16811_s0, %s11127_s16  ;;  %v11983_v11 = vld [vmem:[%s16813_s2 + $0x44] ss:$16 sps:$4 sm:$0xff]   ;;  %v11985_v12 = vld [vmem:[%s16813_s2 + $0x40] ss:$16 sps:$4 sm:$0xff]   ;;  %v12028_v23 = vld [vmem:[%s16813_s2 + $0xec] ss:$16 sps:$4 sm:$0xff]   ;;  %s13280_s27 = scalar_lea.vmem %s16812_s1, %s11127_s16 }
  0x11   : > { %v11986_v13 = vld [vmem:[%s16813_s2 + $0x24] ss:$16 sps:$4 sm:$0xff]   ;;  %v11988_v14 = vld [vmem:[%s16813_s2 + $0x20] ss:$16 sps:$4 sm:$0xff]   ;;  %v13011_v26 = vld [vmem:[%s12954_s25 + $0x8] sm:$0xff]   ;;  %s15984_s17 = scalar_lea.vmem %s16826_s15, %s11958_s26 }
  0x12   : > { %1038 = vmatpush1.bf16.msra.mxu0 %v11973_v4  ;;  %11951 = vmatpush1.bf16.msra.mxu1 %v11973_v4  ;;  %v11989_v15 = vld [vmem:[%s16813_s2 + $0x4] ss:$16 sps:$4 sm:$0xff]   ;;  %v11991_v16 = vld [vmem:[%s16813_s2] ss:$16 sps:$4 sm:$0xff]   ;;  %v12029_v27 = vld [vmem:[%s12954_s25 + $0xc8] sm:$0xff]  }
  0x13   : > { %1039 = vmatprep.subr.bf16.mxu0 %v11974_v5  ;;  %11944 = vmatprep.subr.bf16.mxu1 %v11974_v5  ;;  %v11996_v17 = vld [vmem:[%s16815_s4 + $0x74] ss:$8 sps:$4 sm:$0xff]   ;;  %v12987_v18 = vld [vmem:[%s12954_s25] sm:$0xff]   ;;  %v11994_v19 = vld [vmem:[%s16815_s4 + $0x70] ss:$8 sps:$4 sm:$0xff]  }
  0x14   : > { %v12024_v20 = vld [vmem:[%s12954_s25 + $0xc0] sm:$0xff]   ;;  %v12005_v25 = vld [vmem:[%s16815_s4 + $0x54] ss:$8 sps:$4 sm:$0xff]   ;;  %v12034_v28 = vld [vmem:[%s16813_s2 + $0xc8] ss:$16 sps:$4 sm:$0xff]  }
  0x15   : > { %v12001_v21 = vld [vmem:[%s16815_s4 + $0x64] ss:$8 sps:$4 sm:$0xff]   ;;  %v11999_v24 = vld [vmem:[%s16815_s4 + $0x60] ss:$8 sps:$4 sm:$0xff]   ;;  %v12003_v30 = vld [vmem:[%s16815_s4 + $0x50] ss:$8 sps:$4 sm:$0xff]  }
  0x16   : > { %1040 = vmatpush1.bf16.msra.mxu0 %v11976_v6  ;;  %11952 = vmatpush1.bf16.msra.mxu1 %v11976_v6  ;;  %v12036_v29 = vld [vmem:[%s16813_s2 + $0xcc] ss:$16 sps:$4 sm:$0xff]   ;;  %v12039_v32 = vld [vmem:[%s16813_s2 + $0xa8] ss:$16 sps:$4 sm:$0xff]   ;;  %v13043_v36 = vld [vmem:[%s12954_s25 + $0x10] sm:$0xff]  }
  0x17   : > { %1041 = vmatprep.subr.bf16.mxu0 %v11977_v7  ;;  %11945 = vmatprep.subr.bf16.mxu1 %v11977_v7  ;;  %v12010_v31 = vld [vmem:[%s16815_s4 + $0x44] ss:$8 sps:$4 sm:$0xff]   ;;  %v12008_v34 = vld [vmem:[%s16815_s4 + $0x40] ss:$8 sps:$4 sm:$0xff]   ;;  %v12014_v35 = vld [vmem:[%s16815_s4 + $0x34] ss:$8 sps:$4 sm:$0xff]  }
  0x18   : > { %v12041_v33 = vld [vmem:[%s16813_s2 + $0xac] ss:$16 sps:$4 sm:$0xff]   ;;  %v12037_v37 = vld [vmem:[%s12954_s25 + $0xd0] sm:$0xff]   ;;  %v12047_v41 = vld [vmem:[%s16813_s2 + $0x88] ss:$16 sps:$4 sm:$0xff]  }
  0x19   : > { %v12049_v38 = vld [vmem:[%s16813_s2 + $0x8c] ss:$16 sps:$4 sm:$0xff]   ;;  %v12012_v39 = vld [vmem:[%s16815_s4 + $0x30] ss:$8 sps:$4 sm:$0xff]   ;;  %v12017_v42 = vld [vmem:[%s16815_s4 + $0x20] ss:$8 sps:$4 sm:$0xff]  }
  0x1a   : > { %1042 = vmatpush1.bf16.msra.mxu0 %v11979_v8  ;;  %11953 = vmatpush1.bf16.msra.mxu1 %v11979_v8  ;;  %v12019_v40 = vld [vmem:[%s16815_s4 + $0x24] ss:$8 sps:$4 sm:$0xff]   ;;  %v12023_v44 = vld [vmem:[%s16815_s4 + $0x14] ss:$8 sps:$4 sm:$0xff]   ;;  %v12055_v45 = vld [vmem:[%s16813_s2 + $0x68] ss:$16 sps:$4 sm:$0xff]  }
  0x1b   : > { %1043 = vmatprep.subr.bf16.mxu0 %v11980_v9  ;;  %11946 = vmatprep.subr.bf16.mxu1 %v11980_v9  ;;  %v12057_v43 = vld [vmem:[%s16813_s2 + $0x6c] ss:$16 sps:$4 sm:$0xff]   ;;  %v12021_v48 = vld [vmem:[%s16815_s4 + $0x10] ss:$8 sps:$4 sm:$0xff]   ;;  %v12031_v52 = vld [vmem:[%s16815_s4] ss:$8 sps:$4 sm:$0xff]  }
  0x1c   : > { %v13074_v46 = vld [vmem:[%s12954_s25 + $0x18] sm:$0xff]   ;;  %v12033_v49 = vld [vmem:[%s16815_s4 + $0x4] ss:$8 sps:$4 sm:$0xff]   ;;  %v12052_v61 = vld [vmem:[%s16815_s4 + $0xe0] ss:$8 sps:$4 sm:$0xff]  }
  0x1d   : > { %v12045_v47 = vld [vmem:[%s12954_s25 + $0xd8] sm:$0xff]   ;;  %v13102_v55 = vld [vmem:[%s12954_s25 + $0x20] sm:$0xff]   ;;  %v13123_v62 = vld [vmem:[%s12954_s25 + $0x28] sm:$0xff]  }
  0x1e   : > { %1044 = vmatpush1.bf16.msra.mxu0 %v11982_v10  ;;  %11954 = vmatpush1.bf16.msra.mxu1 %v11982_v10  ;;  %v12062_v50 = vld [vmem:[%s16813_s2 + $0x4c] ss:$16 sps:$4 sm:$0xff]   ;;  %v12060_v51 = vld [vmem:[%s16813_s2 + $0x48] ss:$16 sps:$4 sm:$0xff]   ;;  %v12050_v56 = vld [vmem:[%s12954_s25 + $0xe0] sm:$0xff]  }
  0x1f   : > { %1045 = vmatprep.subr.bf16.mxu0 %v11983_v11  ;;  %11947 = vmatprep.subr.bf16.mxu1 %v11983_v11  ;;  %v12070_v53 = vld [vmem:[%s16813_s2 + $0x2c] ss:$16 sps:$4 sm:$0xff]   ;;  %v12042_v57 = vld [vmem:[%s16815_s4 + $0xf0] ss:$8 sps:$4 sm:$0xff]   ;;  %v12073_v6 = vld [vmem:[%s16815_s4 + $0xc0] ss:$8 sps:$4 sm:$0xff]  }
  0x20   : > { %v12044_v54 = vld [vmem:[%s16815_s4 + $0xf4] ss:$8 sps:$4 sm:$0xff]   ;;  %v12054_v58 = vld [vmem:[%s16815_s4 + $0xe4] ss:$8 sps:$4 sm:$0xff]   ;;  %v12068_v59 = vld [vmem:[%s16813_s2 + $0x28] ss:$16 sps:$4 sm:$0xff]  }
  0x21   : > { %v12078_v60 = vld [vmem:[%s16813_s2 + $0xc] ss:$16 sps:$4 sm:$0xff]   ;;  %v12076_v1 = vld [vmem:[%s16813_s2 + $0x8] ss:$16 sps:$4 sm:$0xff]   ;;  %v13152_v8 = vld [vmem:[%s12954_s25 + $0x30] sm:$0xff]  }
  0x22   : > { %1046 = vmatpush1.bf16.msra.mxu0 %v11985_v12  ;;  %11955 = vmatpush1.bf16.msra.mxu1 %v11985_v12  ;;  %v12058_v63 = vld [vmem:[%s12954_s25 + $0xe8] sm:$0xff]   ;;  %v12065_v0 = vld [vmem:[%s16815_s4 + $0xd4] ss:$8 sps:$4 sm:$0xff]   ;;  %v12063_v3 = vld [vmem:[%s16815_s4 + $0xd0] ss:$8 sps:$4 sm:$0xff]  }
  0x23   : > { %1047 = vmatprep.subr.bf16.mxu0 %v11986_v13  ;;  %11948 = vmatprep.subr.bf16.mxu1 %v11986_v13  ;;  %v12082_v4 = vld [vmem:[%s16815_s4 + $0x174] ss:$8 sps:$4 sm:$0xff]   ;;  %v12075_v5 = vld [vmem:[%s16815_s4 + $0xc4] ss:$8 sps:$4 sm:$0xff]   ;;  %v12083_v10 = vld [vmem:[%s16815_s4 + $0xb0] ss:$8 sps:$4 sm:$0xff]  }
  0x24   : > { %v12085_v7 = vld [vmem:[%s16815_s4 + $0xb4] ss:$8 sps:$4 sm:$0xff]   ;;  %v12090_v11 = vld [vmem:[%s16815_s4 + $0xa4] ss:$8 sps:$4 sm:$0xff]   ;;  %v12088_v12 = vld [vmem:[%s16815_s4 + $0xa0] ss:$8 sps:$4 sm:$0xff]  }
  0x25   : > { %v12066_v9 = vld [vmem:[%s12954_s25 + $0xf0] sm:$0xff]  }
  0x26   : > { %1048 = vmatpush1.bf16.msra.mxu0 %v11988_v14  ;;  %11956 = vmatpush1.bf16.msra.mxu1 %v11988_v14  ;;  %v12097_v13 = vld [vmem:[%s16815_s4 + $0x94] ss:$8 sps:$4 sm:$0xff]  }
  0x27   : > { %1049 = vmatprep.subr.bf16.mxu0 %v11989_v15  ;;  %11949 = vmatprep.subr.bf16.mxu1 %v11989_v15  ;;  %v13171_v14 = vld [vmem:[%s12954_s25 + $0x38] sm:$0xff]  }
  0x28   : > { %v12071_v15 = vld [vmem:[%s12954_s25 + $0xf8] sm:$0xff]  }
  0x2a   : > { %1050 = vmatpush1.bf16.msra.mxu0 %v11991_v16  ;;  %11957 = vmatpush1.bf16.msra.mxu1 %v11991_v16  ;;  %v12095_v16 = vld [vmem:[%s16815_s4 + $0x90] ss:$8 sps:$4 sm:$0xff]  }
  0x2b   : > { %2277 = vmatprep.subr.bf16.mxu0 %v11996_v17  ;;  %1388 = vmatprep.subr.bf16.mxu1 %v12028_v23  ;;  %v13181_v17 = vld [vmem:[%s12954_s25 + $0x40] sm:$0xff]   ;;  %v13199_v23 = vld [vmem:[%s12954_s25 + $0x48] sm:$0xff]  }
  0x2d   : > { %1068 = vmatmul.mubr.bf16.vlgmr.msra.gmra.mxu0 %v12987_v18  ;;  %1308 = vmatmul.mubr.bf16.vlgmr.msra.gmra.mxu1 %v12024_v20  ;;  %v12093_v20 = vld [vmem:[%s16815_s4 + $0x164] ss:$8 sps:$4 sm:$0xff]  }
  0x2e   : > { %1077 = vmatprep.mubr.bf16.mxu0 %v16827_v2  ;;  %2278 = vmatpush1.bf16.msra.mxu0 %v11994_v19  ;;  %v12080_v19 = vld [vmem:[%s16815_s4 + $0x170] ss:$8 sps:$4 sm:$0xff]  }
  0x2f   : > { %2279 = vmatprep.subr.bf16.mxu0 %v12001_v21  ;;  %1389 = vmatpush1.bf16.msra.mxu1 %v12026_v22  ;;  %v12091_v21 = vld [vmem:[%s16815_s4 + $0x160] ss:$8 sps:$4 sm:$0xff]   ;;  %v12101_v22 = vld [vmem:[%s16815_s4 + $0x154] ss:$8 sps:$4 sm:$0xff]  }
  0x30   : > { %1317 = vmatprep.mubr.bf16.mxu1 %v16827_v2  ;;  %1390 = vmatprep.subr.bf16.mxu1 %v12036_v29  ;;  %v12107_v29 = vld [vmem:[%s16815_s4 + $0x144] ss:$8 sps:$4 sm:$0xff]  }
  0x32   : > { %2280 = vmatpush1.bf16.msra.mxu0 %v11999_v24  ;;  %v12102_v24 = vld [vmem:[%s16815_s4 + $0x80] ss:$8 sps:$4 sm:$0xff]  }
  0x33   : > { %2281 = vmatprep.subr.bf16.mxu0 %v12005_v25  ;;  %1391 = vmatpush1.bf16.msra.mxu1 %v12034_v28  ;;  %v12099_v25 = vld [vmem:[%s16815_s4 + $0x150] ss:$8 sps:$4 sm:$0xff]   ;;  %v12105_v28 = vld [vmem:[%s16815_s4 + $0x140] ss:$8 sps:$4 sm:$0xff]  }
  0x34   : > { %1392 = vmatprep.subr.bf16.mxu1 %v12041_v33  ;;  %v12038_v33 = vld [vmem:[%s12954_s25 + $0x68] sm:$0xff]  }
  0x35   : > { %1078 = vmatmul.mubr.bf16.gmra.mxu0 %v13011_v26  ;;  %1318 = vmatmul.mubr.bf16.gmra.mxu1 %v12029_v27  ;;  %v12020_v27 = vld [vmem:[%s12954_s25 + $0x50] sm:$0xff]  }
  0x36   : > { %1087 = vmatprep.mubr.bf16.mxu0 %v16827_v2  ;;  %2282 = vmatpush1.bf16.msra.mxu0 %v12003_v30  ;;  %v12030_v30 = vld [vmem:[%s12954_s25 + $0x60] sm:$0xff]  }
  0x37   : > { %2283 = vmatprep.subr.bf16.mxu0 %v12010_v31  ;;  %1327 = vmatprep.mubr.bf16.mxu1 %v16827_v2  ;;  %v12108_v31 = vld [vmem:[%s16815_s4 + $0x130] ss:$8 sps:$4 sm:$0xff]  }
  0x38   : > { %1393 = vmatpush1.bf16.msra.mxu1 %v12039_v32  ;;  %v12110_v32 = vld [vmem:[%s16815_s4 + $0x134] ss:$8 sps:$4 sm:$0xff]  }
  0x39   : > { %1394 = vmatprep.subr.bf16.mxu1 %v12049_v38  ;;  %v13258_v38 = vld [vmem:[%s12954_s25 + $0x80] sm:$0xff]  }
  0x3a   : > { %2284 = vmatpush1.bf16.msra.mxu0 %v12008_v34  ;;  %v12046_v34 = vld [vmem:[%s12954_s25 + $0x70] sm:$0xff]  }
  0x3b   : > { %2285 = vmatprep.subr.bf16.mxu0 %v12014_v35  ;;  %v12111_v35 = vld [vmem:[%s16815_s4 + $0x120] ss:$8 sps:$4 sm:$0xff]  }
  0x3c   : > { %1395 = vmatpush1.bf16.msra.mxu1 %v12047_v41  ;;  %v13271_v41 = vld [vmem:[%s12954_s25 + $0x88] sm:$0xff]  }
  0x3d   : > { %1088 = vmatmul.mubr.bf16.gmra.mxu0 %v13043_v36  ;;  %1328 = vmatmul.mubr.bf16.gmra.mxu1 %v12037_v37  ;;  %v12051_v37 = vld [vmem:[%s12954_s25 + $0x78] sm:$0xff]  }
  0x3e   : > { %1097 = vmatprep.mubr.bf16.mxu0 %v16827_v2  ;;  %2286 = vmatpush1.bf16.msra.mxu0 %v12012_v39  ;;  %v12114_v39 = vld [vmem:[%s16815_s4 + $0x110] ss:$8 sps:$4 sm:$0xff]  }
  0x3f   : > { %2287 = vmatprep.subr.bf16.mxu0 %v12019_v40  ;;  %1337 = vmatprep.mubr.bf16.mxu1 %v16827_v2  ;;  %v12116_v40 = vld [vmem:[%s16815_s4 + $0x114] ss:$8 sps:$4 sm:$0xff]  }
  0x40   : > { %1396 = vmatprep.subr.bf16.mxu1 %v12057_v43  ;;  %v12117_v43 = vld [vmem:[%s16815_s4 + $0x100] ss:$8 sps:$4 sm:$0xff]  }
  0x41   : > { %1397 = vmatpush1.bf16.msra.mxu1 %v12055_v45  ;;  %v13297_v45 = vld [vmem:[%s12954_s25 + $0x98] sm:$0xff]  }
  0x42   : > { %2288 = vmatpush1.bf16.msra.mxu0 %v12017_v42  ;;  %1398 = vmatprep.subr.bf16.mxu1 %v12062_v50  ;;  %v13285_v42 = vld [vmem:[%s12954_s25 + $0x90] sm:$0xff]  }
  0x43   : > { %2289 = vmatprep.subr.bf16.mxu0 %v12023_v44  ;;  %v12119_v44 = vld [vmem:[%s16815_s4 + $0x104] ss:$8 sps:$4 sm:$0xff]   ;;  %v13321_v50 = vld [vmem:[%s12954_s25 + $0xb0] sm:$0xff]  }
  0x45   : > { %1098 = vmatmul.mubr.bf16.gmra.mxu0 %v13074_v46  ;;  %1338 = vmatmul.mubr.bf16.gmra.mxu1 %v12045_v47  ;;  %v12120_v47 = vld [vmem:[%s16815_s4 + $0x1f0] ss:$8 sps:$4 sm:$0xff]  }
  0x46   : > { %1107 = vmatprep.mubr.bf16.mxu0 %v16827_v2  ;;  %2290 = vmatpush1.bf16.msra.mxu0 %v12021_v48  ;;  %v12122_v48 = vld [vmem:[%s16815_s4 + $0x1f4] ss:$8 sps:$4 sm:$0xff]  }
  0x47   : > { %2291 = vmatprep.subr.bf16.mxu0 %v12033_v49  ;;  %1347 = vmatprep.mubr.bf16.mxu1 %v16827_v2  ;;  %v13315_v49 = vld [vmem:[%s12954_s25 + $0xa8] sm:$0xff]  }
  0x48   : > { %1399 = vmatpush1.bf16.msra.mxu1 %v12060_v51  ;;  %v12123_v51 = vld [vmem:[%s16815_s4 + $0x1e0] ss:$8 sps:$4 sm:$0xff]  }
  0x49   : > { %1400 = vmatprep.subr.bf16.mxu1 %v12070_v53  ;;  %v1743_v53 = vlaneseq }
  0x4a   : > { %2292 = vmatpush1.bf16.msra.mxu0 %v12031_v52  ;;  %v12125_v52 = vld [vmem:[%s16815_s4 + $0x1e4] ss:$8 sps:$4 sm:$0xff]  }
  0x4b   : > { %2293 = vmatprep.subr.bf16.mxu0 %v12044_v54  ;;  %v13333_v54 = vld [vmem:[%s12954_s25 + $0xb8] sm:$0xff]  }
  0x4c   : > { %1401 = vmatpush1.bf16.msra.mxu1 %v12068_v59  ;;  %v12126_v59 = vld [vmem:[%s16815_s4 + $0x1d0] ss:$8 sps:$4 sm:$0xff]  }
  0x4d   : > { %1108 = vmatmul.mubr.bf16.gmra.mxu0 %v13102_v55  ;;  %1348 = vmatmul.mubr.bf16.gmra.mxu1 %v12050_v56 }
  0x4e   : > { %1117 = vmatprep.mubr.bf16.mxu0 %v16827_v2  ;;  %2294 = vmatpush2.bf16.msra.mxu0 %v12042_v57  ;;  %v1741_v57 = vld [vmem:[%s16814_s3] sm:$0x3] }
  0x4f   : > { %2295 = vmatprep.subr.bf16.mxu0 %v12054_v58  ;;  %1357 = vmatprep.mubr.bf16.mxu1 %v16827_v2 }
  0x50   : > { %1402 = vmatprep.subr.bf16.mxu1 %v12078_v60  ;;  %v12128_v60 = vld [vmem:[%s16815_s4 + $0x1d4] ss:$8 sps:$4 sm:$0xff]  }
  0x51   : > { %1403 = vmatpush1.bf16.msra.mxu1 %v12076_v1 }
  0x52   : > { %2296 = vmatpush2.bf16.msra.mxu0 %v12052_v61  ;;  %3028 = vmatprep.subr.bf16.mxu1 %v12082_v4 }
  0x53   : > { %2297 = vmatprep.subr.bf16.mxu0 %v12065_v0 }
  0x55   : > { %1118 = vmatmul.mubr.bf16.gmra.mxu0 %v13123_v62  ;;  %1358 = vmatmul.mubr.bf16.gmra.mxu1 %v12058_v63 }
  0x56   : > { %1127 = vmatprep.mubr.bf16.mxu0 %v16827_v2  ;;  %1367 = vmatprep.mubr.bf16.mxu1 %v16827_v2 }
  0x57   : > { %2298 = vmatpush2.bf16.msra.mxu0 %v12063_v3 }
  0x58   : > { %2299 = vmatprep.subr.bf16.mxu0 %v12075_v5 }
  0x5b   : > { %2300 = vmatpush2.bf16.msra.mxu0 %v12073_v6 }
  0x5c   : > { %2301 = vmatprep.subr.bf16.mxu0 %v12085_v7 }
  0x5d   : > { %1128 = vmatmul.mubr.bf16.gmra.mxu0 %v13152_v8  ;;  %1368 = vmatmul.mubr.bf16.gmra.mxu1 %v12066_v9 }
  0x5e   : > { %1137 = vmatprep.mubr.bf16.mxu0 %v16827_v2  ;;  %1377 = vmatprep.mubr.bf16.mxu1 %v16827_v2 }
  0x5f   : > { %2302 = vmatpush2.bf16.msra.mxu0 %v12083_v10 }
  0x60   : > { %2303 = vmatprep.subr.bf16.mxu0 %v12090_v11 }
  0x63   : > { %2304 = vmatpush2.bf16.msra.mxu0 %v12088_v12 }
  0x64   : > { %2305 = vmatprep.subr.bf16.mxu0 %v12097_v13 }
  0x65   : > { %1138 = vmatmul.mubr.bf16.gmra.mxu0 %v13171_v14  ;;  %1378 = vmatmul.mubr.bf16.gmra.mxu1 %v12071_v15 }
  0x66   : > { %1147 = vmatprep.mubr.bf16.mxu0 %v16827_v2  ;;  %1420 = vmatprep.mubr.bf16.mxu1 %v16827_v2 }
  0x67   : > { %2306 = vmatpush2.bf16.msra.mxu0 %v12095_v16 }
  0x6d   : > { %1148 = vmatmul.mubr.bf16.gmra.mxu0 %v13181_v17  ;;  %1421 = vmatmul.mubr.bf16.vlgmr.msra.gmra.mxu1 %v12987_v18  ;;  %v12104_v18 = vld [vmem:[%s16815_s4 + $0x84] ss:$8 sps:$4 sm:$0xff]  }
  0x6e   : > { %1157 = vmatprep.mubr.bf16.mxu0 %v16827_v2  ;;  %3029 = vmatpush1.bf16.msra.mxu1 %v12080_v19 }
  0x6f   : > { %1430 = vmatprep.mubr.bf16.mxu1 %v16827_v2  ;;  %3030 = vmatprep.subr.bf16.mxu1 %v12093_v20 }
  0x70   : > { %2307 = vmatprep.subr.bf16.mxu0 %v12104_v18 }
  0x71   : > { %2308 = vmatpush2.bf16.msra.mxu0 %v12102_v24 }
  0x72   : > { %3031 = vmatpush1.bf16.msra.mxu1 %v12091_v21 }
  0x73   : > { %3032 = vmatprep.subr.bf16.mxu1 %v12101_v22 }
  0x75   : > { %1158 = vmatmul.mubr.bf16.gmra.mxu0 %v13199_v23  ;;  %1431 = vmatmul.mubr.bf16.gmra.mxu1 %v13011_v26  ;;  %v12025_v26 = vld [vmem:[%s12954_s25 + $0x58] sm:$0xff]  }
  0x76   : > { %1167 = vmatprep.mubr.bf16.mxu0 %v16827_v2  ;;  %1440 = vmatprep.mubr.bf16.mxu1 %v16827_v2 }
  0x77   : > { %3033 = vmatpush1.bf16.msra.mxu1 %v12099_v25 }
  0x78   : > { %3034 = vmatprep.subr.bf16.mxu1 %v12107_v29 }
  0x7b   : > { %3035 = vmatpush1.bf16.msra.mxu1 %v12105_v28 }
  0x7c   : > { %3036 = vmatprep.subr.bf16.mxu1 %v12110_v32 }
  0x7d   : > { %1168 = vmatmul.mubr.bf16.gmra.mxu0 %v12020_v27  ;;  %1441 = vmatmul.mubr.bf16.gmra.mxu1 %v13043_v36  ;;  %v12113_v36 = vld [vmem:[%s16815_s4 + $0x124] ss:$8 sps:$4 sm:$0xff]  }
  0x7e   : > { %1177 = vmatprep.mubr.bf16.mxu0 %v16827_v2  ;;  %1450 = vmatprep.mubr.bf16.mxu1 %v16827_v2 }
  0x7f   : > { %3037 = vmatpush1.bf16.msra.mxu1 %v12108_v31 }
  0x80   : > { %3038 = vmatprep.subr.bf16.mxu1 %v12113_v36 }
  0x83   : > { %3039 = vmatpush1.bf16.msra.mxu1 %v12111_v35 }
  0x84   : > { %3040 = vmatprep.subr.bf16.mxu1 %v12116_v40  ;;  %v12129_v40 = vld [vmem:[%s16815_s4 + $0x1c0] ss:$8 sps:$4 sm:$0xff]  }
  0x85   : > { %1178 = vmatmul.mubr.bf16.gmra.mxu0 %v12025_v26  ;;  %1451 = vmatmul.mubr.bf16.gmra.mxu1 %v13074_v46  ;;  %v13303_v46 = vld [vmem:[%s12954_s25 + $0xa0] sm:$0xff]  }
  0x86   : > { %1187 = vmatprep.mubr.bf16.mxu0 %v16827_v2  ;;  %1460 = vmatprep.mubr.bf16.mxu1 %v16827_v2 }
  0x87   : > { %3041 = vmatpush1.bf16.msra.mxu1 %v12114_v39 }
  0x88   : > { %3042 = vmatprep.subr.bf16.mxu1 %v12119_v44 }
  0x8b   : > { %3043 = vmatpush1.bf16.msra.mxu1 %v12117_v43 }
  0x8c   : > { %3044 = vmatprep.subr.bf16.mxu1 %v12122_v48 }
  0x8d   : > { %1188 = vmatmul.mubr.bf16.gmra.mxu0 %v12030_v30  ;;  %1461 = vmatmul.mubr.bf16.gmra.mxu1 %v13102_v55  ;;  %v1744_v55 = vshrl.u32 %v1743_v53, 7 }
  0x8e   : > { %1197 = vmatprep.mubr.bf16.mxu0 %v16827_v2  ;;  %1470 = vmatprep.mubr.bf16.mxu1 %v16827_v2 }
  0x8f   : > { %3045 = vmatpush2.bf16.msra.mxu1 %v12120_v47  ;;  %v13337_v56 = vsub.s32 0, %v1744_v55  ;;  %v13342_v58 = vsub.s32 1, %v1744_v55 }
  0x90   : > { %3046 = vmatprep.subr.bf16.mxu1 %v12125_v52 }
  0x91   : > { %v13351_v61 = vrot.slane %v1741_v57, %v13337_v56  ;;  %v13355_v0 = vrot.slane %v1741_v57, %v13342_v58 }
  0x93   : > { %3047 = vmatpush2.bf16.msra.mxu1 %v12123_v51 }
  0x94   : > { %3048 = vmatprep.subr.bf16.mxu1 %v12128_v60 }
  0x95   : > { %1198 = vmatmul.mubr.bf16.gmra.mxu0 %v12038_v33  ;;  %1471 = vmatmul.mubr.bf16.gmra.mxu1 %v13123_v62 }
  0x96   : > { %1207 = vmatprep.mubr.bf16.mxu0 %v16827_v2  ;;  %1480 = vmatprep.mubr.bf16.mxu1 %v16827_v2 }
  0x97   : > { %3049 = vmatpush2.bf16.msra.mxu1 %v12126_v59 }
  0x9d   : > { %1208 = vmatmul.mubr.bf16.gmra.mxu0 %v12046_v34  ;;  %1481 = vmatmul.mubr.bf16.gmra.mxu1 %v13152_v8 }
  0x9e   : > { %1217 = vmatprep.mubr.bf16.mxu0 %v16827_v2  ;;  %1490 = vmatprep.mubr.bf16.mxu1 %v16827_v2 }
  0xa5   : > { %1218 = vmatmul.mubr.bf16.gmra.mxu0 %v12051_v37  ;;  %1491 = vmatmul.mubr.bf16.gmra.mxu1 %v13171_v14 }
  0xa6   : > { %1227 = vmatprep.mubr.bf16.mxu0 %v16827_v2  ;;  %1500 = vmatprep.mubr.bf16.mxu1 %v16827_v2 }
  0xad   : > { %1228 = vmatmul.mubr.bf16.gmra.mxu0 %v13258_v38  ;;  %1501 = vmatmul.mubr.bf16.gmra.mxu1 %v13181_v17 }
  0xae   : > { %1237 = vmatprep.mubr.bf16.mxu0 %v16827_v2  ;;  %1510 = vmatprep.mubr.bf16.mxu1 %v16827_v2 }
  0xb5   : > { %1238 = vmatmul.mubr.bf16.gmra.mxu0 %v13271_v41  ;;  %1511 = vmatmul.mubr.bf16.gmra.mxu1 %v13199_v23 }
  0xb6   : > { %1247 = vmatprep.mubr.bf16.mxu0 %v16827_v2  ;;  %1520 = vmatprep.mubr.bf16.mxu1 %v16827_v2 }
  0xbd   : > { %1248 = vmatmul.mubr.bf16.gmra.mxu0 %v13285_v42  ;;  %1521 = vmatmul.mubr.bf16.gmra.mxu1 %v12020_v27 }
  0xbe   : > { %1257 = vmatprep.mubr.bf16.mxu0 %v16827_v2  ;;  %1530 = vmatprep.mubr.bf16.mxu1 %v16827_v2 }
  0xc5   : > { %1258 = vmatmul.mubr.bf16.gmra.mxu0 %v13297_v45  ;;  %1531 = vmatmul.mubr.bf16.gmra.mxu1 %v12025_v26 }
  0xc6   : > { %1267 = vmatprep.mubr.bf16.mxu0 %v16827_v2  ;;  %1540 = vmatprep.mubr.bf16.mxu1 %v16827_v2 }
  0xcd   : > { %1268 = vmatmul.mubr.bf16.gmra.mxu0 %v13303_v46  ;;  %1541 = vmatmul.mubr.bf16.gmra.mxu1 %v12030_v30 }
  0xce   : > { %1277 = vmatprep.mubr.bf16.mxu0 %v16827_v2  ;;  %1550 = vmatprep.mubr.bf16.mxu1 %v16827_v2 }
  0xd5   : > { %1278 = vmatmul.mubr.bf16.gmra.mxu0 %v13315_v49  ;;  %1551 = vmatmul.mubr.bf16.gmra.mxu1 %v12038_v33 }
  0xd6   : > { %1287 = vmatprep.mubr.bf16.mxu0 %v16827_v2  ;;  %1560 = vmatprep.mubr.bf16.mxu1 %v16827_v2 }
  0xdd   : > { %1288 = vmatmul.mubr.bf16.gmra.mxu0 %v13321_v50  ;;  %1561 = vmatmul.mubr.bf16.gmra.mxu1 %v12046_v34 }
  0xde   : > { %1297 = vmatprep.mubr.bf16.mxu0 %v16827_v2  ;;  %1570 = vmatprep.mubr.bf16.mxu1 %v16827_v2 }
  0xe5   : > { %1298 = vmatmul.mubr.bf16.gmra.mxu0 %v13333_v54  ;;  %1571 = vmatmul.mubr.bf16.gmra.mxu1 %v12051_v37 }
  0xe6   : > { %1580 = vmatprep.mubr.bf16.mxu1 %v16827_v2 }
  0xed   : > { %v1069_v62 = vpop.f32.mrf.mxu0  ;;  %v1309_v63 = vpop.f32.mrf.mxu1  ;;  %1581 = vmatmul.mubr.bf16.gmra.mxu1 %v13258_v38 }
  0xee   : > { %v1849_v1 = vadd.f32 %v13351_v61, %v1309_v63  ;;  %1590 = vmatprep.mubr.bf16.mxu1 %v16827_v2  ;;  %v1753_v12 = vadd.f32 %v13351_v61, %v1069_v62 }
  0xef   : > { %v1071_v3 = vpop.f32.mrf.mxu0  ;;  %v1311_v4 = vpop.f32.mrf.mxu1 }
  0xf0   : > { %v1850_v6 = vadd.f32 %v13355_v0, %v1311_v4  ;;  %v1754_v8 = vadd.f32 %v13355_v0, %v1071_v3  ;;  %v1977_v10 = vmax.f32 %v1849_v1, 0.0  ;;  %v1881_v25 = vmax.f32 %v1753_v12, 0.0 }
  0xf1   : > { %v1073_v5 = vpop.f32.mrf.mxu0  ;;  %v1313_v7 = vpop.f32.mrf.mxu1 }
  0xf2   : > { %v1755_v9 = vadd.f32 %v13351_v61, %v1073_v5  ;;  %v1851_v11 = vadd.f32 %v13351_v61, %v1313_v7  ;;  %v1978_v21 = vmax.f32 %v1850_v6, 0.0  ;;  %v1882_v23 = vmax.f32 %v1754_v8, 0.0 }
  0xf3   : > { %v1075_v13 = vpop.f32.mrf.mxu0  ;;  %v1315_v14 = vpop.f32.mrf.mxu1 }
  0xf4   : > { %v1756_v15 = vadd.f32 %v13355_v0, %v1075_v13  ;;  %v1979_v16 = vmax.f32 %v1851_v11, 0.0  ;;  %v1852_v17 = vadd.f32 %v13355_v0, %v1315_v14  ;;  %v1883_v19 = vmax.f32 %v1755_v9, 0.0 }
  0xf5   : > { %v1079_v20 = vpop.f32.mrf.mxu0  ;;  %v1319_v22 = vpop.f32.mrf.mxu1  ;;  %1591 = vmatmul.mubr.bf16.gmra.mxu1 %v13271_v41  ;;  %v12131_v41 = vld [vmem:[%s16815_s4 + $0x1c4] ss:$8 sps:$4 sm:$0xff]  }
  0xf6   : > { %v1884_v24 = vmax.f32 %v1756_v15, 0.0  ;;  %v13367_v18 = vpack.c.bf16 %v1979_v16, %v1977_v10  ;;  %1600 = vmatprep.mubr.bf16.mxu1 %v16827_v2  ;;  %v1980_v28 = vmax.f32 %v1852_v17, 0.0  ;;  %v1853_v29 = vadd.f32 %v13351_v61, %v1319_v22  ;;  %3050 = vmatprep.subr.bf16.mxu1 %v12131_v41 }
  0xf7   : > { %v1081_v27 = vpop.f32.mrf.mxu0  ;;  %v1321_v26 = vpop.f32.mrf.mxu1  ;;  %v2009_v31 = vpack.c.bf16 %v1883_v19, %v1881_v25  ;;  %v1757_v43 = vadd.f32 %v13351_v61, %v1079_v20  ;;  %3051 = vmatpush2.bf16.msra.mxu1 %v12129_v40 }
  0xf8   : > { %v2010_v30 = vpack.c.bf16 %v1884_v24, %v1882_v23  ;;  %v1854_v33 = vadd.f32 %v13355_v0, %v1321_v26  ;;  %v13372_v35 = vpack.c.bf16 %v1980_v28, %v1978_v21  ;;  %v1758_v36 = vadd.f32 %v13355_v0, %v1081_v27 }
  0xf9   : > { %v1083_v32 = vpop.f32.mrf.mxu0  ;;  %v1323_v34 = vpop.f32.mrf.mxu1  ;;  %v1981_v38 = vmax.f32 %v1853_v29, 0.0  ;;  %v1885_v1 = vmax.f32 %v1757_v43, 0.0 }
  0xfa   : > { %v1759_v37 = vadd.f32 %v13351_v61, %v1083_v32  ;;  %2309 = vmatprep.mubr.bf16.mxu0 %v2010_v30  ;;  %v1855_v39 = vadd.f32 %v13351_v61, %v1323_v34  ;;  %v1982_v57 = vmax.f32 %v1854_v33, 0.0  ;;  %v1886_v60 = vmax.f32 %v1758_v36, 0.0 }
  0xfb   : > { %v1085_v44 = vpop.f32.mrf.mxu0  ;;  %2310 = vmatmul.mubr.bf16.vlgmr.msra.gmra.mxu0 %v2009_v31  ;;  %v1325_v47 = vpop.f32.mrf.mxu1 }
  0xfc   : > { %v1760_v48 = vadd.f32 %v13355_v0, %v1085_v44  ;;  %v1983_v51 = vmax.f32 %v1855_v39, 0.0  ;;  %v1856_v52 = vadd.f32 %v13355_v0, %v1325_v47  ;;  %v1887_v53 = vmax.f32 %v1759_v37, 0.0 }
  0xfd   : > { %v1089_v55 = vpop.f32.mrf.mxu0  ;;  %v1329_v59 = vpop.f32.mrf.mxu1  ;;  %1601 = vmatmul.mubr.bf16.gmra.mxu1 %v13285_v42 }
  0xfe   : > { %v1888_v62 = vmax.f32 %v1760_v48, 0.0  ;;  %v13387_v63 = vpack.c.bf16 %v1983_v51, %v1981_v38  ;;  %1610 = vmatprep.mubr.bf16.mxu1 %v16827_v2  ;;  %v1984_v4 = vmax.f32 %v1856_v52, 0.0  ;;  %v1857_v5 = vadd.f32 %v13351_v61, %v1329_v59  ;;  %v12132_v48 = vld [vmem:[%s16815_s4 + $0x1b0] ss:$8 sps:$4 sm:$0xff]   ;;  %v12134_v51 = vld [vmem:[%s16815_s4 + $0x1b4] ss:$8 sps:$4 sm:$0xff]  }
  0xff   : > { %v1091_v3 = vpop.f32.mrf.mxu0  ;;  %v1331_v6 = vpop.f32.mrf.mxu1  ;;  %v2011_v8 = vpack.c.bf16 %v1887_v53, %v1885_v1  ;;  %v1761_v16 = vadd.f32 %v13351_v61, %v1089_v55  ;;  %3052 = vmatprep.subr.bf16.mxu1 %v12134_v51 }
 0x100   : > { %v2012_v7 = vpack.c.bf16 %v1888_v62, %v1886_v60  ;;  %v1858_v10 = vadd.f32 %v13355_v0, %v1331_v6  ;;  %v13392_v42 = vpack.c.bf16 %v1984_v4, %v1982_v57  ;;  %v1762_v12 = vadd.f32 %v13355_v0, %v1091_v3  ;;  %3053 = vmatpush2.bf16.msra.mxu1 %v12132_v48 }
 0x101   : > { %v1093_v9 = vpop.f32.mrf.mxu0  ;;  %v1333_v11 = vpop.f32.mrf.mxu1  ;;  %v1985_v14 = vmax.f32 %v1857_v5, 0.0  ;;  %v1889_v30 = vmax.f32 %v1761_v16, 0.0 }
 0x102   : > { %v1763_v13 = vadd.f32 %v13351_v61, %v1093_v9  ;;  %2319 = vmatprep.mubr.bf16.mxu0 %v2012_v7  ;;  %v1859_v15 = vadd.f32 %v13351_v61, %v1333_v11  ;;  %v1986_v25 = vmax.f32 %v1858_v10, 0.0  ;;  %v1890_v28 = vmax.f32 %v1762_v12, 0.0 }
 0x103   : > { %v1095_v17 = vpop.f32.mrf.mxu0  ;;  %2320 = vmatmul.mubr.bf16.gmra.mxu0 %v2011_v8  ;;  %v1335_v19 = vpop.f32.mrf.mxu1 }
 0x104   : > { %v1764_v20 = vadd.f32 %v13355_v0, %v1095_v17  ;;  %v1987_v21 = vmax.f32 %v1859_v15, 0.0  ;;  %v1860_v22 = vadd.f32 %v13355_v0, %v1335_v19  ;;  %v1891_v23 = vmax.f32 %v1763_v13, 0.0 }
 0x105   : > { %v1099_v24 = vpop.f32.mrf.mxu0  ;;  %v1339_v27 = vpop.f32.mrf.mxu1  ;;  %1611 = vmatmul.mubr.bf16.gmra.mxu1 %v13297_v45 }
 0x106   : > { %v1892_v29 = vmax.f32 %v1764_v20, 0.0  ;;  %v13401_v26 = vpack.c.bf16 %v1987_v21, %v1985_v14  ;;  %1620 = vmatprep.mubr.bf16.mxu1 %v16827_v2  ;;  %v1988_v32 = vmax.f32 %v1860_v22, 0.0  ;;  %v1861_v33 = vadd.f32 %v13351_v61, %v1339_v27 }
 0x107   : > { %v1101_v31 = vpop.f32.mrf.mxu0  ;;  %v1341_v34 = vpop.f32.mrf.mxu1  ;;  %v2013_v37 = vpack.c.bf16 %v1891_v23, %v1889_v30  ;;  %v1765_v52 = vadd.f32 %v13351_v61, %v1099_v24 }
 0x108   : > { %v2014_v36 = vpack.c.bf16 %v1892_v29, %v1890_v28  ;;  %v1862_v39 = vadd.f32 %v13355_v0, %v1341_v34  ;;  %v13406_v41 = vpack.c.bf16 %v1988_v32, %v1986_v25  ;;  %v1766_v45 = vadd.f32 %v13355_v0, %v1101_v31 }
 0x109   : > { %v1103_v38 = vpop.f32.mrf.mxu0  ;;  %v1343_v40 = vpop.f32.mrf.mxu1  ;;  %v1989_v44 = vmax.f32 %v1861_v33, 0.0  ;;  %v1893_v8 = vmax.f32 %v1765_v52, 0.0 }
 0x10a   : > { %v1767_v43 = vadd.f32 %v13351_v61, %v1103_v38  ;;  %2329 = vmatprep.mubr.bf16.mxu0 %v2014_v36  ;;  %v1863_v47 = vadd.f32 %v13351_v61, %v1343_v40  ;;  %v1990_v3 = vmax.f32 %v1862_v39, 0.0  ;;  %v1894_v5 = vmax.f32 %v1766_v45, 0.0 }
 0x10b   : > { %v1105_v53 = vpop.f32.mrf.mxu0  ;;  %2330 = vmatmul.mubr.bf16.gmra.mxu0 %v2013_v37  ;;  %v1345_v55 = vpop.f32.mrf.mxu1 }
 0x10c   : > { %v1768_v57 = vadd.f32 %v13355_v0, %v1105_v53  ;;  %v1991_v59 = vmax.f32 %v1863_v47, 0.0  ;;  %v1864_v60 = vadd.f32 %v13355_v0, %v1345_v55  ;;  %v1895_v62 = vmax.f32 %v1767_v43, 0.0  ;;  %v12135_v47 = vld [vmem:[%s16815_s4 + $0x270] ss:$8 sps:$4 sm:$0xff]  }
 0x10d   : > { %v1109_v1 = vpop.f32.mrf.mxu0  ;;  %v1349_v4 = vpop.f32.mrf.mxu1  ;;  %1621 = vmatmul.mubr.bf16.gmra.mxu1 %v13303_v46 }
 0x10e   : > { %v1896_v6 = vmax.f32 %v1768_v57, 0.0  ;;  %v13421_v7 = vpack.c.bf16 %v1991_v59, %v1989_v44  ;;  %1630 = vmatprep.mubr.bf16.mxu1 %v16827_v2  ;;  %v1992_v10 = vmax.f32 %v1864_v60, 0.0  ;;  %v1865_v11 = vadd.f32 %v13351_v61, %v1349_v4 }
 0x10f   : > { %v1111_v9 = vpop.f32.mrf.mxu0  ;;  %v1351_v12 = vpop.f32.mrf.mxu1  ;;  %v2015_v14 = vpack.c.bf16 %v1895_v62, %v1893_v8  ;;  %v1769_v23 = vadd.f32 %v13351_v61, %v1109_v1  ;;  %v12138_v1 = vld [vmem:[%s16815_s4 + $0x1a0] ss:$8 sps:$4 sm:$0xff]  }
 0x110   : > { %v2016_v13 = vpack.c.bf16 %v1896_v6, %v1894_v5  ;;  %v1866_v16 = vadd.f32 %v13355_v0, %v1351_v12  ;;  %v13426_v46 = vpack.c.bf16 %v1992_v10, %v1990_v3  ;;  %v1770_v19 = vadd.f32 %v13355_v0, %v1111_v9  ;;  %v12140_v3 = vld [vmem:[%s16815_s4 + $0x1a4] ss:$8 sps:$4 sm:$0xff]  }
 0x111   : > { %v1113_v15 = vpop.f32.mrf.mxu0  ;;  %v1353_v17 = vpop.f32.mrf.mxu1  ;;  %v1993_v21 = vmax.f32 %v1865_v11, 0.0  ;;  %v1897_v38 = vmax.f32 %v1769_v23, 0.0  ;;  %3054 = vmatprep.subr.bf16.mxu1 %v12140_v3  ;;  %v12141_v3 = vld [vmem:[%s16815_s4 + $0x260] ss:$8 sps:$4 sm:$0xff]  }
 0x112   : > { %v1771_v20 = vadd.f32 %v13351_v61, %v1113_v15  ;;  %2339 = vmatprep.mubr.bf16.mxu0 %v2016_v13  ;;  %v1867_v22 = vadd.f32 %v13351_v61, %v1353_v17  ;;  %v1994_v32 = vmax.f32 %v1866_v16, 0.0  ;;  %v1898_v34 = vmax.f32 %v1770_v19, 0.0  ;;  %3055 = vmatpush2.bf16.msra.mxu1 %v12138_v1 }
 0x113   : > { %v1115_v24 = vpop.f32.mrf.mxu0  ;;  %2340 = vmatmul.mubr.bf16.gmra.mxu0 %v2015_v14  ;;  %v1355_v25 = vpop.f32.mrf.mxu1 }
 0x114   : > { %v1772_v27 = vadd.f32 %v13355_v0, %v1115_v24  ;;  %v1995_v28 = vmax.f32 %v1867_v22, 0.0  ;;  %v1868_v29 = vadd.f32 %v13355_v0, %v1355_v25  ;;  %v1899_v30 = vmax.f32 %v1771_v20, 0.0 }
 0x115   : > { %v1119_v31 = vpop.f32.mrf.mxu0  ;;  %v1359_v33 = vpop.f32.mrf.mxu1  ;;  %1631 = vmatmul.mubr.bf16.gmra.mxu1 %v13315_v49  ;;  %v12137_v49 = vld [vmem:[%s16815_s4 + $0x274] ss:$8 sps:$4 sm:$0xff]  }
 0x116   : > { %v1900_v36 = vmax.f32 %v1772_v27, 0.0  ;;  %v13435_v37 = vpack.c.bf16 %v1995_v28, %v1993_v21  ;;  %1640 = vmatprep.mubr.bf16.mxu1 %v16827_v2  ;;  %v1996_v40 = vmax.f32 %v1868_v29, 0.0  ;;  %v1869_v45 = vadd.f32 %v13351_v61, %v1359_v33  ;;  %3779 = vmatprep.subr.bf16.mxu0 %v12137_v49 }
 0x117   : > { %v1121_v39 = vpop.f32.mrf.mxu0  ;;  %v1361_v43 = vpop.f32.mrf.mxu1  ;;  %v2017_v48 = vpack.c.bf16 %v1899_v30, %v1897_v38  ;;  %v1773_v4 = vadd.f32 %v13351_v61, %v1119_v31  ;;  %3780 = vmatpush1.bf16.msra.mxu0 %v12135_v47 }
 0x118   : > { %v2018_v44 = vpack.c.bf16 %v1900_v36, %v1898_v34  ;;  %v1870_v52 = vadd.f32 %v13355_v0, %v1361_v43  ;;  %v13446_v55 = vpack.c.bf16 %v1996_v40, %v1994_v32  ;;  %v1774_v57 = vadd.f32 %v13355_v0, %v1121_v39 }
 0x119   : > { %v1123_v51 = vpop.f32.mrf.mxu0  ;;  %v1363_v53 = vpop.f32.mrf.mxu1  ;;  %v1997_v60 = vmax.f32 %v1869_v45, 0.0  ;;  %v1901_v19 = vmax.f32 %v1773_v4, 0.0 }
 0x11a   : > { %v1775_v59 = vadd.f32 %v13351_v61, %v1123_v51  ;;  %2349 = vmatprep.mubr.bf16.mxu0 %v2018_v44  ;;  %v1871_v62 = vadd.f32 %v13351_v61, %v1363_v53  ;;  %v1998_v13 = vmax.f32 %v1870_v52, 0.0  ;;  %v1902_v15 = vmax.f32 %v1774_v57, 0.0 }
 0x11b   : > { %v1125_v5 = vpop.f32.mrf.mxu0  ;;  %2350 = vmatmul.mubr.bf16.gmra.mxu0 %v2017_v48  ;;  %v1365_v6 = vpop.f32.mrf.mxu1 }
 0x11c   : > { %v1776_v8 = vadd.f32 %v13355_v0, %v1125_v5  ;;  %v1999_v9 = vmax.f32 %v1871_v62, 0.0  ;;  %v1872_v10 = vadd.f32 %v13355_v0, %v1365_v6  ;;  %v1903_v11 = vmax.f32 %v1775_v59, 0.0 }
 0x11d   : > { %v1129_v12 = vpop.f32.mrf.mxu0  ;;  %v1369_v14 = vpop.f32.mrf.mxu1  ;;  %1641 = vmatmul.mubr.bf16.gmra.mxu1 %v13321_v50 }
 0x11e   : > { %v1904_v16 = vmax.f32 %v1776_v8, 0.0  ;;  %v13461_v17 = vpack.c.bf16 %v1999_v9, %v1997_v60  ;;  %1650 = vmatprep.mubr.bf16.mxu1 %v16827_v2  ;;  %v2000_v21 = vmax.f32 %v1872_v10, 0.0  ;;  %v1873_v22 = vadd.f32 %v13351_v61, %v1369_v14  ;;  %v12144_v14 = vld [vmem:[%s16815_s4 + $0x190] ss:$8 sps:$4 sm:$0xff]  }
 0x11f   : > { %v1131_v20 = vpop.f32.mrf.mxu0  ;;  %v1371_v23 = vpop.f32.mrf.mxu1  ;;  %v2019_v25 = vpack.c.bf16 %v1903_v11, %v1901_v19  ;;  %v1777_v34 = vadd.f32 %v13351_v61, %v1129_v12 }
 0x120   : > { %v2020_v24 = vpack.c.bf16 %v1904_v16, %v1902_v15  ;;  %v1874_v28 = vadd.f32 %v13355_v0, %v1371_v23  ;;  %v13466_v50 = vpack.c.bf16 %v2000_v21, %v1998_v13  ;;  %v1778_v30 = vadd.f32 %v13355_v0, %v1131_v20  ;;  %v12146_v15 = vld [vmem:[%s16815_s4 + $0x194] ss:$8 sps:$4 sm:$0xff]  }
 0x121   : > { %v1133_v27 = vpop.f32.mrf.mxu0  ;;  %v1373_v29 = vpop.f32.mrf.mxu1  ;;  %v2001_v32 = vmax.f32 %v1873_v22, 0.0  ;;  %v1905_v53 = vmax.f32 %v1777_v34, 0.0  ;;  %3056 = vmatprep.subr.bf16.mxu1 %v12146_v15 }
 0x122   : > { %v1779_v31 = vadd.f32 %v13351_v61, %v1133_v27  ;;  %2359 = vmatprep.mubr.bf16.mxu0 %v2020_v24  ;;  %v1875_v33 = vadd.f32 %v13351_v61, %v1373_v29  ;;  %v2002_v47 = vmax.f32 %v1874_v28, 0.0  ;;  %v1906_v48 = vmax.f32 %v1778_v30, 0.0  ;;  %v12816_v29 = vld [vmem:[%s12954_s25 + $0xc0] sm:$0xff]   ;;  %3057 = vmatpush2.bf16.msra.mxu1 %v12144_v14 }
 0x123   : > { %v1135_v36 = vpop.f32.mrf.mxu0  ;;  %2360 = vmatmul.mubr.bf16.gmra.mxu0 %v2019_v25  ;;  %v1375_v38 = vpop.f32.mrf.mxu1 }
 0x124   : > { %v1780_v39 = vadd.f32 %v13355_v0, %v1135_v36  ;;  %v2003_v40 = vmax.f32 %v1875_v33, 0.0  ;;  %v1876_v45 = vadd.f32 %v13355_v0, %v1375_v38  ;;  %v1907_v43 = vmax.f32 %v1779_v31, 0.0 }
 0x125   : > { %v1139_v44 = vpop.f32.mrf.mxu0  ;;  %v1379_v49 = vpop.f32.mrf.mxu1  ;;  %1651 = vmatmul.mubr.bf16.gmra.mxu1 %v13333_v54  ;;  %v12143_v54 = vld [vmem:[%s16815_s4 + $0x264] ss:$8 sps:$4 sm:$0xff]  }
 0x126   : > { %v1908_v51 = vmax.f32 %v1780_v39, 0.0  ;;  %v13475_v52 = vpack.c.bf16 %v2003_v40, %v2001_v32  ;;  %1660 = vmatprep.mubr.bf16.mxu1 %v16827_v2  ;;  %v2004_v59 = vmax.f32 %v1876_v45, 0.0  ;;  %v1877_v60 = vadd.f32 %v13351_v61, %v1379_v49  ;;  %3781 = vmatprep.subr.bf16.mxu0 %v12143_v54  ;;  %v12817_v54 = vld [vmem:[%s12954_s25 + $0xc8] sm:$0xff]  }
 0x127   : > { %v1141_v57 = vpop.f32.mrf.mxu0  ;;  %v1381_v62 = vpop.f32.mrf.mxu1  ;;  %v2021_v4 = vpack.c.bf16 %v1907_v43, %v1905_v53  ;;  %v1781_v16 = vadd.f32 %v13351_v61, %v1139_v44  ;;  %3782 = vmatpush1.bf16.msra.mxu0 %v12141_v3 }
 0x128   : > { %v2022_v1 = vpack.c.bf16 %v1908_v51, %v1906_v48  ;;  %v1878_v6 = vadd.f32 %v13355_v0, %v1381_v62  ;;  %v13486_v9 = vpack.c.bf16 %v2004_v59, %v2002_v47  ;;  %v1782_v10 = vadd.f32 %v13355_v0, %v1141_v57  ;;  %v12147_v59 = vld [vmem:[%s16815_s4 + $0x250] ss:$8 sps:$4 sm:$0xff]  }
 0x129   : > { %v1143_v5 = vpop.f32.mrf.mxu0  ;;  %v1383_v8 = vpop.f32.mrf.mxu1  ;;  %v2005_v12 = vmax.f32 %v1877_v60, 0.0  ;;  %v1909_v33 = vmax.f32 %v1781_v16, 0.0  ;;  %v12149_v60 = vld [vmem:[%s16815_s4 + $0x254] ss:$8 sps:$4 sm:$0xff]  }
 0x12a   : > { %v1783_v11 = vadd.f32 %v13351_v61, %v1143_v5  ;;  %2369 = vmatprep.mubr.bf16.mxu0 %v2022_v1  ;;  %v1879_v13 = vadd.f32 %v13351_v61, %v1383_v8  ;;  %v2006_v27 = vmax.f32 %v1878_v6, 0.0  ;;  %v1910_v30 = vmax.f32 %v1782_v10, 0.0  ;;  %v12152_v5 = vld [vmem:[%s16815_s4 + $0x184] ss:$8 sps:$4 sm:$0xff]   ;;  %3783 = vmatprep.subr.bf16.mxu0 %v12149_v60 }
 0x12b   : > { %v1145_v19 = vpop.f32.mrf.mxu0  ;;  %2370 = vmatmul.mubr.bf16.gmra.mxu0 %v2021_v4  ;;  %v1385_v20 = vpop.f32.mrf.mxu1  ;;  %v12150_v4 = vld [vmem:[%s16815_s4 + $0x180] ss:$8 sps:$4 sm:$0xff]   ;;  %3058 = vmatprep.subr.bf16.mxu1 %v12152_v5  ;;  %v12819_v5 = vld [vmem:[%s12954_s25 + $0xd8] sm:$0xff]  }
 0x12c   : > { %v1784_v21 = vadd.f32 %v13355_v0, %v1145_v19  ;;  %v2007_v22 = vmax.f32 %v1879_v13, 0.0  ;;  %v1880_v23 = vadd.f32 %v13355_v0, %v1385_v20  ;;  %v1911_v24 = vmax.f32 %v1783_v11, 0.0  ;;  %3784 = vmatpush1.bf16.msra.mxu0 %v12147_v59  ;;  %3059 = vmatpush2.bf16.msra.mxu1 %v12150_v4 }
 0x12d   : > { %v1149_v25 = vpop.f32.mrf.mxu0  ;;  %v13500_v28 = vpop.f32.mrf.mxu1  ;;  %1661 = vmatmul.mubr.bf16.gmra.mxu1 %v12816_v29 }
 0x12e   : > { %v1912_v31 = vmax.f32 %v1784_v21, 0.0  ;;  %v13503_v32 = vpack.c.bf16 %v2007_v22, %v2005_v12  ;;  %1670 = vmatprep.mubr.bf16.mxu1 %v16827_v2  ;;  %v2008_v36 = vmax.f32 %v1880_v23, 0.0  ;;  %v2023_v40 = vpack.c.bf16 %v1911_v24, %v1909_v33 }
 0x12f   : > { %v1151_v34 = vpop.f32.mrf.mxu0  ;;  %v13506_v38 = vpop.f32.mrf.mxu1  ;;  %v1785_v48 = vadd.f32 %v13351_v61, %v1149_v25 }
 0x130   : > { %v2024_v39 = vpack.c.bf16 %v1912_v31, %v1910_v30  ;;  %v13510_v44 = vpack.c.bf16 %v2008_v36, %v2006_v27  ;;  %v1786_v47 = vadd.f32 %v13355_v0, %v1151_v34  ;;  %v12818_v30 = vld [vmem:[%s12954_s25 + $0xd0] sm:$0xff]  }
 0x131   : > { %v1153_v45 = vpop.f32.mrf.mxu0  ;;  %v13508_v43 = vpop.f32.mrf.mxu1  ;;  %v1913_v10 = vmax.f32 %v1785_v48, 0.0 }
 0x132   : > { %v1787_v49 = vadd.f32 %v13351_v61, %v1153_v45  ;;  %2379 = vmatprep.mubr.bf16.mxu0 %v2024_v39  ;;  %v1914_v6 = vmax.f32 %v1786_v47, 0.0 }
 0x133   : > { %v1155_v51 = vpop.f32.mrf.mxu0  ;;  %2380 = vmatmul.mubr.bf16.gmra.mxu0 %v2023_v40  ;;  %v13515_v53 = vpop.f32.mrf.mxu1 }
 0x134   : > { %v1788_v57 = vadd.f32 %v13355_v0, %v1155_v51  ;;  %v1915_v62 = vmax.f32 %v1787_v49, 0.0 }
 0x135   : > { %v1159_v1 = vpop.f32.mrf.mxu0  ;;  %v13524_v3 = vpop.f32.mrf.mxu1  ;;  %1671 = vmatmul.mubr.bf16.gmra.mxu1 %v12817_v54 }
 0x136   : > { %v1916_v8 = vmax.f32 %v1788_v57, 0.0  ;;  %1680 = vmatprep.mubr.bf16.mxu1 %v16827_v2  ;;  %v2025_v14 = vpack.c.bf16 %v1915_v62, %v1913_v10  ;;  %v1789_v21 = vadd.f32 %v13351_v61, %v1159_v1 }
 0x137   : > { %v1161_v11 = vpop.f32.mrf.mxu0  ;;  %v13534_v12 = vpop.f32.mrf.mxu1 }
 0x138   : > { %v2026_v13 = vpack.c.bf16 %v1916_v8, %v1914_v6  ;;  %v1790_v19 = vadd.f32 %v13355_v0, %v1161_v11  ;;  %v1917_v34 = vmax.f32 %v1789_v21, 0.0 }
 0x139   : > { %v1163_v15 = vpop.f32.mrf.mxu0  ;;  %v13536_v16 = vpop.f32.mrf.mxu1 }
 0x13a   : > { %v1791_v20 = vadd.f32 %v13351_v61, %v1163_v15  ;;  %2389 = vmatprep.mubr.bf16.mxu0 %v2026_v13  ;;  %v1918_v31 = vmax.f32 %v1790_v19, 0.0  ;;  %v12153_v15 = vld [vmem:[%s16815_s4 + $0x240] ss:$8 sps:$4 sm:$0xff]   ;;  %v12155_v19 = vld [vmem:[%s16815_s4 + $0x244] ss:$8 sps:$4 sm:$0xff]  }
 0x13b   : > { %v1165_v22 = vpop.f32.mrf.mxu0  ;;  %2390 = vmatmul.mubr.bf16.gmra.mxu0 %v2025_v14  ;;  %v13541_v23 = vpop.f32.mrf.mxu1  ;;  %3785 = vmatprep.subr.bf16.mxu0 %v12155_v19 }
 0x13c   : > { %v1792_v24 = vadd.f32 %v13355_v0, %v1165_v22  ;;  %v1919_v25 = vmax.f32 %v1791_v20, 0.0  ;;  %3786 = vmatpush1.bf16.msra.mxu0 %v12153_v15 }
 0x13d   : > { %v1169_v27 = vpop.f32.mrf.mxu0  ;;  %v13544_v29 = vpop.f32.mrf.mxu1  ;;  %1681 = vmatmul.mubr.bf16.gmra.mxu1 %v12818_v30 }
 0x13e   : > { %v1920_v33 = vmax.f32 %v1792_v24, 0.0  ;;  %1690 = vmatprep.mubr.bf16.mxu1 %v16827_v2  ;;  %v2027_v45 = vpack.c.bf16 %v1919_v25, %v1917_v34  ;;  %v1793_v57 = vadd.f32 %v13351_v61, %v1169_v27 }
 0x13f   : > { %v1171_v36 = vpop.f32.mrf.mxu0  ;;  %v13548_v39 = vpop.f32.mrf.mxu1 }
 0x140   : > { %v2028_v40 = vpack.c.bf16 %v1920_v33, %v1918_v31  ;;  %v1794_v48 = vadd.f32 %v13355_v0, %v1171_v36  ;;  %v1921_v10 = vmax.f32 %v1793_v57, 0.0 }
 0x141   : > { %v1173_v47 = vpop.f32.mrf.mxu0  ;;  %v13550_v49 = vpop.f32.mrf.mxu1 }
 0x142   : > { %v1795_v51 = vadd.f32 %v13351_v61, %v1173_v47  ;;  %2399 = vmatprep.mubr.bf16.mxu0 %v2028_v40  ;;  %v1922_v6 = vmax.f32 %v1794_v48, 0.0 }
 0x143   : > { %v1175_v59 = vpop.f32.mrf.mxu0  ;;  %2400 = vmatmul.mubr.bf16.gmra.mxu0 %v2027_v45  ;;  %v13555_v60 = vpop.f32.mrf.mxu1  ;;  %v12820_v45 = vld [vmem:[%s12954_s25 + $0xe0] sm:$0xff]  }
 0x144   : > { %v1796_v62 = vadd.f32 %v13355_v0, %v1175_v59  ;;  %v1923_v1 = vmax.f32 %v1795_v51, 0.0 }
 0x145   : > { %v1179_v54 = vpop.f32.mrf.mxu0  ;;  %v13558_v4 = vpop.f32.mrf.mxu1  ;;  %1691 = vmatmul.mubr.bf16.gmra.mxu1 %v12819_v5 }
 0x146   : > { %v1924_v8 = vmax.f32 %v1796_v62, 0.0  ;;  %1700 = vmatprep.mubr.bf16.mxu1 %v16827_v2  ;;  %v2029_v20 = vpack.c.bf16 %v1923_v1, %v1921_v10  ;;  %v1797_v27 = vadd.f32 %v13351_v61, %v1179_v54 }
 0x147   : > { %v1181_v11 = vpop.f32.mrf.mxu0  ;;  %v13562_v13 = vpop.f32.mrf.mxu1 }
 0x148   : > { %v2030_v14 = vpack.c.bf16 %v1924_v8, %v1922_v6  ;;  %v1798_v24 = vadd.f32 %v13355_v0, %v1181_v11  ;;  %v1925_v51 = vmax.f32 %v1797_v27, 0.0 }
 0x149   : > { %v1183_v21 = vpop.f32.mrf.mxu0  ;;  %v13570_v22 = vpop.f32.mrf.mxu1 }
 0x14a   : > { %v1799_v25 = vadd.f32 %v13351_v61, %v1183_v21  ;;  %2409 = vmatprep.mubr.bf16.mxu0 %v2030_v14  ;;  %v1926_v47 = vmax.f32 %v1798_v24, 0.0  ;;  %v12821_v24 = vld [vmem:[%s12954_s25 + $0xe8] sm:$0xff]  }
 0x14b   : > { %v1185_v30 = vpop.f32.mrf.mxu0  ;;  %2410 = vmatmul.mubr.bf16.gmra.mxu0 %v2029_v20  ;;  %v13575_v31 = vpop.f32.mrf.mxu1 }
 0x14c   : > { %v1800_v33 = vadd.f32 %v13355_v0, %v1185_v30  ;;  %v1927_v34 = vmax.f32 %v1799_v25, 0.0 }
 0x14d   : > { %v1189_v36 = vpop.f32.mrf.mxu0  ;;  %v13578_v40 = vpop.f32.mrf.mxu1  ;;  %1701 = vmatmul.mubr.bf16.gmra.mxu1 %v12820_v45  ;;  %v12156_v45 = vld [vmem:[%s16815_s4 + $0x230] ss:$8 sps:$4 sm:$0xff]  }
 0x14e   : > { %v1928_v48 = vmax.f32 %v1800_v33, 0.0  ;;  %1710 = vmatprep.mubr.bf16.mxu1 %v16827_v2  ;;  %v2031_v1 = vpack.c.bf16 %v1927_v34, %v1925_v51  ;;  %v1801_v10 = vadd.f32 %v13351_v61, %v1189_v36 }
 0x14f   : > { %v1191_v57 = vpop.f32.mrf.mxu0  ;;  %v13582_v59 = vpop.f32.mrf.mxu1 }
 0x150   : > { %v2032_v62 = vpack.c.bf16 %v1928_v48, %v1926_v47  ;;  %v1802_v6 = vadd.f32 %v13355_v0, %v1191_v57  ;;  %v1929_v30 = vmax.f32 %v1801_v10, 0.0  ;;  %v12158_v47 = vld [vmem:[%s16815_s4 + $0x234] ss:$8 sps:$4 sm:$0xff]  }
 0x151   : > { %v1193_v54 = vpop.f32.mrf.mxu0  ;;  %v13584_v5 = vpop.f32.mrf.mxu1  ;;  %3787 = vmatprep.subr.bf16.mxu0 %v12158_v47 }
 0x152   : > { %v1803_v8 = vadd.f32 %v13351_v61, %v1193_v54  ;;  %2419 = vmatprep.mubr.bf16.mxu0 %v2032_v62  ;;  %v1930_v25 = vmax.f32 %v1802_v6, 0.0  ;;  %3788 = vmatpush1.bf16.msra.mxu0 %v12156_v45 }
 0x153   : > { %v1195_v11 = vpop.f32.mrf.mxu0  ;;  %2420 = vmatmul.mubr.bf16.gmra.mxu0 %v2031_v1  ;;  %v13589_v14 = vpop.f32.mrf.mxu1 }
 0x154   : > { %v1804_v15 = vadd.f32 %v13355_v0, %v1195_v11  ;;  %v1931_v19 = vmax.f32 %v1803_v8, 0.0 }
 0x155   : > { %v1199_v20 = vpop.f32.mrf.mxu0  ;;  %v13592_v21 = vpop.f32.mrf.mxu1  ;;  %1711 = vmatmul.mubr.bf16.gmra.mxu1 %v12821_v24  ;;  %v12822_v24 = vld [vmem:[%s12954_s25 + $0xf0] sm:$0xff]  }
 0x156   : > { %v1932_v27 = vmax.f32 %v1804_v15, 0.0  ;;  %1720 = vmatprep.mubr.bf16.mxu1 %v16827_v2  ;;  %v2033_v48 = vpack.c.bf16 %v1931_v19, %v1929_v30  ;;  %v1805_v54 = vadd.f32 %v13351_v61, %v1199_v20 }
 0x157   : > { %v1201_v33 = vpop.f32.mrf.mxu0  ;;  %v13596_v34 = vpop.f32.mrf.mxu1 }
 0x158   : > { %v2034_v36 = vpack.c.bf16 %v1932_v27, %v1930_v25  ;;  %v1806_v62 = vadd.f32 %v13355_v0, %v1201_v33  ;;  %v1933_v30 = vmax.f32 %v1805_v54, 0.0 }
 0x159   : > { %v1203_v51 = vpop.f32.mrf.mxu0  ;;  %v13604_v57 = vpop.f32.mrf.mxu1 }
 0x15a   : > { %v1807_v1 = vadd.f32 %v13351_v61, %v1203_v51  ;;  %2429 = vmatprep.mubr.bf16.mxu0 %v2034_v36  ;;  %v1934_v25 = vmax.f32 %v1806_v62, 0.0 }
 0x15b   : > { %v1205_v6 = vpop.f32.mrf.mxu0  ;;  %2430 = vmatmul.mubr.bf16.gmra.mxu0 %v2033_v48  ;;  %v13609_v8 = vpop.f32.mrf.mxu1 }
 0x15c   : > { %v1808_v10 = vadd.f32 %v13355_v0, %v1205_v6  ;;  %v1935_v11 = vmax.f32 %v1807_v1, 0.0 }
 0x15d   : > { %v1209_v15 = vpop.f32.mrf.mxu0  ;;  %v13612_v19 = vpop.f32.mrf.mxu1  ;;  %1721 = vmatmul.mubr.bf16.gmra.mxu1 %v12822_v24 }
 0x15e   : > { %16829 = vst [vmem:[#allocation2_spill] sm:$0xff] %v13612_v19  ;;  %v1936_v27 = vmax.f32 %v1808_v10, 0.0  ;;  %1730 = vmatprep.mubr.bf16.mxu1 %v16827_v2  ;;  %v2035_v47 = vpack.c.bf16 %v1935_v11, %v1933_v30  ;;  %v1809_v62 = vadd.f32 %v13351_v61, %v1209_v15  ;;  %v12823_v11 = vld [vmem:[%s12954_s25 + $0xf8] sm:$0xff]   ;;  %v12159_v15 = vld [vmem:[%s16815_s4 + $0x220] ss:$8 sps:$4 sm:$0xff]  }
 0x15f   : > { %v1211_v33 = vpop.f32.mrf.mxu0  ;;  %v13616_v20 = vpop.f32.mrf.mxu1 }
 0x160   : > { %16830 = vst [vmem:[#allocation3_spill] sm:$0xff] %v13616_v20  ;;  %v2036_v36 = vpack.c.bf16 %v1936_v27, %v1934_v25  ;;  %v1810_v45 = vadd.f32 %v13355_v0, %v1211_v33  ;;  %v1937_v33 = vmax.f32 %v1809_v62, 0.0 }
 0x161   : > { %v1213_v48 = vpop.f32.mrf.mxu0  ;;  %v13618_v51 = vpop.f32.mrf.mxu1 }
 0x162   : > { %16831 = vst [vmem:[#allocation4_spill] sm:$0xff] %v13618_v51  ;;  %v1811_v1 = vadd.f32 %v13351_v61, %v1213_v48  ;;  %2439 = vmatprep.mubr.bf16.mxu0 %v2036_v36  ;;  %v1938_v27 = vmax.f32 %v1810_v45, 0.0 }
 0x163   : > { %v1215_v6 = vpop.f32.mrf.mxu0  ;;  %2440 = vmatmul.mubr.bf16.gmra.mxu0 %v2035_v47  ;;  %v13623_v10 = vpop.f32.mrf.mxu1  ;;  %v12161_v47 = vld [vmem:[%s16815_s4 + $0x224] ss:$8 sps:$4 sm:$0xff]  }
 0x164   : > { %16832 = vst [vmem:[#allocation5_spill] sm:$0xff] %v13623_v10  ;;  %v1812_v54 = vadd.f32 %v13355_v0, %v1215_v6  ;;  %v1939_v24 = vmax.f32 %v1811_v1, 0.0  ;;  %3789 = vmatprep.subr.bf16.mxu0 %v12161_v47 }
 0x165   : > { %v1219_v2 = vpop.f32.mrf.mxu0  ;;  %v13626_v25 = vpop.f32.mrf.mxu1  ;;  %1731 = vmatmul.mubr.bf16.gmra.mxu1 %v12823_v11  ;;  %3790 = vmatpush1.bf16.msra.mxu0 %v12159_v15 }
 0x166   : > { %16833 = vst [vmem:[#allocation6_spill] sm:$0xff] %v13626_v25  ;;  %v1940_v30 = vmax.f32 %v1812_v54, 0.0  ;;  %v2037_v1 = vpack.c.bf16 %v1939_v24, %v1937_v33  ;;  %v1813_v54 = vadd.f32 %v13351_v61, %v1219_v2 }
 0x167   : > { %v1221_v19 = vpop.f32.mrf.mxu0  ;;  %v13629_v48 = vpop.f32.mrf.mxu1 }
 0x168   : > { %16834 = vst [vmem:[#allocation7_spill] sm:$0xff] %v13629_v48  ;;  %v2038_v36 = vpack.c.bf16 %v1940_v30, %v1938_v27  ;;  %v1814_v45 = vadd.f32 %v13355_v0, %v1221_v19  ;;  %v1941_v19 = vmax.f32 %v1813_v54, 0.0 }
 0x169   : > { %v1223_v6 = vpop.f32.mrf.mxu0  ;;  %v13637_v25 = vpop.f32.mrf.mxu1 }
 0x16a   : > { %16835 = vst [vmem:[#allocation8_spill] sm:$0xff] %v13637_v25  ;;  %v1815_v62 = vadd.f32 %v13351_v61, %v1223_v6  ;;  %2449 = vmatprep.mubr.bf16.mxu0 %v2038_v36  ;;  %v1942_v25 = vmax.f32 %v1814_v45, 0.0 }
 0x16b   : > { %v1225_v11 = vpop.f32.mrf.mxu0  ;;  %2450 = vmatmul.mubr.bf16.gmra.mxu0 %v2037_v1  ;;  %v13642_v27 = vpop.f32.mrf.mxu1 }
 0x16c   : > { %16836 = vst [vmem:[#allocation9_spill] sm:$0xff] %v13642_v27  ;;  %v1816_v30 = vadd.f32 %v13355_v0, %v1225_v11  ;;  %v1943_v48 = vmax.f32 %v1815_v62, 0.0 }
 0x16d   : > { %v1229_v24 = vpop.f32.mrf.mxu0  ;;  %v13645_v33 = vpop.f32.mrf.mxu1 }
 0x16e   : > { %16837 = vst [vmem:[#allocation10_spill] sm:$0xff] %v13645_v33  ;;  %v1944_v10 = vmax.f32 %v1816_v30, 0.0  ;;  %v2039_v47 = vpack.c.bf16 %v1943_v48, %v1941_v19  ;;  %v1817_v15 = vadd.f32 %v13351_v61, %v1229_v24  ;;  %v12162_v24 = vld [vmem:[%s16815_s4 + $0x210] ss:$8 sps:$4 sm:$0xff]  }
 0x16f   : > { %v1231_v51 = vpop.f32.mrf.mxu0  ;;  %v13647_v6 = vpop.f32.mrf.mxu1 }
 0x170   : > { %16838 = vst [vmem:[#allocation11_spill] sm:$0xff] %v13647_v6  ;;  %v2040_v36 = vpack.c.bf16 %v1944_v10, %v1942_v25  ;;  %v1818_v1 = vadd.f32 %v13355_v0, %v1231_v51  ;;  %v1945_v19 = vmax.f32 %v1817_v15, 0.0 }
 0x171   : > { %v1233_v2 = vpop.f32.mrf.mxu0  ;;  %v13649_v20 = vpop.f32.mrf.mxu1 }
 0x172   : > { %16839 = vst [vmem:[#allocation12_spill] sm:$0xff] %v13649_v20  ;;  %v1819_v11 = vadd.f32 %v13351_v61, %v1233_v2  ;;  %2459 = vmatprep.mubr.bf16.mxu0 %v2040_v36  ;;  %v1946_v25 = vmax.f32 %v1818_v1, 0.0  ;;  %v12164_v36 = vld [vmem:[%s16815_s4 + $0x214] ss:$8 sps:$4 sm:$0xff]  }
 0x173   : > { %v1235_v62 = vpop.f32.mrf.mxu0  ;;  %2460 = vmatmul.mubr.bf16.gmra.mxu0 %v2039_v47  ;;  %v13654_v45 = vpop.f32.mrf.mxu1  ;;  %3791 = vmatprep.subr.bf16.mxu0 %v12164_v36 }
 0x174   : > { %16840 = vst [vmem:[#allocation13_spill] sm:$0xff] %v13654_v45  ;;  %v1820_v54 = vadd.f32 %v13355_v0, %v1235_v62  ;;  %v1947_v30 = vmax.f32 %v1819_v11, 0.0  ;;  %3792 = vmatpush1.bf16.msra.mxu0 %v12162_v24 }
 0x175   : > { %v1239_v33 = vpop.f32.mrf.mxu0  ;;  %v13657_v10 = vpop.f32.mrf.mxu1 }
 0x176   : > { %16841 = vst [vmem:[#allocation14_spill] sm:$0xff] %v13657_v10  ;;  %v1948_v48 = vmax.f32 %v1820_v54, 0.0  ;;  %v2041_v47 = vpack.c.bf16 %v1947_v30, %v1945_v19  ;;  %v1821_v54 = vadd.f32 %v13351_v61, %v1239_v33 }
 0x177   : > { %v1241_v20 = vpop.f32.mrf.mxu0  ;;  %v13659_v51 = vpop.f32.mrf.mxu1 }
 0x178   : > { %16842 = vst [vmem:[#allocation15_spill] sm:$0xff] %v13659_v51  ;;  %v2042_v2 = vpack.c.bf16 %v1948_v48, %v1946_v25  ;;  %v1822_v1 = vadd.f32 %v13355_v0, %v1241_v20  ;;  %v1949_v20 = vmax.f32 %v1821_v54, 0.0 }
 0x179   : > { %v1243_v11 = vpop.f32.mrf.mxu0  ;;  %v13667_v62 = vpop.f32.mrf.mxu1 }
 0x17a   : > { %16843 = vst [vmem:[#allocation16_spill] sm:$0xff] %v13667_v62  ;;  %v1823_v15 = vadd.f32 %v13351_v61, %v1243_v11  ;;  %2469 = vmatprep.mubr.bf16.mxu0 %v2042_v2  ;;  %v1950_v62 = vmax.f32 %v1822_v1, 0.0 }
 0x17b   : > { %v1245_v25 = vpop.f32.mrf.mxu0  ;;  %2470 = vmatmul.mubr.bf16.gmra.mxu0 %v2041_v47  ;;  %v13672_v48 = vpop.f32.mrf.mxu1 }
 0x17c   : > { %16844 = vst [vmem:[#allocation17_spill] sm:$0xff] %v13672_v48  ;;  %v1824_v10 = vadd.f32 %v13355_v0, %v1245_v25  ;;  %v1951_v51 = vmax.f32 %v1823_v15, 0.0 }
 0x17d   : > { %v1249_v30 = vpop.f32.mrf.mxu0  ;;  %v13675_v19 = vpop.f32.mrf.mxu1 }
 0x17e   : > { %16845 = vst [vmem:[#allocation18_spill] sm:$0xff] %v13675_v19  ;;  %v1952_v45 = vmax.f32 %v1824_v10, 0.0  ;;  %v2043_v36 = vpack.c.bf16 %v1951_v51, %v1949_v20  ;;  %v1825_v24 = vadd.f32 %v13351_v61, %v1249_v30  ;;  %v12165_v30 = vld [vmem:[%s16815_s4 + $0x200] ss:$8 sps:$4 sm:$0xff]  }
 0x17f   : > { %v1251_v6 = vpop.f32.mrf.mxu0  ;;  %v13677_v11 = vpop.f32.mrf.mxu1 }
 0x180   : > { %16846 = vst [vmem:[#allocation19_spill] sm:$0xff] %v13677_v11  ;;  %v2044_v2 = vpack.c.bf16 %v1952_v45, %v1950_v62  ;;  %v1826_v47 = vadd.f32 %v13355_v0, %v1251_v6  ;;  %v1953_v20 = vmax.f32 %v1825_v24, 0.0 }
 0x181   : > { %v1253_v33 = vpop.f32.mrf.mxu0  ;;  %v13679_v27 = vpop.f32.mrf.mxu1 }
 0x182   : > { %16847 = vst [vmem:[#allocation20_spill] sm:$0xff] %v13679_v27  ;;  %v1827_v25 = vadd.f32 %v13351_v61, %v1253_v33  ;;  %2479 = vmatprep.mubr.bf16.mxu0 %v2044_v2  ;;  %v1954_v51 = vmax.f32 %v1826_v47, 0.0  ;;  %v12167_v2 = vld [vmem:[%s16815_s4 + $0x204] ss:$8 sps:$4 sm:$0xff]  }
 0x183   : > { %v1255_v15 = vpop.f32.mrf.mxu0  ;;  %2480 = vmatmul.mubr.bf16.gmra.mxu0 %v2043_v36  ;;  %v13684_v1 = vpop.f32.mrf.mxu1  ;;  %3793 = vmatprep.subr.bf16.mxu0 %v12167_v2 }
 0x184   : > { %16848 = vst [vmem:[#allocation21_spill] sm:$0xff] %v13684_v1  ;;  %v1828_v10 = vadd.f32 %v13355_v0, %v1255_v15  ;;  %v1955_v54 = vmax.f32 %v1827_v25, 0.0  ;;  %3794 = vmatpush1.bf16.msra.mxu0 %v12165_v30 }
 0x185   : > { %v1259_v19 = vpop.f32.mrf.mxu0  ;;  %v13687_v45 = vpop.f32.mrf.mxu1 }
 0x186   : > { %16849 = vst [vmem:[#allocation22_spill] sm:$0xff] %v13687_v45  ;;  %v1956_v62 = vmax.f32 %v1828_v10, 0.0  ;;  %v2045_v36 = vpack.c.bf16 %v1955_v54, %v1953_v20  ;;  %v1829_v10 = vadd.f32 %v13351_v61, %v1259_v19 }
 0x187   : > { %v1261_v27 = vpop.f32.mrf.mxu0  ;;  %v13689_v6 = vpop.f32.mrf.mxu1 }
 0x188   : > { %16850 = vst [vmem:[#allocation23_spill] sm:$0xff] %v13689_v6  ;;  %v2046_v33 = vpack.c.bf16 %v1956_v62, %v1954_v51  ;;  %v1830_v47 = vadd.f32 %v13355_v0, %v1261_v27  ;;  %v1957_v27 = vmax.f32 %v1829_v10, 0.0 }
 0x189   : > { %v1263_v25 = vpop.f32.mrf.mxu0  ;;  %v13697_v15 = vpop.f32.mrf.mxu1 }
 0x18a   : > { %16851 = vst [vmem:[#allocation24_spill] sm:$0xff] %v13697_v15  ;;  %v1831_v24 = vadd.f32 %v13351_v61, %v1263_v25  ;;  %2489 = vmatprep.mubr.bf16.mxu0 %v2046_v33  ;;  %v1958_v15 = vmax.f32 %v1830_v47, 0.0 }
 0x18b   : > { %v1265_v51 = vpop.f32.mrf.mxu0  ;;  %2490 = vmatmul.mubr.bf16.gmra.mxu0 %v2045_v36  ;;  %v13702_v62 = vpop.f32.mrf.mxu1 }
 0x18c   : > { %16852 = vst [vmem:[#allocation25_spill] sm:$0xff] %v13702_v62  ;;  %v1832_v45 = vadd.f32 %v13355_v0, %v1265_v51  ;;  %v1959_v6 = vmax.f32 %v1831_v24, 0.0 }
 0x18d   : > { %v1269_v54 = vpop.f32.mrf.mxu0  ;;  %v13705_v20 = vpop.f32.mrf.mxu1 }
 0x18e   : > { %16853 = vst [vmem:[#allocation26_spill] sm:$0xff] %v13705_v20  ;;  %v1960_v1 = vmax.f32 %v1832_v45, 0.0  ;;  %v2047_v2 = vpack.c.bf16 %v1959_v6, %v1957_v27  ;;  %v1833_v30 = vadd.f32 %v13351_v61, %v1269_v54  ;;  %v12168_v54 = vld [vmem:[%s16815_s4 + $0x2f0] ss:$8 sps:$4 sm:$0xff]  }
 0x18f   : > { %v1271_v11 = vpop.f32.mrf.mxu0  ;;  %v13707_v25 = vpop.f32.mrf.mxu1 }
 0x190   : > { %16854 = vst [vmem:[#allocation27_spill] sm:$0xff] %v13707_v25  ;;  %v2048_v33 = vpack.c.bf16 %v1960_v1, %v1958_v15  ;;  %v1834_v36 = vadd.f32 %v13355_v0, %v1271_v11  ;;  %v1961_v27 = vmax.f32 %v1833_v30, 0.0 }
 0x191   : > { %v1273_v19 = vpop.f32.mrf.mxu0  ;;  %v13709_v48 = vpop.f32.mrf.mxu1 }
 0x192   : > { %16855 = vst [vmem:[#allocation28_spill] sm:$0xff] %v13709_v48  ;;  %v1835_v51 = vadd.f32 %v13351_v61, %v1273_v19  ;;  %2499 = vmatprep.mubr.bf16.mxu0 %v2048_v33  ;;  %v1962_v6 = vmax.f32 %v1834_v36, 0.0  ;;  %v12170_v33 = vld [vmem:[%s16815_s4 + $0x2f4] ss:$8 sps:$4 sm:$0xff]  }
 0x193   : > { %v1275_v24 = vpop.f32.mrf.mxu0  ;;  %2500 = vmatmul.mubr.bf16.gmra.mxu0 %v2047_v2  ;;  %v13714_v47 = vpop.f32.mrf.mxu1  ;;  %3795 = vmatprep.subr.bf16.mxu0 %v12170_v33 }
 0x194   : > { %16856 = vst [vmem:[#allocation29_spill] sm:$0xff] %v13714_v47  ;;  %v1836_v45 = vadd.f32 %v13355_v0, %v1275_v24  ;;  %v1963_v10 = vmax.f32 %v1835_v51, 0.0  ;;  %3796 = vmatpush2.bf16.msra.mxu0 %v12168_v54 }
 0x195   : > { %v1279_v20 = vpop.f32.mrf.mxu0  ;;  %v13717_v1 = vpop.f32.mrf.mxu1 }
 0x196   : > { %16857 = vst [vmem:[#allocation30_spill] sm:$0xff] %v13717_v1  ;;  %v1964_v15 = vmax.f32 %v1836_v45, 0.0  ;;  %v2049_v2 = vpack.c.bf16 %v1963_v10, %v1961_v27  ;;  %v1837_v45 = vadd.f32 %v13351_v61, %v1279_v20 }
 0x197   : > { %v1281_v48 = vpop.f32.mrf.mxu0  ;;  %v13719_v11 = vpop.f32.mrf.mxu1 }
 0x198   : > { %16858 = vst [vmem:[#allocation31_spill] sm:$0xff] %v13719_v11  ;;  %v2050_v19 = vpack.c.bf16 %v1964_v15, %v1962_v6  ;;  %v1838_v36 = vadd.f32 %v13355_v0, %v1281_v48  ;;  %v1965_v48 = vmax.f32 %v1837_v45, 0.0 }
 0x199   : > { %v1283_v51 = vpop.f32.mrf.mxu0  ;;  %v13727_v24 = vpop.f32.mrf.mxu1 }
 0x19a   : > { %16859 = vst [vmem:[#allocation32_spill] sm:$0xff] %v13727_v24  ;;  %v1839_v30 = vadd.f32 %v13351_v61, %v1283_v51  ;;  %2509 = vmatprep.mubr.bf16.mxu0 %v2050_v19  ;;  %v1966_v24 = vmax.f32 %v1838_v36, 0.0 }
 0x19b   : > { %v1285_v6 = vpop.f32.mrf.mxu0  ;;  %2510 = vmatmul.mubr.bf16.gmra.mxu0 %v2049_v2  ;;  %v13732_v15 = vpop.f32.mrf.mxu1 }
 0x19c   : > { %v1840_v1 = vadd.f32 %v13355_v0, %v1285_v6  ;;  %v1967_v11 = vmax.f32 %v1839_v30, 0.0 }
 0x19d   : > { %v1289_v10 = vpop.f32.mrf.mxu0  ;;  %v13735_v27 = vpop.f32.mrf.mxu1 }
 0x19e   : > { %16860 = vst [vmem:[#allocation33_spill] sm:$0xff] %v13735_v27  ;;  %v1968_v47 = vmax.f32 %v1840_v1, 0.0  ;;  %v2051_v33 = vpack.c.bf16 %v1967_v11, %v1965_v48  ;;  %v1841_v54 = vadd.f32 %v13351_v61, %v1289_v10  ;;  %v12171_v10 = vld [vmem:[%s16815_s4 + $0x2e0] ss:$8 sps:$4 sm:$0xff]  }
 0x19f   : > { %v1291_v25 = vpop.f32.mrf.mxu0  ;;  %v13737_v51 = vpop.f32.mrf.mxu1 }
 0x1a0   : > { %v2052_v19 = vpack.c.bf16 %v1968_v47, %v1966_v24  ;;  %v1842_v2 = vadd.f32 %v13355_v0, %v1291_v25  ;;  %v1969_v48 = vmax.f32 %v1841_v54, 0.0 }
 0x1a1   : > { %v1293_v20 = vpop.f32.mrf.mxu0  ;;  %v13739_v62 = vpop.f32.mrf.mxu1 }
 0x1a2   : > { %16861 = vst [vmem:[#allocation34_spill] sm:$0xff] %v13739_v62  ;;  %v1843_v6 = vadd.f32 %v13351_v61, %v1293_v20  ;;  %2519 = vmatprep.mubr.bf16.mxu0 %v2052_v19  ;;  %v1970_v11 = vmax.f32 %v1842_v2, 0.0  ;;  %v12173_v19 = vld [vmem:[%s16815_s4 + $0x2e4] ss:$8 sps:$4 sm:$0xff]  }
 0x1a3   : > { %v1295_v30 = vpop.f32.mrf.mxu0  ;;  %2520 = vmatmul.mubr.bf16.gmra.mxu0 %v2051_v33  ;;  %v13744_v36 = vpop.f32.mrf.mxu1  ;;  %3797 = vmatprep.subr.bf16.mxu0 %v12173_v19 }
 0x1a4   : > { %16862 = vst [vmem:[#allocation35_spill] sm:$0xff] %v13744_v36  ;;  %v1844_v1 = vadd.f32 %v13355_v0, %v1295_v30  ;;  %v1971_v45 = vmax.f32 %v1843_v6, 0.0  ;;  %3798 = vmatpush2.bf16.msra.mxu0 %v12171_v10  ;;  %v2105_v10 = vld [vmem:[%s16816_s5] sm:$0x3] }
 0x1a5   : > { %v1299_v27 = vpop.f32.mrf.mxu0  ;;  %v13747_v47 = vpop.f32.mrf.mxu1 }
 0x1a6   : > { %16863 = vst [vmem:[#allocation36_spill] sm:$0xff] %v13747_v47  ;;  %v1972_v24 = vmax.f32 %v1844_v1, 0.0  ;;  %v2053_v33 = vpack.c.bf16 %v1971_v45, %v1969_v48  ;;  %v1845_v1 = vadd.f32 %v13351_v61, %v1299_v27 }
 0x1a7   : > { %v1301_v62 = vpop.f32.mrf.mxu0  ;;  %v13749_v25 = vpop.f32.mrf.mxu1 }
 0x1a8   : > { %16864 = vst [vmem:[#allocation37_spill] sm:$0xff] %v13749_v25  ;;  %v2054_v20 = vpack.c.bf16 %v1972_v24, %v1970_v11  ;;  %v1846_v2 = vadd.f32 %v13355_v0, %v1301_v62  ;;  %v1973_v36 = vmax.f32 %v1845_v1, 0.0 }
 0x1a9   : > { %v1303_v6 = vpop.f32.mrf.mxu0  ;;  %v13757_v30 = vpop.f32.mrf.mxu1 }
 0x1aa   : > { %16865 = vst [vmem:[#allocation38_spill] sm:$0xff] %v13757_v30  ;;  %v1847_v54 = vadd.f32 %v13351_v61, %v1303_v6  ;;  %2529 = vmatprep.mubr.bf16.mxu0 %v2054_v20  ;;  %v1974_v48 = vmax.f32 %v1846_v2, 0.0  ;;  %v13797_v2 = vrot.slane %v2105_v10, %v13337_v56 }
 0x1ab   : > { %v1305_v11 = vpop.f32.mrf.mxu0  ;;  %2530 = vmatmul.mubr.bf16.gmra.mxu0 %v2053_v33  ;;  %v13762_v24 = vpop.f32.mrf.mxu1 }
 0x1ac   : > { %v1848_v47 = vadd.f32 %v13355_v0, %v1305_v11  ;;  %v1975_v25 = vmax.f32 %v1847_v54, 0.0 }
 0x1ad   : > { %v13765_v45 = vpop.f32.mrf.mxu1 }
 0x1ae   : > { %v1976_v30 = vmax.f32 %v1848_v47, 0.0  ;;  %v2055_v20 = vpack.c.bf16 %v1975_v25, %v1973_v36  ;;  %v12174_v47 = vld [vmem:[%s16815_s4 + $0x2d0] ss:$8 sps:$4 sm:$0xff]   ;;  %v12176_v36 = vld [vmem:[%s16815_s4 + $0x2d4] ss:$8 sps:$4 sm:$0xff]  }
 0x1af   : > { %v13767_v62 = vpop.f32.mrf.mxu1  ;;  %3799 = vmatprep.subr.bf16.mxu0 %v12176_v36 }
 0x1b0   : > { %v2056_v6 = vpack.c.bf16 %v1976_v30, %v1974_v48  ;;  %v13794_v30 = vrot.slane %v2105_v10, %v13342_v58  ;;  %3800 = vmatpush2.bf16.msra.mxu0 %v12174_v47 }
 0x1b1   : > { %v13769_v19 = vpop.f32.mrf.mxu1 }
 0x1b2   : > { %2539 = vmatprep.mubr.bf16.mxu0 %v2056_v6 }
 0x1b3   : > { %2540 = vmatmul.mubr.bf16.gmra.mxu0 %v2055_v20  ;;  %v13771_v61 = vpop.f32.mrf.mxu1 }
 0x1b4   : > { %16866 = vst [vmem:[#allocation39_spill] sm:$0xff] %v13771_v61  ;;  %2549 = vmatprep.mubr.bf16.mxu0 %v13372_v35 }
 0x1b5   : > { %v13774_v0 = vpop.f32.mrf.mxu1 }
 0x1b6   : > { %16867 = vst [vmem:[#allocation40_spill] sm:$0xff] %v13774_v0 }
 0x1b7   : > { %v13776_v27 = vpop.f32.mrf.mxu1 }
 0x1b8   : > { %16868 = vst [vmem:[#allocation41_spill] sm:$0xff] %v13776_v27 }
 0x1b9   : > { %v13784_v25 = vpop.f32.mrf.mxu1 }
 0x1ba   : > { %16869 = vst [vmem:[#allocation42_spill] sm:$0xff] %v13784_v25 }
 0x1bb   : > { %v2311_v35 = vpop.f32.mrf.mxu0  ;;  %2550 = vmatmul.mubr.bf16.gmra.mxu0 %v13367_v18  ;;  %v13790_v33 = vpop.f32.mrf.mxu1 }
 0x1bc   : > { %16870 = vst [vmem:[#allocation43_spill] sm:$0xff] %v13790_v33  ;;  %2559 = vmatprep.mubr.bf16.mxu0 %v13392_v42  ;;  %v2312_v20 = vadd.f32 %v2311_v35, %v13797_v2 }
 0x1bd   : > { %v2313_v54 = vpop.f32.mrf.mxu0  ;;  %v13799_v1 = vpop.f32.mrf.mxu1 }
 0x1be   : > { %16871 = vst [vmem:[#allocation44_spill] sm:$0xff] %v13799_v1  ;;  %v2314_v6 = vadd.f32 %v2313_v54, %v13794_v30  ;;  %v2630_v54 = vmax.f32 %v2312_v20, 0.0 }
 0x1bf   : > { %v2315_v11 = vpop.f32.mrf.mxu0  ;;  %v13801_v48 = vpop.f32.mrf.mxu1 }
 0x1c0   : > { %16872 = vst [vmem:[#allocation45_spill] sm:$0xff] %v13801_v48  ;;  %v2316_v18 = vadd.f32 %v2315_v11, %v13797_v2  ;;  %v2631_v1 = vmax.f32 %v2314_v6, 0.0 }
 0x1c1   : > { %v2317_v42 = vpop.f32.mrf.mxu0  ;;  %v13806_v36 = vpop.f32.mrf.mxu1 }
 0x1c2   : > { %16873 = vst [vmem:[#allocation46_spill] sm:$0xff] %v13806_v36  ;;  %v2318_v47 = vadd.f32 %v2317_v42, %v13794_v30  ;;  %v2632_v33 = vmax.f32 %v2316_v18, 0.0 }
 0x1c3   : > { %v2321_v10 = vpop.f32.mrf.mxu0  ;;  %2560 = vmatmul.mubr.bf16.gmra.mxu0 %v13387_v63  ;;  %v13810_v0 = vpop.f32.mrf.mxu1  ;;  %v12177_v63 = vld [vmem:[%s16815_s4 + $0x2c0] ss:$8 sps:$4 sm:$0xff]  }
 0x1c4   : > { %v2633_v25 = vmax.f32 %v2318_v47, 0.0  ;;  %2569 = vmatprep.mubr.bf16.mxu0 %v13406_v41  ;;  %v2758_v27 = vpack.c.bf16 %v2632_v33, %v2630_v54  ;;  %v12179_v41 = vld [vmem:[%s16815_s4 + $0x2c4] ss:$8 sps:$4 sm:$0xff]   ;;  %v2322_v6 = vadd.f32 %v2321_v10, %v13797_v2 }
 0x1c5   : > { %v2323_v48 = vpop.f32.mrf.mxu0  ;;  %v13813_v11 = vpop.f32.mrf.mxu1  ;;  %3801 = vmatprep.subr.bf16.mxu0 %v12179_v41 }
 0x1c6   : > { %16874 = vst [vmem:[#allocation47_spill] sm:$0xff] %v13813_v11  ;;  %v2759_v35 = vpack.c.bf16 %v2633_v25, %v2631_v1  ;;  %v2324_v18 = vadd.f32 %v2323_v48, %v13794_v30  ;;  %3802 = vmatpush2.bf16.msra.mxu0 %v12177_v63 }
 0x1c7   : > { %v2325_v61 = vpop.f32.mrf.mxu0  ;;  %v13815_v36 = vpop.f32.mrf.mxu1 }
 0x1c8   : > { %16875 = vst [vmem:[#allocation48_spill] sm:$0xff] %v13815_v36  ;;  %v2326_v42 = vadd.f32 %v2325_v61, %v13797_v2  ;;  %3060 = vmatprep.mubr.bf16.mxu1 %v2759_v35  ;;  %v2635_v47 = vmax.f32 %v2324_v18, 0.0  ;;  %v2634_v35 = vmax.f32 %v2322_v6, 0.0 }
 0x1c9   : > { %v2327_v25 = vpop.f32.mrf.mxu0  ;;  %3061 = vmatmul.mubr.bf16.vlgmr.msra.gmra.mxu1 %v2758_v27  ;;  %v13826_v33 = vpop.f32.mrf.mxu1 }
 0x1ca   : > { %16876 = vst [vmem:[#allocation49_spill] sm:$0xff] %v13826_v33  ;;  %v2328_v1 = vadd.f32 %v2327_v25, %v13794_v30  ;;  %v2636_v48 = vmax.f32 %v2326_v42, 0.0 }
 0x1cb   : > { %v2331_v61 = vpop.f32.mrf.mxu0  ;;  %2570 = vmatmul.mubr.bf16.gmra.mxu0 %v13401_v26  ;;  %v13830_v20 = vpop.f32.mrf.mxu1 }
 0x1cc   : > { %16877 = vst [vmem:[#allocation50_spill] sm:$0xff] %v13830_v20  ;;  %v2637_v54 = vmax.f32 %v2328_v1, 0.0  ;;  %2579 = vmatprep.mubr.bf16.mxu0 %v13426_v46  ;;  %v2760_v33 = vpack.c.bf16 %v2636_v48, %v2634_v35  ;;  %v2332_v18 = vadd.f32 %v2331_v61, %v13797_v2 }
 0x1cd   : > { %v2333_v10 = vpop.f32.mrf.mxu0  ;;  %v13833_v11 = vpop.f32.mrf.mxu1 }
 0x1ce   : > { %16878 = vst [vmem:[#allocation51_spill] sm:$0xff] %v13833_v11  ;;  %v2761_v27 = vpack.c.bf16 %v2637_v54, %v2635_v47  ;;  %v2334_v42 = vadd.f32 %v2333_v10, %v13794_v30  ;;  %v2638_v54 = vmax.f32 %v2332_v18, 0.0 }
 0x1cf   : > { %v2335_v36 = vpop.f32.mrf.mxu0  ;;  %v13835_v25 = vpop.f32.mrf.mxu1 }
 0x1d0   : > { %16879 = vst [vmem:[#allocation52_spill] sm:$0xff] %v13835_v25  ;;  %v2336_v26 = vadd.f32 %v2335_v36, %v13797_v2  ;;  %3070 = vmatprep.mubr.bf16.mxu1 %v2761_v27  ;;  %v2639_v48 = vmax.f32 %v2334_v42, 0.0 }
 0x1d1   : > { %v2337_v41 = vpop.f32.mrf.mxu0  ;;  %3071 = vmatmul.mubr.bf16.gmra.mxu1 %v2760_v33  ;;  %v13842_v1 = vpop.f32.mrf.mxu1 }
 0x1d2   : > { %v2338_v46 = vadd.f32 %v2337_v41, %v13794_v30  ;;  %v2640_v63 = vmax.f32 %v2336_v26, 0.0  ;;  %16880 = vst [vmem:[#allocation53_spill] sm:$0xff] %v13842_v1 }
 0x1d3   : > { %v2341_v6 = vpop.f32.mrf.mxu0  ;;  %2580 = vmatmul.mubr.bf16.gmra.mxu0 %v13421_v7  ;;  %v13845_v61 = vpop.f32.mrf.mxu1  ;;  %v12180_v7 = vld [vmem:[%s16815_s4 + $0x2b0] ss:$8 sps:$4 sm:$0xff]  }
 0x1d4   : > { %v2641_v47 = vmax.f32 %v2338_v46, 0.0  ;;  %2589 = vmatprep.mubr.bf16.mxu0 %v13446_v55  ;;  %v2762_v10 = vpack.c.bf16 %v2640_v63, %v2638_v54  ;;  %16881 = vst [vmem:[#allocation54_spill] sm:$0xff] %v13845_v61  ;;  %v12182_v55 = vld [vmem:[%s16815_s4 + $0x2b4] ss:$8 sps:$4 sm:$0xff]   ;;  %v2342_v42 = vadd.f32 %v2341_v6, %v13797_v2 }
 0x1d5   : > { %v2343_v35 = vpop.f32.mrf.mxu0  ;;  %3803 = vmatprep.subr.bf16.mxu0 %v12182_v55 }
 0x1d6   : > { %v2763_v36 = vpack.c.bf16 %v2641_v47, %v2639_v48  ;;  %v2344_v33 = vadd.f32 %v2343_v35, %v13794_v30  ;;  %v13858_v48 = vpop.f32.mrf.mxu1  ;;  %3804 = vmatpush2.bf16.msra.mxu0 %v12180_v7  ;;  %v2642_v35 = vmax.f32 %v2342_v42, 0.0 }
 0x1d7   : > { %v2345_v27 = vpop.f32.mrf.mxu0  ;;  %16882 = vst [vmem:[#allocation55_spill] sm:$0xff] %v13858_v48 }
 0x1d8   : > { %v2346_v26 = vadd.f32 %v2345_v27, %v13797_v2  ;;  %3080 = vmatprep.mubr.bf16.mxu1 %v2763_v36  ;;  %v2643_v47 = vmax.f32 %v2344_v33, 0.0 }
 0x1d9   : > { %v2347_v18 = vpop.f32.mrf.mxu0  ;;  %3081 = vmatmul.mubr.bf16.gmra.mxu1 %v2762_v10  ;;  %v13861_v10 = vpop.f32.mrf.mxu1 }
 0x1da   : > { %v2348_v41 = vadd.f32 %v2347_v18, %v13794_v30  ;;  %v2644_v46 = vmax.f32 %v2346_v26, 0.0  ;;  %16883 = vst [vmem:[#allocation56_spill] sm:$0xff] %v13861_v10 }
 0x1db   : > { %v2351_v63 = vpop.f32.mrf.mxu0  ;;  %2590 = vmatmul.mubr.bf16.gmra.mxu0 %v13435_v37  ;;  %v13868_v42 = vpop.f32.mrf.mxu1 }
 0x1dc   : > { %v2645_v54 = vmax.f32 %v2348_v41, 0.0  ;;  %2599 = vmatprep.mubr.bf16.mxu0 %v13466_v50  ;;  %v2764_v6 = vpack.c.bf16 %v2644_v46, %v2642_v35  ;;  %v2352_v37 = vadd.f32 %v2351_v63, %v13797_v2  ;;  %16884 = vst [vmem:[#allocation57_spill] sm:$0xff] %v13868_v42  ;;  %v12183_v63 = vld [vmem:[%s16817_s6 + $0x70] ss:$8 sps:$4 sm:$0xff]   ;;  %v12185_v35 = vld [vmem:[%s16817_s6 + $0x74] ss:$8 sps:$4 sm:$0xff]  }
 0x1dd   : > { %v2353_v36 = vpop.f32.mrf.mxu0  ;;  %4516 = vmatprep.subr.bf16.mxu1 %v12185_v35 }
 0x1de   : > { %v2765_v27 = vpack.c.bf16 %v2645_v54, %v2643_v47  ;;  %v2354_v55 = vadd.f32 %v2353_v36, %v13794_v30  ;;  %v2646_v47 = vmax.f32 %v2352_v37, 0.0  ;;  %4517 = vmatpush1.bf16.msra.mxu1 %v12183_v63 }
 0x1df   : > { %v2355_v61 = vpop.f32.mrf.mxu0 }
 0x1e0   : > { %v2356_v26 = vadd.f32 %v2355_v61, %v13797_v2  ;;  %3090 = vmatprep.mubr.bf16.mxu1 %v2765_v27  ;;  %v2647_v41 = vmax.f32 %v2354_v55, 0.0 }
 0x1e1   : > { %v2357_v18 = vpop.f32.mrf.mxu0  ;;  %3091 = vmatmul.mubr.bf16.gmra.mxu1 %v2764_v6 }
 0x1e2   : > { %v2358_v33 = vadd.f32 %v2357_v18, %v13794_v30  ;;  %v2648_v50 = vmax.f32 %v2356_v26, 0.0  ;;  %v12188_v26 = vld [vmem:[%s16815_s4 + $0x2a4] ss:$8 sps:$4 sm:$0xff]  }
 0x1e3   : > { %v2361_v7 = vpop.f32.mrf.mxu0  ;;  %2600 = vmatmul.mubr.bf16.gmra.mxu0 %v13461_v17  ;;  %v13877_v17 = vpop.f32.mrf.mxu1  ;;  %3805 = vmatprep.subr.bf16.mxu0 %v12188_v26 }
 0x1e4   : > { %v2649_v46 = vmax.f32 %v2358_v33, 0.0  ;;  %2609 = vmatprep.mubr.bf16.mxu0 %v13486_v9  ;;  %v2766_v36 = vpack.c.bf16 %v2648_v50, %v2646_v47  ;;  %16885 = vst [vmem:[#allocation58_spill] sm:$0xff] %v13877_v17  ;;  %v12186_v9 = vld [vmem:[%s16815_s4 + $0x2a0] ss:$8 sps:$4 sm:$0xff]   ;;  %v2362_v37 = vadd.f32 %v2361_v7, %v13797_v2 }
 0x1e5   : > { %v2363_v54 = vpop.f32.mrf.mxu0  ;;  %3806 = vmatpush2.bf16.msra.mxu0 %v12186_v9 }
 0x1e6   : > { %v2767_v61 = vpack.c.bf16 %v2649_v46, %v2647_v41  ;;  %v2364_v6 = vadd.f32 %v2363_v54, %v13794_v30  ;;  %v13890_v46 = vpop.f32.mrf.mxu1 }
 0x1e7   : > { %v2365_v27 = vpop.f32.mrf.mxu0  ;;  %16886 = vst [vmem:[#allocation59_spill] sm:$0xff] %v13890_v46 }
 0x1e8   : > { %v2366_v55 = vadd.f32 %v2365_v27, %v13797_v2  ;;  %3100 = vmatprep.mubr.bf16.mxu1 %v2767_v61  ;;  %v2651_v47 = vmax.f32 %v2364_v6, 0.0  ;;  %v2650_v61 = vmax.f32 %v2362_v37, 0.0  ;;  %v13893_v17 = vpop.f32.mrf.mxu1 }
 0x1e9   : > { %v2367_v18 = vpop.f32.mrf.mxu0  ;;  %3101 = vmatmul.mubr.bf16.gmra.mxu1 %v2766_v36  ;;  %16887 = vst [vmem:[#allocation60_spill] sm:$0xff] %v13893_v17 }
 0x1ea   : > { %v2368_v33 = vadd.f32 %v2367_v18, %v13794_v30  ;;  %v2652_v50 = vmax.f32 %v2366_v55, 0.0  ;;  %v13900_v37 = vpop.f32.mrf.mxu1 }
 0x1eb   : > { %v2371_v41 = vpop.f32.mrf.mxu0  ;;  %2610 = vmatmul.mubr.bf16.gmra.mxu0 %v13475_v52  ;;  %16888 = vst [vmem:[#allocation61_spill] sm:$0xff] %v13900_v37 }
 0x1ec   : > { %v2653_v54 = vmax.f32 %v2368_v33, 0.0  ;;  %2619 = vmatprep.mubr.bf16.mxu0 %v13510_v44  ;;  %v2768_v27 = vpack.c.bf16 %v2652_v50, %v2650_v61  ;;  %v2372_v52 = vadd.f32 %v2371_v41, %v13797_v2  ;;  %v12189_v61 = vld [vmem:[%s16817_s6 + $0x60] ss:$8 sps:$4 sm:$0xff]   ;;  %v12191_v41 = vld [vmem:[%s16817_s6 + $0x64] ss:$8 sps:$4 sm:$0xff]  }
 0x1ed   : > { %v2373_v35 = vpop.f32.mrf.mxu0  ;;  %4518 = vmatprep.subr.bf16.mxu1 %v12191_v41 }
 0x1ee   : > { %v2769_v7 = vpack.c.bf16 %v2653_v54, %v2651_v47  ;;  %v2374_v63 = vadd.f32 %v2373_v35, %v13794_v30  ;;  %v2654_v50 = vmax.f32 %v2372_v52, 0.0  ;;  %4519 = vmatpush1.bf16.msra.mxu1 %v12189_v61 }
 0x1ef   : > { %v2375_v36 = vpop.f32.mrf.mxu0 }
 0x1f0   : > { %v2376_v55 = vadd.f32 %v2375_v36, %v13797_v2  ;;  %3110 = vmatprep.mubr.bf16.mxu1 %v2769_v7  ;;  %v2655_v18 = vmax.f32 %v2374_v63, 0.0  ;;  %v12192_v63 = vld [vmem:[%s16815_s4 + $0x290] ss:$8 sps:$4 sm:$0xff]  }
 0x1f1   : > { %v2377_v26 = vpop.f32.mrf.mxu0  ;;  %3111 = vmatmul.mubr.bf16.gmra.mxu1 %v2768_v27  ;;  %v13908_v27 = vpop.f32.mrf.mxu1 }
 0x1f2   : > { %v2378_v6 = vadd.f32 %v2377_v26, %v13794_v30  ;;  %v2656_v44 = vmax.f32 %v2376_v55, 0.0  ;;  %16889 = vst [vmem:[#allocation62_spill] sm:$0xff] %v13908_v27  ;;  %v12194_v55 = vld [vmem:[%s16815_s4 + $0x294] ss:$8 sps:$4 sm:$0xff]  }
 0x1f3   : > { %v2381_v9 = vpop.f32.mrf.mxu0  ;;  %2620 = vmatmul.mubr.bf16.gmra.mxu0 %v13503_v32  ;;  %3807 = vmatprep.subr.bf16.mxu0 %v12194_v55 }
 0x1f4   : > { %v2657_v33 = vmax.f32 %v2378_v6, 0.0  ;;  %v2770_v35 = vpack.c.bf16 %v2656_v44, %v2654_v50  ;;  %v2382_v52 = vadd.f32 %v2381_v9, %v13797_v2  ;;  %3808 = vmatpush2.bf16.msra.mxu0 %v12192_v63 }
 0x1f5   : > { %v2383_v47 = vpop.f32.mrf.mxu0 }
 0x1f6   : > { %v2771_v54 = vpack.c.bf16 %v2657_v33, %v2655_v18  ;;  %v2384_v32 = vadd.f32 %v2383_v47, %v13794_v30  ;;  %v13920_v33 = vpop.f32.mrf.mxu1 }
 0x1f7   : > { %v2385_v7 = vpop.f32.mrf.mxu0  ;;  %16890 = vst [vmem:[#allocation63_spill] sm:$0xff] %v13920_v33 }
 0x1f8   : > { %v2386_v36 = vadd.f32 %v2385_v7, %v13797_v2  ;;  %3120 = vmatprep.mubr.bf16.mxu1 %v2771_v54  ;;  %v2659_v50 = vmax.f32 %v2384_v32, 0.0  ;;  %v2658_v54 = vmax.f32 %v2382_v52, 0.0  ;;  %v13922_v37 = vpop.f32.mrf.mxu1 }
 0x1f9   : > { %v2387_v26 = vpop.f32.mrf.mxu0  ;;  %3121 = vmatmul.mubr.bf16.gmra.mxu1 %v2770_v35  ;;  %16891 = vst [vmem:[#allocation64_spill] sm:$0xff] %v13922_v37 }
 0x1fa   : > { %v2388_v6 = vadd.f32 %v2387_v26, %v13794_v30  ;;  %v2660_v44 = vmax.f32 %v2386_v36, 0.0  ;;  %v13928_v52 = vpop.f32.mrf.mxu1 }
 0x1fb   : > { %v2391_v18 = vpop.f32.mrf.mxu0  ;;  %16892 = vst [vmem:[#allocation65_spill] sm:$0xff] %v13928_v52 }
 0x1fc   : > { %v2661_v47 = vmax.f32 %v2388_v6, 0.0  ;;  %v2772_v27 = vpack.c.bf16 %v2660_v44, %v2658_v54  ;;  %v2392_v61 = vadd.f32 %v2391_v18, %v13797_v2  ;;  %v12197_v18 = vld [vmem:[%s16817_s6 + $0x54] ss:$8 sps:$4 sm:$0xff]  }
 0x1fd   : > { %v2393_v41 = vpop.f32.mrf.mxu0  ;;  %4520 = vmatprep.subr.bf16.mxu1 %v12197_v18 }
 0x1fe   : > { %v2773_v7 = vpack.c.bf16 %v2661_v47, %v2659_v50  ;;  %v2394_v9 = vadd.f32 %v2393_v41, %v13794_v30  ;;  %v2662_v44 = vmax.f32 %v2392_v61, 0.0  ;;  %v13936_v41 = vpop.f32.mrf.mxu1  ;;  %v12200_v61 = vld [vmem:[%s16815_s4 + $0x284] ss:$8 sps:$4 sm:$0xff]  }
 0x1ff   : > { %v2395_v46 = vpop.f32.mrf.mxu0  ;;  %16893 = vst [vmem:[#allocation66_spill] sm:$0xff] %v13936_v41  ;;  %3809 = vmatprep.subr.bf16.mxu0 %v12200_v61 }
 0x200   : > { %v2396_v35 = vadd.f32 %v2395_v46, %v13797_v2  ;;  %3130 = vmatprep.mubr.bf16.mxu1 %v2773_v7  ;;  %v2663_v26 = vmax.f32 %v2394_v9, 0.0  ;;  %v12195_v46 = vld [vmem:[%s16817_s6 + $0x50] ss:$8 sps:$4 sm:$0xff]  }
 0x201   : > { %v2397_v36 = vpop.f32.mrf.mxu0  ;;  %3131 = vmatmul.mubr.bf16.gmra.mxu1 %v2772_v27 }
 0x202   : > { %v2398_v63 = vadd.f32 %v2397_v36, %v13794_v30  ;;  %v2664_v32 = vmax.f32 %v2396_v35, 0.0  ;;  %v12198_v35 = vld [vmem:[%s16815_s4 + $0x280] ss:$8 sps:$4 sm:$0xff]   ;;  %4521 = vmatpush1.bf16.msra.mxu1 %v12195_v46 }
 0x203   : > { %v2401_v55 = vpop.f32.mrf.mxu0  ;;  %3810 = vmatpush2.bf16.msra.mxu0 %v12198_v35 }
 0x204   : > { %v2665_v6 = vmax.f32 %v2398_v63, 0.0  ;;  %v2774_v27 = vpack.c.bf16 %v2664_v32, %v2662_v44  ;;  %v2402_v36 = vadd.f32 %v2401_v55, %v13797_v2  ;;  %v13948_v44 = vpop.f32.mrf.mxu1 }
 0x205   : > { %v2403_v50 = vpop.f32.mrf.mxu0  ;;  %16894 = vst [vmem:[#allocation67_spill] sm:$0xff] %v13948_v44 }
 0x206   : > { %v2775_v47 = vpack.c.bf16 %v2665_v6, %v2663_v26  ;;  %v2404_v7 = vadd.f32 %v2403_v50, %v13794_v30  ;;  %v2666_v18 = vmax.f32 %v2402_v36, 0.0  ;;  %v13950_v37 = vpop.f32.mrf.mxu1 }
 0x207   : > { %v2405_v54 = vpop.f32.mrf.mxu0  ;;  %16895 = vst [vmem:[#allocation68_spill] sm:$0xff] %v13950_v37 }
 0x208   : > { %v2406_v9 = vadd.f32 %v2405_v54, %v13797_v2  ;;  %3140 = vmatprep.mubr.bf16.mxu1 %v2775_v47  ;;  %v2667_v50 = vmax.f32 %v2404_v7, 0.0  ;;  %v13956_v36 = vpop.f32.mrf.mxu1 }
 0x209   : > { %v2407_v63 = vpop.f32.mrf.mxu0  ;;  %3141 = vmatmul.mubr.bf16.gmra.mxu1 %v2774_v27  ;;  %16896 = vst [vmem:[#allocation69_spill] sm:$0xff] %v13956_v36 }
 0x20a   : > { %v2408_v32 = vadd.f32 %v2407_v63, %v13794_v30  ;;  %v2668_v26 = vmax.f32 %v2406_v9, 0.0 }
 0x20b   : > { %v2411_v6 = vpop.f32.mrf.mxu0 }
 0x20c   : > { %v2669_v47 = vmax.f32 %v2408_v32, 0.0  ;;  %v2776_v33 = vpack.c.bf16 %v2668_v26, %v2666_v18  ;;  %v2412_v46 = vadd.f32 %v2411_v6, %v13797_v2  ;;  %v13964_v18 = vpop.f32.mrf.mxu1 }
 0x20d   : > { %v2413_v54 = vpop.f32.mrf.mxu0  ;;  %16897 = vst [vmem:[#allocation70_spill] sm:$0xff] %v13964_v18 }
 0x20e   : > { %v2777_v41 = vpack.c.bf16 %v2669_v47, %v2667_v50  ;;  %v2414_v55 = vadd.f32 %v2413_v54, %v13794_v30  ;;  %v2670_v26 = vmax.f32 %v2412_v46, 0.0 }
 0x20f   : > { %v2415_v52 = vpop.f32.mrf.mxu0 }
 0x210   : > { %v2416_v27 = vadd.f32 %v2415_v52, %v13797_v2  ;;  %3150 = vmatprep.mubr.bf16.mxu1 %v2777_v41  ;;  %v2671_v63 = vmax.f32 %v2414_v55, 0.0  ;;  %v12201_v52 = vld [vmem:[%s16817_s6 + $0x40] ss:$8 sps:$4 sm:$0xff]   ;;  %v12203_v41 = vld [vmem:[%s16817_s6 + $0x44] ss:$8 sps:$4 sm:$0xff]  }
 0x211   : > { %v2417_v9 = vpop.f32.mrf.mxu0  ;;  %3151 = vmatmul.mubr.bf16.gmra.mxu1 %v2776_v33  ;;  %4522 = vmatprep.subr.bf16.mxu1 %v12203_v41 }
 0x212   : > { %v2418_v35 = vadd.f32 %v2417_v9, %v13794_v30  ;;  %v2672_v7 = vmax.f32 %v2416_v27, 0.0  ;;  %4523 = vmatpush1.bf16.msra.mxu1 %v12201_v52 }
 0x213   : > { %v2421_v61 = vpop.f32.mrf.mxu0 }
 0x214   : > { %v2673_v32 = vmax.f32 %v2418_v35, 0.0  ;;  %v2778_v33 = vpack.c.bf16 %v2672_v7, %v2670_v26  ;;  %v2422_v27 = vadd.f32 %v2421_v61, %v13797_v2 }
 0x215   : > { %v2423_v50 = vpop.f32.mrf.mxu0 }
 0x216   : > { %v2779_v47 = vpack.c.bf16 %v2673_v32, %v2671_v63  ;;  %v2424_v54 = vadd.f32 %v2423_v50, %v13794_v30  ;;  %v13970_v32 = vpop.f32.mrf.mxu1  ;;  %v2674_v18 = vmax.f32 %v2422_v27, 0.0 }
 0x217   : > { %v2425_v6 = vpop.f32.mrf.mxu0  ;;  %16898 = vst [vmem:[#allocation71_spill] sm:$0xff] %v13970_v32 }
 0x218   : > { %v2426_v55 = vadd.f32 %v2425_v6, %v13797_v2  ;;  %3160 = vmatprep.mubr.bf16.mxu1 %v2779_v47  ;;  %v2675_v7 = vmax.f32 %v2424_v54, 0.0  ;;  %v13972_v47 = vpop.f32.mrf.mxu1 }
 0x219   : > { %v2427_v46 = vpop.f32.mrf.mxu0  ;;  %3161 = vmatmul.mubr.bf16.gmra.mxu1 %v2778_v33  ;;  %16899 = vst [vmem:[#allocation72_spill] sm:$0xff] %v13972_v47 }
 0x21a   : > { %v2428_v9 = vadd.f32 %v2427_v46, %v13794_v30  ;;  %v2676_v35 = vmax.f32 %v2426_v55, 0.0  ;;  %v13978_v27 = vpop.f32.mrf.mxu1 }
 0x21b   : > { %v2431_v63 = vpop.f32.mrf.mxu0  ;;  %16900 = vst [vmem:[#allocation73_spill] sm:$0xff] %v13978_v27 }
 0x21c   : > { %v2677_v26 = vmax.f32 %v2428_v9, 0.0  ;;  %v2780_v36 = vpack.c.bf16 %v2676_v35, %v2674_v18  ;;  %v2432_v52 = vadd.f32 %v2431_v63, %v13797_v2  ;;  %v12206_v63 = vld [vmem:[%s16817_s6 + $0x34] ss:$8 sps:$4 sm:$0xff]  }
 0x21d   : > { %v2433_v44 = vpop.f32.mrf.mxu0  ;;  %4524 = vmatprep.subr.bf16.mxu1 %v12206_v63 }
 0x21e   : > { %v2781_v50 = vpack.c.bf16 %v2677_v26, %v2675_v7  ;;  %v2434_v61 = vadd.f32 %v2433_v44, %v13794_v30  ;;  %v2678_v35 = vmax.f32 %v2432_v52, 0.0  ;;  %v12204_v44 = vld [vmem:[%s16817_s6 + $0x30] ss:$8 sps:$4 sm:$0xff]  }
 0x21f   : > { %v2435_v6 = vpop.f32.mrf.mxu0  ;;  %4525 = vmatpush1.bf16.msra.mxu1 %v12204_v44 }
 0x220   : > { %v2436_v41 = vadd.f32 %v2435_v6, %v13797_v2  ;;  %3170 = vmatprep.mubr.bf16.mxu1 %v2781_v50  ;;  %v2679_v9 = vmax.f32 %v2434_v61, 0.0  ;;  %v13986_v6 = vpop.f32.mrf.mxu1 }
 0x221   : > { %v2437_v33 = vpop.f32.mrf.mxu0  ;;  %3171 = vmatmul.mubr.bf16.gmra.mxu1 %v2780_v36  ;;  %16901 = vst [vmem:[#allocation74_spill] sm:$0xff] %v13986_v6 }
 0x222   : > { %v2438_v55 = vadd.f32 %v2437_v33, %v13794_v30  ;;  %v2680_v54 = vmax.f32 %v2436_v41, 0.0  ;;  %v13992_v32 = vpop.f32.mrf.mxu1 }
 0x223   : > { %v2441_v46 = vpop.f32.mrf.mxu0  ;;  %16902 = vst [vmem:[#allocation75_spill] sm:$0xff] %v13992_v32 }
 0x224   : > { %v2681_v18 = vmax.f32 %v2438_v55, 0.0  ;;  %v2782_v36 = vpack.c.bf16 %v2680_v54, %v2678_v35  ;;  %v2442_v52 = vadd.f32 %v2441_v46, %v13797_v2 }
 0x225   : > { %v2443_v7 = vpop.f32.mrf.mxu0 }
 0x226   : > { %v2783_v26 = vpack.c.bf16 %v2681_v18, %v2679_v9  ;;  %v2444_v41 = vadd.f32 %v2443_v7, %v13794_v30  ;;  %v2682_v6 = vmax.f32 %v2442_v52, 0.0 }
 0x227   : > { %v2445_v50 = vpop.f32.mrf.mxu0 }
 0x228   : > { %v2446_v61 = vadd.f32 %v2445_v50, %v13797_v2  ;;  %3180 = vmatprep.mubr.bf16.mxu1 %v2783_v26  ;;  %v2683_v54 = vmax.f32 %v2444_v41, 0.0  ;;  %v13994_v26 = vpop.f32.mrf.mxu1 }
 0x229   : > { %v2447_v33 = vpop.f32.mrf.mxu0  ;;  %3181 = vmatmul.mubr.bf16.gmra.mxu1 %v2782_v36  ;;  %16903 = vst [vmem:[#allocation76_spill] sm:$0xff] %v13994_v26 }
 0x22a   : > { %v2448_v55 = vadd.f32 %v2447_v33, %v13794_v30  ;;  %v2684_v9 = vmax.f32 %v2446_v61, 0.0  ;;  %v14000_v52 = vpop.f32.mrf.mxu1 }
 0x22b   : > { %v2451_v18 = vpop.f32.mrf.mxu0  ;;  %16904 = vst [vmem:[#allocation77_spill] sm:$0xff] %v14000_v52 }
 0x22c   : > { %v2685_v35 = vmax.f32 %v2448_v55, 0.0  ;;  %v2784_v47 = vpack.c.bf16 %v2684_v9, %v2682_v6  ;;  %v2452_v44 = vadd.f32 %v2451_v18, %v13797_v2  ;;  %v12209_v18 = vld [vmem:[%s16817_s6 + $0x24] ss:$8 sps:$4 sm:$0xff]  }
 0x22d   : > { %v2453_v27 = vpop.f32.mrf.mxu0  ;;  %4526 = vmatprep.subr.bf16.mxu1 %v12209_v18 }
 0x22e   : > { %v2785_v7 = vpack.c.bf16 %v2685_v35, %v2683_v54  ;;  %v2454_v46 = vadd.f32 %v2453_v27, %v13794_v30  ;;  %v2686_v9 = vmax.f32 %v2452_v44, 0.0  ;;  %v12207_v27 = vld [vmem:[%s16817_s6 + $0x20] ss:$8 sps:$4 sm:$0xff]  }
 0x22f   : > { %v2455_v50 = vpop.f32.mrf.mxu0  ;;  %4527 = vmatpush1.bf16.msra.mxu1 %v12207_v27 }
 0x230   : > { %v2456_v63 = vadd.f32 %v2455_v50, %v13797_v2  ;;  %3190 = vmatprep.mubr.bf16.mxu1 %v2785_v7  ;;  %v2687_v55 = vmax.f32 %v2454_v46, 0.0  ;;  %v14008_v50 = vpop.f32.mrf.mxu1 }
 0x231   : > { %v2457_v36 = vpop.f32.mrf.mxu0  ;;  %3191 = vmatmul.mubr.bf16.gmra.mxu1 %v2784_v47  ;;  %16905 = vst [vmem:[#allocation78_spill] sm:$0xff] %v14008_v50 }
 0x232   : > { %v2458_v61 = vadd.f32 %v2457_v36, %v13794_v30  ;;  %v2688_v41 = vmax.f32 %v2456_v63, 0.0  ;;  %v14014_v32 = vpop.f32.mrf.mxu1 }
 0x233   : > { %v2461_v33 = vpop.f32.mrf.mxu0  ;;  %16906 = vst [vmem:[#allocation79_spill] sm:$0xff] %v14014_v32 }
 0x234   : > { %v2689_v6 = vmax.f32 %v2458_v61, 0.0  ;;  %v2786_v47 = vpack.c.bf16 %v2688_v41, %v2686_v9  ;;  %v2462_v44 = vadd.f32 %v2461_v33, %v13797_v2 }
 0x235   : > { %v2463_v54 = vpop.f32.mrf.mxu0 }
 0x236   : > { %v2787_v35 = vpack.c.bf16 %v2689_v6, %v2687_v55  ;;  %v2464_v63 = vadd.f32 %v2463_v54, %v13794_v30  ;;  %v2690_v50 = vmax.f32 %v2462_v44, 0.0 }
 0x237   : > { %v2465_v7 = vpop.f32.mrf.mxu0 }
 0x238   : > { %v2466_v46 = vadd.f32 %v2465_v7, %v13797_v2  ;;  %3200 = vmatprep.mubr.bf16.mxu1 %v2787_v35  ;;  %v2691_v41 = vmax.f32 %v2464_v63, 0.0  ;;  %v14016_v35 = vpop.f32.mrf.mxu1 }
 0x239   : > { %v2467_v36 = vpop.f32.mrf.mxu0  ;;  %3201 = vmatmul.mubr.bf16.gmra.mxu1 %v2786_v47  ;;  %16907 = vst [vmem:[#allocation80_spill] sm:$0xff] %v14016_v35 }
 0x23a   : > { %v2468_v61 = vadd.f32 %v2467_v36, %v13794_v30  ;;  %v2692_v55 = vmax.f32 %v2466_v46, 0.0  ;;  %v14022_v44 = vpop.f32.mrf.mxu1 }
 0x23b   : > { %v2471_v6 = vpop.f32.mrf.mxu0  ;;  %16908 = vst [vmem:[#allocation81_spill] sm:$0xff] %v14022_v44 }
 0x23c   : > { %v2693_v9 = vmax.f32 %v2468_v61, 0.0  ;;  %v2788_v52 = vpack.c.bf16 %v2692_v55, %v2690_v50  ;;  %v2472_v27 = vadd.f32 %v2471_v6, %v13797_v2  ;;  %v12212_v6 = vld [vmem:[%s16817_s6 + $0x14] ss:$8 sps:$4 sm:$0xff]  }
 0x23d   : > { %v2473_v26 = vpop.f32.mrf.mxu0  ;;  %4528 = vmatprep.subr.bf16.mxu1 %v12212_v6 }
 0x23e   : > { %v2789_v54 = vpack.c.bf16 %v2693_v9, %v2691_v41  ;;  %v2474_v33 = vadd.f32 %v2473_v26, %v13794_v30  ;;  %v2694_v55 = vmax.f32 %v2472_v27, 0.0  ;;  %v12210_v26 = vld [vmem:[%s16817_s6 + $0x10] ss:$8 sps:$4 sm:$0xff]  }
 0x23f   : > { %v2475_v7 = vpop.f32.mrf.mxu0  ;;  %4529 = vmatpush1.bf16.msra.mxu1 %v12210_v26 }
 0x240   : > { %v2476_v18 = vadd.f32 %v2475_v7, %v13797_v2  ;;  %3210 = vmatprep.mubr.bf16.mxu1 %v2789_v54  ;;  %v2695_v61 = vmax.f32 %v2474_v33, 0.0  ;;  %v14030_v7 = vpop.f32.mrf.mxu1 }
 0x241   : > { %v2477_v47 = vpop.f32.mrf.mxu0  ;;  %3211 = vmatmul.mubr.bf16.gmra.mxu1 %v2788_v52  ;;  %16909 = vst [vmem:[#allocation82_spill] sm:$0xff] %v14030_v7 }
 0x242   : > { %v2478_v46 = vadd.f32 %v2477_v47, %v13794_v30  ;;  %v2696_v63 = vmax.f32 %v2476_v18, 0.0  ;;  %v14036_v32 = vpop.f32.mrf.mxu1 }
 0x243   : > { %v2481_v36 = vpop.f32.mrf.mxu0  ;;  %16910 = vst [vmem:[#allocation83_spill] sm:$0xff] %v14036_v32 }
 0x244   : > { %v2697_v50 = vmax.f32 %v2478_v46, 0.0  ;;  %v2790_v52 = vpack.c.bf16 %v2696_v63, %v2694_v55  ;;  %v2482_v27 = vadd.f32 %v2481_v36, %v13797_v2 }
 0x245   : > { %v2483_v41 = vpop.f32.mrf.mxu0 }
 0x246   : > { %v2791_v9 = vpack.c.bf16 %v2697_v50, %v2695_v61  ;;  %v2484_v18 = vadd.f32 %v2483_v41, %v13794_v30  ;;  %v2698_v7 = vmax.f32 %v2482_v27, 0.0 }
 0x247   : > { %v2485_v54 = vpop.f32.mrf.mxu0 }
 0x248   : > { %v2486_v33 = vadd.f32 %v2485_v54, %v13797_v2  ;;  %3220 = vmatprep.mubr.bf16.mxu1 %v2791_v9  ;;  %v2699_v63 = vmax.f32 %v2484_v18, 0.0  ;;  %v14038_v9 = vpop.f32.mrf.mxu1 }
 0x249   : > { %v2487_v47 = vpop.f32.mrf.mxu0  ;;  %3221 = vmatmul.mubr.bf16.gmra.mxu1 %v2790_v52  ;;  %16911 = vst [vmem:[#allocation84_spill] sm:$0xff] %v14038_v9 }
 0x24a   : > { %v2488_v46 = vadd.f32 %v2487_v47, %v13794_v30  ;;  %v2700_v61 = vmax.f32 %v2486_v33, 0.0  ;;  %v14044_v27 = vpop.f32.mrf.mxu1 }
 0x24b   : > { %v2491_v50 = vpop.f32.mrf.mxu0  ;;  %16912 = vst [vmem:[#allocation85_spill] sm:$0xff] %v14044_v27 }
 0x24c   : > { %v2701_v55 = vmax.f32 %v2488_v46, 0.0  ;;  %v2792_v44 = vpack.c.bf16 %v2700_v61, %v2698_v7  ;;  %v2492_v26 = vadd.f32 %v2491_v50, %v13797_v2  ;;  %v12215_v50 = vld [vmem:[%s16817_s6 + $0x4] ss:$8 sps:$4 sm:$0xff]  }
 0x24d   : > { %v2493_v35 = vpop.f32.mrf.mxu0  ;;  %4530 = vmatprep.subr.bf16.mxu1 %v12215_v50 }
 0x24e   : > { %v2793_v41 = vpack.c.bf16 %v2701_v55, %v2699_v63  ;;  %v2494_v36 = vadd.f32 %v2493_v35, %v13794_v30  ;;  %v2702_v61 = vmax.f32 %v2492_v26, 0.0  ;;  %v12213_v35 = vld [vmem:[%s16817_s6] ss:$8 sps:$4 sm:$0xff]  }
 0x24f   : > { %v2495_v54 = vpop.f32.mrf.mxu0  ;;  %4531 = vmatpush1.bf16.msra.mxu1 %v12213_v35 }
 0x250   : > { %v2496_v6 = vadd.f32 %v2495_v54, %v13797_v2  ;;  %3230 = vmatprep.mubr.bf16.mxu1 %v2793_v41  ;;  %v2703_v46 = vmax.f32 %v2494_v36, 0.0  ;;  %v14052_v54 = vpop.f32.mrf.mxu1 }
 0x251   : > { %v2497_v52 = vpop.f32.mrf.mxu0  ;;  %3231 = vmatmul.mubr.bf16.gmra.mxu1 %v2792_v44  ;;  %16913 = vst [vmem:[#allocation86_spill] sm:$0xff] %v14052_v54 }
 0x252   : > { %v2498_v33 = vadd.f32 %v2497_v52, %v13794_v30  ;;  %v2704_v18 = vmax.f32 %v2496_v6, 0.0  ;;  %v14058_v32 = vpop.f32.mrf.mxu1 }
 0x253   : > { %v2501_v47 = vpop.f32.mrf.mxu0  ;;  %16914 = vst [vmem:[#allocation87_spill] sm:$0xff] %v14058_v32 }
 0x254   : > { %v2705_v7 = vmax.f32 %v2498_v33, 0.0  ;;  %v2794_v44 = vpack.c.bf16 %v2704_v18, %v2702_v61  ;;  %v2502_v26 = vadd.f32 %v2501_v47, %v13797_v2 }
 0x255   : > { %v2503_v63 = vpop.f32.mrf.mxu0 }
 0x256   : > { %v2795_v55 = vpack.c.bf16 %v2705_v7, %v2703_v46  ;;  %v2504_v6 = vadd.f32 %v2503_v63, %v13794_v30  ;;  %v2706_v54 = vmax.f32 %v2502_v26, 0.0 }
 0x257   : > { %v2505_v41 = vpop.f32.mrf.mxu0 }
 0x258   : > { %v2506_v36 = vadd.f32 %v2505_v41, %v13797_v2  ;;  %3240 = vmatprep.mubr.bf16.mxu1 %v2795_v55  ;;  %v2707_v18 = vmax.f32 %v2504_v6, 0.0  ;;  %v14060_v55 = vpop.f32.mrf.mxu1 }
 0x259   : > { %v2507_v52 = vpop.f32.mrf.mxu0  ;;  %3241 = vmatmul.mubr.bf16.gmra.mxu1 %v2794_v44  ;;  %16915 = vst [vmem:[#allocation88_spill] sm:$0xff] %v14060_v55 }
 0x25a   : > { %v2508_v33 = vadd.f32 %v2507_v52, %v13794_v30  ;;  %v2708_v46 = vmax.f32 %v2506_v36, 0.0  ;;  %v14066_v26 = vpop.f32.mrf.mxu1 }
 0x25b   : > { %v2511_v7 = vpop.f32.mrf.mxu0  ;;  %16916 = vst [vmem:[#allocation89_spill] sm:$0xff] %v14066_v26 }
 0x25c   : > { %v2709_v61 = vmax.f32 %v2508_v33, 0.0  ;;  %v2796_v27 = vpack.c.bf16 %v2708_v46, %v2706_v54  ;;  %v2512_v35 = vadd.f32 %v2511_v7, %v13797_v2  ;;  %v12218_v7 = vld [vmem:[%s16817_s6 + $0xf4] ss:$8 sps:$4 sm:$0xff]  }
 0x25d   : > { %v2513_v9 = vpop.f32.mrf.mxu0  ;;  %4532 = vmatprep.subr.bf16.mxu1 %v12218_v7 }
 0x25e   : > { %v2797_v63 = vpack.c.bf16 %v2709_v61, %v2707_v18  ;;  %v2514_v47 = vadd.f32 %v2513_v9, %v13794_v30  ;;  %v2710_v46 = vmax.f32 %v2512_v35, 0.0  ;;  %v12216_v9 = vld [vmem:[%s16817_s6 + $0xf0] ss:$8 sps:$4 sm:$0xff]  }
 0x25f   : > { %v2515_v41 = vpop.f32.mrf.mxu0  ;;  %4533 = vmatpush2.bf16.msra.mxu1 %v12216_v9 }
 0x260   : > { %v2516_v50 = vadd.f32 %v2515_v41, %v13797_v2  ;;  %3250 = vmatprep.mubr.bf16.mxu1 %v2797_v63  ;;  %v2711_v33 = vmax.f32 %v2514_v47, 0.0  ;;  %v14074_v41 = vpop.f32.mrf.mxu1 }
 0x261   : > { %v2517_v44 = vpop.f32.mrf.mxu0  ;;  %3251 = vmatmul.mubr.bf16.gmra.mxu1 %v2796_v27  ;;  %16917 = vst [vmem:[#allocation90_spill] sm:$0xff] %v14074_v41 }
 0x262   : > { %v2518_v36 = vadd.f32 %v2517_v44, %v13794_v30  ;;  %v2712_v6 = vmax.f32 %v2516_v50, 0.0  ;;  %v14080_v32 = vpop.f32.mrf.mxu1 }
 0x263   : > { %v2521_v52 = vpop.f32.mrf.mxu0  ;;  %16918 = vst [vmem:[#allocation91_spill] sm:$0xff] %v14080_v32 }
 0x264   : > { %v2713_v54 = vmax.f32 %v2518_v36, 0.0  ;;  %v2798_v27 = vpack.c.bf16 %v2712_v6, %v2710_v46  ;;  %v2522_v35 = vadd.f32 %v2521_v52, %v13797_v2 }
 0x265   : > { %v2523_v18 = vpop.f32.mrf.mxu0 }
 0x266   : > { %v2799_v61 = vpack.c.bf16 %v2713_v54, %v2711_v33  ;;  %v2524_v50 = vadd.f32 %v2523_v18, %v13794_v30  ;;  %v2714_v41 = vmax.f32 %v2522_v35, 0.0 }
 0x267   : > { %v2525_v63 = vpop.f32.mrf.mxu0 }
 0x268   : > { %v2526_v47 = vadd.f32 %v2525_v63, %v13797_v2  ;;  %3260 = vmatprep.mubr.bf16.mxu1 %v2799_v61  ;;  %v2715_v6 = vmax.f32 %v2524_v50, 0.0  ;;  %v14082_v61 = vpop.f32.mrf.mxu1 }
 0x269   : > { %v2527_v44 = vpop.f32.mrf.mxu0  ;;  %3261 = vmatmul.mubr.bf16.gmra.mxu1 %v2798_v27  ;;  %16919 = vst [vmem:[#allocation92_spill] sm:$0xff] %v14082_v61 }
 0x26a   : > { %v2528_v36 = vadd.f32 %v2527_v44, %v13794_v30  ;;  %v2716_v33 = vmax.f32 %v2526_v47, 0.0  ;;  %v14088_v35 = vpop.f32.mrf.mxu1 }
 0x26b   : > { %v2531_v54 = vpop.f32.mrf.mxu0  ;;  %16920 = vst [vmem:[#allocation93_spill] sm:$0xff] %v14088_v35 }
 0x26c   : > { %v2717_v46 = vmax.f32 %v2528_v36, 0.0  ;;  %v2800_v26 = vpack.c.bf16 %v2716_v33, %v2714_v41  ;;  %v2532_v9 = vadd.f32 %v2531_v54, %v13797_v2  ;;  %v12221_v54 = vld [vmem:[%s16817_s6 + $0xe4] ss:$8 sps:$4 sm:$0xff]  }
 0x26d   : > { %v2533_v55 = vpop.f32.mrf.mxu0  ;;  %4534 = vmatprep.subr.bf16.mxu1 %v12221_v54 }
 0x26e   : > { %v2801_v18 = vpack.c.bf16 %v2717_v46, %v2715_v6  ;;  %v2534_v52 = vadd.f32 %v2533_v55, %v13794_v30  ;;  %v2718_v33 = vmax.f32 %v2532_v9, 0.0  ;;  %v12219_v55 = vld [vmem:[%s16817_s6 + $0xe0] ss:$8 sps:$4 sm:$0xff]  }
 0x26f   : > { %v2535_v63 = vpop.f32.mrf.mxu0  ;;  %4535 = vmatpush2.bf16.msra.mxu1 %v12219_v55 }
 0x270   : > { %v2536_v7 = vadd.f32 %v2535_v63, %v13797_v2  ;;  %3270 = vmatprep.mubr.bf16.mxu1 %v2801_v18  ;;  %v2719_v36 = vmax.f32 %v2534_v52, 0.0  ;;  %v14096_v63 = vpop.f32.mrf.mxu1 }
 0x271   : > { %v2537_v27 = vpop.f32.mrf.mxu0  ;;  %3271 = vmatmul.mubr.bf16.gmra.mxu1 %v2800_v26  ;;  %16921 = vst [vmem:[#allocation94_spill] sm:$0xff] %v14096_v63 }
 0x272   : > { %v2538_v47 = vadd.f32 %v2537_v27, %v13794_v30  ;;  %v2720_v50 = vmax.f32 %v2536_v7, 0.0 }
 0x273   : > { %v2541_v44 = vpop.f32.mrf.mxu0 }
 0x274   : > { %v2721_v41 = vmax.f32 %v2538_v47, 0.0  ;;  %v2802_v26 = vpack.c.bf16 %v2720_v50, %v2718_v33  ;;  %v2542_v9 = vadd.f32 %v2541_v44, %v13797_v2 }
 0x275   : > { %v2543_v6 = vpop.f32.mrf.mxu0 }
 0x276   : > { %v2803_v46 = vpack.c.bf16 %v2721_v41, %v2719_v36  ;;  %v2544_v7 = vadd.f32 %v2543_v6, %v13794_v30  ;;  %v14102_v41 = vpop.f32.mrf.mxu1  ;;  %v2722_v63 = vmax.f32 %v2542_v9, 0.0 }
 0x277   : > { %v2545_v18 = vpop.f32.mrf.mxu0  ;;  %16922 = vst [vmem:[#allocation95_spill] sm:$0xff] %v14102_v41 }
 0x278   : > { %v2546_v52 = vadd.f32 %v2545_v18, %v13797_v2  ;;  %3280 = vmatprep.mubr.bf16.mxu1 %v2803_v46  ;;  %v2723_v33 = vmax.f32 %v2544_v7, 0.0  ;;  %v14104_v18 = vpop.f32.mrf.mxu1 }
 0x279   : > { %v2547_v27 = vpop.f32.mrf.mxu0  ;;  %3281 = vmatmul.mubr.bf16.gmra.mxu1 %v2802_v26  ;;  %16923 = vst [vmem:[#allocation96_spill] sm:$0xff] %v14104_v18 }
 0x27a   : > { %v2548_v47 = vadd.f32 %v2547_v27, %v13794_v30  ;;  %v2724_v36 = vmax.f32 %v2546_v52, 0.0  ;;  %v14110_v7 = vpop.f32.mrf.mxu1 }
 0x27b   : > { %v2551_v50 = vpop.f32.mrf.mxu0  ;;  %16924 = vst [vmem:[#allocation97_spill] sm:$0xff] %v14110_v7 }
 0x27c   : > { %v2725_v61 = vmax.f32 %v2548_v47, 0.0  ;;  %v2804_v35 = vpack.c.bf16 %v2724_v36, %v2722_v63  ;;  %v2552_v55 = vadd.f32 %v2551_v50, %v13797_v2  ;;  %v12224_v50 = vld [vmem:[%s16817_s6 + $0xd4] ss:$8 sps:$4 sm:$0xff]  }
 0x27d   : > { %v2553_v32 = vpop.f32.mrf.mxu0  ;;  %4536 = vmatprep.subr.bf16.mxu1 %v12224_v50 }
 0x27e   : > { %v2805_v6 = vpack.c.bf16 %v2725_v61, %v2723_v33  ;;  %v2554_v44 = vadd.f32 %v2553_v32, %v13794_v30  ;;  %v2726_v47 = vmax.f32 %v2552_v55, 0.0  ;;  %v12222_v32 = vld [vmem:[%s16817_s6 + $0xd0] ss:$8 sps:$4 sm:$0xff]  }
 0x27f   : > { %v2555_v46 = vpop.f32.mrf.mxu0  ;;  %4537 = vmatpush2.bf16.msra.mxu1 %v12222_v32 }
 0x280   : > { %v2556_v54 = vadd.f32 %v2555_v46, %v13797_v2  ;;  %3290 = vmatprep.mubr.bf16.mxu1 %v2805_v6  ;;  %v2727_v61 = vmax.f32 %v2554_v44, 0.0  ;;  %v14118_v6 = vpop.f32.mrf.mxu1 }
 0x281   : > { %v2557_v26 = vpop.f32.mrf.mxu0  ;;  %3291 = vmatmul.mubr.bf16.gmra.mxu1 %v2804_v35  ;;  %16925 = vst [vmem:[#allocation98_spill] sm:$0xff] %v14118_v6 }
 0x282   : > { %v2558_v52 = vadd.f32 %v2557_v26, %v13794_v30  ;;  %v2728_v9 = vmax.f32 %v2556_v54, 0.0 }
 0x283   : > { %v2561_v27 = vpop.f32.mrf.mxu0 }
 0x284   : > { %v2729_v63 = vmax.f32 %v2558_v52, 0.0  ;;  %v2806_v35 = vpack.c.bf16 %v2728_v9, %v2726_v47  ;;  %v2562_v55 = vadd.f32 %v2561_v27, %v13797_v2  ;;  %v11260_v52 = vld [vmem:[%s16816_s5 + $0x2] sm:$0x3] }
 0x285   : > { %v2563_v36 = vpop.f32.mrf.mxu0  ;;  %v14131_v27 = vrot.slane %v11260_v52, %v13337_v56 }
 0x286   : > { %v2807_v33 = vpack.c.bf16 %v2729_v63, %v2727_v61  ;;  %v2564_v54 = vadd.f32 %v2563_v36, %v13794_v30  ;;  %v14128_v36 = vrot.slane %v11260_v52, %v13342_v58  ;;  %v2730_v6 = vmax.f32 %v2562_v55, 0.0 }
 0x287   : > { %v2565_v46 = vpop.f32.mrf.mxu0 }
 0x288   : > { %v2566_v44 = vadd.f32 %v2565_v46, %v13797_v2  ;;  %3300 = vmatprep.mubr.bf16.mxu1 %v2807_v33  ;;  %v2731_v33 = vmax.f32 %v2564_v54, 0.0 }
 0x289   : > { %v2567_v26 = vpop.f32.mrf.mxu0  ;;  %v3062_v61 = vpop.f32.mrf.mxu1  ;;  %3301 = vmatmul.mubr.bf16.gmra.mxu1 %v2806_v35 }
 0x28a   : > { %v2568_v9 = vadd.f32 %v2567_v26, %v13794_v30  ;;  %v2732_v63 = vmax.f32 %v2566_v44, 0.0  ;;  %v3063_v17 = vadd.f32 %v3062_v61, %v14131_v27 }
 0x28b   : > { %v2571_v47 = vpop.f32.mrf.mxu0  ;;  %v3064_v46 = vpop.f32.mrf.mxu1 }
 0x28c   : > { %v2733_v50 = vmax.f32 %v2568_v9, 0.0  ;;  %v2808_v37 = vpack.c.bf16 %v2732_v63, %v2730_v6  ;;  %v3065_v32 = vadd.f32 %v3064_v46, %v14128_v36  ;;  %v3381_v61 = vmax.f32 %v3063_v17, 0.0 }
 0x28d   : > { %v2573_v41 = vpop.f32.mrf.mxu0  ;;  %v3066_v7 = vpop.f32.mrf.mxu1 }
 0x28e   : > { %v3067_v18 = vadd.f32 %v3066_v7, %v14131_v27  ;;  %v2809_v35 = vpack.c.bf16 %v2733_v50, %v2731_v33  ;;  %v2574_v52 = vadd.f32 %v2573_v41, %v13794_v30  ;;  %v2572_v7 = vadd.f32 %v2571_v47, %v13797_v2  ;;  %v12227_v47 = vld [vmem:[%s16817_s6 + $0xc4] ss:$8 sps:$4 sm:$0xff]  }
 0x28f   : > { %v2575_v44 = vpop.f32.mrf.mxu0  ;;  %v3068_v26 = vpop.f32.mrf.mxu1  ;;  %v3382_v46 = vmax.f32 %v3065_v32, 0.0  ;;  %4538 = vmatprep.subr.bf16.mxu1 %v12227_v47 }
 0x290   : > { %v2576_v48 = vadd.f32 %v2575_v44, %v13797_v2  ;;  %v3069_v54 = vadd.f32 %v3068_v26, %v14128_v36  ;;  %3310 = vmatprep.mubr.bf16.mxu1 %v2809_v35  ;;  %v3383_v33 = vmax.f32 %v3067_v18, 0.0  ;;  %v2735_v11 = vmax.f32 %v2574_v52, 0.0  ;;  %v12225_v18 = vld [vmem:[%s16817_s6 + $0xc0] ss:$8 sps:$4 sm:$0xff]  }
 0x291   : > { %v2577_v55 = vpop.f32.mrf.mxu0  ;;  %v3072_v9 = vpop.f32.mrf.mxu1  ;;  %3311 = vmatmul.mubr.bf16.gmra.mxu1 %v2808_v37  ;;  %v2734_v41 = vmax.f32 %v2572_v7, 0.0 }
 0x292   : > { %v3384_v6 = vmax.f32 %v3069_v54, 0.0  ;;  %v2578_v63 = vadd.f32 %v2577_v55, %v13794_v30  ;;  %v2736_v10 = vmax.f32 %v2576_v48, 0.0  ;;  %v3509_v25 = vpack.c.bf16 %v3383_v33, %v3381_v61  ;;  %4539 = vmatpush2.bf16.msra.mxu1 %v12225_v18 }
 0x293   : > { %v2581_v50 = vpop.f32.mrf.mxu0  ;;  %v3074_v42 = vpop.f32.mrf.mxu1  ;;  %v3073_v17 = vadd.f32 %v3072_v9, %v14131_v27 }
 0x294   : > { %v2737_v44 = vmax.f32 %v2578_v63, 0.0  ;;  %v3510_v1 = vpack.c.bf16 %v3384_v6, %v3382_v46  ;;  %v3075_v48 = vadd.f32 %v3074_v42, %v14128_v36  ;;  %v2810_v55 = vpack.c.bf16 %v2736_v10, %v2734_v41 }
 0x295   : > { %v2583_v26 = vpop.f32.mrf.mxu0  ;;  %v3076_v35 = vpop.f32.mrf.mxu1  ;;  %v2582_v9 = vadd.f32 %v2581_v50, %v13797_v2 }
 0x296   : > { %v3077_v37 = vadd.f32 %v3076_v35, %v14131_v27  ;;  %3811 = vmatprep.mubr.bf16.mxu0 %v3510_v1  ;;  %v2811_v52 = vpack.c.bf16 %v2737_v44, %v2735_v11  ;;  %v2584_v6 = vadd.f32 %v2583_v26, %v13794_v30  ;;  %v3386_v11 = vmax.f32 %v3075_v48, 0.0 }
 0x297   : > { %v2585_v32 = vpop.f32.mrf.mxu0  ;;  %v3078_v54 = vpop.f32.mrf.mxu1  ;;  %3812 = vmatmul.mubr.bf16.vlgmr.msra.gmra.mxu0 %v3509_v25  ;;  %v3385_v35 = vmax.f32 %v3073_v17, 0.0 }
 0x298   : > { %v2586_v7 = vadd.f32 %v2585_v32, %v13797_v2  ;;  %v3079_v33 = vadd.f32 %v3078_v54, %v14128_v36  ;;  %3320 = vmatprep.mubr.bf16.mxu1 %v2811_v52  ;;  %v3387_v42 = vmax.f32 %v3077_v37, 0.0  ;;  %v2739_v47 = vmax.f32 %v2584_v6, 0.0 }
 0x299   : > { %v2587_v63 = vpop.f32.mrf.mxu0  ;;  %v3082_v46 = vpop.f32.mrf.mxu1  ;;  %3321 = vmatmul.mubr.bf16.gmra.mxu1 %v2810_v55  ;;  %v2738_v52 = vmax.f32 %v2582_v9, 0.0 }
 0x29a   : > { %v3388_v1 = vmax.f32 %v3079_v33, 0.0  ;;  %v2588_v61 = vadd.f32 %v2587_v63, %v13794_v30  ;;  %v2740_v41 = vmax.f32 %v2586_v7, 0.0  ;;  %v3511_v20 = vpack.c.bf16 %v3387_v42, %v3385_v35 }
 0x29b   : > { %v2591_v10 = vpop.f32.mrf.mxu0  ;;  %v3084_v44 = vpop.f32.mrf.mxu1  ;;  %v3083_v63 = vadd.f32 %v3082_v46, %v14131_v27 }
 0x29c   : > { %v2741_v25 = vmax.f32 %v2588_v61, 0.0  ;;  %v3512_v54 = vpack.c.bf16 %v3388_v1, %v3386_v11  ;;  %v3085_v50 = vadd.f32 %v3084_v44, %v14128_v36  ;;  %v2812_v48 = vpack.c.bf16 %v2740_v41, %v2738_v52 }
 0x29d   : > { %v2593_v32 = vpop.f32.mrf.mxu0  ;;  %v3086_v26 = vpop.f32.mrf.mxu1  ;;  %v2592_v1 = vadd.f32 %v2591_v10, %v13797_v2  ;;  %v12228_v10 = vld [vmem:[%s16817_s6 + $0xb0] ss:$8 sps:$4 sm:$0xff]  }
 0x29e   : > { %v3087_v18 = vadd.f32 %v3086_v26, %v14131_v27  ;;  %3821 = vmatprep.mubr.bf16.mxu0 %v3512_v54  ;;  %v2813_v55 = vpack.c.bf16 %v2741_v25, %v2739_v47  ;;  %v2594_v6 = vadd.f32 %v2593_v32, %v13794_v30  ;;  %v3390_v35 = vmax.f32 %v3085_v50, 0.0 }
 0x29f   : > { %v2595_v37 = vpop.f32.mrf.mxu0  ;;  %v3088_v33 = vpop.f32.mrf.mxu1  ;;  %3822 = vmatmul.mubr.bf16.gmra.mxu0 %v3511_v20  ;;  %v3389_v25 = vmax.f32 %v3083_v63, 0.0 }
 0x2a0   : > { %v2596_v17 = vadd.f32 %v2595_v37, %v13797_v2  ;;  %v3089_v7 = vadd.f32 %v3088_v33, %v14128_v36  ;;  %3330 = vmatprep.mubr.bf16.mxu1 %v2813_v55  ;;  %v3391_v61 = vmax.f32 %v3087_v18, 0.0  ;;  %v2743_v54 = vmax.f32 %v2594_v6, 0.0  ;;  %v12230_v18 = vld [vmem:[%s16817_s6 + $0xb4] ss:$8 sps:$4 sm:$0xff]  }
 0x2a1   : > { %v2597_v9 = vpop.f32.mrf.mxu0  ;;  %v3092_v42 = vpop.f32.mrf.mxu1  ;;  %3331 = vmatmul.mubr.bf16.gmra.mxu1 %v2812_v48  ;;  %v2742_v37 = vmax.f32 %v2592_v1, 0.0  ;;  %4540 = vmatprep.subr.bf16.mxu1 %v12230_v18 }
 0x2a2   : > { %v3392_v11 = vmax.f32 %v3089_v7, 0.0  ;;  %v2598_v44 = vadd.f32 %v2597_v9, %v13794_v30  ;;  %v2744_v47 = vmax.f32 %v2596_v17, 0.0  ;;  %v3513_v33 = vpack.c.bf16 %v3391_v61, %v3389_v25  ;;  %4541 = vmatpush2.bf16.msra.mxu1 %v12228_v10 }
 0x2a3   : > { %v2601_v41 = vpop.f32.mrf.mxu0  ;;  %v3094_v46 = vpop.f32.mrf.mxu1  ;;  %v3093_v50 = vadd.f32 %v3092_v42, %v14131_v27 }
 0x2a4   : > { %v2745_v26 = vmax.f32 %v2598_v44, 0.0  ;;  %v3514_v32 = vpack.c.bf16 %v3392_v11, %v3390_v35  ;;  %v3095_v48 = vadd.f32 %v3094_v46, %v14128_v36  ;;  %v2814_v6 = vpack.c.bf16 %v2744_v47, %v2742_v37 }
 0x2a5   : > { %v2603_v20 = vpop.f32.mrf.mxu0  ;;  %v3096_v52 = vpop.f32.mrf.mxu1  ;;  %v2602_v42 = vadd.f32 %v2601_v41, %v13797_v2 }
 0x2a6   : > { %v3097_v55 = vadd.f32 %v3096_v52, %v14131_v27  ;;  %3831 = vmatprep.mubr.bf16.mxu0 %v3514_v32  ;;  %v2815_v7 = vpack.c.bf16 %v2745_v26, %v2743_v54  ;;  %v2604_v61 = vadd.f32 %v2603_v20, %v13794_v30  ;;  %v3394_v47 = vmax.f32 %v3095_v48, 0.0 }
 0x2a7   : > { %v2605_v63 = vpop.f32.mrf.mxu0  ;;  %v3098_v17 = vpop.f32.mrf.mxu1  ;;  %3832 = vmatmul.mubr.bf16.gmra.mxu0 %v3513_v33  ;;  %v3393_v52 = vmax.f32 %v3093_v50, 0.0 }
 0x2a8   : > { %v2606_v9 = vadd.f32 %v2605_v63, %v13797_v2  ;;  %v3099_v1 = vadd.f32 %v3098_v17, %v14128_v36  ;;  %3340 = vmatprep.mubr.bf16.mxu1 %v2815_v7  ;;  %v3395_v35 = vmax.f32 %v3097_v55, 0.0  ;;  %v2747_v33 = vmax.f32 %v2604_v61, 0.0 }
 0x2a9   : > { %v2607_v11 = vpop.f32.mrf.mxu0  ;;  %v3102_v44 = vpop.f32.mrf.mxu1  ;;  %3341 = vmatmul.mubr.bf16.gmra.mxu1 %v2814_v6  ;;  %v2746_v17 = vmax.f32 %v2602_v42, 0.0 }
 0x2aa   : > { %v3396_v46 = vmax.f32 %v3099_v1, 0.0  ;;  %v2608_v25 = vadd.f32 %v2607_v11, %v13794_v30  ;;  %v2748_v32 = vmax.f32 %v2606_v9, 0.0  ;;  %v3515_v7 = vpack.c.bf16 %v3395_v35, %v3393_v52 }
 0x2ab   : > { %v2611_v26 = vpop.f32.mrf.mxu0  ;;  %v3104_v54 = vpop.f32.mrf.mxu1  ;;  %v3103_v11 = vadd.f32 %v3102_v44, %v14131_v27 }
 0x2ac   : > { %v2749_v37 = vmax.f32 %v2608_v25, 0.0  ;;  %v3516_v63 = vpack.c.bf16 %v3396_v46, %v3394_v47  ;;  %v3105_v41 = vadd.f32 %v3104_v54, %v14128_v36  ;;  %v2816_v48 = vpack.c.bf16 %v2748_v32, %v2746_v17 }
 0x2ad   : > { %v2613_v18 = vpop.f32.mrf.mxu0  ;;  %v3106_v20 = vpop.f32.mrf.mxu1  ;;  %v2612_v61 = vadd.f32 %v2611_v26, %v13797_v2  ;;  %v12231_v26 = vld [vmem:[%s16815_s4 + $0x370] ss:$8 sps:$4 sm:$0xff]  }
 0x2ae   : > { %v3107_v10 = vadd.f32 %v3106_v20, %v14131_v27  ;;  %3841 = vmatprep.mubr.bf16.mxu0 %v3516_v63  ;;  %v2817_v6 = vpack.c.bf16 %v2749_v37, %v2747_v33  ;;  %v2614_v42 = vadd.f32 %v2613_v18, %v13794_v30  ;;  %v3398_v52 = vmax.f32 %v3105_v41, 0.0  ;;  %v12233_v18 = vld [vmem:[%s16815_s4 + $0x374] ss:$8 sps:$4 sm:$0xff]  }
 0x2af   : > { %v2615_v55 = vpop.f32.mrf.mxu0  ;;  %v3108_v1 = vpop.f32.mrf.mxu1  ;;  %3842 = vmatmul.mubr.bf16.gmra.mxu0 %v3515_v7  ;;  %v3397_v33 = vmax.f32 %v3103_v11, 0.0  ;;  %v2750_v63 = vmax.f32 %v2612_v61, 0.0  ;;  %5279 = vmatprep.subr.bf16.mxu0 %v12233_v18  ;;  %v12236_v11 = vld [vmem:[%s16817_s6 + $0xa4] ss:$8 sps:$4 sm:$0xff]  }
 0x2b0   : > { %v2616_v50 = vadd.f32 %v2615_v55, %v13797_v2  ;;  %v3109_v9 = vadd.f32 %v3108_v1, %v14128_v36  ;;  %3350 = vmatprep.mubr.bf16.mxu1 %v2817_v6  ;;  %v3399_v25 = vmax.f32 %v3107_v10, 0.0  ;;  %v2751_v17 = vmax.f32 %v2614_v42, 0.0  ;;  %5280 = vmatpush1.bf16.msra.mxu0 %v12231_v26 }
 0x2b1   : > { %v2617_v35 = vpop.f32.mrf.mxu0  ;;  %v3112_v46 = vpop.f32.mrf.mxu1  ;;  %3351 = vmatmul.mubr.bf16.gmra.mxu1 %v2816_v48  ;;  %v12234_v48 = vld [vmem:[%s16817_s6 + $0xa0] ss:$8 sps:$4 sm:$0xff]   ;;  %4542 = vmatprep.subr.bf16.mxu1 %v12236_v11 }
 0x2b2   : > { %v3400_v47 = vmax.f32 %v3109_v9, 0.0  ;;  %v2618_v54 = vadd.f32 %v2617_v35, %v13794_v30  ;;  %v2752_v32 = vmax.f32 %v2616_v50, 0.0  ;;  %v3517_v1 = vpack.c.bf16 %v3399_v25, %v3397_v33  ;;  %4543 = vmatpush2.bf16.msra.mxu1 %v12234_v48 }
 0x2b3   : > { %v2621_v44 = vpop.f32.mrf.mxu0  ;;  %v3114_v37 = vpop.f32.mrf.mxu1  ;;  %v3113_v9 = vadd.f32 %v3112_v46, %v14131_v27 }
 0x2b4   : > { %v2753_v20 = vmax.f32 %v2618_v54, 0.0  ;;  %v3518_v55 = vpack.c.bf16 %v3400_v47, %v3398_v52  ;;  %v3115_v41 = vadd.f32 %v3114_v37, %v14128_v36  ;;  %v2818_v50 = vpack.c.bf16 %v2752_v32, %v2750_v63 }
 0x2b5   : > { %v2623_v7 = vpop.f32.mrf.mxu0  ;;  %v3116_v10 = vpop.f32.mrf.mxu1  ;;  %v2622_v52 = vadd.f32 %v2621_v44, %v13797_v2  ;;  %v3401_v26 = vmax.f32 %v3113_v9, 0.0 }
 0x2b6   : > { %v3117_v6 = vadd.f32 %v3116_v10, %v14131_v27  ;;  %3851 = vmatprep.mubr.bf16.mxu0 %v3518_v55  ;;  %v2819_v35 = vpack.c.bf16 %v2753_v20, %v2751_v17  ;;  %v2624_v25 = vadd.f32 %v2623_v7, %v13794_v30  ;;  %v3402_v46 = vmax.f32 %v3115_v41, 0.0 }
 0x2b7   : > { %v2625_v61 = vpop.f32.mrf.mxu0  ;;  %v3118_v42 = vpop.f32.mrf.mxu1  ;;  %3852 = vmatmul.mubr.bf16.gmra.mxu0 %v3517_v1  ;;  %v2754_v1 = vmax.f32 %v2622_v52, 0.0 }
 0x2b8   : > { %v2626_v47 = vadd.f32 %v2625_v61, %v13797_v2  ;;  %v3119_v54 = vadd.f32 %v3118_v42, %v14128_v36  ;;  %3360 = vmatprep.mubr.bf16.mxu1 %v2819_v35  ;;  %v3403_v33 = vmax.f32 %v3117_v6, 0.0  ;;  %v2755_v17 = vmax.f32 %v2624_v25, 0.0 }
 0x2b9   : > { %v2627_v37 = vpop.f32.mrf.mxu0  ;;  %v3122_v32 = vpop.f32.mrf.mxu1  ;;  %3361 = vmatmul.mubr.bf16.gmra.mxu1 %v2818_v50 }
 0x2ba   : > { %v3404_v18 = vmax.f32 %v3119_v54, 0.0  ;;  %v2628_v20 = vadd.f32 %v2627_v37, %v13794_v30  ;;  %v2756_v7 = vmax.f32 %v2626_v47, 0.0  ;;  %v3519_v61 = vpack.c.bf16 %v3403_v33, %v3401_v26  ;;  %v12237_v37 = vld [vmem:[%s16815_s4 + $0x360] ss:$8 sps:$4 sm:$0xff]   ;;  %v12240_v26 = vld [vmem:[%s16817_s6 + $0x90] ss:$8 sps:$4 sm:$0xff]  }
 0x2bb   : > { %v3124_v63 = vpop.f32.mrf.mxu1  ;;  %v3123_v30 = vadd.f32 %v3122_v32, %v14131_v27  ;;  %v12239_v32 = vld [vmem:[%s16815_s4 + $0x364] ss:$8 sps:$4 sm:$0xff]  }
 0x2bc   : > { %v2757_v10 = vmax.f32 %v2628_v20, 0.0  ;;  %v3520_v55 = vpack.c.bf16 %v3404_v18, %v3402_v46  ;;  %v3125_v2 = vadd.f32 %v3124_v63, %v14128_v36  ;;  %v2820_v48 = vpack.c.bf16 %v2756_v7, %v2754_v1  ;;  %5281 = vmatprep.subr.bf16.mxu0 %v12239_v32  ;;  %v12242_v63 = vld [vmem:[%s16817_s6 + $0x94] ss:$8 sps:$4 sm:$0xff]  }
 0x2bd   : > { %v3126_v11 = vpop.f32.mrf.mxu1  ;;  %v3405_v54 = vmax.f32 %v3123_v30, 0.0  ;;  %5282 = vmatpush1.bf16.msra.mxu0 %v12237_v37  ;;  %4544 = vmatprep.subr.bf16.mxu1 %v12242_v63 }
 0x2be   : > { %v3127_v44 = vadd.f32 %v3126_v11, %v14131_v27  ;;  %3861 = vmatprep.mubr.bf16.mxu0 %v3520_v55  ;;  %v2821_v41 = vpack.c.bf16 %v2757_v10, %v2755_v17  ;;  %v3406_v42 = vmax.f32 %v3125_v2, 0.0  ;;  %4545 = vmatpush2.bf16.msra.mxu1 %v12240_v26 }
 0x2bf   : > { %v3128_v6 = vpop.f32.mrf.mxu1  ;;  %3862 = vmatmul.mubr.bf16.gmra.mxu0 %v3519_v61 }
 0x2c0   : > { %v3129_v50 = vadd.f32 %v3128_v6, %v14128_v36  ;;  %3370 = vmatprep.mubr.bf16.mxu1 %v2821_v41  ;;  %v3407_v35 = vmax.f32 %v3127_v44, 0.0 }
 0x2c1   : > { %v3132_v9 = vpop.f32.mrf.mxu1  ;;  %3371 = vmatmul.mubr.bf16.gmra.mxu1 %v2820_v48 }
 0x2c2   : > { %v3408_v25 = vmax.f32 %v3129_v50, 0.0  ;;  %v3521_v33 = vpack.c.bf16 %v3407_v35, %v3405_v54  ;;  %v3133_v7 = vadd.f32 %v3132_v9, %v14131_v27 }
 0x2c3   : > { %v3134_v47 = vpop.f32.mrf.mxu1 }
 0x2c4   : > { %v3522_v52 = vpack.c.bf16 %v3408_v25, %v3406_v42  ;;  %v3135_v18 = vadd.f32 %v3134_v47, %v14128_v36  ;;  %v3409_v44 = vmax.f32 %v3133_v7, 0.0  ;;  %v12246_v7 = vld [vmem:[%s16817_s6 + $0x80] ss:$8 sps:$4 sm:$0xff]  }
 0x2c5   : > { %v3136_v46 = vpop.f32.mrf.mxu1 }
 0x2c6   : > { %v3137_v20 = vadd.f32 %v3136_v46, %v14131_v27  ;;  %3871 = vmatprep.mubr.bf16.mxu0 %v3522_v52  ;;  %v3410_v1 = vmax.f32 %v3135_v18, 0.0  ;;  %v12245_v18 = vld [vmem:[%s16815_s4 + $0x354] ss:$8 sps:$4 sm:$0xff]  }
 0x2c7   : > { %v3138_v17 = vpop.f32.mrf.mxu1  ;;  %3872 = vmatmul.mubr.bf16.gmra.mxu0 %v3521_v33  ;;  %v12243_v33 = vld [vmem:[%s16815_s4 + $0x350] ss:$8 sps:$4 sm:$0xff]   ;;  %5283 = vmatprep.subr.bf16.mxu0 %v12245_v18 }
 0x2c8   : > { %v3139_v10 = vadd.f32 %v3138_v17, %v14128_v36  ;;  %v3411_v11 = vmax.f32 %v3137_v20, 0.0  ;;  %5284 = vmatpush1.bf16.msra.mxu0 %v12243_v33 }
 0x2c9   : > { %v3142_v55 = vpop.f32.mrf.mxu1 }
 0x2ca   : > { %v3412_v61 = vmax.f32 %v3139_v10, 0.0  ;;  %v3523_v48 = vpack.c.bf16 %v3411_v11, %v3409_v44  ;;  %v3143_v42 = vadd.f32 %v3142_v55, %v14131_v27  ;;  %v12248_v10 = vld [vmem:[%s16817_s6 + $0x84] ss:$8 sps:$4 sm:$0xff]  }
 0x2cb   : > { %v3144_v2 = vpop.f32.mrf.mxu1  ;;  %4546 = vmatprep.subr.bf16.mxu1 %v12248_v10 }
 0x2cc   : > { %v3524_v41 = vpack.c.bf16 %v3412_v61, %v3410_v1  ;;  %v3145_v30 = vadd.f32 %v3144_v2, %v14128_v36  ;;  %v3413_v32 = vmax.f32 %v3143_v42, 0.0  ;;  %4547 = vmatpush2.bf16.msra.mxu1 %v12246_v7 }
 0x2cd   : > { %v3146_v6 = vpop.f32.mrf.mxu1 }
 0x2ce   : > { %v3147_v50 = vadd.f32 %v3146_v6, %v14131_v27  ;;  %3881 = vmatprep.mubr.bf16.mxu0 %v3524_v41  ;;  %v3414_v47 = vmax.f32 %v3145_v30, 0.0 }
 0x2cf   : > { %v3148_v9 = vpop.f32.mrf.mxu1  ;;  %3882 = vmatmul.mubr.bf16.gmra.mxu0 %v3523_v48 }
 0x2d0   : > { %v3149_v35 = vadd.f32 %v3148_v9, %v14128_v36  ;;  %v3415_v54 = vmax.f32 %v3147_v50, 0.0 }
 0x2d1   : > { %v3152_v25 = vpop.f32.mrf.mxu1 }
 0x2d2   : > { %v3416_v52 = vmax.f32 %v3149_v35, 0.0  ;;  %v3525_v26 = vpack.c.bf16 %v3415_v54, %v3413_v32  ;;  %v3153_v1 = vadd.f32 %v3152_v25, %v14131_v27 }
 0x2d3   : > { %v3154_v37 = vpop.f32.mrf.mxu1 }
 0x2d4   : > { %v3526_v46 = vpack.c.bf16 %v3416_v52, %v3414_v47  ;;  %v3155_v63 = vadd.f32 %v3154_v37, %v14128_v36  ;;  %v3417_v48 = vmax.f32 %v3153_v1, 0.0 }
 0x2d5   : > { %v3156_v20 = vpop.f32.mrf.mxu1 }
 0x2d6   : > { %v3157_v17 = vadd.f32 %v3156_v20, %v14131_v27  ;;  %3891 = vmatprep.mubr.bf16.mxu0 %v3526_v46  ;;  %v3418_v2 = vmax.f32 %v3155_v63, 0.0  ;;  %v12249_v63 = vld [vmem:[%s16815_s4 + $0x340] ss:$8 sps:$4 sm:$0xff]  }
 0x2d7   : > { %v3158_v55 = vpop.f32.mrf.mxu1  ;;  %3892 = vmatmul.mubr.bf16.gmra.mxu0 %v3525_v26 }
 0x2d8   : > { %v3159_v11 = vadd.f32 %v3158_v55, %v14128_v36  ;;  %v3419_v44 = vmax.f32 %v3157_v17, 0.0  ;;  %v12251_v17 = vld [vmem:[%s16815_s4 + $0x344] ss:$8 sps:$4 sm:$0xff]  }
 0x2d9   : > { %v3162_v61 = vpop.f32.mrf.mxu1  ;;  %5285 = vmatprep.subr.bf16.mxu0 %v12251_v17  ;;  %v12252_v17 = vld [vmem:[%s16815_s4 + $0x330] ss:$8 sps:$4 sm:$0xff]  }
 0x2da   : > { %v3420_v41 = vmax.f32 %v3159_v11, 0.0  ;;  %v3527_v9 = vpack.c.bf16 %v3419_v44, %v3417_v48  ;;  %v3163_v47 = vadd.f32 %v3162_v61, %v14131_v27  ;;  %5286 = vmatpush1.bf16.msra.mxu0 %v12249_v63 }
 0x2db   : > { %v3164_v6 = vpop.f32.mrf.mxu1 }
 0x2dc   : > { %v3528_v30 = vpack.c.bf16 %v3420_v41, %v3418_v2  ;;  %v3165_v42 = vadd.f32 %v3164_v6, %v14128_v36  ;;  %v3421_v18 = vmax.f32 %v3163_v47, 0.0 }
 0x2dd   : > { %v3166_v50 = vpop.f32.mrf.mxu1 }
 0x2de   : > { %v3167_v35 = vadd.f32 %v3166_v50, %v14131_v27  ;;  %3901 = vmatprep.mubr.bf16.mxu0 %v3528_v30  ;;  %v3422_v37 = vmax.f32 %v3165_v42, 0.0 }
 0x2df   : > { %v3168_v25 = vpop.f32.mrf.mxu1  ;;  %3902 = vmatmul.mubr.bf16.gmra.mxu0 %v3527_v9 }
 0x2e0   : > { %v3169_v54 = vadd.f32 %v3168_v25, %v14128_v36  ;;  %v3423_v32 = vmax.f32 %v3167_v35, 0.0 }
 0x2e1   : > { %v3172_v52 = vpop.f32.mrf.mxu1 }
 0x2e2   : > { %v3424_v46 = vmax.f32 %v3169_v54, 0.0  ;;  %v3529_v7 = vpack.c.bf16 %v3423_v32, %v3421_v18  ;;  %v3173_v11 = vadd.f32 %v3172_v52, %v14131_v27 }
 0x2e3   : > { %v3174_v33 = vpop.f32.mrf.mxu1 }
 0x2e4   : > { %v3530_v20 = vpack.c.bf16 %v3424_v46, %v3422_v37  ;;  %v3175_v10 = vadd.f32 %v3174_v33, %v14128_v36  ;;  %v3425_v30 = vmax.f32 %v3173_v11, 0.0 }
 0x2e5   : > { %v3176_v26 = vpop.f32.mrf.mxu1 }
 0x2e6   : > { %v3177_v55 = vadd.f32 %v3176_v26, %v14131_v27  ;;  %3911 = vmatprep.mubr.bf16.mxu0 %v3530_v20  ;;  %v3426_v44 = vmax.f32 %v3175_v10, 0.0 }
 0x2e7   : > { %v3178_v1 = vpop.f32.mrf.mxu1  ;;  %3912 = vmatmul.mubr.bf16.gmra.mxu0 %v3529_v7  ;;  %v12254_v7 = vld [vmem:[%s16815_s4 + $0x334] ss:$8 sps:$4 sm:$0xff]  }
 0x2e8   : > { %v3179_v61 = vadd.f32 %v3178_v1, %v14128_v36  ;;  %v3427_v41 = vmax.f32 %v3177_v55, 0.0  ;;  %5287 = vmatprep.subr.bf16.mxu0 %v12254_v7  ;;  %v12255_v7 = vld [vmem:[%s16815_s4 + $0x320] ss:$8 sps:$4 sm:$0xff]  }
 0x2e9   : > { %v3182_v2 = vpop.f32.mrf.mxu1  ;;  %5288 = vmatpush1.bf16.msra.mxu0 %v12252_v17 }
 0x2ea   : > { %v3428_v6 = vmax.f32 %v3179_v61, 0.0  ;;  %v3531_v42 = vpack.c.bf16 %v3427_v41, %v3425_v30  ;;  %v3183_v54 = vadd.f32 %v3182_v2, %v14131_v27 }
 0x2eb   : > { %v3184_v48 = vpop.f32.mrf.mxu1 }
 0x2ec   : > { %v3532_v50 = vpack.c.bf16 %v3428_v6, %v3426_v44  ;;  %v3185_v35 = vadd.f32 %v3184_v48, %v14128_v36  ;;  %v3429_v20 = vmax.f32 %v3183_v54, 0.0 }
 0x2ed   : > { %v3186_v9 = vpop.f32.mrf.mxu1 }
 0x2ee   : > { %v3187_v25 = vadd.f32 %v3186_v9, %v14131_v27  ;;  %3921 = vmatprep.mubr.bf16.mxu0 %v3532_v50  ;;  %v3430_v32 = vmax.f32 %v3185_v35, 0.0 }
 0x2ef   : > { %v3188_v47 = vpop.f32.mrf.mxu1  ;;  %3922 = vmatmul.mubr.bf16.gmra.mxu0 %v3531_v42 }
 0x2f0   : > { %v3189_v52 = vadd.f32 %v3188_v47, %v14128_v36  ;;  %v3431_v46 = vmax.f32 %v3187_v25, 0.0 }
 0x2f1   : > { %v3192_v37 = vpop.f32.mrf.mxu1 }
 0x2f2   : > { %v3432_v33 = vmax.f32 %v3189_v52, 0.0  ;;  %v3533_v10 = vpack.c.bf16 %v3431_v46, %v3429_v20  ;;  %v3193_v61 = vadd.f32 %v3192_v37, %v14131_v27 }
 0x2f3   : > { %v3194_v18 = vpop.f32.mrf.mxu1 }
 0x2f4   : > { %v3534_v26 = vpack.c.bf16 %v3432_v33, %v3430_v32  ;;  %v3195_v55 = vadd.f32 %v3194_v18, %v14128_v36  ;;  %v3433_v50 = vmax.f32 %v3193_v61, 0.0 }
 0x2f5   : > { %v3196_v63 = vpop.f32.mrf.mxu1 }
 0x2f6   : > { %v3197_v1 = vadd.f32 %v3196_v63, %v14131_v27  ;;  %3931 = vmatprep.mubr.bf16.mxu0 %v3534_v26  ;;  %v3434_v41 = vmax.f32 %v3195_v55, 0.0 }
 0x2f7   : > { %v3198_v11 = vpop.f32.mrf.mxu1  ;;  %3932 = vmatmul.mubr.bf16.gmra.mxu0 %v3533_v10  ;;  %v12257_v10 = vld [vmem:[%s16815_s4 + $0x324] ss:$8 sps:$4 sm:$0xff]  }
 0x2f8   : > { %v3199_v2 = vadd.f32 %v3198_v11, %v14128_v36  ;;  %v3435_v6 = vmax.f32 %v3197_v1, 0.0  ;;  %5289 = vmatprep.subr.bf16.mxu0 %v12257_v10  ;;  %v12258_v10 = vld [vmem:[%s16815_s4 + $0x310] ss:$8 sps:$4 sm:$0xff]  }
 0x2f9   : > { %v3202_v44 = vpop.f32.mrf.mxu1  ;;  %5290 = vmatpush1.bf16.msra.mxu0 %v12255_v7 }
 0x2fa   : > { %v3436_v48 = vmax.f32 %v3199_v2, 0.0  ;;  %v3535_v35 = vpack.c.bf16 %v3435_v6, %v3433_v50  ;;  %v3203_v52 = vadd.f32 %v3202_v44, %v14131_v27 }
 0x2fb   : > { %v3204_v30 = vpop.f32.mrf.mxu1 }
 0x2fc   : > { %v3536_v9 = vpack.c.bf16 %v3436_v48, %v3434_v41  ;;  %v3205_v25 = vadd.f32 %v3204_v30, %v14128_v36  ;;  %v3437_v26 = vmax.f32 %v3203_v52, 0.0 }
 0x2fd   : > { %v3206_v42 = vpop.f32.mrf.mxu1 }
 0x2fe   : > { %v3207_v47 = vadd.f32 %v3206_v42, %v14131_v27  ;;  %3941 = vmatprep.mubr.bf16.mxu0 %v3536_v9  ;;  %v3438_v46 = vmax.f32 %v3205_v25, 0.0 }
 0x2ff   : > { %v3208_v54 = vpop.f32.mrf.mxu1  ;;  %3942 = vmatmul.mubr.bf16.gmra.mxu0 %v3535_v35 }
 0x300   : > { %v3209_v37 = vadd.f32 %v3208_v54, %v14128_v36  ;;  %v3439_v33 = vmax.f32 %v3207_v47, 0.0 }
 0x301   : > { %v3212_v32 = vpop.f32.mrf.mxu1 }
 0x302   : > { %v3440_v18 = vmax.f32 %v3209_v37, 0.0  ;;  %v3537_v55 = vpack.c.bf16 %v3439_v33, %v3437_v26  ;;  %v3213_v2 = vadd.f32 %v3212_v32, %v14131_v27 }
 0x303   : > { %v3214_v20 = vpop.f32.mrf.mxu1 }
 0x304   : > { %v3538_v63 = vpack.c.bf16 %v3440_v18, %v3438_v46  ;;  %v3215_v1 = vadd.f32 %v3214_v20, %v14128_v36  ;;  %v3441_v9 = vmax.f32 %v3213_v2, 0.0 }
 0x305   : > { %v3216_v17 = vpop.f32.mrf.mxu1 }
 0x306   : > { %v3217_v11 = vadd.f32 %v3216_v17, %v14131_v27  ;;  %3951 = vmatprep.mubr.bf16.mxu0 %v3538_v63  ;;  %v3442_v6 = vmax.f32 %v3215_v1, 0.0 }
 0x307   : > { %v3218_v61 = vpop.f32.mrf.mxu1  ;;  %3952 = vmatmul.mubr.bf16.gmra.mxu0 %v3537_v55  ;;  %v12260_v55 = vld [vmem:[%s16815_s4 + $0x314] ss:$8 sps:$4 sm:$0xff]  }
 0x308   : > { %v3219_v44 = vadd.f32 %v3218_v61, %v14128_v36  ;;  %v3443_v48 = vmax.f32 %v3217_v11, 0.0  ;;  %5291 = vmatprep.subr.bf16.mxu0 %v12260_v55  ;;  %v12261_v55 = vld [vmem:[%s16815_s4 + $0x300] ss:$8 sps:$4 sm:$0xff]  }
 0x309   : > { %v3222_v41 = vpop.f32.mrf.mxu1  ;;  %5292 = vmatpush1.bf16.msra.mxu0 %v12258_v10 }
 0x30a   : > { %v3444_v30 = vmax.f32 %v3219_v44, 0.0  ;;  %v3539_v25 = vpack.c.bf16 %v3443_v48, %v3441_v9  ;;  %v3223_v37 = vadd.f32 %v3222_v41, %v14131_v27 }
 0x30b   : > { %v3224_v50 = vpop.f32.mrf.mxu1 }
 0x30c   : > { %v3540_v42 = vpack.c.bf16 %v3444_v30, %v3442_v6  ;;  %v3225_v47 = vadd.f32 %v3224_v50, %v14128_v36  ;;  %v3445_v63 = vmax.f32 %v3223_v37, 0.0 }
 0x30d   : > { %v3226_v35 = vpop.f32.mrf.mxu1 }
 0x30e   : > { %v3227_v54 = vadd.f32 %v3226_v35, %v14131_v27  ;;  %3961 = vmatprep.mubr.bf16.mxu0 %v3540_v42  ;;  %v3446_v33 = vmax.f32 %v3225_v47, 0.0 }
 0x30f   : > { %v3228_v52 = vpop.f32.mrf.mxu1  ;;  %3962 = vmatmul.mubr.bf16.gmra.mxu0 %v3539_v25 }
 0x310   : > { %v3229_v32 = vadd.f32 %v3228_v52, %v14128_v36  ;;  %v3447_v18 = vmax.f32 %v3227_v54, 0.0 }
 0x311   : > { %v3232_v46 = vpop.f32.mrf.mxu1 }
 0x312   : > { %v3448_v20 = vmax.f32 %v3229_v32, 0.0  ;;  %v3541_v1 = vpack.c.bf16 %v3447_v18, %v3445_v63  ;;  %v3233_v44 = vadd.f32 %v3232_v46, %v14131_v27 }
 0x313   : > { %v3234_v26 = vpop.f32.mrf.mxu1 }
 0x314   : > { %v3542_v17 = vpack.c.bf16 %v3448_v20, %v3446_v33  ;;  %v3235_v11 = vadd.f32 %v3234_v26, %v14128_v36  ;;  %v3449_v42 = vmax.f32 %v3233_v44, 0.0 }
 0x315   : > { %v3236_v7 = vpop.f32.mrf.mxu1 }
 0x316   : > { %v3237_v61 = vadd.f32 %v3236_v7, %v14131_v27  ;;  %3971 = vmatprep.mubr.bf16.mxu0 %v3542_v17  ;;  %v3450_v48 = vmax.f32 %v3235_v11, 0.0 }
 0x317   : > { %v3238_v2 = vpop.f32.mrf.mxu1  ;;  %3972 = vmatmul.mubr.bf16.gmra.mxu0 %v3541_v1  ;;  %v12263_v1 = vld [vmem:[%s16815_s4 + $0x304] ss:$8 sps:$4 sm:$0xff]  }
 0x318   : > { %v3239_v41 = vadd.f32 %v3238_v2, %v14128_v36  ;;  %v3451_v30 = vmax.f32 %v3237_v61, 0.0  ;;  %5293 = vmatprep.subr.bf16.mxu0 %v12263_v1  ;;  %v12264_v1 = vld [vmem:[%s16815_s4 + $0x3f0] ss:$8 sps:$4 sm:$0xff]  }
 0x319   : > { %v3242_v6 = vpop.f32.mrf.mxu1  ;;  %5294 = vmatpush1.bf16.msra.mxu0 %v12261_v55 }
 0x31a   : > { %v3452_v50 = vmax.f32 %v3239_v41, 0.0  ;;  %v3543_v47 = vpack.c.bf16 %v3451_v30, %v3449_v42  ;;  %v3243_v32 = vadd.f32 %v3242_v6, %v14131_v27 }
 0x31b   : > { %v3244_v9 = vpop.f32.mrf.mxu1 }
 0x31c   : > { %v3544_v35 = vpack.c.bf16 %v3452_v50, %v3450_v48  ;;  %v3245_v54 = vadd.f32 %v3244_v9, %v14128_v36  ;;  %v3453_v17 = vmax.f32 %v3243_v32, 0.0 }
 0x31d   : > { %v3246_v25 = vpop.f32.mrf.mxu1 }
 0x31e   : > { %v3247_v52 = vadd.f32 %v3246_v25, %v14131_v27  ;;  %3981 = vmatprep.mubr.bf16.mxu0 %v3544_v35  ;;  %v3454_v18 = vmax.f32 %v3245_v54, 0.0 }
 0x31f   : > { %v3248_v37 = vpop.f32.mrf.mxu1  ;;  %3982 = vmatmul.mubr.bf16.gmra.mxu0 %v3543_v47 }
 0x320   : > { %v3249_v46 = vadd.f32 %v3248_v37, %v14128_v36  ;;  %v3455_v20 = vmax.f32 %v3247_v52, 0.0 }
 0x321   : > { %v3252_v33 = vpop.f32.mrf.mxu1 }
 0x322   : > { %v3456_v26 = vmax.f32 %v3249_v46, 0.0  ;;  %v3545_v11 = vpack.c.bf16 %v3455_v20, %v3453_v17  ;;  %v3253_v41 = vadd.f32 %v3252_v33, %v14131_v27 }
 0x323   : > { %v3254_v63 = vpop.f32.mrf.mxu1 }
 0x324   : > { %v3546_v7 = vpack.c.bf16 %v3456_v26, %v3454_v18  ;;  %v3255_v61 = vadd.f32 %v3254_v63, %v14128_v36  ;;  %v3457_v35 = vmax.f32 %v3253_v41, 0.0 }
 0x325   : > { %v3256_v10 = vpop.f32.mrf.mxu1 }
 0x326   : > { %v3257_v2 = vadd.f32 %v3256_v10, %v14131_v27  ;;  %3991 = vmatprep.mubr.bf16.mxu0 %v3546_v7  ;;  %v3458_v30 = vmax.f32 %v3255_v61, 0.0 }
 0x327   : > { %v3258_v44 = vpop.f32.mrf.mxu1  ;;  %3992 = vmatmul.mubr.bf16.gmra.mxu0 %v3545_v11  ;;  %v12266_v11 = vld [vmem:[%s16815_s4 + $0x3f4] ss:$8 sps:$4 sm:$0xff]  }
 0x328   : > { %v3259_v6 = vadd.f32 %v3258_v44, %v14128_v36  ;;  %v3459_v50 = vmax.f32 %v3257_v2, 0.0  ;;  %5295 = vmatprep.subr.bf16.mxu0 %v12266_v11  ;;  %v12267_v11 = vld [vmem:[%s16815_s4 + $0x3e0] ss:$8 sps:$4 sm:$0xff]  }
 0x329   : > { %v3262_v48 = vpop.f32.mrf.mxu1  ;;  %5296 = vmatpush2.bf16.msra.mxu0 %v12264_v1 }
 0x32a   : > { %v3460_v9 = vmax.f32 %v3259_v6, 0.0  ;;  %v3547_v54 = vpack.c.bf16 %v3459_v50, %v3457_v35  ;;  %v3263_v46 = vadd.f32 %v3262_v48, %v14131_v27 }
 0x32b   : > { %v3264_v42 = vpop.f32.mrf.mxu1 }
 0x32c   : > { %v3548_v25 = vpack.c.bf16 %v3460_v9, %v3458_v30  ;;  %v3265_v52 = vadd.f32 %v3264_v42, %v14128_v36  ;;  %v3461_v7 = vmax.f32 %v3263_v46, 0.0 }
 0x32d   : > { %v3266_v47 = vpop.f32.mrf.mxu1 }
 0x32e   : > { %v3267_v37 = vadd.f32 %v3266_v47, %v14131_v27  ;;  %4001 = vmatprep.mubr.bf16.mxu0 %v3548_v25  ;;  %v3462_v20 = vmax.f32 %v3265_v52, 0.0 }
 0x32f   : > { %v3268_v32 = vpop.f32.mrf.mxu1  ;;  %4002 = vmatmul.mubr.bf16.gmra.mxu0 %v3547_v54 }
 0x330   : > { %v3269_v33 = vadd.f32 %v3268_v32, %v14128_v36  ;;  %v3463_v26 = vmax.f32 %v3267_v37, 0.0 }
 0x331   : > { %v3272_v18 = vpop.f32.mrf.mxu1 }
 0x332   : > { %v3464_v63 = vmax.f32 %v3269_v33, 0.0  ;;  %v3549_v61 = vpack.c.bf16 %v3463_v26, %v3461_v7  ;;  %v3273_v6 = vadd.f32 %v3272_v18, %v14131_v27 }
 0x333   : > { %v3274_v17 = vpop.f32.mrf.mxu1 }
 0x334   : > { %v3550_v10 = vpack.c.bf16 %v3464_v63, %v3462_v20  ;;  %v3275_v2 = vadd.f32 %v3274_v17, %v14128_v36  ;;  %v3465_v25 = vmax.f32 %v3273_v6, 0.0 }
 0x335   : > { %v3276_v55 = vpop.f32.mrf.mxu1 }
 0x336   : > { %v3277_v44 = vadd.f32 %v3276_v55, %v14131_v27  ;;  %4011 = vmatprep.mubr.bf16.mxu0 %v3550_v10  ;;  %v3466_v50 = vmax.f32 %v3275_v2, 0.0 }
 0x337   : > { %v3278_v41 = vpop.f32.mrf.mxu1  ;;  %4012 = vmatmul.mubr.bf16.gmra.mxu0 %v3549_v61  ;;  %v12269_v61 = vld [vmem:[%s16815_s4 + $0x3e4] ss:$8 sps:$4 sm:$0xff]  }
 0x338   : > { %v3279_v48 = vadd.f32 %v3278_v41, %v14128_v36  ;;  %v3467_v9 = vmax.f32 %v3277_v44, 0.0  ;;  %5297 = vmatprep.subr.bf16.mxu0 %v12269_v61  ;;  %v12270_v61 = vld [vmem:[%s16815_s4 + $0x3d0] ss:$8 sps:$4 sm:$0xff]  }
 0x339   : > { %v3282_v30 = vpop.f32.mrf.mxu1  ;;  %5298 = vmatpush2.bf16.msra.mxu0 %v12267_v11 }
 0x33a   : > { %v3468_v42 = vmax.f32 %v3279_v48, 0.0  ;;  %v3551_v52 = vpack.c.bf16 %v3467_v9, %v3465_v25  ;;  %v3283_v33 = vadd.f32 %v3282_v30, %v14131_v27 }
 0x33b   : > { %v3284_v35 = vpop.f32.mrf.mxu1 }
 0x33c   : > { %v3552_v47 = vpack.c.bf16 %v3468_v42, %v3466_v50  ;;  %v3285_v37 = vadd.f32 %v3284_v35, %v14128_v36  ;;  %v3469_v10 = vmax.f32 %v3283_v33, 0.0 }
 0x33d   : > { %v3286_v54 = vpop.f32.mrf.mxu1 }
 0x33e   : > { %v3287_v32 = vadd.f32 %v3286_v54, %v14131_v27  ;;  %4021 = vmatprep.mubr.bf16.mxu0 %v3552_v47  ;;  %v3470_v26 = vmax.f32 %v3285_v37, 0.0 }
 0x33f   : > { %v3288_v46 = vpop.f32.mrf.mxu1  ;;  %4022 = vmatmul.mubr.bf16.gmra.mxu0 %v3551_v52 }
 0x340   : > { %v3289_v18 = vadd.f32 %v3288_v46, %v14128_v36  ;;  %v3471_v63 = vmax.f32 %v3287_v32, 0.0 }
 0x341   : > { %v3292_v20 = vpop.f32.mrf.mxu1 }
 0x342   : > { %v3472_v17 = vmax.f32 %v3289_v18, 0.0  ;;  %v3553_v2 = vpack.c.bf16 %v3471_v63, %v3469_v10  ;;  %v3293_v48 = vadd.f32 %v3292_v20, %v14131_v27 }
 0x343   : > { %v3294_v7 = vpop.f32.mrf.mxu1 }
 0x344   : > { %v3554_v55 = vpack.c.bf16 %v3472_v17, %v3470_v26  ;;  %v3295_v44 = vadd.f32 %v3294_v7, %v14128_v36  ;;  %v3473_v47 = vmax.f32 %v3293_v48, 0.0 }
 0x345   : > { %v3296_v1 = vpop.f32.mrf.mxu1 }
 0x346   : > { %v3297_v41 = vadd.f32 %v3296_v1, %v14131_v27  ;;  %4031 = vmatprep.mubr.bf16.mxu0 %v3554_v55  ;;  %v3474_v9 = vmax.f32 %v3295_v44, 0.0 }
 0x347   : > { %v3298_v6 = vpop.f32.mrf.mxu1  ;;  %4032 = vmatmul.mubr.bf16.gmra.mxu0 %v3553_v2  ;;  %v12272_v2 = vld [vmem:[%s16815_s4 + $0x3d4] ss:$8 sps:$4 sm:$0xff]  }
 0x348   : > { %v3299_v30 = vadd.f32 %v3298_v6, %v14128_v36  ;;  %v3475_v42 = vmax.f32 %v3297_v41, 0.0  ;;  %5299 = vmatprep.subr.bf16.mxu0 %v12272_v2 }
 0x349   : > { %v3302_v50 = vpop.f32.mrf.mxu1  ;;  %5300 = vmatpush2.bf16.msra.mxu0 %v12270_v61 }
 0x34a   : > { %v3476_v35 = vmax.f32 %v3299_v30, 0.0  ;;  %v3555_v37 = vpack.c.bf16 %v3475_v42, %v3473_v47  ;;  %v3303_v18 = vadd.f32 %v3302_v50, %v14131_v27 }
 0x34b   : > { %v3304_v25 = vpop.f32.mrf.mxu1 }
 0x34c   : > { %v3556_v54 = vpack.c.bf16 %v3476_v35, %v3474_v9  ;;  %v3305_v32 = vadd.f32 %v3304_v25, %v14128_v36  ;;  %v3477_v55 = vmax.f32 %v3303_v18, 0.0  ;;  %v11325_v9 = vld [vmem:[%s16816_s5 + $0x4] sm:$0x3] }
 0x34d   : > { %v3306_v52 = vpop.f32.mrf.mxu1 }
 0x34e   : > { %v3307_v46 = vadd.f32 %v3306_v52, %v14131_v27  ;;  %4041 = vmatprep.mubr.bf16.mxu0 %v3556_v54  ;;  %v3478_v63 = vmax.f32 %v3305_v32, 0.0  ;;  %v14361_v52 = vrot.slane %v11325_v9, %v13342_v58  ;;  %v14364_v32 = vrot.slane %v11325_v9, %v13337_v56 }
 0x34f   : > { %v3308_v33 = vpop.f32.mrf.mxu1  ;;  %4042 = vmatmul.mubr.bf16.gmra.mxu0 %v3555_v37 }
 0x350   : > { %v3309_v20 = vadd.f32 %v3308_v33, %v14128_v36  ;;  %v3479_v17 = vmax.f32 %v3307_v46, 0.0 }
 0x351   : > { %v3312_v26 = vpop.f32.mrf.mxu1 }
 0x352   : > { %v3480_v7 = vmax.f32 %v3309_v20, 0.0  ;;  %v3557_v44 = vpack.c.bf16 %v3479_v17, %v3477_v55  ;;  %v3313_v30 = vadd.f32 %v3312_v26, %v14131_v27 }
 0x353   : > { %v3314_v10 = vpop.f32.mrf.mxu1 }
 0x354   : > { %v3558_v1 = vpack.c.bf16 %v3480_v7, %v3478_v63  ;;  %v3315_v41 = vadd.f32 %v3314_v10, %v14128_v36  ;;  %v3481_v46 = vmax.f32 %v3313_v30, 0.0 }
 0x355   : > { %v3316_v11 = vpop.f32.mrf.mxu1 }
 0x356   : > { %v3317_v6 = vadd.f32 %v3316_v11, %v14131_v27  ;;  %4051 = vmatprep.mubr.bf16.mxu0 %v3558_v1  ;;  %v3482_v35 = vmax.f32 %v3315_v41, 0.0 }
 0x357   : > { %v3318_v48 = vpop.f32.mrf.mxu1  ;;  %v3813_v42 = vpop.f32.mrf.mxu0  ;;  %4052 = vmatmul.mubr.bf16.gmra.mxu0 %v3557_v44 }
 0x358   : > { %v3319_v50 = vadd.f32 %v3318_v48, %v14128_v36  ;;  %v3483_v25 = vmax.f32 %v3317_v6, 0.0  ;;  %v3814_v55 = vadd.f32 %v3813_v42, %v14364_v32 }
 0x359   : > { %v3322_v54 = vpop.f32.mrf.mxu1  ;;  %v3815_v37 = vpop.f32.mrf.mxu0 }
 0x35a   : > { %v3484_v47 = vmax.f32 %v3319_v50, 0.0  ;;  %v3559_v63 = vpack.c.bf16 %v3483_v25, %v3481_v46  ;;  %v3816_v17 = vadd.f32 %v3815_v37, %v14361_v52  ;;  %v3323_v41 = vadd.f32 %v3322_v54, %v14131_v27  ;;  %v12273_v54 = vld [vmem:[%s16815_s4 + $0x3c0] ss:$8 sps:$4 sm:$0xff]  }
 0x35b   : > { %v3324_v33 = vpop.f32.mrf.mxu1  ;;  %v3817_v18 = vpop.f32.mrf.mxu0  ;;  %v4132_v25 = vmax.f32 %v3814_v55, 0.0 }
 0x35c   : > { %v3560_v20 = vpack.c.bf16 %v3484_v47, %v3482_v35  ;;  %v3818_v26 = vadd.f32 %v3817_v18, %v14364_v32  ;;  %v3325_v61 = vadd.f32 %v3324_v33, %v14128_v36  ;;  %v4133_v50 = vmax.f32 %v3816_v17, 0.0 }
 0x35d   : > { %v3326_v7 = vpop.f32.mrf.mxu1  ;;  %v3819_v10 = vpop.f32.mrf.mxu0  ;;  %v3485_v33 = vmax.f32 %v3323_v41, 0.0 }
 0x35e   : > { %4061 = vmatprep.mubr.bf16.mxu0 %v3560_v20  ;;  %v3327_v1 = vadd.f32 %v3326_v7, %v14131_v27  ;;  %v3820_v11 = vadd.f32 %v3819_v10, %v14361_v52  ;;  %v4134_v6 = vmax.f32 %v3818_v26, 0.0  ;;  %v3486_v37 = vmax.f32 %v3325_v61, 0.0  ;;  %v12275_v26 = vld [vmem:[%s16815_s4 + $0x3c4] ss:$8 sps:$4 sm:$0xff]  }
 0x35f   : > { %v3328_v2 = vpop.f32.mrf.mxu1  ;;  %v3823_v44 = vpop.f32.mrf.mxu0  ;;  %4062 = vmatmul.mubr.bf16.gmra.mxu0 %v3559_v63  ;;  %5301 = vmatprep.subr.bf16.mxu0 %v12275_v26 }
 0x360   : > { %v4135_v48 = vmax.f32 %v3820_v11, 0.0  ;;  %v3329_v30 = vadd.f32 %v3328_v2, %v14128_v36  ;;  %v3487_v42 = vmax.f32 %v3327_v1, 0.0  ;;  %v4260_v7 = vpack.c.bf16 %v4134_v6, %v4132_v25  ;;  %5302 = vmatpush2.bf16.msra.mxu0 %v12273_v54 }
 0x361   : > { %v3332_v9 = vpop.f32.mrf.mxu1  ;;  %v3825_v35 = vpop.f32.mrf.mxu0  ;;  %v3824_v17 = vadd.f32 %v3823_v44, %v14364_v32 }
 0x362   : > { %v3488_v47 = vmax.f32 %v3329_v30, 0.0  ;;  %v4261_v20 = vpack.c.bf16 %v4135_v48, %v4133_v50  ;;  %v3826_v10 = vadd.f32 %v3825_v35, %v14361_v52  ;;  %v3561_v61 = vpack.c.bf16 %v3487_v42, %v3485_v33 }
 0x363   : > { %v3334_v46 = vpop.f32.mrf.mxu1  ;;  %v3827_v18 = vpop.f32.mrf.mxu0  ;;  %v3333_v44 = vadd.f32 %v3332_v9, %v14131_v27 }
 0x364   : > { %v3828_v63 = vadd.f32 %v3827_v18, %v14364_v32  ;;  %4548 = vmatprep.mubr.bf16.mxu1 %v4261_v20  ;;  %v3562_v11 = vpack.c.bf16 %v3488_v47, %v3486_v37  ;;  %v3335_v6 = vadd.f32 %v3334_v46, %v14128_v36  ;;  %v4137_v42 = vmax.f32 %v3826_v10, 0.0 }
 0x365   : > { %v3336_v55 = vpop.f32.mrf.mxu1  ;;  %v3829_v1 = vpop.f32.mrf.mxu0  ;;  %4549 = vmatmul.mubr.bf16.vlgmr.msra.gmra.mxu1 %v4260_v7  ;;  %v4136_v18 = vmax.f32 %v3824_v17, 0.0 }
 0x366   : > { %v3337_v2 = vadd.f32 %v3336_v55, %v14131_v27  ;;  %v3830_v41 = vadd.f32 %v3829_v1, %v14361_v52  ;;  %4071 = vmatprep.mubr.bf16.mxu0 %v3562_v11  ;;  %v4138_v50 = vmax.f32 %v3828_v63, 0.0  ;;  %v3490_v7 = vmax.f32 %v3335_v6, 0.0 }
 0x367   : > { %v3338_v48 = vpop.f32.mrf.mxu1  ;;  %v3833_v30 = vpop.f32.mrf.mxu0  ;;  %4072 = vmatmul.mubr.bf16.gmra.mxu0 %v3561_v61  ;;  %v3489_v1 = vmax.f32 %v3333_v44, 0.0 }
 0x368   : > { %v4139_v35 = vmax.f32 %v3830_v41, 0.0  ;;  %v3339_v25 = vadd.f32 %v3338_v48, %v14128_v36  ;;  %v3491_v20 = vmax.f32 %v3337_v2, 0.0  ;;  %v4262_v11 = vpack.c.bf16 %v4138_v50, %v4136_v18 }
 0x369   : > { %v3342_v47 = vpop.f32.mrf.mxu1  ;;  %v3835_v37 = vpop.f32.mrf.mxu0  ;;  %v3834_v48 = vadd.f32 %v3833_v30, %v14364_v32 }
 0x36a   : > { %v3492_v33 = vmax.f32 %v3339_v25, 0.0  ;;  %v4263_v55 = vpack.c.bf16 %v4139_v35, %v4137_v42  ;;  %v3836_v9 = vadd.f32 %v3835_v37, %v14361_v52  ;;  %v3563_v10 = vpack.c.bf16 %v3491_v20, %v3489_v1 }
 0x36b   : > { %v3344_v26 = vpop.f32.mrf.mxu1  ;;  %v3837_v46 = vpop.f32.mrf.mxu0  ;;  %v3343_v35 = vadd.f32 %v3342_v47, %v14131_v27  ;;  %v12276_v47 = vld [vmem:[%s16815_s4 + $0x3b0] ss:$8 sps:$4 sm:$0xff]  }
 0x36c   : > { %v3838_v54 = vadd.f32 %v3837_v46, %v14364_v32  ;;  %4558 = vmatprep.mubr.bf16.mxu1 %v4263_v55  ;;  %v3564_v61 = vpack.c.bf16 %v3492_v33, %v3490_v7  ;;  %v3345_v6 = vadd.f32 %v3344_v26, %v14128_v36  ;;  %v4141_v18 = vmax.f32 %v3836_v9, 0.0 }
 0x36d   : > { %v3346_v63 = vpop.f32.mrf.mxu1  ;;  %v3839_v41 = vpop.f32.mrf.mxu0  ;;  %4559 = vmatmul.mubr.bf16.gmra.mxu1 %v4262_v11  ;;  %v4140_v33 = vmax.f32 %v3834_v48, 0.0 }
 0x36e   : > { %v3347_v17 = vadd.f32 %v3346_v63, %v14131_v27  ;;  %v3840_v2 = vadd.f32 %v3839_v41, %v14361_v52  ;;  %4081 = vmatprep.mubr.bf16.mxu0 %v3564_v61  ;;  %v4142_v25 = vmax.f32 %v3838_v54, 0.0  ;;  %v3494_v55 = vmax.f32 %v3345_v6, 0.0  ;;  %v12278_v54 = vld [vmem:[%s16815_s4 + $0x3b4] ss:$8 sps:$4 sm:$0xff]  }
 0x36f   : > { %v3348_v44 = vpop.f32.mrf.mxu1  ;;  %v3843_v50 = vpop.f32.mrf.mxu0  ;;  %4082 = vmatmul.mubr.bf16.gmra.mxu0 %v3563_v10  ;;  %v3493_v63 = vmax.f32 %v3343_v35, 0.0  ;;  %5303 = vmatprep.subr.bf16.mxu0 %v12278_v54 }
 0x370   : > { %v4143_v42 = vmax.f32 %v3840_v2, 0.0  ;;  %v3349_v37 = vadd.f32 %v3348_v44, %v14128_v36  ;;  %v3495_v7 = vmax.f32 %v3347_v17, 0.0  ;;  %v4264_v41 = vpack.c.bf16 %v4142_v25, %v4140_v33  ;;  %5304 = vmatpush2.bf16.msra.mxu0 %v12276_v47 }
 0x371   : > { %v3352_v20 = vpop.f32.mrf.mxu1  ;;  %v3845_v30 = vpop.f32.mrf.mxu0  ;;  %v3844_v9 = vadd.f32 %v3843_v50, %v14364_v32 }
 0x372   : > { %v3496_v46 = vmax.f32 %v3349_v37, 0.0  ;;  %v4265_v26 = vpack.c.bf16 %v4143_v42, %v4141_v18  ;;  %v3846_v10 = vadd.f32 %v3845_v30, %v14361_v52  ;;  %v3565_v6 = vpack.c.bf16 %v3495_v7, %v3493_v63 }
 0x373   : > { %v3354_v1 = vpop.f32.mrf.mxu1  ;;  %v3847_v11 = vpop.f32.mrf.mxu0  ;;  %v3353_v50 = vadd.f32 %v3352_v20, %v14131_v27 }
 0x374   : > { %v3848_v61 = vadd.f32 %v3847_v11, %v14364_v32  ;;  %4568 = vmatprep.mubr.bf16.mxu1 %v4265_v26  ;;  %v3566_v2 = vpack.c.bf16 %v3496_v46, %v3494_v55  ;;  %v3355_v25 = vadd.f32 %v3354_v1, %v14128_v36  ;;  %v4145_v7 = vmax.f32 %v3846_v10, 0.0 }
 0x375   : > { %v3356_v48 = vpop.f32.mrf.mxu1  ;;  %v3849_v17 = vpop.f32.mrf.mxu0  ;;  %4569 = vmatmul.mubr.bf16.gmra.mxu1 %v4264_v41  ;;  %v4144_v11 = vmax.f32 %v3844_v9, 0.0 }
 0x376   : > { %v3357_v44 = vadd.f32 %v3356_v48, %v14131_v27  ;;  %v3850_v35 = vadd.f32 %v3849_v17, %v14361_v52  ;;  %4091 = vmatprep.mubr.bf16.mxu0 %v3566_v2  ;;  %v4146_v18 = vmax.f32 %v3848_v61, 0.0  ;;  %v3498_v41 = vmax.f32 %v3355_v25, 0.0 }
 0x377   : > { %v3358_v42 = vpop.f32.mrf.mxu1  ;;  %v3853_v37 = vpop.f32.mrf.mxu0  ;;  %4092 = vmatmul.mubr.bf16.gmra.mxu0 %v3565_v6  ;;  %v3497_v17 = vmax.f32 %v3353_v50, 0.0 }
 0x378   : > { %v4147_v30 = vmax.f32 %v3850_v35, 0.0  ;;  %v3359_v33 = vadd.f32 %v3358_v42, %v14128_v36  ;;  %v3499_v26 = vmax.f32 %v3357_v44, 0.0  ;;  %v4266_v2 = vpack.c.bf16 %v4146_v18, %v4144_v11 }
 0x379   : > { %v3362_v46 = vpop.f32.mrf.mxu1  ;;  %v3855_v55 = vpop.f32.mrf.mxu0  ;;  %v3854_v42 = vadd.f32 %v3853_v37, %v14364_v32 }
 0x37a   : > { %v3500_v63 = vmax.f32 %v3359_v33, 0.0  ;;  %v4267_v48 = vpack.c.bf16 %v4147_v30, %v4145_v7  ;;  %v3856_v20 = vadd.f32 %v3855_v55, %v14361_v52  ;;  %v3567_v10 = vpack.c.bf16 %v3499_v26, %v3497_v17 }
 0x37b   : > { %v3364_v54 = vpop.f32.mrf.mxu1  ;;  %v3857_v1 = vpop.f32.mrf.mxu0  ;;  %v3363_v25 = vadd.f32 %v3362_v46, %v14131_v27  ;;  %v12279_v46 = vld [vmem:[%s16815_s4 + $0x470] ss:$8 sps:$4 sm:$0xff]  }
 0x37c   : > { %v3858_v47 = vadd.f32 %v3857_v1, %v14364_v32  ;;  %4578 = vmatprep.mubr.bf16.mxu1 %v4267_v48  ;;  %v3568_v6 = vpack.c.bf16 %v3500_v63, %v3498_v41  ;;  %v3365_v50 = vadd.f32 %v3364_v54, %v14128_v36  ;;  %v4149_v11 = vmax.f32 %v3856_v20, 0.0  ;;  %v12281_v54 = vld [vmem:[%s16815_s4 + $0x474] ss:$8 sps:$4 sm:$0xff]  }
 0x37d   : > { %v3366_v61 = vpop.f32.mrf.mxu1  ;;  %v3859_v35 = vpop.f32.mrf.mxu0  ;;  %4579 = vmatmul.mubr.bf16.gmra.mxu1 %v4266_v2  ;;  %v4148_v41 = vmax.f32 %v3854_v42, 0.0  ;;  %v3501_v48 = vmax.f32 %v3363_v25, 0.0  ;;  %6030 = vmatprep.subr.bf16.mxu1 %v12281_v54  ;;  %v12284_v42 = vld [vmem:[%s16815_s4 + $0x3a4] ss:$8 sps:$4 sm:$0xff]  }
 0x37e   : > { %v3367_v9 = vadd.f32 %v3366_v61, %v14131_v27  ;;  %v3860_v44 = vadd.f32 %v3859_v35, %v14361_v52  ;;  %4101 = vmatprep.mubr.bf16.mxu0 %v3568_v6  ;;  %v4150_v33 = vmax.f32 %v3858_v47, 0.0  ;;  %v3502_v17 = vmax.f32 %v3365_v50, 0.0  ;;  %6031 = vmatpush1.bf16.msra.mxu1 %v12279_v46 }
 0x37f   : > { %v3368_v18 = vpop.f32.mrf.mxu1  ;;  %v3863_v30 = vpop.f32.mrf.mxu0  ;;  %4102 = vmatmul.mubr.bf16.gmra.mxu0 %v3567_v10  ;;  %v12282_v10 = vld [vmem:[%s16815_s4 + $0x3a0] ss:$8 sps:$4 sm:$0xff]   ;;  %5305 = vmatprep.subr.bf16.mxu0 %v12284_v42 }
 0x380   : > { %v4151_v7 = vmax.f32 %v3860_v44, 0.0  ;;  %v3369_v55 = vadd.f32 %v3368_v18, %v14128_v36  ;;  %v3503_v26 = vmax.f32 %v3367_v9, 0.0  ;;  %v4268_v35 = vpack.c.bf16 %v4150_v33, %v4148_v41  ;;  %5306 = vmatpush2.bf16.msra.mxu0 %v12282_v10 }
 0x381   : > { %v3372_v37 = vpop.f32.mrf.mxu1  ;;  %v3865_v63 = vpop.f32.mrf.mxu0  ;;  %v3864_v44 = vadd.f32 %v3863_v30, %v14364_v32 }
 0x382   : > { %v3504_v1 = vmax.f32 %v3369_v55, 0.0  ;;  %v4269_v61 = vpack.c.bf16 %v4151_v7, %v4149_v11  ;;  %v3866_v20 = vadd.f32 %v3865_v63, %v14361_v52  ;;  %v3569_v9 = vpack.c.bf16 %v3503_v26, %v3501_v48 }
 0x383   : > { %v3374_v2 = vpop.f32.mrf.mxu1  ;;  %v3867_v47 = vpop.f32.mrf.mxu0  ;;  %v3373_v11 = vadd.f32 %v3372_v37, %v14131_v27  ;;  %v4152_v46 = vmax.f32 %v3864_v44, 0.0 }
 0x384   : > { %v3868_v6 = vadd.f32 %v3867_v47, %v14364_v32  ;;  %4588 = vmatprep.mubr.bf16.mxu1 %v4269_v61  ;;  %v3570_v18 = vpack.c.bf16 %v3504_v1, %v3502_v17  ;;  %v3375_v33 = vadd.f32 %v3374_v2, %v14128_v36  ;;  %v4153_v30 = vmax.f32 %v3866_v20, 0.0 }
 0x385   : > { %v3376_v25 = vpop.f32.mrf.mxu1  ;;  %v3869_v50 = vpop.f32.mrf.mxu0  ;;  %4589 = vmatmul.mubr.bf16.gmra.mxu1 %v4268_v35  ;;  %v3505_v35 = vmax.f32 %v3373_v11, 0.0 }
 0x386   : > { %v3377_v7 = vadd.f32 %v3376_v25, %v14131_v27  ;;  %v3870_v55 = vadd.f32 %v3869_v50, %v14361_v52  ;;  %4111 = vmatprep.mubr.bf16.mxu0 %v3570_v18  ;;  %v4154_v41 = vmax.f32 %v3868_v6, 0.0  ;;  %v3506_v17 = vmax.f32 %v3375_v33, 0.0 }
 0x387   : > { %v3378_v63 = vpop.f32.mrf.mxu1  ;;  %v3873_v26 = vpop.f32.mrf.mxu0  ;;  %4112 = vmatmul.mubr.bf16.gmra.mxu0 %v3569_v9 }
 0x388   : > { %v4155_v54 = vmax.f32 %v3870_v55, 0.0  ;;  %v3379_v1 = vadd.f32 %v3378_v63, %v14128_v36  ;;  %v3507_v2 = vmax.f32 %v3377_v7, 0.0  ;;  %v4270_v25 = vpack.c.bf16 %v4154_v41, %v4152_v46  ;;  %v12285_v63 = vld [vmem:[%s16815_s4 + $0x460] ss:$8 sps:$4 sm:$0xff]   ;;  %v12288_v46 = vld [vmem:[%s16815_s4 + $0x390] ss:$8 sps:$4 sm:$0xff]  }
 0x389   : > { %v3875_v48 = vpop.f32.mrf.mxu0  ;;  %v3874_v36 = vadd.f32 %v3873_v26, %v14364_v32  ;;  %v12287_v26 = vld [vmem:[%s16815_s4 + $0x464] ss:$8 sps:$4 sm:$0xff]  }
 0x38a   : > { %v3508_v47 = vmax.f32 %v3379_v1, 0.0  ;;  %v4271_v61 = vpack.c.bf16 %v4155_v54, %v4153_v30  ;;  %v3876_v27 = vadd.f32 %v3875_v48, %v14361_v52  ;;  %v3571_v10 = vpack.c.bf16 %v3507_v2, %v3505_v35  ;;  %6032 = vmatprep.subr.bf16.mxu1 %v12287_v26  ;;  %v12290_v48 = vld [vmem:[%s16815_s4 + $0x394] ss:$8 sps:$4 sm:$0xff]  }
 0x38b   : > { %v3877_v42 = vpop.f32.mrf.mxu0  ;;  %v4156_v55 = vmax.f32 %v3874_v36, 0.0  ;;  %6033 = vmatpush1.bf16.msra.mxu1 %v12285_v63  ;;  %5307 = vmatprep.subr.bf16.mxu0 %v12290_v48 }
 0x38c   : > { %v3878_v37 = vadd.f32 %v3877_v42, %v14364_v32  ;;  %4598 = vmatprep.mubr.bf16.mxu1 %v4271_v61  ;;  %v3572_v20 = vpack.c.bf16 %v3508_v47, %v3506_v17  ;;  %v4157_v50 = vmax.f32 %v3876_v27, 0.0  ;;  %5308 = vmatpush2.bf16.msra.mxu0 %v12288_v46 }
 0x38d   : > { %v3879_v6 = vpop.f32.mrf.mxu0  ;;  %4599 = vmatmul.mubr.bf16.gmra.mxu1 %v4270_v25 }
 0x38e   : > { %v3880_v9 = vadd.f32 %v3879_v6, %v14361_v52  ;;  %4121 = vmatprep.mubr.bf16.mxu0 %v3572_v20  ;;  %v4158_v18 = vmax.f32 %v3878_v37, 0.0 }
 0x38f   : > { %v3883_v44 = vpop.f32.mrf.mxu0  ;;  %4122 = vmatmul.mubr.bf16.gmra.mxu0 %v3571_v10 }
 0x390   : > { %v4159_v33 = vmax.f32 %v3880_v9, 0.0  ;;  %v4272_v41 = vpack.c.bf16 %v4158_v18, %v4156_v55  ;;  %v3884_v2 = vadd.f32 %v3883_v44, %v14364_v32 }
 0x391   : > { %v3885_v7 = vpop.f32.mrf.mxu0 }
 0x392   : > { %v4273_v11 = vpack.c.bf16 %v4159_v33, %v4157_v50  ;;  %v3886_v54 = vadd.f32 %v3885_v7, %v14361_v52  ;;  %v4160_v37 = vmax.f32 %v3884_v2, 0.0  ;;  %v12294_v2 = vld [vmem:[%s16815_s4 + $0x380] ss:$8 sps:$4 sm:$0xff]  }
 0x393   : > { %v3887_v30 = vpop.f32.mrf.mxu0 }
 0x394   : > { %v3888_v1 = vadd.f32 %v3887_v30, %v14364_v32  ;;  %4608 = vmatprep.mubr.bf16.mxu1 %v4273_v11  ;;  %v4161_v35 = vmax.f32 %v3886_v54, 0.0  ;;  %v12293_v54 = vld [vmem:[%s16815_s4 + $0x454] ss:$8 sps:$4 sm:$0xff]  }
 0x395   : > { %v3889_v17 = vpop.f32.mrf.mxu0  ;;  %4609 = vmatmul.mubr.bf16.gmra.mxu1 %v4272_v41  ;;  %v12291_v41 = vld [vmem:[%s16815_s4 + $0x450] ss:$8 sps:$4 sm:$0xff]   ;;  %6034 = vmatprep.subr.bf16.mxu1 %v12293_v54 }
 0x396   : > { %v3890_v47 = vadd.f32 %v3889_v17, %v14361_v52  ;;  %v4162_v42 = vmax.f32 %v3888_v1, 0.0  ;;  %6035 = vmatpush1.bf16.msra.mxu1 %v12291_v41 }
 0x397   : > { %v3893_v61 = vpop.f32.mrf.mxu0 }
 0x398   : > { %v4163_v25 = vmax.f32 %v3890_v47, 0.0  ;;  %v4274_v10 = vpack.c.bf16 %v4162_v42, %v4160_v37  ;;  %v3894_v50 = vadd.f32 %v3893_v61, %v14364_v32  ;;  %v12296_v47 = vld [vmem:[%s16815_s4 + $0x384] ss:$8 sps:$4 sm:$0xff]  }
 0x399   : > { %v3895_v27 = vpop.f32.mrf.mxu0  ;;  %5309 = vmatprep.subr.bf16.mxu0 %v12296_v47 }
 0x39a   : > { %v4275_v20 = vpack.c.bf16 %v4163_v25, %v4161_v35  ;;  %v3896_v36 = vadd.f32 %v3895_v27, %v14361_v52  ;;  %v4164_v26 = vmax.f32 %v3894_v50, 0.0  ;;  %5310 = vmatpush2.bf16.msra.mxu0 %v12294_v2 }
 0x39b   : > { %v3897_v6 = vpop.f32.mrf.mxu0 }
 0x39c   : > { %v3898_v9 = vadd.f32 %v3897_v6, %v14364_v32  ;;  %4618 = vmatprep.mubr.bf16.mxu1 %v4275_v20  ;;  %v4165_v7 = vmax.f32 %v3896_v36, 0.0 }
 0x39d   : > { %v3899_v44 = vpop.f32.mrf.mxu0  ;;  %4619 = vmatmul.mubr.bf16.gmra.mxu1 %v4274_v10 }
 0x39e   : > { %v3900_v18 = vadd.f32 %v3899_v44, %v14361_v52  ;;  %v4166_v55 = vmax.f32 %v3898_v9, 0.0 }
 0x39f   : > { %v3903_v33 = vpop.f32.mrf.mxu0 }
 0x3a0   : > { %v4167_v11 = vmax.f32 %v3900_v18, 0.0  ;;  %v4276_v46 = vpack.c.bf16 %v4166_v55, %v4164_v26  ;;  %v3904_v35 = vadd.f32 %v3903_v33, %v14364_v32 }
 0x3a1   : > { %v3905_v63 = vpop.f32.mrf.mxu0 }
 0x3a2   : > { %v4277_v30 = vpack.c.bf16 %v4167_v11, %v4165_v7  ;;  %v3906_v48 = vadd.f32 %v3905_v63, %v14361_v52  ;;  %v4168_v10 = vmax.f32 %v3904_v35, 0.0 }
 0x3a3   : > { %v3907_v1 = vpop.f32.mrf.mxu0 }
 0x3a4   : > { %v3908_v17 = vadd.f32 %v3907_v1, %v14364_v32  ;;  %4628 = vmatprep.mubr.bf16.mxu1 %v4277_v30  ;;  %v4169_v27 = vmax.f32 %v3906_v48, 0.0  ;;  %v12297_v48 = vld [vmem:[%s16815_s4 + $0x440] ss:$8 sps:$4 sm:$0xff]  }
 0x3a5   : > { %v3909_v61 = vpop.f32.mrf.mxu0  ;;  %4629 = vmatmul.mubr.bf16.gmra.mxu1 %v4276_v46 }
 0x3a6   : > { %v3910_v42 = vadd.f32 %v3909_v61, %v14361_v52  ;;  %v4170_v37 = vmax.f32 %v3908_v17, 0.0  ;;  %v12299_v17 = vld [vmem:[%s16815_s4 + $0x444] ss:$8 sps:$4 sm:$0xff]  }
 0x3a7   : > { %v3913_v25 = vpop.f32.mrf.mxu0  ;;  %6036 = vmatprep.subr.bf16.mxu1 %v12299_v17  ;;  %v12300_v17 = vld [vmem:[%s16815_s4 + $0x430] ss:$8 sps:$4 sm:$0xff]  }
 0x3a8   : > { %v4171_v20 = vmax.f32 %v3910_v42, 0.0  ;;  %v4278_v44 = vpack.c.bf16 %v4170_v37, %v4168_v10  ;;  %v3914_v7 = vadd.f32 %v3913_v25, %v14364_v32  ;;  %6037 = vmatpush1.bf16.msra.mxu1 %v12297_v48 }
 0x3a9   : > { %v3915_v6 = vpop.f32.mrf.mxu0 }
 0x3aa   : > { %v4279_v36 = vpack.c.bf16 %v4171_v20, %v4169_v27  ;;  %v3916_v50 = vadd.f32 %v3915_v6, %v14361_v52  ;;  %v4172_v54 = vmax.f32 %v3914_v7, 0.0 }
 0x3ab   : > { %v3917_v9 = vpop.f32.mrf.mxu0 }
 0x3ac   : > { %v3918_v18 = vadd.f32 %v3917_v9, %v14364_v32  ;;  %4638 = vmatprep.mubr.bf16.mxu1 %v4279_v36  ;;  %v4173_v63 = vmax.f32 %v3916_v50, 0.0 }
 0x3ad   : > { %v3919_v33 = vpop.f32.mrf.mxu0  ;;  %4639 = vmatmul.mubr.bf16.gmra.mxu1 %v4278_v44 }
 0x3ae   : > { %v3920_v55 = vadd.f32 %v3919_v33, %v14361_v52  ;;  %v4174_v26 = vmax.f32 %v3918_v18, 0.0 }
 0x3af   : > { %v3923_v11 = vpop.f32.mrf.mxu0 }
 0x3b0   : > { %v4175_v30 = vmax.f32 %v3920_v55, 0.0  ;;  %v4280_v2 = vpack.c.bf16 %v4174_v26, %v4172_v54  ;;  %v3924_v42 = vadd.f32 %v3923_v11, %v14364_v32 }
 0x3b1   : > { %v3925_v41 = vpop.f32.mrf.mxu0 }
 0x3b2   : > { %v4281_v1 = vpack.c.bf16 %v4175_v30, %v4173_v63  ;;  %v3926_v47 = vadd.f32 %v3925_v41, %v14361_v52  ;;  %v4176_v36 = vmax.f32 %v3924_v42, 0.0 }
 0x3b3   : > { %v3927_v46 = vpop.f32.mrf.mxu0 }
 0x3b4   : > { %v3928_v61 = vadd.f32 %v3927_v46, %v14364_v32  ;;  %4648 = vmatprep.mubr.bf16.mxu1 %v4281_v1  ;;  %v4177_v37 = vmax.f32 %v3926_v47, 0.0 }
 0x3b5   : > { %v3929_v35 = vpop.f32.mrf.mxu0  ;;  %4649 = vmatmul.mubr.bf16.gmra.mxu1 %v4280_v2  ;;  %v12302_v2 = vld [vmem:[%s16815_s4 + $0x434] ss:$8 sps:$4 sm:$0xff]  }
 0x3b6   : > { %v3930_v25 = vadd.f32 %v3929_v35, %v14361_v52  ;;  %v4178_v20 = vmax.f32 %v3928_v61, 0.0  ;;  %6038 = vmatprep.subr.bf16.mxu1 %v12302_v2  ;;  %v12303_v2 = vld [vmem:[%s16815_s4 + $0x420] ss:$8 sps:$4 sm:$0xff]  }
 0x3b7   : > { %v3933_v27 = vpop.f32.mrf.mxu0  ;;  %6039 = vmatpush1.bf16.msra.mxu1 %v12300_v17 }
 0x3b8   : > { %v4179_v6 = vmax.f32 %v3930_v25, 0.0  ;;  %v4282_v50 = vpack.c.bf16 %v4178_v20, %v4176_v36  ;;  %v3934_v55 = vadd.f32 %v3933_v27, %v14364_v32 }
 0x3b9   : > { %v3935_v10 = vpop.f32.mrf.mxu0 }
 0x3ba   : > { %v4283_v9 = vpack.c.bf16 %v4179_v6, %v4177_v37  ;;  %v3936_v18 = vadd.f32 %v3935_v10, %v14361_v52  ;;  %v4180_v1 = vmax.f32 %v3934_v55, 0.0 }
 0x3bb   : > { %v3937_v44 = vpop.f32.mrf.mxu0 }
 0x3bc   : > { %v3938_v33 = vadd.f32 %v3937_v44, %v14364_v32  ;;  %4658 = vmatprep.mubr.bf16.mxu1 %v4283_v9  ;;  %v4181_v26 = vmax.f32 %v3936_v18, 0.0 }
 0x3bd   : > { %v3939_v7 = vpop.f32.mrf.mxu0  ;;  %4659 = vmatmul.mubr.bf16.gmra.mxu1 %v4282_v50 }
 0x3be   : > { %v3940_v11 = vadd.f32 %v3939_v7, %v14361_v52  ;;  %v4182_v30 = vmax.f32 %v3938_v33, 0.0 }
 0x3bf   : > { %v3943_v63 = vpop.f32.mrf.mxu0 }
 0x3c0   : > { %v4183_v41 = vmax.f32 %v3940_v11, 0.0  ;;  %v4284_v47 = vpack.c.bf16 %v4182_v30, %v4180_v1  ;;  %v3944_v25 = vadd.f32 %v3943_v63, %v14364_v32 }
 0x3c1   : > { %v3945_v54 = vpop.f32.mrf.mxu0 }
 0x3c2   : > { %v4285_v46 = vpack.c.bf16 %v4183_v41, %v4181_v26  ;;  %v3946_v61 = vadd.f32 %v3945_v54, %v14361_v52  ;;  %v4184_v9 = vmax.f32 %v3944_v25, 0.0 }
 0x3c3   : > { %v3947_v48 = vpop.f32.mrf.mxu0 }
 0x3c4   : > { %v3948_v35 = vadd.f32 %v3947_v48, %v14364_v32  ;;  %4668 = vmatprep.mubr.bf16.mxu1 %v4285_v46  ;;  %v4185_v20 = vmax.f32 %v3946_v61, 0.0 }
 0x3c5   : > { %v3949_v42 = vpop.f32.mrf.mxu0  ;;  %4669 = vmatmul.mubr.bf16.gmra.mxu1 %v4284_v47  ;;  %v12305_v47 = vld [vmem:[%s16815_s4 + $0x424] ss:$8 sps:$4 sm:$0xff]  }
 0x3c6   : > { %v3950_v27 = vadd.f32 %v3949_v42, %v14361_v52  ;;  %v4186_v6 = vmax.f32 %v3948_v35, 0.0  ;;  %6040 = vmatprep.subr.bf16.mxu1 %v12305_v47  ;;  %v12306_v47 = vld [vmem:[%s16815_s4 + $0x410] ss:$8 sps:$4 sm:$0xff]  }
 0x3c7   : > { %v3953_v37 = vpop.f32.mrf.mxu0  ;;  %6041 = vmatpush1.bf16.msra.mxu1 %v12303_v2 }
 0x3c8   : > { %v4187_v10 = vmax.f32 %v3950_v27, 0.0  ;;  %v4286_v18 = vpack.c.bf16 %v4186_v6, %v4184_v9  ;;  %v3954_v11 = vadd.f32 %v3953_v37, %v14364_v32 }
 0x3c9   : > { %v3955_v36 = vpop.f32.mrf.mxu0 }
 0x3ca   : > { %v4287_v44 = vpack.c.bf16 %v4187_v10, %v4185_v20  ;;  %v3956_v33 = vadd.f32 %v3955_v36, %v14361_v52  ;;  %v4188_v46 = vmax.f32 %v3954_v11, 0.0 }
 0x3cb   : > { %v3957_v50 = vpop.f32.mrf.mxu0 }
 0x3cc   : > { %v3958_v7 = vadd.f32 %v3957_v50, %v14364_v32  ;;  %4678 = vmatprep.mubr.bf16.mxu1 %v4287_v44  ;;  %v4189_v30 = vmax.f32 %v3956_v33, 0.0 }
 0x3cd   : > { %v3959_v55 = vpop.f32.mrf.mxu0  ;;  %4679 = vmatmul.mubr.bf16.gmra.mxu1 %v4286_v18 }
 0x3ce   : > { %v3960_v63 = vadd.f32 %v3959_v55, %v14361_v52  ;;  %v4190_v41 = vmax.f32 %v3958_v7, 0.0 }
 0x3cf   : > { %v3963_v26 = vpop.f32.mrf.mxu0 }
 0x3d0   : > { %v4191_v54 = vmax.f32 %v3960_v63, 0.0  ;;  %v4288_v61 = vpack.c.bf16 %v4190_v41, %v4188_v46  ;;  %v3964_v27 = vadd.f32 %v3963_v26, %v14364_v32 }
 0x3d1   : > { %v3965_v1 = vpop.f32.mrf.mxu0 }
 0x3d2   : > { %v4289_v48 = vpack.c.bf16 %v4191_v54, %v4189_v30  ;;  %v3966_v35 = vadd.f32 %v3965_v1, %v14361_v52  ;;  %v4192_v44 = vmax.f32 %v3964_v27, 0.0 }
 0x3d3   : > { %v3967_v17 = vpop.f32.mrf.mxu0 }
 0x3d4   : > { %v3968_v42 = vadd.f32 %v3967_v17, %v14364_v32  ;;  %4688 = vmatprep.mubr.bf16.mxu1 %v4289_v48  ;;  %v4193_v6 = vmax.f32 %v3966_v35, 0.0 }
 0x3d5   : > { %v3969_v25 = vpop.f32.mrf.mxu0  ;;  %4689 = vmatmul.mubr.bf16.gmra.mxu1 %v4288_v61  ;;  %v12308_v61 = vld [vmem:[%s16815_s4 + $0x414] ss:$8 sps:$4 sm:$0xff]  }
 0x3d6   : > { %v3970_v37 = vadd.f32 %v3969_v25, %v14361_v52  ;;  %v4194_v10 = vmax.f32 %v3968_v42, 0.0  ;;  %6042 = vmatprep.subr.bf16.mxu1 %v12308_v61  ;;  %v12309_v61 = vld [vmem:[%s16815_s4 + $0x400] ss:$8 sps:$4 sm:$0xff]  }
 0x3d7   : > { %v3973_v20 = vpop.f32.mrf.mxu0  ;;  %6043 = vmatpush1.bf16.msra.mxu1 %v12306_v47 }
 0x3d8   : > { %v4195_v36 = vmax.f32 %v3970_v37, 0.0  ;;  %v4290_v33 = vpack.c.bf16 %v4194_v10, %v4192_v44  ;;  %v3974_v63 = vadd.f32 %v3973_v20, %v14364_v32 }
 0x3d9   : > { %v3975_v9 = vpop.f32.mrf.mxu0 }
 0x3da   : > { %v4291_v50 = vpack.c.bf16 %v4195_v36, %v4193_v6  ;;  %v3976_v7 = vadd.f32 %v3975_v9, %v14361_v52  ;;  %v4196_v48 = vmax.f32 %v3974_v63, 0.0 }
 0x3db   : > { %v3977_v18 = vpop.f32.mrf.mxu0 }
 0x3dc   : > { %v3978_v55 = vadd.f32 %v3977_v18, %v14364_v32  ;;  %4698 = vmatprep.mubr.bf16.mxu1 %v4291_v50  ;;  %v4197_v41 = vmax.f32 %v3976_v7, 0.0 }
 0x3dd   : > { %v3979_v11 = vpop.f32.mrf.mxu0  ;;  %4699 = vmatmul.mubr.bf16.gmra.mxu1 %v4290_v33 }
 0x3de   : > { %v3980_v26 = vadd.f32 %v3979_v11, %v14361_v52  ;;  %v4198_v54 = vmax.f32 %v3978_v55, 0.0 }
 0x3df   : > { %v3983_v30 = vpop.f32.mrf.mxu0 }
 0x3e0   : > { %v4199_v1 = vmax.f32 %v3980_v26, 0.0  ;;  %v4292_v35 = vpack.c.bf16 %v4198_v54, %v4196_v48  ;;  %v3984_v37 = vadd.f32 %v3983_v30, %v14364_v32 }
 0x3e1   : > { %v3985_v46 = vpop.f32.mrf.mxu0 }
 0x3e2   : > { %v4293_v17 = vpack.c.bf16 %v4199_v1, %v4197_v41  ;;  %v3986_v42 = vadd.f32 %v3985_v46, %v14361_v52  ;;  %v4200_v50 = vmax.f32 %v3984_v37, 0.0 }
 0x3e3   : > { %v3987_v2 = vpop.f32.mrf.mxu0 }
 0x3e4   : > { %v3988_v25 = vadd.f32 %v3987_v2, %v14364_v32  ;;  %4708 = vmatprep.mubr.bf16.mxu1 %v4293_v17  ;;  %v4201_v10 = vmax.f32 %v3986_v42, 0.0 }
 0x3e5   : > { %v3989_v27 = vpop.f32.mrf.mxu0  ;;  %4709 = vmatmul.mubr.bf16.gmra.mxu1 %v4292_v35  ;;  %v12311_v35 = vld [vmem:[%s16815_s4 + $0x404] ss:$8 sps:$4 sm:$0xff]  }
 0x3e6   : > { %v3990_v20 = vadd.f32 %v3989_v27, %v14361_v52  ;;  %v4202_v36 = vmax.f32 %v3988_v25, 0.0  ;;  %6044 = vmatprep.subr.bf16.mxu1 %v12311_v35  ;;  %v12312_v35 = vld [vmem:[%s16815_s4 + $0x4f0] ss:$8 sps:$4 sm:$0xff]  }
 0x3e7   : > { %v3993_v6 = vpop.f32.mrf.mxu0  ;;  %6045 = vmatpush1.bf16.msra.mxu1 %v12309_v61 }
 0x3e8   : > { %v4203_v9 = vmax.f32 %v3990_v20, 0.0  ;;  %v4294_v7 = vpack.c.bf16 %v4202_v36, %v4200_v50  ;;  %v3994_v26 = vadd.f32 %v3993_v6, %v14364_v32 }
 0x3e9   : > { %v3995_v44 = vpop.f32.mrf.mxu0 }
 0x3ea   : > { %v4295_v18 = vpack.c.bf16 %v4203_v9, %v4201_v10  ;;  %v3996_v55 = vadd.f32 %v3995_v44, %v14361_v52  ;;  %v4204_v17 = vmax.f32 %v3994_v26, 0.0 }
 0x3eb   : > { %v3997_v33 = vpop.f32.mrf.mxu0 }
 0x3ec   : > { %v3998_v11 = vadd.f32 %v3997_v33, %v14364_v32  ;;  %4718 = vmatprep.mubr.bf16.mxu1 %v4295_v18  ;;  %v4205_v54 = vmax.f32 %v3996_v55, 0.0 }
 0x3ed   : > { %v3999_v63 = vpop.f32.mrf.mxu0  ;;  %4719 = vmatmul.mubr.bf16.gmra.mxu1 %v4294_v7 }
 0x3ee   : > { %v4000_v30 = vadd.f32 %v3999_v63, %v14361_v52  ;;  %v4206_v1 = vmax.f32 %v3998_v11, 0.0 }
 0x3ef   : > { %v4003_v41 = vpop.f32.mrf.mxu0 }
 0x3f0   : > { %v4207_v46 = vmax.f32 %v4000_v30, 0.0  ;;  %v4296_v42 = vpack.c.bf16 %v4206_v1, %v4204_v17  ;;  %v4004_v20 = vadd.f32 %v4003_v41, %v14364_v32 }
 0x3f1   : > { %v4005_v48 = vpop.f32.mrf.mxu0 }
 0x3f2   : > { %v4297_v2 = vpack.c.bf16 %v4207_v46, %v4205_v54  ;;  %v4006_v25 = vadd.f32 %v4005_v48, %v14361_v52  ;;  %v4208_v18 = vmax.f32 %v4004_v20, 0.0 }
 0x3f3   : > { %v4007_v47 = vpop.f32.mrf.mxu0 }
 0x3f4   : > { %v4008_v27 = vadd.f32 %v4007_v47, %v14364_v32  ;;  %4728 = vmatprep.mubr.bf16.mxu1 %v4297_v2  ;;  %v4209_v36 = vmax.f32 %v4006_v25, 0.0 }
 0x3f5   : > { %v4009_v37 = vpop.f32.mrf.mxu0  ;;  %4729 = vmatmul.mubr.bf16.gmra.mxu1 %v4296_v42  ;;  %v12314_v42 = vld [vmem:[%s16815_s4 + $0x4f4] ss:$8 sps:$4 sm:$0xff]  }
 0x3f6   : > { %v4010_v6 = vadd.f32 %v4009_v37, %v14361_v52  ;;  %v4210_v9 = vmax.f32 %v4008_v27, 0.0  ;;  %6046 = vmatprep.subr.bf16.mxu1 %v12314_v42  ;;  %v12315_v42 = vld [vmem:[%s16815_s4 + $0x4e0] ss:$8 sps:$4 sm:$0xff]  }
 0x3f7   : > { %v4013_v10 = vpop.f32.mrf.mxu0  ;;  %6047 = vmatpush2.bf16.msra.mxu1 %v12312_v35 }
 0x3f8   : > { %v4211_v44 = vmax.f32 %v4010_v6, 0.0  ;;  %v4298_v55 = vpack.c.bf16 %v4210_v9, %v4208_v18  ;;  %v4014_v30 = vadd.f32 %v4013_v10, %v14364_v32 }
 0x3f9   : > { %v4015_v50 = vpop.f32.mrf.mxu0 }
 0x3fa   : > { %v4299_v33 = vpack.c.bf16 %v4211_v44, %v4209_v36  ;;  %v4016_v11 = vadd.f32 %v4015_v50, %v14361_v52  ;;  %v4212_v2 = vmax.f32 %v4014_v30, 0.0 }
 0x3fb   : > { %v4017_v7 = vpop.f32.mrf.mxu0 }
 0x3fc   : > { %v4018_v63 = vadd.f32 %v4017_v7, %v14364_v32  ;;  %4738 = vmatprep.mubr.bf16.mxu1 %v4299_v33  ;;  %v4213_v1 = vmax.f32 %v4016_v11, 0.0 }
 0x3fd   : > { %v4019_v26 = vpop.f32.mrf.mxu0  ;;  %4739 = vmatmul.mubr.bf16.gmra.mxu1 %v4298_v55 }
 0x3fe   : > { %v4020_v41 = vadd.f32 %v4019_v26, %v14361_v52  ;;  %v4214_v46 = vmax.f32 %v4018_v63, 0.0 }
 0x3ff   : > { %v4023_v54 = vpop.f32.mrf.mxu0 }
 0x400   : > { %v4215_v48 = vmax.f32 %v4020_v41, 0.0  ;;  %v4300_v25 = vpack.c.bf16 %v4214_v46, %v4212_v2  ;;  %v4024_v6 = vadd.f32 %v4023_v54, %v14364_v32 }
 0x401   : > { %v4025_v17 = vpop.f32.mrf.mxu0 }
 0x402   : > { %v4301_v47 = vpack.c.bf16 %v4215_v48, %v4213_v1  ;;  %v4026_v27 = vadd.f32 %v4025_v17, %v14361_v52  ;;  %v4216_v33 = vmax.f32 %v4024_v6, 0.0 }
 0x403   : > { %v4027_v61 = vpop.f32.mrf.mxu0 }
 0x404   : > { %v4028_v37 = vadd.f32 %v4027_v61, %v14364_v32  ;;  %4748 = vmatprep.mubr.bf16.mxu1 %v4301_v47  ;;  %v4217_v9 = vmax.f32 %v4026_v27, 0.0 }
 0x405   : > { %v4029_v20 = vpop.f32.mrf.mxu0  ;;  %4749 = vmatmul.mubr.bf16.gmra.mxu1 %v4300_v25  ;;  %v12317_v25 = vld [vmem:[%s16815_s4 + $0x4e4] ss:$8 sps:$4 sm:$0xff]  }
 0x406   : > { %v4030_v10 = vadd.f32 %v4029_v20, %v14361_v52  ;;  %v4218_v44 = vmax.f32 %v4028_v37, 0.0  ;;  %6048 = vmatprep.subr.bf16.mxu1 %v12317_v25  ;;  %v12318_v25 = vld [vmem:[%s16815_s4 + $0x4d0] ss:$8 sps:$4 sm:$0xff]  }
 0x407   : > { %v4033_v36 = vpop.f32.mrf.mxu0  ;;  %6049 = vmatpush2.bf16.msra.mxu1 %v12315_v42 }
 0x408   : > { %v4219_v50 = vmax.f32 %v4030_v10, 0.0  ;;  %v4302_v11 = vpack.c.bf16 %v4218_v44, %v4216_v33  ;;  %v4034_v41 = vadd.f32 %v4033_v36, %v14364_v32 }
 0x409   : > { %v4035_v18 = vpop.f32.mrf.mxu0 }
 0x40a   : > { %v4303_v7 = vpack.c.bf16 %v4219_v50, %v4217_v9  ;;  %v4036_v63 = vadd.f32 %v4035_v18, %v14361_v52  ;;  %v4220_v47 = vmax.f32 %v4034_v41, 0.0 }
 0x40b   : > { %v4037_v55 = vpop.f32.mrf.mxu0 }
 0x40c   : > { %v4038_v26 = vadd.f32 %v4037_v55, %v14364_v32  ;;  %4758 = vmatprep.mubr.bf16.mxu1 %v4303_v7  ;;  %v4221_v46 = vmax.f32 %v4036_v63, 0.0 }
 0x40d   : > { %v4039_v30 = vpop.f32.mrf.mxu0  ;;  %4759 = vmatmul.mubr.bf16.gmra.mxu1 %v4302_v11 }
 0x40e   : > { %v4040_v54 = vadd.f32 %v4039_v30, %v14361_v52  ;;  %v4222_v48 = vmax.f32 %v4038_v26, 0.0 }
 0x40f   : > { %v4043_v1 = vpop.f32.mrf.mxu0 }
 0x410   : > { %v4223_v17 = vmax.f32 %v4040_v54, 0.0  ;;  %v4304_v27 = vpack.c.bf16 %v4222_v48, %v4220_v47  ;;  %v4044_v10 = vadd.f32 %v4043_v1, %v14364_v32 }
 0x411   : > { %v4045_v2 = vpop.f32.mrf.mxu0 }
 0x412   : > { %v4305_v61 = vpack.c.bf16 %v4223_v17, %v4221_v46  ;;  %v4046_v37 = vadd.f32 %v4045_v2, %v14361_v52  ;;  %v4224_v7 = vmax.f32 %v4044_v10, 0.0 }
 0x413   : > { %v4047_v35 = vpop.f32.mrf.mxu0 }
 0x414   : > { %v4048_v20 = vadd.f32 %v4047_v35, %v14364_v32  ;;  %4768 = vmatprep.mubr.bf16.mxu1 %v4305_v61  ;;  %v4225_v44 = vmax.f32 %v4046_v37, 0.0 }
 0x415   : > { %v4049_v6 = vpop.f32.mrf.mxu0  ;;  %4769 = vmatmul.mubr.bf16.gmra.mxu1 %v4304_v27  ;;  %v12320_v27 = vld [vmem:[%s16815_s4 + $0x4d4] ss:$8 sps:$4 sm:$0xff]  }
 0x416   : > { %v4050_v36 = vadd.f32 %v4049_v6, %v14361_v52  ;;  %v4226_v50 = vmax.f32 %v4048_v20, 0.0  ;;  %6050 = vmatprep.subr.bf16.mxu1 %v12320_v27 }
 0x417   : > { %v4053_v9 = vpop.f32.mrf.mxu0  ;;  %6051 = vmatpush2.bf16.msra.mxu1 %v12318_v25 }
 0x418   : > { %v4227_v18 = vmax.f32 %v4050_v36, 0.0  ;;  %v4306_v63 = vpack.c.bf16 %v4226_v50, %v4224_v7  ;;  %v4054_v54 = vadd.f32 %v4053_v9, %v14364_v32 }
 0x419   : > { %v4055_v33 = vpop.f32.mrf.mxu0 }
 0x41a   : > { %v4307_v55 = vpack.c.bf16 %v4227_v18, %v4225_v44  ;;  %v4056_v26 = vadd.f32 %v4055_v33, %v14361_v52  ;;  %v4228_v61 = vmax.f32 %v4054_v54, 0.0 }
 0x41b   : > { %v4057_v11 = vpop.f32.mrf.mxu0 }
 0x41c   : > { %v4058_v30 = vadd.f32 %v4057_v11, %v14364_v32  ;;  %4778 = vmatprep.mubr.bf16.mxu1 %v4307_v55  ;;  %v4229_v48 = vmax.f32 %v4056_v26, 0.0 }
 0x41d   : > { %v4059_v41 = vpop.f32.mrf.mxu0  ;;  %4779 = vmatmul.mubr.bf16.gmra.mxu1 %v4306_v63  ;;  %v4869_v63 = vld [vmem:[%s16818_s7] sm:$0x3] }
 0x41e   : > { %v4060_v1 = vadd.f32 %v4059_v41, %v14361_v52  ;;  %v4230_v17 = vmax.f32 %v4058_v30, 0.0 }
 0x41f   : > { %v4063_v46 = vpop.f32.mrf.mxu0 }
 0x420   : > { %v4231_v2 = vmax.f32 %v4060_v1, 0.0  ;;  %v4308_v37 = vpack.c.bf16 %v4230_v17, %v4228_v61  ;;  %v4064_v36 = vadd.f32 %v4063_v46, %v14364_v32  ;;  %v14600_v61 = vrot.slane %v4869_v63, %v13337_v56 }
 0x421   : > { %v4065_v47 = vpop.f32.mrf.mxu0 }
 0x422   : > { %v4309_v35 = vpack.c.bf16 %v4231_v2, %v4229_v48  ;;  %v4066_v20 = vadd.f32 %v4065_v47, %v14361_v52  ;;  %v4232_v11 = vmax.f32 %v4064_v36, 0.0  ;;  %v14596_v48 = vrot.slane %v4869_v63, %v13342_v58 }
 0x423   : > { %v4067_v42 = vpop.f32.mrf.mxu0 }
 0x424   : > { %v4068_v6 = vadd.f32 %v4067_v42, %v14364_v32  ;;  %4788 = vmatprep.mubr.bf16.mxu1 %v4309_v35  ;;  %v4233_v50 = vmax.f32 %v4066_v20, 0.0 }
 0x425   : > { %v4069_v10 = vpop.f32.mrf.mxu0  ;;  %v4550_v44 = vpop.f32.mrf.mxu1  ;;  %4789 = vmatmul.mubr.bf16.gmra.mxu1 %v4308_v37 }
 0x426   : > { %v4070_v9 = vadd.f32 %v4069_v10, %v14361_v52  ;;  %v4234_v18 = vmax.f32 %v4068_v6, 0.0  ;;  %v4551_v47 = vadd.f32 %v4550_v44, %v13500_v28 }
 0x427   : > { %v4073_v7 = vpop.f32.mrf.mxu0  ;;  %v4552_v55 = vpop.f32.mrf.mxu1 }
 0x428   : > { %v4235_v33 = vmax.f32 %v4070_v9, 0.0  ;;  %v4310_v1 = vpack.c.bf16 %v4234_v18, %v4232_v11  ;;  %v4553_v46 = vadd.f32 %v4552_v55, %v13506_v38  ;;  %v4074_v38 = vadd.f32 %v4073_v7, %v14364_v32 }
 0x429   : > { %v4075_v26 = vpop.f32.mrf.mxu0  ;;  %v4554_v30 = vpop.f32.mrf.mxu1  ;;  %v4881_v9 = vadd.f32 %v14600_v61, %v4551_v47 }
 0x42a   : > { %v4311_v41 = vpack.c.bf16 %v4235_v33, %v4233_v50  ;;  %v4555_v54 = vadd.f32 %v4554_v30, %v13508_v43  ;;  %v4076_v43 = vadd.f32 %v4075_v26, %v14361_v52  ;;  %v4882_v6 = vadd.f32 %v14596_v48, %v4553_v46  ;;  %v12321_v26 = vld [vmem:[%s16815_s4 + $0x4c0] ss:$8 sps:$4 sm:$0xff]   ;;  %v12323_v30 = vld [vmem:[%s16815_s4 + $0x4c4] ss:$8 sps:$4 sm:$0xff]  }
 0x42b   : > { %v4077_v17 = vpop.f32.mrf.mxu0  ;;  %v4556_v2 = vpop.f32.mrf.mxu1  ;;  %v4236_v11 = vmax.f32 %v4074_v38, 0.0  ;;  %6052 = vmatprep.subr.bf16.mxu1 %v12323_v30 }
 0x42c   : > { %4798 = vmatprep.mubr.bf16.mxu1 %v4311_v41  ;;  %v4078_v35 = vadd.f32 %v4077_v17, %v14364_v32  ;;  %v4557_v42 = vadd.f32 %v4556_v2, %v13515_v53  ;;  %v4883_v37 = vadd.f32 %v14600_v61, %v4555_v54  ;;  %v4237_v50 = vmax.f32 %v4076_v43, 0.0  ;;  %6053 = vmatpush2.bf16.msra.mxu1 %v12321_v26 }
 0x42d   : > { %v4079_v25 = vpop.f32.mrf.mxu0  ;;  %v4560_v27 = vpop.f32.mrf.mxu1  ;;  %4799 = vmatmul.mubr.bf16.gmra.mxu1 %v4310_v1 }
 0x42e   : > { %v4884_v20 = vadd.f32 %v14596_v48, %v4557_v42  ;;  %v4080_v28 = vadd.f32 %v4079_v25, %v14361_v52  ;;  %v4238_v53 = vmax.f32 %v4078_v35, 0.0  ;;  %v5009_v7 = vpack.c.bf16 %v4883_v37, %v4881_v9 }
 0x42f   : > { %v4083_v10 = vpop.f32.mrf.mxu0  ;;  %v4562_v36 = vpop.f32.mrf.mxu1  ;;  %v4561_v41 = vadd.f32 %v4560_v27, %v13524_v3 }
 0x430   : > { %v4239_v44 = vmax.f32 %v4080_v28, 0.0  ;;  %v5010_v55 = vpack.c.bf16 %v4884_v20, %v4882_v6  ;;  %v4563_v54 = vadd.f32 %v4562_v36, %v13534_v12  ;;  %v4312_v2 = vpack.c.bf16 %v4238_v53, %v4236_v11 }
 0x431   : > { %v4085_v18 = vpop.f32.mrf.mxu0  ;;  %v4564_v33 = vpop.f32.mrf.mxu1  ;;  %v4084_v3 = vadd.f32 %v4083_v10, %v14364_v32  ;;  %v4885_v20 = vadd.f32 %v14600_v61, %v4561_v41 }
 0x432   : > { %v4565_v63 = vadd.f32 %v4564_v33, %v13536_v16  ;;  %5311 = vmatprep.mubr.bf16.mxu0 %v5010_v55  ;;  %v4313_v17 = vpack.c.bf16 %v4239_v44, %v4237_v50  ;;  %v4086_v35 = vadd.f32 %v4085_v18, %v14361_v52  ;;  %v4886_v38 = vadd.f32 %v14596_v48, %v4563_v54 }
 0x433   : > { %v4087_v1 = vpop.f32.mrf.mxu0  ;;  %v4566_v46 = vpop.f32.mrf.mxu1  ;;  %5312 = vmatmul.mubr.bf16.vlgmr.msra.gmra.mxu0 %v5009_v7  ;;  %v4240_v10 = vmax.f32 %v4084_v3, 0.0 }
 0x434   : > { %v4088_v47 = vadd.f32 %v4087_v1, %v14364_v32  ;;  %v4567_v16 = vadd.f32 %v4566_v46, %v13541_v23  ;;  %4808 = vmatprep.mubr.bf16.mxu1 %v4313_v17  ;;  %v4887_v12 = vadd.f32 %v14600_v61, %v4565_v63  ;;  %v4241_v36 = vmax.f32 %v4086_v35, 0.0 }
 0x435   : > { %v4089_v42 = vpop.f32.mrf.mxu0  ;;  %v4570_v43 = vpop.f32.mrf.mxu1  ;;  %4809 = vmatmul.mubr.bf16.gmra.mxu1 %v4312_v2 }
 0x436   : > { %v4888_v25 = vadd.f32 %v14596_v48, %v4567_v16  ;;  %v4090_v27 = vadd.f32 %v4089_v42, %v14361_v52  ;;  %v4242_v28 = vmax.f32 %v4088_v47, 0.0  ;;  %v5011_v50 = vpack.c.bf16 %v4887_v12, %v4885_v20  ;;  %v12326_v20 = vld [vmem:[%s16815_s4 + $0x4b4] ss:$8 sps:$4 sm:$0xff]  }
 0x437   : > { %v4093_v23 = vpop.f32.mrf.mxu0  ;;  %v4572_v37 = vpop.f32.mrf.mxu1  ;;  %v4571_v26 = vadd.f32 %v4570_v43, %v13544_v29  ;;  %6054 = vmatprep.subr.bf16.mxu1 %v12326_v20 }
 0x438   : > { %v4243_v6 = vmax.f32 %v4090_v27, 0.0  ;;  %v5012_v44 = vpack.c.bf16 %v4888_v25, %v4886_v38  ;;  %v4573_v33 = vadd.f32 %v4572_v37, %v13548_v39  ;;  %v4314_v63 = vpack.c.bf16 %v4242_v28, %v4240_v10  ;;  %v12324_v37 = vld [vmem:[%s16815_s4 + $0x4b0] ss:$8 sps:$4 sm:$0xff]  }
 0x439   : > { %v4095_v9 = vpop.f32.mrf.mxu0  ;;  %v4574_v53 = vpop.f32.mrf.mxu1  ;;  %6055 = vmatpush2.bf16.msra.mxu1 %v12324_v37 }
 0x43a   : > { %v4575_v18 = vadd.f32 %v4574_v53, %v13550_v49  ;;  %5321 = vmatprep.mubr.bf16.mxu0 %v5012_v44  ;;  %v4315_v7 = vpack.c.bf16 %v4243_v6, %v4241_v36  ;;  %v4096_v54 = vadd.f32 %v4095_v9, %v14361_v52  ;;  %v4094_v49 = vadd.f32 %v4093_v23, %v14364_v32 }
 0x43b   : > { %v4097_v55 = vpop.f32.mrf.mxu0  ;;  %v4576_v11 = vpop.f32.mrf.mxu1  ;;  %5322 = vmatmul.mubr.bf16.gmra.mxu0 %v5011_v50  ;;  %v4890_v29 = vadd.f32 %v14596_v48, %v4573_v33 }
 0x43c   : > { %v4098_v30 = vadd.f32 %v4097_v55, %v14364_v32  ;;  %v4577_v41 = vadd.f32 %v4576_v11, %v13555_v60  ;;  %4818 = vmatprep.mubr.bf16.mxu1 %v4315_v7  ;;  %v4891_v39 = vadd.f32 %v14600_v61, %v4575_v18  ;;  %v4889_v60 = vadd.f32 %v14600_v61, %v4571_v26 }
 0x43d   : > { %v4099_v1 = vpop.f32.mrf.mxu0  ;;  %v4580_v46 = vpop.f32.mrf.mxu1  ;;  %4819 = vmatmul.mubr.bf16.gmra.mxu1 %v4314_v63  ;;  %v4245_v43 = vmax.f32 %v4096_v54, 0.0  ;;  %v4244_v27 = vmax.f32 %v4094_v49, 0.0 }
 0x43e   : > { %v4892_v17 = vadd.f32 %v14596_v48, %v4577_v41  ;;  %v4100_v2 = vadd.f32 %v4099_v1, %v14361_v52  ;;  %v4246_v35 = vmax.f32 %v4098_v30, 0.0  ;;  %v5013_v38 = vpack.c.bf16 %v4891_v39, %v4889_v60 }
 0x43f   : > { %v4103_v47 = vpop.f32.mrf.mxu0  ;;  %v4582_v16 = vpop.f32.mrf.mxu1  ;;  %v4581_v28 = vadd.f32 %v4580_v46, %v13558_v4 }
 0x440   : > { %v4247_v42 = vmax.f32 %v4100_v2, 0.0  ;;  %v5014_v25 = vpack.c.bf16 %v4892_v17, %v4890_v29  ;;  %v4583_v6 = vadd.f32 %v4582_v16, %v13562_v13  ;;  %v4316_v44 = vpack.c.bf16 %v4246_v35, %v4244_v27 }
 0x441   : > { %v4105_v3 = vpop.f32.mrf.mxu0  ;;  %v4584_v12 = vpop.f32.mrf.mxu1  ;;  %v4104_v4 = vadd.f32 %v4103_v47, %v14364_v32  ;;  %v4893_v26 = vadd.f32 %v14600_v61, %v4581_v28 }
 0x442   : > { %v4585_v23 = vadd.f32 %v4584_v12, %v13570_v22  ;;  %5331 = vmatprep.mubr.bf16.mxu0 %v5014_v25  ;;  %v4317_v53 = vpack.c.bf16 %v4247_v42, %v4245_v43  ;;  %v4106_v50 = vadd.f32 %v4105_v3, %v14361_v52  ;;  %v4894_v7 = vadd.f32 %v14596_v48, %v4583_v6 }
 0x443   : > { %v4107_v36 = vpop.f32.mrf.mxu0  ;;  %v4586_v9 = vpop.f32.mrf.mxu1  ;;  %5332 = vmatmul.mubr.bf16.gmra.mxu0 %v5013_v38  ;;  %v4248_v39 = vmax.f32 %v4104_v4, 0.0 }
 0x444   : > { %v4108_v10 = vadd.f32 %v4107_v36, %v14364_v32  ;;  %v4587_v22 = vadd.f32 %v4586_v9, %v13575_v31  ;;  %4828 = vmatprep.mubr.bf16.mxu1 %v4317_v53  ;;  %v4895_v13 = vadd.f32 %v14600_v61, %v4585_v23  ;;  %v4249_v54 = vmax.f32 %v4106_v50, 0.0  ;;  %v12327_v36 = vld [vmem:[%s16815_s4 + $0x570] ss:$8 sps:$4 sm:$0xff]   ;;  %v12329_v9 = vld [vmem:[%s16815_s4 + $0x574] ss:$8 sps:$4 sm:$0xff]  }
 0x445   : > { %v4109_v18 = vpop.f32.mrf.mxu0  ;;  %v4590_v33 = vpop.f32.mrf.mxu1  ;;  %4829 = vmatmul.mubr.bf16.gmra.mxu1 %v4316_v44  ;;  %6781 = vmatprep.subr.bf16.mxu0 %v12329_v9  ;;  %v12333_v9 = vld [vmem:[%s16815_s4 + $0x560] ss:$8 sps:$4 sm:$0xff]  }
 0x446   : > { %v4896_v55 = vadd.f32 %v14596_v48, %v4587_v22  ;;  %v4110_v11 = vadd.f32 %v4109_v18, %v14361_v52  ;;  %v4250_v30 = vmax.f32 %v4108_v10, 0.0  ;;  %v5015_v17 = vpack.c.bf16 %v4895_v13, %v4893_v26  ;;  %v12330_v13 = vld [vmem:[%s16815_s4 + $0x4a0] ss:$8 sps:$4 sm:$0xff]   ;;  %6782 = vmatpush1.bf16.msra.mxu0 %v12327_v36 }
 0x447   : > { %v4113_v31 = vpop.f32.mrf.mxu0  ;;  %v4592_v63 = vpop.f32.mrf.mxu1  ;;  %v4591_v42 = vadd.f32 %v4590_v33, %v13578_v40 }
 0x448   : > { %v4251_v41 = vmax.f32 %v4110_v11, 0.0  ;;  %v5016_v49 = vpack.c.bf16 %v4896_v55, %v4894_v7  ;;  %v4593_v29 = vadd.f32 %v4592_v63, %v13582_v59  ;;  %v4318_v35 = vpack.c.bf16 %v4250_v30, %v4248_v39  ;;  %v12332_v55 = vld [vmem:[%s16815_s4 + $0x4a4] ss:$8 sps:$4 sm:$0xff]  }
 0x449   : > { %v4115_v1 = vpop.f32.mrf.mxu0  ;;  %v4594_v46 = vpop.f32.mrf.mxu1  ;;  %v4114_v12 = vadd.f32 %v4113_v31, %v14364_v32  ;;  %v4897_v28 = vadd.f32 %v14600_v61, %v4591_v42  ;;  %6056 = vmatprep.subr.bf16.mxu1 %v12332_v55  ;;  %v16926_v42 = vld [vmem:[#allocation3_spill] sm:$0xff] }
 0x44a   : > { %v4595_v2 = vadd.f32 %v4594_v46, %v13584_v5  ;;  %5341 = vmatprep.mubr.bf16.mxu0 %v5016_v49  ;;  %v4319_v60 = vpack.c.bf16 %v4251_v41, %v4249_v54  ;;  %v4116_v25 = vadd.f32 %v4115_v1, %v14361_v52  ;;  %v4898_v40 = vadd.f32 %v14596_v48, %v4593_v29 }
 0x44b   : > { %v4117_v47 = vpop.f32.mrf.mxu0  ;;  %v4596_v16 = vpop.f32.mrf.mxu1  ;;  %5342 = vmatmul.mubr.bf16.gmra.mxu0 %v5015_v17  ;;  %v4252_v53 = vmax.f32 %v4114_v12, 0.0  ;;  %6057 = vmatpush2.bf16.msra.mxu1 %v12330_v13  ;;  %v12338_v13 = vld [vmem:[%s16815_s4 + $0x494] ss:$8 sps:$4 sm:$0xff]  }
 0x44c   : > { %v4118_v43 = vadd.f32 %v4117_v47, %v14364_v32  ;;  %v4597_v3 = vadd.f32 %v4596_v16, %v13589_v14  ;;  %4838 = vmatprep.mubr.bf16.mxu1 %v4319_v60  ;;  %v4899_v59 = vadd.f32 %v14600_v61, %v4595_v2  ;;  %v4253_v44 = vmax.f32 %v4116_v25, 0.0  ;;  %6058 = vmatprep.subr.bf16.mxu1 %v12338_v13 }
 0x44d   : > { %v4119_v5 = vpop.f32.mrf.mxu0  ;;  %v4600_v27 = vpop.f32.mrf.mxu1  ;;  %4839 = vmatmul.mubr.bf16.gmra.mxu1 %v4318_v35 }
 0x44e   : > { %v4900_v38 = vadd.f32 %v14596_v48, %v4597_v3  ;;  %v4120_v23 = vadd.f32 %v4119_v5, %v14361_v52  ;;  %v4254_v37 = vmax.f32 %v4118_v43, 0.0  ;;  %v5017_v18 = vpack.c.bf16 %v4899_v59, %v4897_v28  ;;  %v16927_v3 = vld [vmem:[#allocation4_spill] sm:$0xff] }
 0x44f   : > { %v4123_v20 = vpop.f32.mrf.mxu0  ;;  %v4602_v14 = vpop.f32.mrf.mxu1  ;;  %v4601_v7 = vadd.f32 %v4600_v27, %v13592_v21 }
 0x450   : > { %v4255_v6 = vmax.f32 %v4120_v23, 0.0  ;;  %v5018_v50 = vpack.c.bf16 %v4900_v38, %v4898_v40  ;;  %v4603_v33 = vadd.f32 %v4602_v14, %v13596_v34  ;;  %v4320_v11 = vpack.c.bf16 %v4254_v37, %v4252_v53  ;;  %v16929_v38 = vld [vmem:[#allocation5_spill] sm:$0xff]  ;;  %v12335_v53 = vld [vmem:[%s16815_s4 + $0x564] ss:$8 sps:$4 sm:$0xff]  }
 0x451   : > { %v4125_v10 = vpop.f32.mrf.mxu0  ;;  %v4604_v22 = vpop.f32.mrf.mxu1  ;;  %v4124_v41 = vadd.f32 %v4123_v20, %v14364_v32  ;;  %v4901_v17 = vadd.f32 %v14600_v61, %v4601_v7  ;;  %6783 = vmatprep.subr.bf16.mxu0 %v12335_v53 }
 0x452   : > { %v4605_v4 = vadd.f32 %v4604_v22, %v13604_v57  ;;  %5351 = vmatprep.mubr.bf16.mxu0 %v5018_v50  ;;  %v4321_v26 = vpack.c.bf16 %v4255_v6, %v4253_v44  ;;  %v4126_v34 = vadd.f32 %v4125_v10, %v14361_v52  ;;  %v4902_v21 = vadd.f32 %v14596_v48, %v4603_v33  ;;  %v16930_v22 = vld [vmem:[#allocation7_spill] sm:$0xff] }
 0x453   : > { %v4127_v31 = vpop.f32.mrf.mxu0  ;;  %v4606_v63 = vpop.f32.mrf.mxu1  ;;  %5352 = vmatmul.mubr.bf16.gmra.mxu0 %v5017_v18  ;;  %v4256_v16 = vmax.f32 %v4124_v41, 0.0  ;;  %v16931_v18 = vld [vmem:[#allocation8_spill] sm:$0xff] }
 0x454   : > { %v4128_v57 = vadd.f32 %v4127_v31, %v14364_v32  ;;  %v4607_v30 = vadd.f32 %v4606_v63, %v13609_v8  ;;  %4848 = vmatprep.mubr.bf16.mxu1 %v4321_v26  ;;  %v4903_v46 = vadd.f32 %v14600_v61, %v4605_v4  ;;  %v4257_v2 = vmax.f32 %v4126_v34, 0.0  ;;  %v12336_v4 = vld [vmem:[%s16815_s4 + $0x490] ss:$8 sps:$4 sm:$0xff]   ;;  %6784 = vmatpush1.bf16.msra.mxu0 %v12333_v9 }
 0x455   : > { %v4129_v54 = vpop.f32.mrf.mxu0  ;;  %v4610_v1 = vpop.f32.mrf.mxu1  ;;  %4849 = vmatmul.mubr.bf16.gmra.mxu1 %v4320_v11  ;;  %v16932_v11 = vld [vmem:[#allocation6_spill] sm:$0xff]  ;;  %v16933_v31 = vld [vmem:[#allocation9_spill] sm:$0xff] }
 0x456   : > { %v4904_v49 = vadd.f32 %v14596_v48, %v4607_v30  ;;  %v4130_v39 = vadd.f32 %v4129_v54, %v14361_v52  ;;  %v4258_v29 = vmax.f32 %v4128_v57, 0.0  ;;  %v5019_v35 = vpack.c.bf16 %v4903_v46, %v4901_v17  ;;  %v16928_v52 = vld [vmem:[#allocation2_spill] sm:$0xff]  ;;  %6059 = vmatpush2.bf16.msra.mxu1 %v12336_v4  ;;  %v16935_v17 = vld [vmem:[#allocation12_spill] sm:$0xff]  ;;  %v16941_v9 = vld [vmem:[#allocation17_spill] sm:$0xff] }
 0x457   : > { %v4612_v8 = vpop.f32.mrf.mxu1  ;;  %v4611_v59 = vadd.f32 %v4610_v1, %v16928_v52 }
 0x458   : > { %v4259_v47 = vmax.f32 %v4130_v39, 0.0  ;;  %v5020_v32 = vpack.c.bf16 %v4904_v49, %v4902_v21  ;;  %v4613_v43 = vadd.f32 %v4612_v8, %v16926_v42  ;;  %v4322_v27 = vpack.c.bf16 %v4258_v29, %v4256_v16  ;;  %v16934_v49 = vld [vmem:[#allocation11_spill] sm:$0xff]  ;;  %v16936_v29 = vld [vmem:[#allocation10_spill] sm:$0xff] }
 0x459   : > { %v4614_v60 = vpop.f32.mrf.mxu1  ;;  %v4905_v6 = vadd.f32 %v14600_v61, %v4611_v59 }
 0x45a   : > { %v4615_v12 = vadd.f32 %v4614_v60, %v16927_v3  ;;  %5361 = vmatprep.mubr.bf16.mxu0 %v5020_v32  ;;  %v4323_v25 = vpack.c.bf16 %v4259_v47, %v4257_v2  ;;  %v4906_v37 = vadd.f32 %v14596_v48, %v4613_v43  ;;  %v16937_v32 = vld [vmem:[#allocation13_spill] sm:$0xff] }
 0x45b   : > { %v4616_v5 = vpop.f32.mrf.mxu1  ;;  %5362 = vmatmul.mubr.bf16.gmra.mxu0 %v5019_v35 }
 0x45c   : > { %v4617_v23 = vadd.f32 %v4616_v5, %v16929_v38  ;;  %4858 = vmatprep.mubr.bf16.mxu1 %v4323_v25  ;;  %v4907_v20 = vadd.f32 %v14600_v61, %v4615_v12  ;;  %v12339_v5 = vld [vmem:[%s16815_s4 + $0x550] ss:$8 sps:$4 sm:$0xff]   ;;  %v16938_v38 = vld [vmem:[#allocation15_spill] sm:$0xff] }
 0x45d   : > { %v4620_v40 = vpop.f32.mrf.mxu1  ;;  %4859 = vmatmul.mubr.bf16.gmra.mxu1 %v4322_v27  ;;  %v12341_v27 = vld [vmem:[%s16815_s4 + $0x554] ss:$8 sps:$4 sm:$0xff]  }
 0x45e   : > { %v4908_v14 = vadd.f32 %v14596_v48, %v4617_v23  ;;  %v5021_v10 = vpack.c.bf16 %v4907_v20, %v4905_v6  ;;  %v4621_v7 = vadd.f32 %v4620_v40, %v16932_v11  ;;  %v16939_v40 = vld [vmem:[#allocation16_spill] sm:$0xff]  ;;  %6785 = vmatprep.subr.bf16.mxu0 %v12341_v27  ;;  %v12342_v20 = vld [vmem:[%s16815_s4 + $0x480] ss:$8 sps:$4 sm:$0xff]  }
 0x45f   : > { %v4622_v28 = vpop.f32.mrf.mxu1  ;;  %6786 = vmatpush1.bf16.msra.mxu0 %v12339_v5  ;;  %v16940_v6 = vld [vmem:[#allocation14_spill] sm:$0xff]  ;;  %v16942_v11 = vld [vmem:[#allocation19_spill] sm:$0xff] }
 0x460   : > { %v5022_v36 = vpack.c.bf16 %v4908_v14, %v4906_v37  ;;  %v4623_v50 = vadd.f32 %v4622_v28, %v16930_v22  ;;  %v4909_v54 = vadd.f32 %v14600_v61, %v4621_v7  ;;  %v12344_v14 = vld [vmem:[%s16815_s4 + $0x484] ss:$8 sps:$4 sm:$0xff]  }
 0x461   : > { %v4624_v44 = vpop.f32.mrf.mxu1  ;;  %6060 = vmatprep.subr.bf16.mxu1 %v12344_v14  ;;  %v16950_v14 = vld [vmem:[#allocation27_spill] sm:$0xff] }
 0x462   : > { %v4625_v33 = vadd.f32 %v4624_v44, %v16931_v18  ;;  %5371 = vmatprep.mubr.bf16.mxu0 %v5022_v36  ;;  %v4910_v34 = vadd.f32 %v14596_v48, %v4623_v50  ;;  %6061 = vmatpush2.bf16.msra.mxu1 %v12342_v20 }
 0x463   : > { %v4626_v55 = vpop.f32.mrf.mxu1  ;;  %5372 = vmatmul.mubr.bf16.gmra.mxu0 %v5021_v10 }
 0x464   : > { %v4627_v63 = vadd.f32 %v4626_v55, %v16933_v31  ;;  %v4911_v57 = vadd.f32 %v14600_v61, %v4625_v33  ;;  %v16943_v31 = vld [vmem:[#allocation20_spill] sm:$0xff] }
 0x465   : > { %v4630_v26 = vpop.f32.mrf.mxu1 }
 0x466   : > { %v4912_v30 = vadd.f32 %v14596_v48, %v4627_v63  ;;  %v5023_v46 = vpack.c.bf16 %v4911_v57, %v4909_v54  ;;  %v4631_v47 = vadd.f32 %v4630_v26, %v16936_v29  ;;  %v12347_v29 = vld [vmem:[%s16815_s4 + $0x544] ss:$8 sps:$4 sm:$0xff]  }
 0x467   : > { %v4632_v41 = vpop.f32.mrf.mxu1  ;;  %6787 = vmatprep.subr.bf16.mxu0 %v12347_v29 }
 0x468   : > { %v5024_v1 = vpack.c.bf16 %v4912_v30, %v4910_v34  ;;  %v4633_v39 = vadd.f32 %v4632_v41, %v16934_v49  ;;  %v4913_v12 = vadd.f32 %v14600_v61, %v4631_v47  ;;  %v16944_v34 = vld [vmem:[#allocation18_spill] sm:$0xff]  ;;  %v16945_v30 = vld [vmem:[#allocation21_spill] sm:$0xff] }
 0x469   : > { %v4634_v21 = vpop.f32.mrf.mxu1 }
 0x46a   : > { %v4635_v8 = vadd.f32 %v4634_v21, %v16935_v17  ;;  %5381 = vmatprep.mubr.bf16.mxu0 %v5024_v1  ;;  %v4914_v35 = vadd.f32 %v14596_v48, %v4633_v39 }
 0x46b   : > { %v4636_v2 = vpop.f32.mrf.mxu1  ;;  %5382 = vmatmul.mubr.bf16.gmra.mxu0 %v5023_v46 }
 0x46c   : > { %v4637_v16 = vadd.f32 %v4636_v2, %v16937_v32  ;;  %v4915_v42 = vadd.f32 %v14600_v61, %v4635_v8  ;;  %v12345_v2 = vld [vmem:[%s16815_s4 + $0x540] ss:$8 sps:$4 sm:$0xff]  }
 0x46d   : > { %v4640_v60 = vpop.f32.mrf.mxu1  ;;  %v16946_v32 = vld [vmem:[#allocation23_spill] sm:$0xff]  ;;  %6788 = vmatpush1.bf16.msra.mxu0 %v12345_v2 }
 0x46e   : > { %v4916_v43 = vadd.f32 %v14596_v48, %v4637_v16  ;;  %v5025_v59 = vpack.c.bf16 %v4915_v42, %v4913_v12  ;;  %v4641_v36 = vadd.f32 %v4640_v60, %v16940_v6  ;;  %v16947_v60 = vld [vmem:[#allocation24_spill] sm:$0xff]  ;;  %v16949_v12 = vld [vmem:[#allocation25_spill] sm:$0xff] }
 0x46f   : > { %v4642_v3 = vpop.f32.mrf.mxu1  ;;  %v16951_v6 = vld [vmem:[#allocation28_spill] sm:$0xff] }
 0x470   : > { %v5026_v25 = vpack.c.bf16 %v4916_v43, %v4914_v35  ;;  %v4643_v23 = vadd.f32 %v4642_v3, %v16938_v38  ;;  %v4917_v33 = vadd.f32 %v14600_v61, %v4641_v36  ;;  %v16948_v43 = vld [vmem:[#allocation22_spill] sm:$0xff] }
 0x471   : > { %v4644_v52 = vpop.f32.mrf.mxu1 }
 0x472   : > { %v4645_v37 = vadd.f32 %v4644_v52, %v16939_v40  ;;  %5391 = vmatprep.mubr.bf16.mxu0 %v5026_v25  ;;  %v4918_v10 = vadd.f32 %v14596_v48, %v4643_v23 }
 0x473   : > { %v4646_v28 = vpop.f32.mrf.mxu1  ;;  %5392 = vmatmul.mubr.bf16.gmra.mxu0 %v5025_v59 }
 0x474   : > { %v4647_v53 = vadd.f32 %v4646_v28, %v16941_v9  ;;  %v4919_v22 = vadd.f32 %v14600_v61, %v4645_v37 }
 0x475   : > { %v4650_v44 = vpop.f32.mrf.mxu1 }
 0x476   : > { %v4920_v50 = vadd.f32 %v14596_v48, %v4647_v53  ;;  %v5027_v55 = vpack.c.bf16 %v4919_v22, %v4917_v33  ;;  %v4651_v57 = vadd.f32 %v4650_v44, %v16944_v34  ;;  %v16952_v53 = vld [vmem:[#allocation26_spill] sm:$0xff]  ;;  %v16954_v34 = vld [vmem:[#allocation31_spill] sm:$0xff] }
 0x477   : > { %v4652_v18 = vpop.f32.mrf.mxu1 }
 0x478   : > { %v5028_v4 = vpack.c.bf16 %v4920_v50, %v4918_v10  ;;  %v4653_v7 = vadd.f32 %v4652_v18, %v16942_v11  ;;  %v4921_v39 = vadd.f32 %v14600_v61, %v4651_v57  ;;  %v16953_v10 = vld [vmem:[#allocation29_spill] sm:$0xff] }
 0x479   : > { %v4654_v13 = vpop.f32.mrf.mxu1 }
 0x47a   : > { %v4655_v63 = vadd.f32 %v4654_v13, %v16943_v31  ;;  %5401 = vmatprep.mubr.bf16.mxu0 %v5028_v4  ;;  %v4922_v1 = vadd.f32 %v14596_v48, %v4653_v7  ;;  %v12348_v31 = vld [vmem:[%s16815_s4 + $0x530] ss:$8 sps:$4 sm:$0xff]  }
 0x47b   : > { %v4656_v26 = vpop.f32.mrf.mxu1  ;;  %5402 = vmatmul.mubr.bf16.gmra.mxu0 %v5027_v55 }
 0x47c   : > { %v4657_v41 = vadd.f32 %v4656_v26, %v16945_v30  ;;  %v4923_v21 = vadd.f32 %v14600_v61, %v4655_v63  ;;  %v12350_v63 = vld [vmem:[%s16815_s4 + $0x534] ss:$8 sps:$4 sm:$0xff]  }
 0x47d   : > { %v4660_v54 = vpop.f32.mrf.mxu1  ;;  %v16955_v30 = vld [vmem:[#allocation32_spill] sm:$0xff]  ;;  %6789 = vmatprep.subr.bf16.mxu0 %v12350_v63 }
 0x47e   : > { %v4924_v46 = vadd.f32 %v14596_v48, %v4657_v41  ;;  %v5029_v47 = vpack.c.bf16 %v4923_v21, %v4921_v39  ;;  %v4661_v3 = vadd.f32 %v4660_v54, %v16948_v43  ;;  %6790 = vmatpush1.bf16.msra.mxu0 %v12348_v31  ;;  %v16958_v43 = vld [vmem:[#allocation33_spill] sm:$0xff] }
 0x47f   : > { %v4662_v49 = vpop.f32.mrf.mxu1 }
 0x480   : > { %v5030_v17 = vpack.c.bf16 %v4924_v46, %v4922_v1  ;;  %v4663_v16 = vadd.f32 %v4662_v49, %v16946_v32  ;;  %v4925_v23 = vadd.f32 %v14600_v61, %v4661_v3  ;;  %v16956_v1 = vld [vmem:[#allocation30_spill] sm:$0xff] }
 0x481   : > { %v4664_v8 = vpop.f32.mrf.mxu1 }
 0x482   : > { %v4665_v35 = vadd.f32 %v4664_v8, %v16947_v60  ;;  %5411 = vmatprep.mubr.bf16.mxu0 %v5030_v17  ;;  %v4926_v27 = vadd.f32 %v14596_v48, %v4663_v16 }
 0x483   : > { %v4666_v42 = vpop.f32.mrf.mxu1  ;;  %5412 = vmatmul.mubr.bf16.gmra.mxu0 %v5029_v47 }
 0x484   : > { %v4667_v25 = vadd.f32 %v4666_v42, %v16949_v12  ;;  %v4927_v52 = vadd.f32 %v14600_v61, %v4665_v35  ;;  %v16957_v35 = vld [vmem:[#allocation34_spill] sm:$0xff]  ;;  %v16959_v12 = vld [vmem:[#allocation35_spill] sm:$0xff] }
 0x485   : > { %v4670_v5 = vpop.f32.mrf.mxu1 }
 0x486   : > { %v4928_v59 = vadd.f32 %v14596_v48, %v4667_v25  ;;  %v5031_v20 = vpack.c.bf16 %v4927_v52, %v4925_v23  ;;  %v4671_v44 = vadd.f32 %v4670_v5, %v16952_v53 }
 0x487   : > { %v4672_v38 = vpop.f32.mrf.mxu1 }
 0x488   : > { %v5032_v40 = vpack.c.bf16 %v4928_v59, %v4926_v27  ;;  %v4673_v28 = vadd.f32 %v4672_v38, %v16950_v14  ;;  %v4929_v55 = vadd.f32 %v14600_v61, %v4671_v44  ;;  %v16962_v44 = vld [vmem:[#allocation36_spill] sm:$0xff] }
 0x489   : > { %v4674_v37 = vpop.f32.mrf.mxu1 }
 0x48a   : > { %v4675_v36 = vadd.f32 %v4674_v37, %v16951_v6  ;;  %5421 = vmatprep.mubr.bf16.mxu0 %v5032_v40  ;;  %v4930_v18 = vadd.f32 %v14596_v48, %v4673_v28  ;;  %v12351_v37 = vld [vmem:[%s16815_s4 + $0x520] ss:$8 sps:$4 sm:$0xff]   ;;  %v16960_v28 = vld [vmem:[#allocation37_spill] sm:$0xff] }
 0x48b   : > { %v4676_v9 = vpop.f32.mrf.mxu1  ;;  %5422 = vmatmul.mubr.bf16.gmra.mxu0 %v5031_v20  ;;  %v12353_v20 = vld [vmem:[%s16815_s4 + $0x524] ss:$8 sps:$4 sm:$0xff]  }
 0x48c   : > { %v4677_v22 = vadd.f32 %v4676_v9, %v16953_v10  ;;  %v4931_v33 = vadd.f32 %v14600_v61, %v4675_v36  ;;  %v16961_v36 = vld [vmem:[#allocation38_spill] sm:$0xff]  ;;  %6791 = vmatprep.subr.bf16.mxu0 %v12353_v20  ;;  %v16970_v20 = vld [vmem:[#allocation44_spill] sm:$0xff] }
 0x48d   : > { %v4680_v50 = vpop.f32.mrf.mxu1  ;;  %6792 = vmatpush1.bf16.msra.mxu0 %v12351_v37 }
 0x48e   : > { %v4932_v4 = vadd.f32 %v14596_v48, %v4677_v22  ;;  %v5033_v26 = vpack.c.bf16 %v4931_v33, %v4929_v55  ;;  %v4681_v21 = vadd.f32 %v4680_v50, %v16956_v1 }
 0x48f   : > { %v4682_v13 = vpop.f32.mrf.mxu1 }
 0x490   : > { %v5034_v11 = vpack.c.bf16 %v4932_v4, %v4930_v18  ;;  %v4683_v57 = vadd.f32 %v4682_v13, %v16954_v34  ;;  %v4933_v29 = vadd.f32 %v14600_v61, %v4681_v21 }
 0x491   : > { %v4684_v7 = vpop.f32.mrf.mxu1 }
 0x492   : > { %v4685_v41 = vadd.f32 %v4684_v7, %v16955_v30  ;;  %5431 = vmatprep.mubr.bf16.mxu0 %v5034_v11  ;;  %v4934_v39 = vadd.f32 %v14596_v48, %v4683_v57  ;;  %v16963_v57 = vld [vmem:[#allocation39_spill] sm:$0xff] }
 0x493   : > { %v4686_v54 = vpop.f32.mrf.mxu1  ;;  %5432 = vmatmul.mubr.bf16.gmra.mxu0 %v5033_v26 }
 0x494   : > { %v4687_v46 = vadd.f32 %v4686_v54, %v13732_v15  ;;  %v4935_v17 = vadd.f32 %v14600_v61, %v4685_v41 }
 0x495   : > { %v4690_v49 = vpop.f32.mrf.mxu1 }
 0x496   : > { %v4936_v8 = vadd.f32 %v14596_v48, %v4687_v46  ;;  %v5035_v16 = vpack.c.bf16 %v4935_v17, %v4933_v29  ;;  %v4691_v3 = vadd.f32 %v4690_v49, %v16958_v43  ;;  %v16965_v29 = vld [vmem:[#allocation42_spill] sm:$0xff] }
 0x497   : > { %v4692_v2 = vpop.f32.mrf.mxu1 }
 0x498   : > { %v5036_v47 = vpack.c.bf16 %v4936_v8, %v4934_v39  ;;  %v4693_v60 = vadd.f32 %v4692_v2, %v13737_v51  ;;  %v4937_v23 = vadd.f32 %v14600_v61, %v4691_v3  ;;  %v16964_v8 = vld [vmem:[#allocation41_spill] sm:$0xff] }
 0x499   : > { %v4694_v32 = vpop.f32.mrf.mxu1 }
 0x49a   : > { %v4695_v42 = vadd.f32 %v4694_v32, %v16957_v35  ;;  %5441 = vmatprep.mubr.bf16.mxu0 %v5036_v47  ;;  %v4938_v27 = vadd.f32 %v14596_v48, %v4693_v60  ;;  %v16967_v35 = vld [vmem:[#allocation43_spill] sm:$0xff] }
 0x49b   : > { %v4696_v15 = vpop.f32.mrf.mxu1  ;;  %5442 = vmatmul.mubr.bf16.gmra.mxu0 %v5035_v16  ;;  %v16966_v16 = vld [vmem:[#allocation40_spill] sm:$0xff] }
 0x49c   : > { %v4697_v25 = vadd.f32 %v4696_v15, %v16959_v12  ;;  %v4939_v52 = vadd.f32 %v14600_v61, %v4695_v42 }
 0x49d   : > { %v4700_v5 = vpop.f32.mrf.mxu1 }
 0x49e   : > { %v4940_v59 = vadd.f32 %v14596_v48, %v4697_v25  ;;  %v5037_v14 = vpack.c.bf16 %v4939_v52, %v4937_v23  ;;  %v4701_v10 = vadd.f32 %v4700_v5, %v16962_v44 }
 0x49f   : > { %v4702_v38 = vpop.f32.mrf.mxu1 }
 0x4a0   : > { %v5038_v51 = vpack.c.bf16 %v4940_v59, %v4938_v27  ;;  %v4703_v6 = vadd.f32 %v4702_v38, %v16960_v28  ;;  %v4941_v55 = vadd.f32 %v14600_v61, %v4701_v10  ;;  %v16968_v38 = vld [vmem:[#allocation45_spill] sm:$0xff] }
 0x4a1   : > { %v4704_v40 = vpop.f32.mrf.mxu1 }
 0x4a2   : > { %v4705_v9 = vadd.f32 %v4704_v40, %v16961_v36  ;;  %5451 = vmatprep.mubr.bf16.mxu0 %v5038_v51  ;;  %v4942_v18 = vadd.f32 %v14596_v48, %v4703_v6  ;;  %v16969_v51 = vld [vmem:[#allocation46_spill] sm:$0xff] }
 0x4a3   : > { %v4706_v53 = vpop.f32.mrf.mxu1  ;;  %5452 = vmatmul.mubr.bf16.gmra.mxu0 %v5037_v14 }
 0x4a4   : > { %v4707_v22 = vadd.f32 %v4706_v53, %v13762_v24  ;;  %v4943_v33 = vadd.f32 %v14600_v61, %v4705_v9 }
 0x4a5   : > { %v4710_v50 = vpop.f32.mrf.mxu1 }
 0x4a6   : > { %v4944_v4 = vadd.f32 %v14596_v48, %v4707_v22  ;;  %v5039_v31 = vpack.c.bf16 %v4943_v33, %v4941_v55  ;;  %v4711_v34 = vadd.f32 %v4710_v50, %v13765_v45  ;;  %v12356_v45 = vld [vmem:[%s16815_s4 + $0x514] ss:$8 sps:$4 sm:$0xff]  }
 0x4a7   : > { %v4712_v13 = vpop.f32.mrf.mxu1  ;;  %6793 = vmatprep.subr.bf16.mxu0 %v12356_v45  ;;  %v16972_v55 = vld [vmem:[#allocation49_spill] sm:$0xff] }
 0x4a8   : > { %v5040_v11 = vpack.c.bf16 %v4944_v4, %v4942_v18  ;;  %v4713_v63 = vadd.f32 %v4712_v13, %v13767_v62  ;;  %v4945_v49 = vadd.f32 %v14600_v61, %v4711_v34  ;;  %v12357_v18 = vld [vmem:[%s16815_s4 + $0x500] ss:$8 sps:$4 sm:$0xff]   ;;  %v16971_v4 = vld [vmem:[#allocation48_spill] sm:$0xff] }
 0x4a9   : > { %v4714_v7 = vpop.f32.mrf.mxu1 }
 0x4aa   : > { %v4715_v26 = vadd.f32 %v4714_v7, %v13769_v19  ;;  %5461 = vmatprep.mubr.bf16.mxu0 %v5040_v11  ;;  %v4946_v54 = vadd.f32 %v14596_v48, %v4713_v63  ;;  %v12354_v19 = vld [vmem:[%s16815_s4 + $0x510] ss:$8 sps:$4 sm:$0xff]  }
 0x4ab   : > { %v4716_v24 = vpop.f32.mrf.mxu1  ;;  %5462 = vmatmul.mubr.bf16.gmra.mxu0 %v5039_v31  ;;  %v16973_v31 = vld [vmem:[#allocation47_spill] sm:$0xff] }
 0x4ac   : > { %v4717_v30 = vadd.f32 %v4716_v24, %v16963_v57  ;;  %v4947_v1 = vadd.f32 %v14600_v61, %v4715_v26  ;;  %6794 = vmatpush1.bf16.msra.mxu0 %v12354_v19  ;;  %v16974_v26 = vld [vmem:[#allocation50_spill] sm:$0xff]  ;;  %v16976_v19 = vld [vmem:[#allocation53_spill] sm:$0xff] }
 0x4ad   : > { %v4720_v41 = vpop.f32.mrf.mxu1 }
 0x4ae   : > { %v4948_v21 = vadd.f32 %v14596_v48, %v4717_v30  ;;  %v5041_v17 = vpack.c.bf16 %v4947_v1, %v4945_v49  ;;  %v4721_v60 = vadd.f32 %v4720_v41, %v16966_v16 }
 0x4af   : > { %v4722_v46 = vpop.f32.mrf.mxu1 }
 0x4b0   : > { %v5042_v62 = vpack.c.bf16 %v4948_v21, %v4946_v54  ;;  %v4723_v2 = vadd.f32 %v4722_v46, %v16964_v8  ;;  %v4949_v5 = vadd.f32 %v14600_v61, %v4721_v60  ;;  %v16977_v8 = vld [vmem:[#allocation51_spill] sm:$0xff] }
 0x4b1   : > { %v4724_v39 = vpop.f32.mrf.mxu1 }
 0x4b2   : > { %v4725_v47 = vadd.f32 %v4724_v39, %v16965_v29  ;;  %5471 = vmatprep.mubr.bf16.mxu0 %v5042_v62  ;;  %v4950_v43 = vadd.f32 %v14596_v48, %v4723_v2  ;;  %v16975_v62 = vld [vmem:[#allocation52_spill] sm:$0xff]  ;;  %v16978_v29 = vld [vmem:[#allocation54_spill] sm:$0xff] }
 0x4b3   : > { %v4726_v32 = vpop.f32.mrf.mxu1  ;;  %5472 = vmatmul.mubr.bf16.gmra.mxu0 %v5041_v17 }
 0x4b4   : > { %v4727_v42 = vadd.f32 %v4726_v32, %v16967_v35  ;;  %v4951_v3 = vadd.f32 %v14600_v61, %v4725_v47 }
 0x4b5   : > { %v4730_v15 = vpop.f32.mrf.mxu1 }
 0x4b6   : > { %v4952_v12 = vadd.f32 %v14596_v48, %v4727_v42  ;;  %v5043_v59 = vpack.c.bf16 %v4951_v3, %v4949_v5  ;;  %v4731_v14 = vadd.f32 %v4730_v15, %v16970_v20 }
 0x4b7   : > { %v4732_v25 = vpop.f32.mrf.mxu1 }
 0x4b8   : > { %v5044_v27 = vpack.c.bf16 %v4952_v12, %v4950_v43  ;;  %v4733_v23 = vadd.f32 %v4732_v25, %v16968_v38  ;;  %v4953_v10 = vadd.f32 %v14600_v61, %v4731_v14  ;;  %v12360_v12 = vld [vmem:[%s16815_s4 + $0x5f0] ss:$8 sps:$4 sm:$0xff]   ;;  %v12362_v25 = vld [vmem:[%s16815_s4 + $0x5f4] ss:$8 sps:$4 sm:$0xff]  }
 0x4b9   : > { %v4734_v52 = vpop.f32.mrf.mxu1 }
 0x4ba   : > { %v4735_v40 = vadd.f32 %v4734_v52, %v16969_v51  ;;  %5481 = vmatprep.mubr.bf16.mxu0 %v5044_v27  ;;  %v4954_v36 = vadd.f32 %v14596_v48, %v4733_v23  ;;  %v16979_v27 = vld [vmem:[#allocation56_spill] sm:$0xff]  ;;  %v16981_v51 = vld [vmem:[#allocation55_spill] sm:$0xff] }
 0x4bb   : > { %v4736_v37 = vpop.f32.mrf.mxu1  ;;  %5482 = vmatmul.mubr.bf16.gmra.mxu0 %v5043_v59  ;;  %v16980_v59 = vld [vmem:[#allocation57_spill] sm:$0xff] }
 0x4bc   : > { %v4737_v28 = vadd.f32 %v4736_v37, %v13810_v0  ;;  %v4955_v9 = vadd.f32 %v14600_v61, %v4735_v40  ;;  %v12359_v0 = vld [vmem:[%s16815_s4 + $0x504] ss:$8 sps:$4 sm:$0xff]  }
 0x4bd   : > { %v4740_v6 = vpop.f32.mrf.mxu1  ;;  %6795 = vmatprep.subr.bf16.mxu0 %v12359_v0  ;;  %v16982_v37 = vld [vmem:[#allocation58_spill] sm:$0xff]  ;;  %v16984_v0 = vld [vmem:[#allocation61_spill] sm:$0xff] }
 0x4be   : > { %v4956_v53 = vadd.f32 %v14596_v48, %v4737_v28  ;;  %v5045_v33 = vpack.c.bf16 %v4955_v9, %v4953_v10  ;;  %v4741_v63 = vadd.f32 %v4740_v6, %v16973_v31  ;;  %6796 = vmatpush1.bf16.msra.mxu0 %v12357_v18 }
 0x4bf   : > { %v4742_v44 = vpop.f32.mrf.mxu1  ;;  %6797 = vmatprep.subr.bf16.mxu0 %v12362_v25  ;;  %v16992_v25 = vld [vmem:[#allocation69_spill] sm:$0xff] }
 0x4c0   : > { %v5046_v22 = vpack.c.bf16 %v4956_v53, %v4954_v36  ;;  %v4743_v13 = vadd.f32 %v4742_v44, %v16971_v4  ;;  %v4957_v1 = vadd.f32 %v14600_v61, %v4741_v63 }
 0x4c1   : > { %v4744_v50 = vpop.f32.mrf.mxu1 }
 0x4c2   : > { %v4745_v11 = vadd.f32 %v4744_v50, %v16972_v55  ;;  %5491 = vmatprep.mubr.bf16.mxu0 %v5046_v22  ;;  %v4958_v57 = vadd.f32 %v14596_v48, %v4743_v13  ;;  %6798 = vmatpush2.bf16.msra.mxu0 %v12360_v12  ;;  %v16983_v50 = vld [vmem:[#allocation60_spill] sm:$0xff]  ;;  %v16985_v13 = vld [vmem:[#allocation59_spill] sm:$0xff] }
 0x4c3   : > { %v4746_v7 = vpop.f32.mrf.mxu1  ;;  %5492 = vmatmul.mubr.bf16.gmra.mxu0 %v5045_v33 }
 0x4c4   : > { %v4747_v24 = vadd.f32 %v4746_v7, %v16974_v26  ;;  %v4959_v30 = vadd.f32 %v14600_v61, %v4745_v11  ;;  %v16986_v11 = vld [vmem:[#allocation62_spill] sm:$0xff] }
 0x4c5   : > { %v4750_v34 = vpop.f32.mrf.mxu1 }
 0x4c6   : > { %v4960_v41 = vadd.f32 %v14596_v48, %v4747_v24  ;;  %v5047_v49 = vpack.c.bf16 %v4959_v30, %v4957_v1  ;;  %v4751_v2 = vadd.f32 %v4750_v34, %v16977_v8  ;;  %v12365_v1 = vld [vmem:[%s16815_s4 + $0x5e4] ss:$8 sps:$4 sm:$0xff]  }
 0x4c7   : > { %v4752_v54 = vpop.f32.mrf.mxu1  ;;  %6799 = vmatprep.subr.bf16.mxu0 %v12365_v1  ;;  %v16990_v8 = vld [vmem:[#allocation66_spill] sm:$0xff] }
 0x4c8   : > { %v5048_v21 = vpack.c.bf16 %v4960_v41, %v4958_v57  ;;  %v4753_v39 = vadd.f32 %v4752_v54, %v16975_v62  ;;  %v4961_v15 = vadd.f32 %v14600_v61, %v4751_v2  ;;  %v12363_v54 = vld [vmem:[%s16815_s4 + $0x5e0] ss:$8 sps:$4 sm:$0xff]   ;;  %v16988_v62 = vld [vmem:[#allocation65_spill] sm:$0xff] }
 0x4c9   : > { %v4754_v46 = vpop.f32.mrf.mxu1  ;;  %6800 = vmatpush2.bf16.msra.mxu0 %v12363_v54 }
 0x4ca   : > { %v4755_v45 = vadd.f32 %v4754_v46, %v16976_v19  ;;  %5501 = vmatprep.mubr.bf16.mxu0 %v5048_v21  ;;  %v4962_v16 = vadd.f32 %v14596_v48, %v4753_v39  ;;  %v16987_v46 = vld [vmem:[#allocation64_spill] sm:$0xff] }
 0x4cb   : > { %v4756_v17 = vpop.f32.mrf.mxu1  ;;  %5502 = vmatmul.mubr.bf16.gmra.mxu0 %v5047_v49 }
 0x4cc   : > { %v4757_v47 = vadd.f32 %v4756_v17, %v16978_v29  ;;  %v4963_v60 = vadd.f32 %v14600_v61, %v4755_v45  ;;  %v16989_v45 = vld [vmem:[#allocation63_spill] sm:$0xff] }
 0x4cd   : > { %v4760_v32 = vpop.f32.mrf.mxu1 }
 0x4ce   : > { %v4964_v35 = vadd.f32 %v14596_v48, %v4757_v47  ;;  %v5049_v5 = vpack.c.bf16 %v4963_v60, %v4961_v15  ;;  %v4761_v40 = vadd.f32 %v4760_v32, %v16981_v51 }
 0x4cf   : > { %v4762_v42 = vpop.f32.mrf.mxu1 }
 0x4d0   : > { %v5050_v43 = vpack.c.bf16 %v4964_v35, %v4962_v16  ;;  %v4763_v52 = vadd.f32 %v4762_v42, %v16979_v27  ;;  %v4965_v53 = vadd.f32 %v14600_v61, %v4761_v40 }
 0x4d1   : > { %v4764_v3 = vpop.f32.mrf.mxu1 }
 0x4d2   : > { %v4765_v38 = vadd.f32 %v4764_v3, %v16980_v59  ;;  %5511 = vmatprep.mubr.bf16.mxu0 %v5050_v43  ;;  %v4966_v28 = vadd.f32 %v14596_v48, %v4763_v52  ;;  %v16991_v3 = vld [vmem:[#allocation68_spill] sm:$0xff]  ;;  %v16993_v52 = vld [vmem:[#allocation67_spill] sm:$0xff] }
 0x4d3   : > { %v4766_v23 = vpop.f32.mrf.mxu1  ;;  %5512 = vmatmul.mubr.bf16.gmra.mxu0 %v5049_v5 }
 0x4d4   : > { %v4767_v20 = vadd.f32 %v4766_v23, %v16982_v37  ;;  %v4967_v6 = vadd.f32 %v14600_v61, %v4765_v38  ;;  %v16994_v38 = vld [vmem:[#allocation70_spill] sm:$0xff] }
 0x4d5   : > { %v4770_v14 = vpop.f32.mrf.mxu1 }
 0x4d6   : > { %v4968_v36 = vadd.f32 %v14596_v48, %v4767_v20  ;;  %v5051_v22 = vpack.c.bf16 %v4967_v6, %v4965_v53  ;;  %v4771_v55 = vadd.f32 %v4770_v14, %v16985_v13  ;;  %v12368_v53 = vld [vmem:[%s16815_s4 + $0x5d4] ss:$8 sps:$4 sm:$0xff]   ;;  %v16998_v13 = vld [vmem:[#allocation74_spill] sm:$0xff] }
 0x4d7   : > { %v4772_v9 = vpop.f32.mrf.mxu1  ;;  %6801 = vmatprep.subr.bf16.mxu0 %v12368_v53 }
 0x4d8   : > { %v5052_v44 = vpack.c.bf16 %v4968_v36, %v4966_v28  ;;  %v4773_v18 = vadd.f32 %v4772_v9, %v16983_v50  ;;  %v4969_v57 = vadd.f32 %v14600_v61, %v4771_v55  ;;  %v12366_v9 = vld [vmem:[%s16815_s4 + $0x5d0] ss:$8 sps:$4 sm:$0xff]  }
 0x4d9   : > { %v4774_v10 = vpop.f32.mrf.mxu1  ;;  %v16996_v50 = vld [vmem:[#allocation73_spill] sm:$0xff]  ;;  %6802 = vmatpush2.bf16.msra.mxu0 %v12366_v9 }
 0x4da   : > { %v4775_v33 = vadd.f32 %v4774_v10, %v16984_v0  ;;  %5521 = vmatprep.mubr.bf16.mxu0 %v5052_v44  ;;  %v4970_v63 = vadd.f32 %v14596_v48, %v4773_v18  ;;  %v16995_v10 = vld [vmem:[#allocation72_spill] sm:$0xff] }
 0x4db   : > { %v4776_v4 = vpop.f32.mrf.mxu1  ;;  %5522 = vmatmul.mubr.bf16.gmra.mxu0 %v5051_v22 }
 0x4dc   : > { %v4777_v7 = vadd.f32 %v4776_v4, %v16986_v11  ;;  %v4971_v26 = vadd.f32 %v14600_v61, %v4775_v33  ;;  %v16997_v33 = vld [vmem:[#allocation71_spill] sm:$0xff]  ;;  %v11422_v11 = vld [vmem:[%s16816_s5 + $0x6] sm:$0x3] }
 0x4dd   : > { %v4780_v31 = vpop.f32.mrf.mxu1 }
 0x4de   : > { %v4972_v24 = vadd.f32 %v14596_v48, %v4777_v7  ;;  %v5053_v21 = vpack.c.bf16 %v4971_v26, %v4969_v57  ;;  %v4781_v17 = vadd.f32 %v4780_v31, %v16989_v45 }
 0x4df   : > { %v4782_v34 = vpop.f32.mrf.mxu1 }
 0x4e0   : > { %v5054_v30 = vpack.c.bf16 %v4972_v24, %v4970_v63  ;;  %v4783_v49 = vadd.f32 %v4782_v34, %v16987_v46  ;;  %v4973_v35 = vadd.f32 %v14600_v61, %v4781_v17  ;;  %v14930_v34 = vrot.slane %v11422_v11, %v13342_v58  ;;  %v16999_v17 = vld [vmem:[#allocation77_spill] sm:$0xff] }
 0x4e1   : > { %v4784_v41 = vpop.f32.mrf.mxu1 }
 0x4e2   : > { %v4785_v39 = vadd.f32 %v4784_v41, %v16988_v62  ;;  %5531 = vmatprep.mubr.bf16.mxu0 %v5054_v30  ;;  %v4974_v47 = vadd.f32 %v14596_v48, %v4783_v49  ;;  %v14933_v30 = vrot.slane %v11422_v11, %v13337_v56  ;;  %v17005_v11 = vld [vmem:[#allocation79_spill] sm:$0xff] }
 0x4e3   : > { %v4786_v19 = vpop.f32.mrf.mxu1  ;;  %5532 = vmatmul.mubr.bf16.gmra.mxu0 %v5053_v21 }
 0x4e4   : > { %v4787_v2 = vadd.f32 %v4786_v19, %v16990_v8  ;;  %v4975_v32 = vadd.f32 %v14600_v61, %v4785_v39 }
 0x4e5   : > { %v4790_v29 = vpop.f32.mrf.mxu1 }
 0x4e6   : > { %v4976_v16 = vadd.f32 %v14596_v48, %v4787_v2  ;;  %v5055_v43 = vpack.c.bf16 %v4975_v32, %v4973_v35  ;;  %v4791_v59 = vadd.f32 %v4790_v29, %v16993_v52  ;;  %v17000_v29 = vld [vmem:[#allocation76_spill] sm:$0xff] }
 0x4e7   : > { %v4792_v60 = vpop.f32.mrf.mxu1 }
 0x4e8   : > { %v5056_v42 = vpack.c.bf16 %v4976_v16, %v4974_v47  ;;  %v4793_v12 = vadd.f32 %v4792_v60, %v16991_v3  ;;  %v4977_v28 = vadd.f32 %v14600_v61, %v4791_v59  ;;  %v17001_v60 = vld [vmem:[#allocation75_spill] sm:$0xff] }
 0x4e9   : > { %v4794_v15 = vpop.f32.mrf.mxu1 }
 0x4ea   : > { %v4795_v5 = vadd.f32 %v4794_v15, %v16992_v25  ;;  %5541 = vmatprep.mubr.bf16.mxu0 %v5056_v42  ;;  %v4978_v40 = vadd.f32 %v14596_v48, %v4793_v12 }
 0x4eb   : > { %v4796_v27 = vpop.f32.mrf.mxu1  ;;  %5542 = vmatmul.mubr.bf16.gmra.mxu0 %v5055_v43  ;;  %v17002_v43 = vld [vmem:[#allocation78_spill] sm:$0xff] }
 0x4ec   : > { %v4797_v23 = vadd.f32 %v4796_v27, %v16994_v38  ;;  %v4979_v37 = vadd.f32 %v14600_v61, %v4795_v5 }
 0x4ed   : > { %v4800_v51 = vpop.f32.mrf.mxu1 }
 0x4ee   : > { %v4980_v20 = vadd.f32 %v14596_v48, %v4797_v23  ;;  %v5057_v44 = vpack.c.bf16 %v4979_v37, %v4977_v28  ;;  %v4801_v4 = vadd.f32 %v4800_v51, %v16997_v33  ;;  %v12369_v28 = vld [vmem:[%s16815_s4 + $0x5c0] ss:$8 sps:$4 sm:$0xff]   ;;  %v17004_v33 = vld [vmem:[#allocation80_spill] sm:$0xff] }
 0x4ef   : > { %v4802_v14 = vpop.f32.mrf.mxu1 }
 0x4f0   : > { %v5058_v6 = vpack.c.bf16 %v4980_v20, %v4978_v40  ;;  %v4803_v22 = vadd.f32 %v4802_v14, %v16995_v10  ;;  %v4981_v41 = vadd.f32 %v14600_v61, %v4801_v4 }
 0x4f1   : > { %v4804_v36 = vpop.f32.mrf.mxu1 }
 0x4f2   : > { %v4805_v18 = vadd.f32 %v4804_v36, %v16996_v50  ;;  %5551 = vmatprep.mubr.bf16.mxu0 %v5058_v6  ;;  %v4982_v31 = vadd.f32 %v14596_v48, %v4803_v22  ;;  %v12371_v6 = vld [vmem:[%s16815_s4 + $0x5c4] ss:$8 sps:$4 sm:$0xff]   ;;  %v17003_v50 = vld [vmem:[#allocation81_spill] sm:$0xff] }
 0x4f3   : > { %v4806_v0 = vpop.f32.mrf.mxu1  ;;  %v5313_v7 = vpop.f32.mrf.mxu0  ;;  %5552 = vmatmul.mubr.bf16.gmra.mxu0 %v5057_v44  ;;  %6803 = vmatprep.subr.bf16.mxu0 %v12371_v6 }
 0x4f4   : > { %v4807_v55 = vadd.f32 %v4806_v0, %v16998_v13  ;;  %v4983_v63 = vadd.f32 %v14600_v61, %v4805_v18  ;;  %v5314_v45 = vadd.f32 %v5313_v7, %v14933_v30  ;;  %6804 = vmatpush2.bf16.msra.mxu0 %v12369_v28 }
 0x4f5   : > { %v4810_v24 = vpop.f32.mrf.mxu1  ;;  %v5315_v57 = vpop.f32.mrf.mxu0 }
 0x4f6   : > { %v4984_v26 = vadd.f32 %v14596_v48, %v4807_v55  ;;  %v5059_v49 = vpack.c.bf16 %v4983_v63, %v4981_v41  ;;  %v5316_v62 = vadd.f32 %v5315_v57, %v14930_v34  ;;  %v4811_v35 = vadd.f32 %v4810_v24, %v17001_v60 }
 0x4f7   : > { %v4812_v54 = vpop.f32.mrf.mxu1  ;;  %v5317_v1 = vpop.f32.mrf.mxu0  ;;  %v5632_v27 = vmax.f32 %v5314_v45, 0.0 }
 0x4f8   : > { %v5060_v21 = vpack.c.bf16 %v4984_v26, %v4982_v31  ;;  %v5318_v46 = vadd.f32 %v5317_v1, %v14933_v30  ;;  %v4813_v47 = vadd.f32 %v4812_v54, %v17000_v29  ;;  %v5633_v12 = vmax.f32 %v5316_v62, 0.0  ;;  %v17006_v26 = vld [vmem:[#allocation82_spill] sm:$0xff] }
 0x4f9   : > { %v4814_v39 = vpop.f32.mrf.mxu1  ;;  %v5319_v19 = vpop.f32.mrf.mxu0  ;;  %v4985_v37 = vadd.f32 %v14600_v61, %v4811_v35  ;;  %v17007_v35 = vld [vmem:[#allocation85_spill] sm:$0xff] }
 0x4fa   : > { %5561 = vmatprep.mubr.bf16.mxu0 %v5060_v21  ;;  %v4815_v8 = vadd.f32 %v4814_v39, %v16999_v17  ;;  %v5320_v2 = vadd.f32 %v5319_v19, %v14930_v34  ;;  %v5634_v42 = vmax.f32 %v5318_v46, 0.0  ;;  %v4986_v38 = vadd.f32 %v14596_v48, %v4813_v47 }
 0x4fb   : > { %v4816_v32 = vpop.f32.mrf.mxu1  ;;  %v5323_v16 = vpop.f32.mrf.mxu0  ;;  %5562 = vmatmul.mubr.bf16.gmra.mxu0 %v5059_v49 }
 0x4fc   : > { %v5635_v15 = vmax.f32 %v5320_v2, 0.0  ;;  %v4817_v3 = vadd.f32 %v4816_v32, %v17002_v43  ;;  %v4987_v52 = vadd.f32 %v14600_v61, %v4815_v8  ;;  %v5760_v20 = vpack.c.bf16 %v5634_v42, %v5632_v27  ;;  %v17008_v43 = vld [vmem:[#allocation84_spill] sm:$0xff] }
 0x4fd   : > { %v4820_v25 = vpop.f32.mrf.mxu1  ;;  %v5325_v5 = vpop.f32.mrf.mxu0  ;;  %v5324_v36 = vadd.f32 %v5323_v16, %v14933_v30 }
 0x4fe   : > { %v4988_v59 = vadd.f32 %v14596_v48, %v4817_v3  ;;  %v5761_v40 = vpack.c.bf16 %v5635_v15, %v5633_v12  ;;  %v5326_v9 = vadd.f32 %v5325_v5, %v14930_v34  ;;  %v5061_v22 = vpack.c.bf16 %v4987_v52, %v4985_v37  ;;  %v17009_v5 = vld [vmem:[#allocation83_spill] sm:$0xff] }
 0x4ff   : > { %v4822_v23 = vpop.f32.mrf.mxu1  ;;  %v5327_v51 = vpop.f32.mrf.mxu0  ;;  %v4821_v7 = vadd.f32 %v4820_v25, %v17005_v11  ;;  %v5636_v1 = vmax.f32 %v5324_v36, 0.0 }
 0x500   : > { %v5328_v14 = vadd.f32 %v5327_v51, %v14933_v30  ;;  %6062 = vmatprep.mubr.bf16.mxu1 %v5761_v40  ;;  %v5062_v10 = vpack.c.bf16 %v4988_v59, %v4986_v38  ;;  %v4823_v4 = vadd.f32 %v4822_v23, %v17004_v33  ;;  %v5637_v57 = vmax.f32 %v5326_v9, 0.0  ;;  %v17010_v38 = vld [vmem:[#allocation86_spill] sm:$0xff] }
 0x501   : > { %v4824_v53 = vpop.f32.mrf.mxu1  ;;  %v5329_v44 = vpop.f32.mrf.mxu0  ;;  %6063 = vmatmul.mubr.bf16.vlgmr.msra.gmra.mxu1 %v5760_v20  ;;  %v4989_v45 = vadd.f32 %v14600_v61, %v4821_v7  ;;  %v17011_v7 = vld [vmem:[#allocation89_spill] sm:$0xff] }
 0x502   : > { %v4825_v18 = vadd.f32 %v4824_v53, %v17003_v50  ;;  %v5330_v0 = vadd.f32 %v5329_v44, %v14930_v34  ;;  %5571 = vmatprep.mubr.bf16.mxu0 %v5062_v10  ;;  %v5638_v31 = vmax.f32 %v5328_v14, 0.0  ;;  %v4990_v49 = vadd.f32 %v14596_v48, %v4823_v4  ;;  %v12372_v50 = vld [vmem:[%s16815_s4 + $0x5b0] ss:$8 sps:$4 sm:$0xff]  }
 0x503   : > { %v4826_v13 = vpop.f32.mrf.mxu1  ;;  %v5333_v55 = vpop.f32.mrf.mxu0  ;;  %5572 = vmatmul.mubr.bf16.gmra.mxu0 %v5061_v22 }
 0x504   : > { %v5639_v63 = vmax.f32 %v5330_v0, 0.0  ;;  %v4827_v24 = vadd.f32 %v4826_v13, %v17006_v26  ;;  %v4991_v21 = vadd.f32 %v14600_v61, %v4825_v18  ;;  %v5762_v17 = vpack.c.bf16 %v5638_v31, %v5636_v1  ;;  %v12374_v18 = vld [vmem:[%s16815_s4 + $0x5b4] ss:$8 sps:$4 sm:$0xff]  }
 0x505   : > { %v4830_v41 = vpop.f32.mrf.mxu1  ;;  %v5335_v54 = vpop.f32.mrf.mxu0  ;;  %v5334_v60 = vadd.f32 %v5333_v55, %v14933_v30  ;;  %6805 = vmatprep.subr.bf16.mxu0 %v12374_v18  ;;  %v17012_v26 = vld [vmem:[#allocation88_spill] sm:$0xff] }
 0x506   : > { %v4992_v46 = vadd.f32 %v14596_v48, %v4827_v24  ;;  %v5763_v19 = vpack.c.bf16 %v5639_v63, %v5637_v57  ;;  %v5336_v2 = vadd.f32 %v5335_v54, %v14930_v34  ;;  %v5063_v16 = vpack.c.bf16 %v4991_v21, %v4989_v45  ;;  %6806 = vmatpush2.bf16.msra.mxu0 %v12372_v50  ;;  %v17013_v54 = vld [vmem:[#allocation87_spill] sm:$0xff]  ;;  %v12375_v18 = vld [vmem:[%s16815_s4 + $0x670] ss:$8 sps:$4 sm:$0xff]  }
 0x507   : > { %v4832_v62 = vpop.f32.mrf.mxu1  ;;  %v5337_v39 = vpop.f32.mrf.mxu0  ;;  %v4831_v27 = vadd.f32 %v4830_v41, %v17009_v5  ;;  %v5640_v20 = vmax.f32 %v5334_v60, 0.0 }
 0x508   : > { %v5338_v8 = vadd.f32 %v5337_v39, %v14933_v30  ;;  %6072 = vmatprep.mubr.bf16.mxu1 %v5763_v19  ;;  %v5064_v32 = vpack.c.bf16 %v4992_v46, %v4990_v49  ;;  %v4833_v3 = vadd.f32 %v4832_v62, %v17008_v43  ;;  %v5641_v51 = vmax.f32 %v5336_v2, 0.0  ;;  %v17014_v49 = vld [vmem:[#allocation90_spill] sm:$0xff] }
 0x509   : > { %v4834_v29 = vpop.f32.mrf.mxu1  ;;  %v5339_v47 = vpop.f32.mrf.mxu0  ;;  %6073 = vmatmul.mubr.bf16.gmra.mxu1 %v5762_v17  ;;  %v4993_v44 = vadd.f32 %v14600_v61, %v4831_v27  ;;  %v17015_v27 = vld [vmem:[#allocation93_spill] sm:$0xff] }
 0x50a   : > { %v4835_v42 = vadd.f32 %v4834_v29, %v17007_v35  ;;  %v5340_v15 = vadd.f32 %v5339_v47, %v14930_v34  ;;  %5581 = vmatprep.mubr.bf16.mxu0 %v5064_v32  ;;  %v5642_v52 = vmax.f32 %v5338_v8, 0.0  ;;  %v4994_v6 = vadd.f32 %v14596_v48, %v4833_v3 }
 0x50b   : > { %v4836_v12 = vpop.f32.mrf.mxu1  ;;  %v5343_v25 = vpop.f32.mrf.mxu0  ;;  %5582 = vmatmul.mubr.bf16.gmra.mxu0 %v5063_v16 }
 0x50c   : > { %v5643_v59 = vmax.f32 %v5340_v15, 0.0  ;;  %v4837_v23 = vadd.f32 %v4836_v12, %v17010_v38  ;;  %v4995_v14 = vadd.f32 %v14600_v61, %v4835_v42  ;;  %v5764_v10 = vpack.c.bf16 %v5642_v52, %v5640_v20  ;;  %v17016_v38 = vld [vmem:[#allocation91_spill] sm:$0xff] }
 0x50d   : > { %v4840_v40 = vpop.f32.mrf.mxu1  ;;  %v5345_v37 = vpop.f32.mrf.mxu0  ;;  %v5344_v0 = vadd.f32 %v5343_v25, %v14933_v30 }
 0x50e   : > { %v4996_v28 = vadd.f32 %v14596_v48, %v4837_v23  ;;  %v5765_v53 = vpack.c.bf16 %v5643_v59, %v5641_v51  ;;  %v5346_v33 = vadd.f32 %v5345_v37, %v14930_v34  ;;  %v5065_v11 = vpack.c.bf16 %v4995_v14, %v4993_v44  ;;  %v17017_v51 = vld [vmem:[#allocation92_spill] sm:$0xff] }
 0x50f   : > { %v4842_v36 = vpop.f32.mrf.mxu1  ;;  %v5347_v9 = vpop.f32.mrf.mxu0  ;;  %v4841_v1 = vadd.f32 %v4840_v40, %v17013_v54  ;;  %v5644_v17 = vmax.f32 %v5344_v0, 0.0  ;;  %v12377_v0 = vld [vmem:[%s16815_s4 + $0x674] ss:$8 sps:$4 sm:$0xff]  }
 0x510   : > { %v5348_v22 = vadd.f32 %v5347_v9, %v14933_v30  ;;  %6082 = vmatprep.mubr.bf16.mxu1 %v5765_v53  ;;  %v5066_v55 = vpack.c.bf16 %v4996_v28, %v4994_v6  ;;  %v4843_v24 = vadd.f32 %v4842_v36, %v17012_v26  ;;  %v5645_v39 = vmax.f32 %v5346_v33, 0.0  ;;  %v17018_v6 = vld [vmem:[#allocation94_spill] sm:$0xff]  ;;  %7532 = vmatprep.subr.bf16.mxu1 %v12377_v0  ;;  %v12386_v0 = vld [vmem:[%s16815_s4 + $0x594] ss:$8 sps:$4 sm:$0xff]  }
 0x511   : > { %v4844_v4 = vpop.f32.mrf.mxu1  ;;  %v5349_v13 = vpop.f32.mrf.mxu0  ;;  %6083 = vmatmul.mubr.bf16.gmra.mxu1 %v5764_v10  ;;  %v4997_v60 = vadd.f32 %v14600_v61, %v4841_v1  ;;  %v12378_v26 = vld [vmem:[%s16815_s4 + $0x5a0] ss:$8 sps:$4 sm:$0xff]  }
 0x512   : > { %v4845_v31 = vadd.f32 %v4844_v4, %v17011_v7  ;;  %v5350_v63 = vadd.f32 %v5349_v13, %v14930_v34  ;;  %5591 = vmatprep.mubr.bf16.mxu0 %v5066_v55  ;;  %v5646_v21 = vmax.f32 %v5348_v22, 0.0  ;;  %v4998_v29 = vadd.f32 %v14596_v48, %v4843_v24  ;;  %v12380_v24 = vld [vmem:[%s16815_s4 + $0x5a4] ss:$8 sps:$4 sm:$0xff]   ;;  %7533 = vmatpush1.bf16.msra.mxu1 %v12375_v18  ;;  %v12384_v18 = vld [vmem:[%s16815_s4 + $0x590] ss:$8 sps:$4 sm:$0xff]  }
 0x513   : > { %v4846_v57 = vpop.f32.mrf.mxu1  ;;  %v5353_v41 = vpop.f32.mrf.mxu0  ;;  %5592 = vmatmul.mubr.bf16.gmra.mxu0 %v5065_v11  ;;  %6807 = vmatprep.subr.bf16.mxu0 %v12380_v24 }
 0x514   : > { %v5647_v46 = vmax.f32 %v5350_v63, 0.0  ;;  %v4847_v62 = vadd.f32 %v4846_v57, %v17014_v49  ;;  %v4999_v8 = vadd.f32 %v14600_v61, %v4845_v31  ;;  %v5766_v35 = vpack.c.bf16 %v5646_v21, %v5644_v17  ;;  %6808 = vmatpush2.bf16.msra.mxu0 %v12378_v26 }
 0x515   : > { %v4850_v19 = vpop.f32.mrf.mxu1  ;;  %v5355_v45 = vpop.f32.mrf.mxu0  ;;  %v5354_v5 = vadd.f32 %v5353_v41, %v14933_v30  ;;  %6809 = vmatprep.subr.bf16.mxu0 %v12386_v0 }
 0x516   : > { %v5000_v2 = vadd.f32 %v14596_v48, %v4847_v62  ;;  %v5767_v16 = vpack.c.bf16 %v5647_v46, %v5645_v39  ;;  %v5356_v15 = vadd.f32 %v5355_v45, %v14930_v34  ;;  %v5067_v25 = vpack.c.bf16 %v4999_v8, %v4997_v60  ;;  %v17019_v46 = vld [vmem:[#allocation96_spill] sm:$0xff]  ;;  %v17020_v62 = vld [vmem:[#allocation97_spill] sm:$0xff]  ;;  %v17021_v45 = vld [vmem:[#allocation95_spill] sm:$0xff] }
 0x517   : > { %v4852_v47 = vpop.f32.mrf.mxu1  ;;  %v5357_v32 = vpop.f32.mrf.mxu0  ;;  %v4851_v23 = vadd.f32 %v4850_v19, %v17016_v38  ;;  %v5648_v22 = vmax.f32 %v5354_v5, 0.0 }
 0x518   : > { %v5358_v42 = vadd.f32 %v5357_v32, %v14933_v30  ;;  %6092 = vmatprep.mubr.bf16.mxu1 %v5767_v16  ;;  %v5068_v12 = vpack.c.bf16 %v5000_v2, %v4998_v29  ;;  %v4853_v40 = vadd.f32 %v4852_v47, %v17017_v51  ;;  %v5649_v9 = vmax.f32 %v5356_v15, 0.0  ;;  %v17022_v16 = vld [vmem:[#allocation98_spill] sm:$0xff]  ;;  %6810 = vmatpush2.bf16.msra.mxu0 %v12384_v18 }
 0x519   : > { %v4854_v43 = vpop.f32.mrf.mxu1  ;;  %v5359_v3 = vpop.f32.mrf.mxu0  ;;  %6093 = vmatmul.mubr.bf16.gmra.mxu1 %v5766_v35  ;;  %v5001_v33 = vadd.f32 %v14600_v61, %v4851_v23  ;;  %v12395_v18 = vld [vmem:[%s16815_s4 + $0x644] ss:$8 sps:$4 sm:$0xff]  }
 0x51a   : > { %v4855_v52 = vadd.f32 %v4854_v43, %v17015_v27  ;;  %v5360_v59 = vadd.f32 %v5359_v3, %v14930_v34  ;;  %5601 = vmatprep.mubr.bf16.mxu0 %v5068_v12  ;;  %v5650_v14 = vmax.f32 %v5358_v42, 0.0  ;;  %v5002_v4 = vadd.f32 %v14596_v48, %v4853_v40 }
 0x51b   : > { %v4856_v37 = vpop.f32.mrf.mxu1  ;;  %v5363_v20 = vpop.f32.mrf.mxu0  ;;  %5602 = vmatmul.mubr.bf16.gmra.mxu0 %v5067_v25 }
 0x51c   : > { %v5651_v28 = vmax.f32 %v5360_v59, 0.0  ;;  %v4857_v36 = vadd.f32 %v4856_v37, %v17018_v6  ;;  %v5003_v53 = vadd.f32 %v14600_v61, %v4855_v52  ;;  %v5768_v7 = vpack.c.bf16 %v5650_v14, %v5648_v22 }
 0x51d   : > { %v4860_v44 = vpop.f32.mrf.mxu1  ;;  %v5365_v10 = vpop.f32.mrf.mxu0  ;;  %v5364_v41 = vadd.f32 %v5363_v20, %v14933_v30 }
 0x51e   : > { %v5004_v50 = vadd.f32 %v14596_v48, %v4857_v36  ;;  %v5769_v11 = vpack.c.bf16 %v5651_v28, %v5649_v9  ;;  %v5366_v31 = vadd.f32 %v5365_v10, %v14930_v34  ;;  %v5069_v57 = vpack.c.bf16 %v5003_v53, %v5001_v33  ;;  %v12381_v9 = vld [vmem:[%s16815_s4 + $0x660] ss:$8 sps:$4 sm:$0xff]   ;;  %v12383_v53 = vld [vmem:[%s16815_s4 + $0x664] ss:$8 sps:$4 sm:$0xff]  }
 0x51f   : > { %v4862_v13 = vpop.f32.mrf.mxu1  ;;  %v5367_v55 = vpop.f32.mrf.mxu0  ;;  %v4861_v17 = vadd.f32 %v4860_v44, %v17021_v45  ;;  %v5652_v35 = vmax.f32 %v5364_v41, 0.0  ;;  %7534 = vmatprep.subr.bf16.mxu1 %v12383_v53 }
 0x520   : > { %v5368_v63 = vadd.f32 %v5367_v55, %v14933_v30  ;;  %6102 = vmatprep.mubr.bf16.mxu1 %v5769_v11  ;;  %v5070_v21 = vpack.c.bf16 %v5004_v50, %v5002_v4  ;;  %v4863_v49 = vadd.f32 %v4862_v13, %v17019_v46  ;;  %v5653_v29 = vmax.f32 %v5366_v31, 0.0  ;;  %7535 = vmatpush1.bf16.msra.mxu1 %v12381_v9 }
 0x521   : > { %v4864_v54 = vpop.f32.mrf.mxu1  ;;  %v5369_v1 = vpop.f32.mrf.mxu0  ;;  %6103 = vmatmul.mubr.bf16.gmra.mxu1 %v5768_v7  ;;  %v5005_v25 = vadd.f32 %v14600_v61, %v4861_v17 }
 0x522   : > { %v4865_v39 = vadd.f32 %v4864_v54, %v17020_v62  ;;  %v5370_v19 = vadd.f32 %v5369_v1, %v14930_v34  ;;  %5611 = vmatprep.mubr.bf16.mxu0 %v5070_v21  ;;  %v5654_v47 = vmax.f32 %v5368_v63, 0.0  ;;  %v5006_v15 = vadd.f32 %v14596_v48, %v4863_v49 }
 0x523   : > { %v4866_v8 = vpop.f32.mrf.mxu1  ;;  %v5373_v2 = vpop.f32.mrf.mxu0  ;;  %5612 = vmatmul.mubr.bf16.gmra.mxu0 %v5069_v57 }
 0x524   : > { %v5655_v32 = vmax.f32 %v5370_v19, 0.0  ;;  %v4867_v60 = vadd.f32 %v4866_v8, %v17022_v16  ;;  %v5007_v43 = vadd.f32 %v14600_v61, %v4865_v39  ;;  %v5770_v27 = vpack.c.bf16 %v5654_v47, %v5652_v35  ;;  %v12389_v47 = vld [vmem:[%s16815_s4 + $0x654] ss:$8 sps:$4 sm:$0xff]  }
 0x525   : > { %v5375_v42 = vpop.f32.mrf.mxu0  ;;  %v5374_v40 = vadd.f32 %v5373_v2, %v14933_v30  ;;  %7536 = vmatprep.subr.bf16.mxu1 %v12389_v47 }
 0x526   : > { %v5008_v3 = vadd.f32 %v14596_v48, %v4867_v60  ;;  %v5771_v12 = vpack.c.bf16 %v5655_v32, %v5653_v29  ;;  %v5376_v52 = vadd.f32 %v5375_v42, %v14930_v34  ;;  %v5071_v51 = vpack.c.bf16 %v5007_v43, %v5005_v25  ;;  %v12387_v29 = vld [vmem:[%s16815_s4 + $0x650] ss:$8 sps:$4 sm:$0xff]   ;;  %v12390_v42 = vld [vmem:[%s16815_s4 + $0x580] ss:$8 sps:$4 sm:$0xff]  }
 0x527   : > { %v5377_v5 = vpop.f32.mrf.mxu0  ;;  %v5656_v6 = vmax.f32 %v5374_v40, 0.0  ;;  %7537 = vmatpush1.bf16.msra.mxu1 %v12387_v29 }
 0x528   : > { %v5378_v59 = vadd.f32 %v5377_v5, %v14933_v30  ;;  %6112 = vmatprep.mubr.bf16.mxu1 %v5771_v12  ;;  %v5072_v38 = vpack.c.bf16 %v5008_v3, %v5006_v15  ;;  %v5657_v20 = vmax.f32 %v5376_v52, 0.0  ;;  %v12392_v15 = vld [vmem:[%s16815_s4 + $0x584] ss:$8 sps:$4 sm:$0xff]   ;;  %7538 = vmatprep.subr.bf16.mxu1 %v12395_v18 }
 0x529   : > { %v5379_v23 = vpop.f32.mrf.mxu0  ;;  %6113 = vmatmul.mubr.bf16.gmra.mxu1 %v5770_v27  ;;  %6811 = vmatprep.subr.bf16.mxu0 %v12392_v15  ;;  %v12401_v18 = vld [vmem:[%s16815_s4 + $0x624] ss:$8 sps:$4 sm:$0xff]  }
 0x52a   : > { %v5380_v37 = vadd.f32 %v5379_v23, %v14930_v34  ;;  %5621 = vmatprep.mubr.bf16.mxu0 %v5072_v38  ;;  %v5658_v14 = vmax.f32 %v5378_v59, 0.0  ;;  %6812 = vmatpush2.bf16.msra.mxu0 %v12390_v42 }
 0x52b   : > { %v5383_v48 = vpop.f32.mrf.mxu0  ;;  %5622 = vmatmul.mubr.bf16.gmra.mxu0 %v5071_v51 }
 0x52c   : > { %v5659_v61 = vmax.f32 %v5380_v37, 0.0  ;;  %v5772_v10 = vpack.c.bf16 %v5658_v14, %v5656_v6  ;;  %v5384_v4 = vadd.f32 %v5383_v48, %v14933_v30 }
 0x52d   : > { %v5385_v28 = vpop.f32.mrf.mxu0 }
 0x52e   : > { %v5773_v36 = vpack.c.bf16 %v5659_v61, %v5657_v20  ;;  %v5386_v22 = vadd.f32 %v5385_v28, %v14930_v34  ;;  %v5660_v26 = vmax.f32 %v5384_v4, 0.0 }
 0x52f   : > { %v5387_v44 = vpop.f32.mrf.mxu0 }
 0x530   : > { %v5388_v50 = vadd.f32 %v5387_v44, %v14933_v30  ;;  %6122 = vmatprep.mubr.bf16.mxu1 %v5773_v36  ;;  %v5661_v11 = vmax.f32 %v5386_v22, 0.0 }
 0x531   : > { %v5389_v33 = vpop.f32.mrf.mxu0  ;;  %6123 = vmatmul.mubr.bf16.gmra.mxu1 %v5772_v10 }
 0x532   : > { %v5390_v13 = vadd.f32 %v5389_v33, %v14930_v34  ;;  %v5662_v7 = vmax.f32 %v5388_v50, 0.0  ;;  %v12393_v50 = vld [vmem:[%s16815_s4 + $0x640] ss:$8 sps:$4 sm:$0xff]  }
 0x533   : > { %v5393_v55 = vpop.f32.mrf.mxu0  ;;  %7539 = vmatpush1.bf16.msra.mxu1 %v12393_v50  ;;  %v12399_v50 = vld [vmem:[%s16815_s4 + $0x620] ss:$8 sps:$4 sm:$0xff]  }
 0x534   : > { %v5663_v31 = vmax.f32 %v5390_v13, 0.0  ;;  %v5774_v41 = vpack.c.bf16 %v5662_v7, %v5660_v26  ;;  %v5394_v46 = vadd.f32 %v5393_v55, %v14933_v30 }
 0x535   : > { %v5395_v63 = vpop.f32.mrf.mxu0 }
 0x536   : > { %v5775_v24 = vpack.c.bf16 %v5663_v31, %v5661_v11  ;;  %v5396_v54 = vadd.f32 %v5395_v63, %v14930_v34  ;;  %v5664_v8 = vmax.f32 %v5394_v46, 0.0 }
 0x537   : > { %v5397_v57 = vpop.f32.mrf.mxu0 }
 0x538   : > { %v5398_v1 = vadd.f32 %v5397_v57, %v14933_v30  ;;  %6132 = vmatprep.mubr.bf16.mxu1 %v5775_v24  ;;  %v5665_v39 = vmax.f32 %v5396_v54, 0.0 }
 0x539   : > { %v5399_v21 = vpop.f32.mrf.mxu0  ;;  %6133 = vmatmul.mubr.bf16.gmra.mxu1 %v5774_v41 }
 0x53a   : > { %v5400_v49 = vadd.f32 %v5399_v21, %v14930_v34  ;;  %v5666_v19 = vmax.f32 %v5398_v1, 0.0 }
 0x53b   : > { %v5403_v62 = vpop.f32.mrf.mxu0 }
 0x53c   : > { %v5667_v45 = vmax.f32 %v5400_v49, 0.0  ;;  %v5776_v16 = vpack.c.bf16 %v5666_v19, %v5664_v8  ;;  %v5404_v3 = vadd.f32 %v5403_v62, %v14933_v30 }
 0x53d   : > { %v5405_v17 = vpop.f32.mrf.mxu0 }
 0x53e   : > { %v5777_v2 = vpack.c.bf16 %v5667_v45, %v5665_v39  ;;  %v5406_v60 = vadd.f32 %v5405_v17, %v14930_v34  ;;  %v5668_v38 = vmax.f32 %v5404_v3, 0.0 }
 0x53f   : > { %v5407_v32 = vpop.f32.mrf.mxu0 }
 0x540   : > { %v5408_v35 = vadd.f32 %v5407_v32, %v14933_v30  ;;  %6142 = vmatprep.mubr.bf16.mxu1 %v5777_v2  ;;  %v5669_v5 = vmax.f32 %v5406_v60, 0.0  ;;  %v12398_v60 = vld [vmem:[%s16815_s4 + $0x634] ss:$8 sps:$4 sm:$0xff]  }
 0x541   : > { %v5409_v43 = vpop.f32.mrf.mxu0  ;;  %6143 = vmatmul.mubr.bf16.gmra.mxu1 %v5776_v16  ;;  %v12396_v16 = vld [vmem:[%s16815_s4 + $0x630] ss:$8 sps:$4 sm:$0xff]   ;;  %7540 = vmatprep.subr.bf16.mxu1 %v12398_v60  ;;  %v12404_v60 = vld [vmem:[%s16815_s4 + $0x614] ss:$8 sps:$4 sm:$0xff]  }
 0x542   : > { %v5410_v12 = vadd.f32 %v5409_v43, %v14930_v34  ;;  %v5670_v27 = vmax.f32 %v5408_v35, 0.0  ;;  %7541 = vmatpush1.bf16.msra.mxu1 %v12396_v16  ;;  %v12402_v16 = vld [vmem:[%s16815_s4 + $0x610] ss:$8 sps:$4 sm:$0xff]  }
 0x543   : > { %v5413_v25 = vpop.f32.mrf.mxu0  ;;  %7542 = vmatprep.subr.bf16.mxu1 %v12401_v18  ;;  %v12407_v18 = vld [vmem:[%s16815_s4 + $0x604] ss:$8 sps:$4 sm:$0xff]  }
 0x544   : > { %v5671_v52 = vmax.f32 %v5410_v12, 0.0  ;;  %v5778_v40 = vpack.c.bf16 %v5670_v27, %v5668_v38  ;;  %v5414_v14 = vadd.f32 %v5413_v25, %v14933_v30 }
 0x545   : > { %v5415_v59 = vpop.f32.mrf.mxu0 }
 0x546   : > { %v5779_v23 = vpack.c.bf16 %v5671_v52, %v5669_v5  ;;  %v5416_v37 = vadd.f32 %v5415_v59, %v14930_v34  ;;  %v5672_v44 = vmax.f32 %v5414_v14, 0.0  ;;  %7543 = vmatpush1.bf16.msra.mxu1 %v12399_v50  ;;  %v12405_v50 = vld [vmem:[%s16815_s4 + $0x600] ss:$8 sps:$4 sm:$0xff]  }
 0x547   : > { %v5417_v51 = vpop.f32.mrf.mxu0  ;;  %7544 = vmatprep.subr.bf16.mxu1 %v12404_v60  ;;  %v12410_v60 = vld [vmem:[%s16815_s4 + $0x6f4] ss:$8 sps:$4 sm:$0xff]  }
 0x548   : > { %v5418_v48 = vadd.f32 %v5417_v51, %v14933_v30  ;;  %6152 = vmatprep.mubr.bf16.mxu1 %v5779_v23  ;;  %v5673_v6 = vmax.f32 %v5416_v37, 0.0 }
 0x549   : > { %v5419_v20 = vpop.f32.mrf.mxu0  ;;  %6153 = vmatmul.mubr.bf16.gmra.mxu1 %v5778_v40 }
 0x54a   : > { %v5420_v61 = vadd.f32 %v5419_v20, %v14930_v34  ;;  %v5674_v36 = vmax.f32 %v5418_v48, 0.0  ;;  %7545 = vmatpush1.bf16.msra.mxu1 %v12402_v16  ;;  %v12408_v16 = vld [vmem:[%s16815_s4 + $0x6f0] ss:$8 sps:$4 sm:$0xff]  }
 0x54b   : > { %v5423_v28 = vpop.f32.mrf.mxu0  ;;  %7546 = vmatprep.subr.bf16.mxu1 %v12407_v18  ;;  %v12413_v18 = vld [vmem:[%s16815_s4 + $0x6e4] ss:$8 sps:$4 sm:$0xff]  }
 0x54c   : > { %v5675_v9 = vmax.f32 %v5420_v61, 0.0  ;;  %v5780_v0 = vpack.c.bf16 %v5674_v36, %v5672_v44  ;;  %v5424_v55 = vadd.f32 %v5423_v28, %v14933_v30 }
 0x54d   : > { %v5425_v53 = vpop.f32.mrf.mxu0 }
 0x54e   : > { %v5781_v10 = vpack.c.bf16 %v5675_v9, %v5673_v6  ;;  %v5426_v33 = vadd.f32 %v5425_v53, %v14930_v34  ;;  %v5676_v57 = vmax.f32 %v5424_v55, 0.0  ;;  %7547 = vmatpush1.bf16.msra.mxu1 %v12405_v50  ;;  %v12411_v50 = vld [vmem:[%s16815_s4 + $0x6e0] ss:$8 sps:$4 sm:$0xff]  }
 0x54f   : > { %v5427_v22 = vpop.f32.mrf.mxu0  ;;  %7548 = vmatprep.subr.bf16.mxu1 %v12410_v60  ;;  %v12416_v60 = vld [vmem:[%s16815_s4 + $0x6d4] ss:$8 sps:$4 sm:$0xff]  }
 0x550   : > { %v5428_v4 = vadd.f32 %v5427_v22, %v14933_v30  ;;  %6162 = vmatprep.mubr.bf16.mxu1 %v5781_v10  ;;  %v5677_v31 = vmax.f32 %v5426_v33, 0.0 }
 0x551   : > { %v5429_v13 = vpop.f32.mrf.mxu0  ;;  %6163 = vmatmul.mubr.bf16.gmra.mxu1 %v5780_v0 }
 0x552   : > { %v5430_v11 = vadd.f32 %v5429_v13, %v14930_v34  ;;  %v5678_v63 = vmax.f32 %v5428_v4, 0.0  ;;  %7549 = vmatpush2.bf16.msra.mxu1 %v12408_v16  ;;  %v12414_v16 = vld [vmem:[%s16815_s4 + $0x6d0] ss:$8 sps:$4 sm:$0xff]  }
 0x553   : > { %v5433_v7 = vpop.f32.mrf.mxu0  ;;  %7550 = vmatprep.subr.bf16.mxu1 %v12413_v18 }
 0x554   : > { %v5679_v26 = vmax.f32 %v5430_v11, 0.0  ;;  %v5782_v1 = vpack.c.bf16 %v5678_v63, %v5676_v57  ;;  %v5434_v62 = vadd.f32 %v5433_v7, %v14933_v30 }
 0x555   : > { %v5435_v24 = vpop.f32.mrf.mxu0 }
 0x556   : > { %v5783_v41 = vpack.c.bf16 %v5679_v26, %v5677_v31  ;;  %v5436_v21 = vadd.f32 %v5435_v24, %v14930_v34  ;;  %v5680_v29 = vmax.f32 %v5434_v62, 0.0  ;;  %7551 = vmatpush2.bf16.msra.mxu1 %v12411_v50 }
 0x557   : > { %v5437_v54 = vpop.f32.mrf.mxu0  ;;  %7552 = vmatprep.subr.bf16.mxu1 %v12416_v60 }
 0x558   : > { %v5438_v46 = vadd.f32 %v5437_v54, %v14933_v30  ;;  %6172 = vmatprep.mubr.bf16.mxu1 %v5783_v41  ;;  %v5681_v45 = vmax.f32 %v5436_v21, 0.0 }
 0x559   : > { %v5439_v49 = vpop.f32.mrf.mxu0  ;;  %6173 = vmatmul.mubr.bf16.gmra.mxu1 %v5782_v1 }
 0x55a   : > { %v5440_v39 = vadd.f32 %v5439_v49, %v14930_v34  ;;  %v5682_v17 = vmax.f32 %v5438_v46, 0.0  ;;  %7553 = vmatpush2.bf16.msra.mxu1 %v12414_v16 }
 0x55b   : > { %v5443_v19 = vpop.f32.mrf.mxu0 }
 0x55c   : > { %v5683_v8 = vmax.f32 %v5440_v39, 0.0  ;;  %v5784_v35 = vpack.c.bf16 %v5682_v17, %v5680_v29  ;;  %v5444_v3 = vadd.f32 %v5443_v19, %v14933_v30 }
 0x55d   : > { %v5445_v2 = vpop.f32.mrf.mxu0 }
 0x55e   : > { %v5785_v47 = vpack.c.bf16 %v5683_v8, %v5681_v45  ;;  %v5446_v42 = vadd.f32 %v5445_v2, %v14930_v34  ;;  %v5684_v38 = vmax.f32 %v5444_v3, 0.0 }
 0x55f   : > { %v5447_v32 = vpop.f32.mrf.mxu0 }
 0x560   : > { %v5448_v15 = vadd.f32 %v5447_v32, %v14933_v30  ;;  %6182 = vmatprep.mubr.bf16.mxu1 %v5785_v47  ;;  %v5685_v5 = vmax.f32 %v5446_v42, 0.0 }
 0x561   : > { %v5449_v43 = vpop.f32.mrf.mxu0  ;;  %6183 = vmatmul.mubr.bf16.gmra.mxu1 %v5784_v35 }
 0x562   : > { %v5450_v12 = vadd.f32 %v5449_v43, %v14930_v34  ;;  %v5686_v27 = vmax.f32 %v5448_v15, 0.0 }
 0x563   : > { %v5453_v25 = vpop.f32.mrf.mxu0 }
 0x564   : > { %v5687_v52 = vmax.f32 %v5450_v12, 0.0  ;;  %v5786_v40 = vpack.c.bf16 %v5686_v27, %v5684_v38  ;;  %v5454_v14 = vadd.f32 %v5453_v25, %v14933_v30 }
 0x565   : > { %v5455_v59 = vpop.f32.mrf.mxu0 }
 0x566   : > { %v5787_v23 = vpack.c.bf16 %v5687_v52, %v5685_v5  ;;  %v5456_v37 = vadd.f32 %v5455_v59, %v14930_v34  ;;  %v5688_v44 = vmax.f32 %v5454_v14, 0.0 }
 0x567   : > { %v5457_v51 = vpop.f32.mrf.mxu0 }
 0x568   : > { %v5458_v48 = vadd.f32 %v5457_v51, %v14933_v30  ;;  %6192 = vmatprep.mubr.bf16.mxu1 %v5787_v23  ;;  %v5689_v6 = vmax.f32 %v5456_v37, 0.0 }
 0x569   : > { %v5459_v20 = vpop.f32.mrf.mxu0  ;;  %6193 = vmatmul.mubr.bf16.gmra.mxu1 %v5786_v40 }
 0x56a   : > { %v5460_v61 = vadd.f32 %v5459_v20, %v14930_v34  ;;  %v5690_v36 = vmax.f32 %v5458_v48, 0.0 }
 0x56b   : > { %v5463_v28 = vpop.f32.mrf.mxu0 }
 0x56c   : > { %v5691_v9 = vmax.f32 %v5460_v61, 0.0  ;;  %v5788_v0 = vpack.c.bf16 %v5690_v36, %v5688_v44  ;;  %v5464_v55 = vadd.f32 %v5463_v28, %v14933_v30 }
 0x56d   : > { %v5465_v53 = vpop.f32.mrf.mxu0 }
 0x56e   : > { %v5789_v10 = vpack.c.bf16 %v5691_v9, %v5689_v6  ;;  %v5466_v33 = vadd.f32 %v5465_v53, %v14930_v34  ;;  %v5692_v57 = vmax.f32 %v5464_v55, 0.0 }
 0x56f   : > { %v5467_v22 = vpop.f32.mrf.mxu0 }
 0x570   : > { %v5468_v4 = vadd.f32 %v5467_v22, %v14933_v30  ;;  %6202 = vmatprep.mubr.bf16.mxu1 %v5789_v10  ;;  %v5693_v31 = vmax.f32 %v5466_v33, 0.0 }
 0x571   : > { %v5469_v13 = vpop.f32.mrf.mxu0  ;;  %6203 = vmatmul.mubr.bf16.gmra.mxu1 %v5788_v0 }
 0x572   : > { %v5470_v11 = vadd.f32 %v5469_v13, %v14930_v34  ;;  %v5694_v63 = vmax.f32 %v5468_v4, 0.0 }
 0x573   : > { %v5473_v7 = vpop.f32.mrf.mxu0 }
 0x574   : > { %v5695_v26 = vmax.f32 %v5470_v11, 0.0  ;;  %v5790_v1 = vpack.c.bf16 %v5694_v63, %v5692_v57  ;;  %v5474_v62 = vadd.f32 %v5473_v7, %v14933_v30 }
 0x575   : > { %v5475_v24 = vpop.f32.mrf.mxu0 }
 0x576   : > { %v5791_v41 = vpack.c.bf16 %v5695_v26, %v5693_v31  ;;  %v5476_v21 = vadd.f32 %v5475_v24, %v14930_v34  ;;  %v5696_v29 = vmax.f32 %v5474_v62, 0.0 }
 0x577   : > { %v5477_v54 = vpop.f32.mrf.mxu0 }
 0x578   : > { %v5478_v46 = vadd.f32 %v5477_v54, %v14933_v30  ;;  %6212 = vmatprep.mubr.bf16.mxu1 %v5791_v41  ;;  %v5697_v45 = vmax.f32 %v5476_v21, 0.0 }
 0x579   : > { %v5479_v49 = vpop.f32.mrf.mxu0  ;;  %6213 = vmatmul.mubr.bf16.gmra.mxu1 %v5790_v1 }
 0x57a   : > { %v5480_v39 = vadd.f32 %v5479_v49, %v14930_v34  ;;  %v5698_v17 = vmax.f32 %v5478_v46, 0.0 }
 0x57b   : > { %v5483_v19 = vpop.f32.mrf.mxu0 }
 0x57c   : > { %v5699_v8 = vmax.f32 %v5480_v39, 0.0  ;;  %v5792_v35 = vpack.c.bf16 %v5698_v17, %v5696_v29  ;;  %v5484_v3 = vadd.f32 %v5483_v19, %v14933_v30 }
 0x57d   : > { %v5485_v2 = vpop.f32.mrf.mxu0 }
 0x57e   : > { %v5793_v47 = vpack.c.bf16 %v5699_v8, %v5697_v45  ;;  %v5486_v42 = vadd.f32 %v5485_v2, %v14930_v34  ;;  %v5700_v38 = vmax.f32 %v5484_v3, 0.0 }
 0x57f   : > { %v5487_v32 = vpop.f32.mrf.mxu0 }
 0x580   : > { %v5488_v15 = vadd.f32 %v5487_v32, %v14933_v30  ;;  %6222 = vmatprep.mubr.bf16.mxu1 %v5793_v47  ;;  %v5701_v5 = vmax.f32 %v5486_v42, 0.0 }
 0x581   : > { %v5489_v43 = vpop.f32.mrf.mxu0  ;;  %6223 = vmatmul.mubr.bf16.gmra.mxu1 %v5792_v35 }
 0x582   : > { %v5490_v12 = vadd.f32 %v5489_v43, %v14930_v34  ;;  %v5702_v27 = vmax.f32 %v5488_v15, 0.0 }
 0x583   : > { %v5493_v25 = vpop.f32.mrf.mxu0 }
 0x584   : > { %v5703_v52 = vmax.f32 %v5490_v12, 0.0  ;;  %v5794_v40 = vpack.c.bf16 %v5702_v27, %v5700_v38  ;;  %v5494_v14 = vadd.f32 %v5493_v25, %v14933_v30 }
 0x585   : > { %v5495_v59 = vpop.f32.mrf.mxu0 }
 0x586   : > { %v5795_v23 = vpack.c.bf16 %v5703_v52, %v5701_v5  ;;  %v5496_v37 = vadd.f32 %v5495_v59, %v14930_v34  ;;  %v5704_v44 = vmax.f32 %v5494_v14, 0.0 }
 0x587   : > { %v5497_v51 = vpop.f32.mrf.mxu0 }
 0x588   : > { %v5498_v48 = vadd.f32 %v5497_v51, %v14933_v30  ;;  %6232 = vmatprep.mubr.bf16.mxu1 %v5795_v23  ;;  %v5705_v6 = vmax.f32 %v5496_v37, 0.0 }
 0x589   : > { %v5499_v20 = vpop.f32.mrf.mxu0  ;;  %6233 = vmatmul.mubr.bf16.gmra.mxu1 %v5794_v40 }
 0x58a   : > { %v5500_v61 = vadd.f32 %v5499_v20, %v14930_v34  ;;  %v5706_v36 = vmax.f32 %v5498_v48, 0.0 }
 0x58b   : > { %v5503_v28 = vpop.f32.mrf.mxu0 }
 0x58c   : > { %v5707_v9 = vmax.f32 %v5500_v61, 0.0  ;;  %v5796_v0 = vpack.c.bf16 %v5706_v36, %v5704_v44  ;;  %v5504_v55 = vadd.f32 %v5503_v28, %v14933_v30 }
 0x58d   : > { %v5505_v53 = vpop.f32.mrf.mxu0 }
 0x58e   : > { %v5797_v10 = vpack.c.bf16 %v5707_v9, %v5705_v6  ;;  %v5506_v33 = vadd.f32 %v5505_v53, %v14930_v34  ;;  %v5708_v57 = vmax.f32 %v5504_v55, 0.0 }
 0x58f   : > { %v5507_v22 = vpop.f32.mrf.mxu0 }
 0x590   : > { %v5508_v4 = vadd.f32 %v5507_v22, %v14933_v30  ;;  %6242 = vmatprep.mubr.bf16.mxu1 %v5797_v10  ;;  %v5709_v31 = vmax.f32 %v5506_v33, 0.0 }
 0x591   : > { %v5509_v13 = vpop.f32.mrf.mxu0  ;;  %6243 = vmatmul.mubr.bf16.gmra.mxu1 %v5796_v0 }
 0x592   : > { %v5510_v11 = vadd.f32 %v5509_v13, %v14930_v34  ;;  %v5710_v63 = vmax.f32 %v5508_v4, 0.0 }
 0x593   : > { %v5513_v7 = vpop.f32.mrf.mxu0 }
 0x594   : > { %v5711_v26 = vmax.f32 %v5510_v11, 0.0  ;;  %v5798_v1 = vpack.c.bf16 %v5710_v63, %v5708_v57  ;;  %v5514_v62 = vadd.f32 %v5513_v7, %v14933_v30 }
 0x595   : > { %v5515_v24 = vpop.f32.mrf.mxu0 }
 0x596   : > { %v5799_v41 = vpack.c.bf16 %v5711_v26, %v5709_v31  ;;  %v5516_v21 = vadd.f32 %v5515_v24, %v14930_v34  ;;  %v5712_v29 = vmax.f32 %v5514_v62, 0.0 }
 0x597   : > { %v5517_v54 = vpop.f32.mrf.mxu0 }
 0x598   : > { %v5518_v46 = vadd.f32 %v5517_v54, %v14933_v30  ;;  %6252 = vmatprep.mubr.bf16.mxu1 %v5799_v41  ;;  %v5713_v45 = vmax.f32 %v5516_v21, 0.0 }
 0x599   : > { %v5519_v49 = vpop.f32.mrf.mxu0  ;;  %6253 = vmatmul.mubr.bf16.gmra.mxu1 %v5798_v1 }
 0x59a   : > { %v5520_v39 = vadd.f32 %v5519_v49, %v14930_v34  ;;  %v5714_v17 = vmax.f32 %v5518_v46, 0.0 }
 0x59b   : > { %v5523_v19 = vpop.f32.mrf.mxu0 }
 0x59c   : > { %v5715_v8 = vmax.f32 %v5520_v39, 0.0  ;;  %v5800_v35 = vpack.c.bf16 %v5714_v17, %v5712_v29  ;;  %v5524_v3 = vadd.f32 %v5523_v19, %v14933_v30 }
 0x59d   : > { %v5525_v2 = vpop.f32.mrf.mxu0 }
 0x59e   : > { %v5801_v47 = vpack.c.bf16 %v5715_v8, %v5713_v45  ;;  %v5526_v42 = vadd.f32 %v5525_v2, %v14930_v34  ;;  %v5716_v38 = vmax.f32 %v5524_v3, 0.0 }
 0x59f   : > { %v5527_v32 = vpop.f32.mrf.mxu0 }
 0x5a0   : > { %v5528_v15 = vadd.f32 %v5527_v32, %v14933_v30  ;;  %6262 = vmatprep.mubr.bf16.mxu1 %v5801_v47  ;;  %v5717_v5 = vmax.f32 %v5526_v42, 0.0 }
 0x5a1   : > { %v5529_v43 = vpop.f32.mrf.mxu0  ;;  %6263 = vmatmul.mubr.bf16.gmra.mxu1 %v5800_v35 }
 0x5a2   : > { %v5530_v12 = vadd.f32 %v5529_v43, %v14930_v34  ;;  %v5718_v27 = vmax.f32 %v5528_v15, 0.0 }
 0x5a3   : > { %v5533_v25 = vpop.f32.mrf.mxu0 }
 0x5a4   : > { %v5719_v52 = vmax.f32 %v5530_v12, 0.0  ;;  %v5802_v40 = vpack.c.bf16 %v5718_v27, %v5716_v38  ;;  %v5534_v14 = vadd.f32 %v5533_v25, %v14933_v30  ;;  %v11487_v25 = vld [vmem:[%s16816_s5 + $0x8] sm:$0x3] }
 0x5a5   : > { %v5535_v59 = vpop.f32.mrf.mxu0 }
 0x5a6   : > { %v5803_v23 = vpack.c.bf16 %v5719_v52, %v5717_v5  ;;  %v5536_v37 = vadd.f32 %v5535_v59, %v14930_v34  ;;  %v5720_v44 = vmax.f32 %v5534_v14, 0.0 }
 0x5a7   : > { %v5537_v51 = vpop.f32.mrf.mxu0 }
 0x5a8   : > { %v5538_v48 = vadd.f32 %v5537_v51, %v14933_v30  ;;  %6272 = vmatprep.mubr.bf16.mxu1 %v5803_v23  ;;  %v5721_v6 = vmax.f32 %v5536_v37, 0.0  ;;  %v15188_v23 = vrot.slane %v11487_v25, %v13342_v58 }
 0x5a9   : > { %v5539_v20 = vpop.f32.mrf.mxu0  ;;  %6273 = vmatmul.mubr.bf16.gmra.mxu1 %v5802_v40  ;;  %v15191_v40 = vrot.slane %v11487_v25, %v13337_v56 }
 0x5aa   : > { %v5540_v61 = vadd.f32 %v5539_v20, %v14930_v34  ;;  %v5722_v36 = vmax.f32 %v5538_v48, 0.0 }
 0x5ab   : > { %v5543_v28 = vpop.f32.mrf.mxu0 }
 0x5ac   : > { %v5723_v9 = vmax.f32 %v5540_v61, 0.0  ;;  %v5804_v0 = vpack.c.bf16 %v5722_v36, %v5720_v44  ;;  %v5544_v55 = vadd.f32 %v5543_v28, %v14933_v30 }
 0x5ad   : > { %v5545_v53 = vpop.f32.mrf.mxu0 }
 0x5ae   : > { %v5805_v10 = vpack.c.bf16 %v5723_v9, %v5721_v6  ;;  %v5546_v33 = vadd.f32 %v5545_v53, %v14930_v34  ;;  %v5724_v57 = vmax.f32 %v5544_v55, 0.0 }
 0x5af   : > { %v5547_v22 = vpop.f32.mrf.mxu0 }
 0x5b0   : > { %v5548_v4 = vadd.f32 %v5547_v22, %v14933_v30  ;;  %6282 = vmatprep.mubr.bf16.mxu1 %v5805_v10  ;;  %v5725_v31 = vmax.f32 %v5546_v33, 0.0 }
 0x5b1   : > { %v5549_v13 = vpop.f32.mrf.mxu0  ;;  %6283 = vmatmul.mubr.bf16.gmra.mxu1 %v5804_v0 }
 0x5b2   : > { %v5550_v11 = vadd.f32 %v5549_v13, %v14930_v34  ;;  %v5726_v63 = vmax.f32 %v5548_v4, 0.0 }
 0x5b3   : > { %v5553_v7 = vpop.f32.mrf.mxu0 }
 0x5b4   : > { %v5727_v26 = vmax.f32 %v5550_v11, 0.0  ;;  %v5806_v1 = vpack.c.bf16 %v5726_v63, %v5724_v57  ;;  %v5554_v62 = vadd.f32 %v5553_v7, %v14933_v30 }
 0x5b5   : > { %v5555_v24 = vpop.f32.mrf.mxu0 }
 0x5b6   : > { %v5807_v41 = vpack.c.bf16 %v5727_v26, %v5725_v31  ;;  %v5556_v21 = vadd.f32 %v5555_v24, %v14930_v34  ;;  %v5728_v29 = vmax.f32 %v5554_v62, 0.0  ;;  %v12419_v62 = vld [vmem:[%s16815_s4 + $0x6c4] ss:$8 sps:$4 sm:$0xff]  }
 0x5b7   : > { %v5557_v54 = vpop.f32.mrf.mxu0  ;;  %7554 = vmatprep.subr.bf16.mxu1 %v12419_v62  ;;  %v12422_v62 = vld [vmem:[%s16815_s4 + $0x6b4] ss:$8 sps:$4 sm:$0xff]  }
 0x5b8   : > { %v5558_v46 = vadd.f32 %v5557_v54, %v14933_v30  ;;  %6292 = vmatprep.mubr.bf16.mxu1 %v5807_v41  ;;  %v5729_v45 = vmax.f32 %v5556_v21, 0.0 }
 0x5b9   : > { %v5559_v49 = vpop.f32.mrf.mxu0  ;;  %6293 = vmatmul.mubr.bf16.gmra.mxu1 %v5806_v1 }
 0x5ba   : > { %v5560_v39 = vadd.f32 %v5559_v49, %v14930_v34  ;;  %v5730_v17 = vmax.f32 %v5558_v46, 0.0  ;;  %v12417_v49 = vld [vmem:[%s16815_s4 + $0x6c0] ss:$8 sps:$4 sm:$0xff]  }
 0x5bb   : > { %v5563_v19 = vpop.f32.mrf.mxu0  ;;  %7555 = vmatpush2.bf16.msra.mxu1 %v12417_v49  ;;  %v12420_v49 = vld [vmem:[%s16815_s4 + $0x6b0] ss:$8 sps:$4 sm:$0xff]  }
 0x5bc   : > { %v5731_v8 = vmax.f32 %v5560_v39, 0.0  ;;  %v5808_v35 = vpack.c.bf16 %v5730_v17, %v5728_v29  ;;  %v5564_v3 = vadd.f32 %v5563_v19, %v14933_v30  ;;  %7556 = vmatprep.subr.bf16.mxu1 %v12422_v62  ;;  %v12425_v62 = vld [vmem:[%s16815_s4 + $0x6a4] ss:$8 sps:$4 sm:$0xff]  }
 0x5bd   : > { %v5565_v2 = vpop.f32.mrf.mxu0 }
 0x5be   : > { %v5809_v47 = vpack.c.bf16 %v5731_v8, %v5729_v45  ;;  %v5566_v42 = vadd.f32 %v5565_v2, %v14930_v34  ;;  %v5732_v37 = vmax.f32 %v5564_v3, 0.0 }
 0x5bf   : > { %v5567_v32 = vpop.f32.mrf.mxu0  ;;  %7557 = vmatpush2.bf16.msra.mxu1 %v12420_v49 }
 0x5c0   : > { %v5568_v15 = vadd.f32 %v5567_v32, %v14933_v30  ;;  %6302 = vmatprep.mubr.bf16.mxu1 %v5809_v47  ;;  %v5733_v27 = vmax.f32 %v5566_v42, 0.0  ;;  %7558 = vmatprep.subr.bf16.mxu1 %v12425_v62 }
 0x5c1   : > { %v5569_v43 = vpop.f32.mrf.mxu0  ;;  %v6064_v5 = vpop.f32.mrf.mxu1  ;;  %6303 = vmatmul.mubr.bf16.gmra.mxu1 %v5808_v35 }
 0x5c2   : > { %v5570_v12 = vadd.f32 %v5569_v43, %v14930_v34  ;;  %v5734_v52 = vmax.f32 %v5568_v15, 0.0  ;;  %v6065_v53 = vadd.f32 %v6064_v5, %v15191_v40 }
 0x5c3   : > { %v5573_v38 = vpop.f32.mrf.mxu0  ;;  %v6066_v51 = vpop.f32.mrf.mxu1 }
 0x5c4   : > { %v5735_v59 = vmax.f32 %v5570_v12, 0.0  ;;  %v5810_v28 = vpack.c.bf16 %v5734_v52, %v5732_v37  ;;  %v6067_v6 = vadd.f32 %v6066_v51, %v15188_v23  ;;  %v5574_v0 = vadd.f32 %v5573_v38, %v14933_v30 }
 0x5c5   : > { %v5575_v48 = vpop.f32.mrf.mxu0  ;;  %v6068_v20 = vpop.f32.mrf.mxu1  ;;  %v6383_v31 = vmax.f32 %v6065_v53, 0.0 }
 0x5c6   : > { %v5811_v14 = vpack.c.bf16 %v5735_v59, %v5733_v27  ;;  %v6069_v61 = vadd.f32 %v6068_v20, %v15191_v40  ;;  %v5576_v22 = vadd.f32 %v5575_v48, %v14930_v34  ;;  %v6384_v55 = vmax.f32 %v6067_v6, 0.0 }
 0x5c7   : > { %v5577_v36 = vpop.f32.mrf.mxu0  ;;  %v6070_v9 = vpop.f32.mrf.mxu1  ;;  %v5736_v1 = vmax.f32 %v5574_v0, 0.0 }
 0x5c8   : > { %6312 = vmatprep.mubr.bf16.mxu1 %v5811_v14  ;;  %v5578_v44 = vadd.f32 %v5577_v36, %v14933_v30  ;;  %v6071_v10 = vadd.f32 %v6070_v9, %v15188_v23  ;;  %v6385_v33 = vmax.f32 %v6069_v61, 0.0  ;;  %v5737_v24 = vmax.f32 %v5576_v22, 0.0 }
 0x5c9   : > { %v5579_v50 = vpop.f32.mrf.mxu0  ;;  %v6074_v18 = vpop.f32.mrf.mxu1  ;;  %6313 = vmatmul.mubr.bf16.gmra.mxu1 %v5810_v28 }
 0x5ca   : > { %v6386_v4 = vmax.f32 %v6071_v10, 0.0  ;;  %v5580_v13 = vadd.f32 %v5579_v50, %v14930_v34  ;;  %v5738_v63 = vmax.f32 %v5578_v44, 0.0  ;;  %v6511_v21 = vpack.c.bf16 %v6385_v33, %v6383_v31 }
 0x5cb   : > { %v5583_v11 = vpop.f32.mrf.mxu0  ;;  %v6076_v7 = vpop.f32.mrf.mxu1  ;;  %v6075_v39 = vadd.f32 %v6074_v18, %v15191_v40 }
 0x5cc   : > { %v5739_v26 = vmax.f32 %v5580_v13, 0.0  ;;  %v6512_v54 = vpack.c.bf16 %v6386_v4, %v6384_v55  ;;  %v6077_v19 = vadd.f32 %v6076_v7, %v15188_v23  ;;  %v5812_v2 = vpack.c.bf16 %v5738_v63, %v5736_v1 }
 0x5cd   : > { %v5585_v57 = vpop.f32.mrf.mxu0  ;;  %v6078_v41 = vpop.f32.mrf.mxu1  ;;  %v5584_v35 = vadd.f32 %v5583_v11, %v14933_v30  ;;  %v6387_v5 = vmax.f32 %v6075_v39, 0.0 }
 0x5ce   : > { %v6079_v46 = vadd.f32 %v6078_v41, %v15191_v40  ;;  %6813 = vmatprep.mubr.bf16.mxu0 %v6512_v54  ;;  %v5813_v8 = vpack.c.bf16 %v5739_v26, %v5737_v24  ;;  %v5586_v32 = vadd.f32 %v5585_v57, %v14930_v34  ;;  %v6388_v3 = vmax.f32 %v6077_v19, 0.0 }
 0x5cf   : > { %v5587_v45 = vpop.f32.mrf.mxu0  ;;  %v6080_v17 = vpop.f32.mrf.mxu1  ;;  %6814 = vmatmul.mubr.bf16.vlgmr.msra.gmra.mxu0 %v6511_v21  ;;  %v5740_v48 = vmax.f32 %v5584_v35, 0.0 }
 0x5d0   : > { %v5588_v29 = vadd.f32 %v5587_v45, %v14933_v30  ;;  %v6081_v47 = vadd.f32 %v6080_v17, %v15188_v23  ;;  %6322 = vmatprep.mubr.bf16.mxu1 %v5813_v8  ;;  %v6389_v42 = vmax.f32 %v6079_v46, 0.0  ;;  %v5741_v59 = vmax.f32 %v5586_v32, 0.0 }
 0x5d1   : > { %v5589_v16 = vpop.f32.mrf.mxu0  ;;  %v6084_v60 = vpop.f32.mrf.mxu1  ;;  %6323 = vmatmul.mubr.bf16.gmra.mxu1 %v5812_v2 }
 0x5d2   : > { %v6390_v15 = vmax.f32 %v6081_v47, 0.0  ;;  %v5590_v43 = vadd.f32 %v5589_v16, %v14930_v34  ;;  %v5742_v27 = vmax.f32 %v5588_v29, 0.0  ;;  %v6513_v20 = vpack.c.bf16 %v6389_v42, %v6387_v5 }
 0x5d3   : > { %v5593_v12 = vpop.f32.mrf.mxu0  ;;  %v6086_v25 = vpop.f32.mrf.mxu1  ;;  %v6085_v53 = vadd.f32 %v6084_v60, %v15191_v40 }
 0x5d4   : > { %v5743_v52 = vmax.f32 %v5590_v43, 0.0  ;;  %v6514_v37 = vpack.c.bf16 %v6390_v15, %v6388_v3  ;;  %v6087_v61 = vadd.f32 %v6086_v25, %v15188_v23  ;;  %v5814_v9 = vpack.c.bf16 %v5742_v27, %v5740_v48 }
 0x5d5   : > { %v5595_v38 = vpop.f32.mrf.mxu0  ;;  %v6088_v51 = vpop.f32.mrf.mxu1  ;;  %v5594_v0 = vadd.f32 %v5593_v12, %v14933_v30  ;;  %v6391_v31 = vmax.f32 %v6085_v53, 0.0 }
 0x5d6   : > { %v6089_v14 = vadd.f32 %v6088_v51, %v15191_v40  ;;  %6823 = vmatprep.mubr.bf16.mxu0 %v6514_v37  ;;  %v5815_v36 = vpack.c.bf16 %v5743_v52, %v5741_v59  ;;  %v5596_v22 = vadd.f32 %v5595_v38, %v14930_v34  ;;  %v6392_v55 = vmax.f32 %v6087_v61, 0.0 }
 0x5d7   : > { %v5597_v28 = vpop.f32.mrf.mxu0  ;;  %v6090_v6 = vpop.f32.mrf.mxu1  ;;  %6824 = vmatmul.mubr.bf16.gmra.mxu0 %v6513_v20  ;;  %v5744_v1 = vmax.f32 %v5594_v0, 0.0 }
 0x5d8   : > { %v5598_v44 = vadd.f32 %v5597_v28, %v14933_v30  ;;  %v6091_v10 = vadd.f32 %v6090_v6, %v15188_v23  ;;  %6332 = vmatprep.mubr.bf16.mxu1 %v5815_v36  ;;  %v6393_v33 = vmax.f32 %v6089_v14, 0.0  ;;  %v5745_v24 = vmax.f32 %v5596_v22, 0.0 }
 0x5d9   : > { %v5599_v50 = vpop.f32.mrf.mxu0  ;;  %v6094_v18 = vpop.f32.mrf.mxu1  ;;  %6333 = vmatmul.mubr.bf16.gmra.mxu1 %v5814_v9 }
 0x5da   : > { %v6394_v4 = vmax.f32 %v6091_v10, 0.0  ;;  %v5600_v13 = vadd.f32 %v5599_v50, %v14930_v34  ;;  %v5746_v63 = vmax.f32 %v5598_v44, 0.0  ;;  %v6515_v21 = vpack.c.bf16 %v6393_v33, %v6391_v31 }
 0x5db   : > { %v5603_v11 = vpop.f32.mrf.mxu0  ;;  %v6096_v7 = vpop.f32.mrf.mxu1  ;;  %v6095_v39 = vadd.f32 %v6094_v18, %v15191_v40 }
 0x5dc   : > { %v5747_v26 = vmax.f32 %v5600_v13, 0.0  ;;  %v6516_v54 = vpack.c.bf16 %v6394_v4, %v6392_v55  ;;  %v6097_v19 = vadd.f32 %v6096_v7, %v15188_v23  ;;  %v5816_v2 = vpack.c.bf16 %v5746_v63, %v5744_v1 }
 0x5dd   : > { %v5605_v57 = vpop.f32.mrf.mxu0  ;;  %v6098_v41 = vpop.f32.mrf.mxu1  ;;  %v5604_v35 = vadd.f32 %v5603_v11, %v14933_v30  ;;  %v6395_v5 = vmax.f32 %v6095_v39, 0.0 }
 0x5de   : > { %v6099_v46 = vadd.f32 %v6098_v41, %v15191_v40  ;;  %6833 = vmatprep.mubr.bf16.mxu0 %v6516_v54  ;;  %v5817_v8 = vpack.c.bf16 %v5747_v26, %v5745_v24  ;;  %v5606_v32 = vadd.f32 %v5605_v57, %v14930_v34  ;;  %v6396_v3 = vmax.f32 %v6097_v19, 0.0 }
 0x5df   : > { %v5607_v45 = vpop.f32.mrf.mxu0  ;;  %v6100_v17 = vpop.f32.mrf.mxu1  ;;  %6834 = vmatmul.mubr.bf16.gmra.mxu0 %v6515_v21  ;;  %v5748_v48 = vmax.f32 %v5604_v35, 0.0 }
 0x5e0   : > { %v5608_v29 = vadd.f32 %v5607_v45, %v14933_v30  ;;  %v6101_v47 = vadd.f32 %v6100_v17, %v15188_v23  ;;  %6342 = vmatprep.mubr.bf16.mxu1 %v5817_v8  ;;  %v6397_v42 = vmax.f32 %v6099_v46, 0.0  ;;  %v5749_v59 = vmax.f32 %v5606_v32, 0.0 }
 0x5e1   : > { %v5609_v16 = vpop.f32.mrf.mxu0  ;;  %v6104_v60 = vpop.f32.mrf.mxu1  ;;  %6343 = vmatmul.mubr.bf16.gmra.mxu1 %v5816_v2  ;;  %v12423_v2 = vld [vmem:[%s16815_s4 + $0x6a0] ss:$8 sps:$4 sm:$0xff]  }
 0x5e2   : > { %v6398_v15 = vmax.f32 %v6101_v47, 0.0  ;;  %v5610_v43 = vadd.f32 %v5609_v16, %v14930_v34  ;;  %v5750_v27 = vmax.f32 %v5608_v29, 0.0  ;;  %v6517_v20 = vpack.c.bf16 %v6397_v42, %v6395_v5  ;;  %v12426_v29 = vld [vmem:[%s16820_s9 + $0x70] ss:$8 sps:$4 sm:$0xff]   ;;  %v12428_v47 = vld [vmem:[%s16820_s9 + $0x74] ss:$8 sps:$4 sm:$0xff]   ;;  %7559 = vmatpush2.bf16.msra.mxu1 %v12423_v2 }
 0x5e3   : > { %v5613_v12 = vpop.f32.mrf.mxu0  ;;  %v6106_v25 = vpop.f32.mrf.mxu1  ;;  %v6105_v53 = vadd.f32 %v6104_v60, %v15191_v40  ;;  %8285 = vmatprep.subr.bf16.mxu0 %v12428_v47 }
 0x5e4   : > { %v5751_v52 = vmax.f32 %v5610_v43, 0.0  ;;  %v6518_v37 = vpack.c.bf16 %v6398_v15, %v6396_v3  ;;  %v6107_v61 = vadd.f32 %v6106_v25, %v15188_v23  ;;  %v5818_v9 = vpack.c.bf16 %v5750_v27, %v5748_v48  ;;  %8286 = vmatpush1.bf16.msra.mxu0 %v12426_v29 }
 0x5e5   : > { %v5615_v38 = vpop.f32.mrf.mxu0  ;;  %v6108_v51 = vpop.f32.mrf.mxu1  ;;  %v5614_v22 = vadd.f32 %v5613_v12, %v14933_v30  ;;  %v6399_v63 = vmax.f32 %v6105_v53, 0.0 }
 0x5e6   : > { %v6109_v14 = vadd.f32 %v6108_v51, %v15191_v40  ;;  %6843 = vmatprep.mubr.bf16.mxu0 %v6518_v37  ;;  %v5819_v36 = vpack.c.bf16 %v5751_v52, %v5749_v59  ;;  %v5616_v50 = vadd.f32 %v5615_v38, %v14930_v34  ;;  %v6400_v55 = vmax.f32 %v6107_v61, 0.0 }
 0x5e7   : > { %v5617_v28 = vpop.f32.mrf.mxu0  ;;  %v6110_v6 = vpop.f32.mrf.mxu1  ;;  %6844 = vmatmul.mubr.bf16.gmra.mxu0 %v6517_v20  ;;  %v5752_v24 = vmax.f32 %v5614_v22, 0.0 }
 0x5e8   : > { %v5618_v44 = vadd.f32 %v5617_v28, %v14933_v30  ;;  %v6111_v10 = vadd.f32 %v6110_v6, %v15188_v23  ;;  %6352 = vmatprep.mubr.bf16.mxu1 %v5819_v36  ;;  %v6401_v33 = vmax.f32 %v6109_v14, 0.0  ;;  %v5753_v57 = vmax.f32 %v5616_v50, 0.0 }
 0x5e9   : > { %v5619_v18 = vpop.f32.mrf.mxu0  ;;  %v6114_v0 = vpop.f32.mrf.mxu1  ;;  %6353 = vmatmul.mubr.bf16.gmra.mxu1 %v5818_v9 }
 0x5ea   : > { %v6402_v4 = vmax.f32 %v6111_v10, 0.0  ;;  %v5620_v13 = vadd.f32 %v5619_v18, %v14930_v34  ;;  %v5754_v11 = vmax.f32 %v5618_v44, 0.0  ;;  %v6519_v21 = vpack.c.bf16 %v6401_v33, %v6399_v63  ;;  %v12434_v63 = vld [vmem:[%s16820_s9 + $0x64] ss:$8 sps:$4 sm:$0xff]  }
 0x5eb   : > { %v5623_v7 = vpop.f32.mrf.mxu0  ;;  %v6116_v31 = vpop.f32.mrf.mxu1  ;;  %v6115_v19 = vadd.f32 %v6114_v0, %v15191_v40  ;;  %8287 = vmatprep.subr.bf16.mxu0 %v12434_v63 }
 0x5ec   : > { %v5755_v26 = vmax.f32 %v5620_v13, 0.0  ;;  %v6520_v1 = vpack.c.bf16 %v6402_v4, %v6400_v55  ;;  %v6117_v46 = vadd.f32 %v6116_v31, %v15188_v23  ;;  %v5820_v39 = vpack.c.bf16 %v5754_v11, %v5752_v24  ;;  %v12429_v55 = vld [vmem:[%s16815_s4 + $0x690] ss:$8 sps:$4 sm:$0xff]   ;;  %v12431_v11 = vld [vmem:[%s16815_s4 + $0x694] ss:$8 sps:$4 sm:$0xff]  }
 0x5ed   : > { %v5625_v41 = vpop.f32.mrf.mxu0  ;;  %v6118_v54 = vpop.f32.mrf.mxu1  ;;  %v5624_v35 = vadd.f32 %v5623_v7, %v14933_v30  ;;  %v6403_v5 = vmax.f32 %v6115_v19, 0.0  ;;  %v12432_v31 = vld [vmem:[%s16820_s9 + $0x60] ss:$8 sps:$4 sm:$0xff]   ;;  %7560 = vmatprep.subr.bf16.mxu1 %v12431_v11 }
 0x5ee   : > { %v6119_v49 = vadd.f32 %v6118_v54, %v15191_v40  ;;  %6853 = vmatprep.mubr.bf16.mxu0 %v6520_v1  ;;  %v5821_v8 = vpack.c.bf16 %v5755_v26, %v5753_v57  ;;  %v5626_v32 = vadd.f32 %v5625_v41, %v14930_v34  ;;  %v6404_v43 = vmax.f32 %v6117_v46, 0.0  ;;  %7561 = vmatpush2.bf16.msra.mxu1 %v12429_v55 }
 0x5ef   : > { %v5627_v45 = vpop.f32.mrf.mxu0  ;;  %v6120_v17 = vpop.f32.mrf.mxu1  ;;  %6854 = vmatmul.mubr.bf16.gmra.mxu0 %v6519_v21  ;;  %v5756_v37 = vmax.f32 %v5624_v35, 0.0 }
 0x5f0   : > { %v5628_v16 = vadd.f32 %v5627_v45, %v14933_v30  ;;  %v6121_v60 = vadd.f32 %v6120_v17, %v15188_v23  ;;  %6362 = vmatprep.mubr.bf16.mxu1 %v5821_v8  ;;  %v6405_v3 = vmax.f32 %v6119_v49, 0.0  ;;  %v5757_v52 = vmax.f32 %v5626_v32, 0.0  ;;  %8288 = vmatpush1.bf16.msra.mxu0 %v12432_v31 }
 0x5f1   : > { %v5629_v42 = vpop.f32.mrf.mxu0  ;;  %v6124_v15 = vpop.f32.mrf.mxu1  ;;  %6363 = vmatmul.mubr.bf16.gmra.mxu1 %v5820_v39 }
 0x5f2   : > { %v6406_v12 = vmax.f32 %v6121_v60, 0.0  ;;  %v5630_v25 = vadd.f32 %v5629_v42, %v14930_v34  ;;  %v5758_v59 = vmax.f32 %v5628_v16, 0.0  ;;  %v6521_v48 = vpack.c.bf16 %v6405_v3, %v6403_v5  ;;  %v12437_v5 = vld [vmem:[%s16815_s4 + $0x684] ss:$8 sps:$4 sm:$0xff]  }
 0x5f3   : > { %v6126_v27 = vpop.f32.mrf.mxu1  ;;  %v6125_v6 = vadd.f32 %v6124_v15, %v15191_v40  ;;  %7562 = vmatprep.subr.bf16.mxu1 %v12437_v5 }
 0x5f4   : > { %v5759_v38 = vmax.f32 %v5630_v25, 0.0  ;;  %v6522_v51 = vpack.c.bf16 %v6406_v12, %v6404_v43  ;;  %v6127_v20 = vadd.f32 %v6126_v27, %v15188_v23  ;;  %v5822_v34 = vpack.c.bf16 %v5758_v59, %v5756_v37  ;;  %v12435_v25 = vld [vmem:[%s16815_s4 + $0x680] ss:$8 sps:$4 sm:$0xff]   ;;  %v12440_v59 = vld [vmem:[%s16820_s9 + $0x54] ss:$8 sps:$4 sm:$0xff]  }
 0x5f5   : > { %v6128_v30 = vpop.f32.mrf.mxu1  ;;  %v6407_v50 = vmax.f32 %v6125_v6, 0.0  ;;  %8289 = vmatprep.subr.bf16.mxu0 %v12440_v59  ;;  %7563 = vmatpush2.bf16.msra.mxu1 %v12435_v25 }
 0x5f6   : > { %v6129_v14 = vadd.f32 %v6128_v30, %v15191_v40  ;;  %6863 = vmatprep.mubr.bf16.mxu0 %v6522_v51  ;;  %v5823_v61 = vpack.c.bf16 %v5759_v38, %v5757_v52  ;;  %v6408_v53 = vmax.f32 %v6127_v20, 0.0  ;;  %v12438_v52 = vld [vmem:[%s16820_s9 + $0x50] ss:$8 sps:$4 sm:$0xff]  }
 0x5f7   : > { %v6130_v28 = vpop.f32.mrf.mxu1  ;;  %6864 = vmatmul.mubr.bf16.gmra.mxu0 %v6521_v48 }
 0x5f8   : > { %v6131_v36 = vadd.f32 %v6130_v28, %v15188_v23  ;;  %6372 = vmatprep.mubr.bf16.mxu1 %v5823_v61  ;;  %v6409_v44 = vmax.f32 %v6129_v14, 0.0  ;;  %8290 = vmatpush1.bf16.msra.mxu0 %v12438_v52 }
 0x5f9   : > { %v6134_v9 = vpop.f32.mrf.mxu1  ;;  %6373 = vmatmul.mubr.bf16.gmra.mxu1 %v5822_v34 }
 0x5fa   : > { %v6410_v10 = vmax.f32 %v6131_v36, 0.0  ;;  %v6523_v33 = vpack.c.bf16 %v6409_v44, %v6407_v50  ;;  %v6135_v26 = vadd.f32 %v6134_v9, %v15191_v40 }
 0x5fb   : > { %v6136_v22 = vpop.f32.mrf.mxu1 }
 0x5fc   : > { %v6524_v18 = vpack.c.bf16 %v6410_v10, %v6408_v53  ;;  %v6137_v4 = vadd.f32 %v6136_v22, %v15188_v23  ;;  %v6411_v46 = vmax.f32 %v6135_v26, 0.0 }
 0x5fd   : > { %v6138_v0 = vpop.f32.mrf.mxu1 }
 0x5fe   : > { %v6139_v13 = vadd.f32 %v6138_v0, %v15191_v40  ;;  %6873 = vmatprep.mubr.bf16.mxu0 %v6524_v18  ;;  %v6412_v41 = vmax.f32 %v6137_v4, 0.0 }
 0x5ff   : > { %v6140_v7 = vpop.f32.mrf.mxu1  ;;  %6874 = vmatmul.mubr.bf16.gmra.mxu0 %v6523_v33 }
 0x600   : > { %v6141_v24 = vadd.f32 %v6140_v7, %v15188_v23  ;;  %v6413_v54 = vmax.f32 %v6139_v13, 0.0 }
 0x601   : > { %v6144_v57 = vpop.f32.mrf.mxu1 }
 0x602   : > { %v6414_v1 = vmax.f32 %v6141_v24, 0.0  ;;  %v6525_v39 = vpack.c.bf16 %v6413_v54, %v6411_v46  ;;  %v6145_v8 = vadd.f32 %v6144_v57, %v15191_v40  ;;  %v12443_v54 = vld [vmem:[%s16820_s9 + $0x44] ss:$8 sps:$4 sm:$0xff]  }
 0x603   : > { %v6146_v21 = vpop.f32.mrf.mxu1  ;;  %8291 = vmatprep.subr.bf16.mxu0 %v12443_v54  ;;  %v12450_v54 = vld [vmem:[%s16820_s9 + $0x20] ss:$8 sps:$4 sm:$0xff]  }
 0x604   : > { %v6526_v49 = vpack.c.bf16 %v6414_v1, %v6412_v41  ;;  %v6147_v19 = vadd.f32 %v6146_v21, %v15188_v23  ;;  %v6415_v35 = vmax.f32 %v6145_v8, 0.0  ;;  %v12441_v41 = vld [vmem:[%s16820_s9 + $0x40] ss:$8 sps:$4 sm:$0xff]  }
 0x605   : > { %v6148_v62 = vpop.f32.mrf.mxu1  ;;  %8292 = vmatpush1.bf16.msra.mxu0 %v12441_v41 }
 0x606   : > { %v6149_v45 = vadd.f32 %v6148_v62, %v15191_v40  ;;  %6883 = vmatprep.mubr.bf16.mxu0 %v6526_v49  ;;  %v6416_v47 = vmax.f32 %v6147_v19, 0.0  ;;  %v12446_v49 = vld [vmem:[%s16819_s8 + $0x74] ss:$8 sps:$4 sm:$0xff]  }
 0x607   : > { %v6150_v17 = vpop.f32.mrf.mxu1  ;;  %6884 = vmatmul.mubr.bf16.gmra.mxu0 %v6525_v39  ;;  %8910 = vmatprep.subr.bf16.mxu1 %v12446_v49 }
 0x608   : > { %v6151_v2 = vadd.f32 %v6150_v17, %v15188_v23  ;;  %v6417_v32 = vmax.f32 %v6149_v45, 0.0 }
 0x609   : > { %v6154_v29 = vpop.f32.mrf.mxu1 }
 0x60a   : > { %v6418_v16 = vmax.f32 %v6151_v2, 0.0  ;;  %v6527_v43 = vpack.c.bf16 %v6417_v32, %v6415_v35  ;;  %v6155_v38 = vadd.f32 %v6154_v29, %v15191_v40 }
 0x60b   : > { %v6156_v60 = vpop.f32.mrf.mxu1 }
 0x60c   : > { %v6528_v42 = vpack.c.bf16 %v6418_v16, %v6416_v47  ;;  %v6157_v3 = vadd.f32 %v6156_v60, %v15188_v23  ;;  %v6419_v61 = vmax.f32 %v6155_v38, 0.0 }
 0x60d   : > { %v6158_v15 = vpop.f32.mrf.mxu1 }
 0x60e   : > { %v6159_v12 = vadd.f32 %v6158_v15, %v15191_v40  ;;  %6893 = vmatprep.mubr.bf16.mxu0 %v6528_v42  ;;  %v6420_v30 = vmax.f32 %v6157_v3, 0.0 }
 0x60f   : > { %v6160_v27 = vpop.f32.mrf.mxu1  ;;  %6894 = vmatmul.mubr.bf16.gmra.mxu0 %v6527_v43 }
 0x610   : > { %v6161_v51 = vadd.f32 %v6160_v27, %v15188_v23  ;;  %v6421_v48 = vmax.f32 %v6159_v12, 0.0 }
 0x611   : > { %v6164_v37 = vpop.f32.mrf.mxu1 }
 0x612   : > { %v6422_v20 = vmax.f32 %v6161_v51, 0.0  ;;  %v6529_v6 = vpack.c.bf16 %v6421_v48, %v6419_v61  ;;  %v6165_v44 = vadd.f32 %v6164_v37, %v15191_v40  ;;  %v12447_v37 = vld [vmem:[%s16820_s9 + $0x30] ss:$8 sps:$4 sm:$0xff]  }
 0x613   : > { %v6166_v14 = vpop.f32.mrf.mxu1 }
 0x614   : > { %v6530_v28 = vpack.c.bf16 %v6422_v20, %v6420_v30  ;;  %v6167_v36 = vadd.f32 %v6166_v14, %v15188_v23  ;;  %v6423_v4 = vmax.f32 %v6165_v44, 0.0  ;;  %v12449_v30 = vld [vmem:[%s16820_s9 + $0x34] ss:$8 sps:$4 sm:$0xff]  }
 0x615   : > { %v6168_v34 = vpop.f32.mrf.mxu1  ;;  %8293 = vmatprep.subr.bf16.mxu0 %v12449_v30  ;;  %v12458_v30 = vld [vmem:[%s16820_s9 + $0x14] ss:$8 sps:$4 sm:$0xff]  }
 0x616   : > { %v6169_v9 = vadd.f32 %v6168_v34, %v15191_v40  ;;  %6903 = vmatprep.mubr.bf16.mxu0 %v6530_v28  ;;  %v6424_v50 = vmax.f32 %v6167_v36, 0.0  ;;  %8294 = vmatpush1.bf16.msra.mxu0 %v12447_v37  ;;  %v12456_v37 = vld [vmem:[%s16820_s9 + $0x10] ss:$8 sps:$4 sm:$0xff]  }
 0x617   : > { %v6170_v53 = vpop.f32.mrf.mxu1  ;;  %6904 = vmatmul.mubr.bf16.gmra.mxu0 %v6529_v6 }
 0x618   : > { %v6171_v10 = vadd.f32 %v6170_v53, %v15188_v23  ;;  %v6425_v18 = vmax.f32 %v6169_v9, 0.0 }
 0x619   : > { %v6174_v22 = vpop.f32.mrf.mxu1 }
 0x61a   : > { %v6426_v0 = vmax.f32 %v6171_v10, 0.0  ;;  %v6531_v11 = vpack.c.bf16 %v6425_v18, %v6423_v4  ;;  %v6175_v26 = vadd.f32 %v6174_v22, %v15191_v40 }
 0x61b   : > { %v6176_v33 = vpop.f32.mrf.mxu1 }
 0x61c   : > { %v6532_v13 = vpack.c.bf16 %v6426_v0, %v6424_v50  ;;  %v6177_v7 = vadd.f32 %v6176_v33, %v15188_v23  ;;  %v6427_v39 = vmax.f32 %v6175_v26, 0.0 }
 0x61d   : > { %v6178_v55 = vpop.f32.mrf.mxu1 }
 0x61e   : > { %v6179_v31 = vadd.f32 %v6178_v55, %v15191_v40  ;;  %6913 = vmatprep.mubr.bf16.mxu0 %v6532_v13  ;;  %v6428_v1 = vmax.f32 %v6177_v7, 0.0 }
 0x61f   : > { %v6180_v63 = vpop.f32.mrf.mxu1  ;;  %6914 = vmatmul.mubr.bf16.gmra.mxu0 %v6531_v11 }
 0x620   : > { %v6181_v24 = vadd.f32 %v6180_v63, %v15188_v23  ;;  %v6429_v21 = vmax.f32 %v6179_v31, 0.0 }
 0x621   : > { %v6184_v57 = vpop.f32.mrf.mxu1 }
 0x622   : > { %v6430_v46 = vmax.f32 %v6181_v24, 0.0  ;;  %v6533_v17 = vpack.c.bf16 %v6429_v21, %v6427_v39  ;;  %v6185_v47 = vadd.f32 %v6184_v57, %v15191_v40 }
 0x623   : > { %v6186_v62 = vpop.f32.mrf.mxu1 }
 0x624   : > { %v6534_v19 = vpack.c.bf16 %v6430_v46, %v6428_v1  ;;  %v6187_v8 = vadd.f32 %v6186_v62, %v15188_v23  ;;  %v6431_v43 = vmax.f32 %v6185_v47, 0.0  ;;  %v12452_v1 = vld [vmem:[%s16820_s9 + $0x24] ss:$8 sps:$4 sm:$0xff]  }
 0x625   : > { %v6188_v45 = vpop.f32.mrf.mxu1  ;;  %8295 = vmatprep.subr.bf16.mxu0 %v12452_v1  ;;  %v12461_v1 = vld [vmem:[%s16820_s9 + $0x4] ss:$8 sps:$4 sm:$0xff]  }
 0x626   : > { %v6189_v2 = vadd.f32 %v6188_v45, %v15191_v40  ;;  %6923 = vmatprep.mubr.bf16.mxu0 %v6534_v19  ;;  %v6432_v60 = vmax.f32 %v6187_v8, 0.0  ;;  %8296 = vmatpush1.bf16.msra.mxu0 %v12450_v54  ;;  %v12459_v54 = vld [vmem:[%s16820_s9] ss:$8 sps:$4 sm:$0xff]  }
 0x627   : > { %v6190_v29 = vpop.f32.mrf.mxu1  ;;  %6924 = vmatmul.mubr.bf16.gmra.mxu0 %v6533_v17  ;;  %8297 = vmatprep.subr.bf16.mxu0 %v12458_v30  ;;  %v12467_v30 = vld [vmem:[%s16820_s9 + $0xf4] ss:$8 sps:$4 sm:$0xff]  }
 0x628   : > { %v6191_v32 = vadd.f32 %v6190_v29, %v15188_v23  ;;  %v6433_v35 = vmax.f32 %v6189_v2, 0.0 }
 0x629   : > { %v6194_v16 = vpop.f32.mrf.mxu1 }
 0x62a   : > { %v6434_v42 = vmax.f32 %v6191_v32, 0.0  ;;  %v6535_v25 = vpack.c.bf16 %v6433_v35, %v6431_v43  ;;  %v6195_v59 = vadd.f32 %v6194_v16, %v15191_v40  ;;  %8298 = vmatpush1.bf16.msra.mxu0 %v12456_v37  ;;  %v12465_v37 = vld [vmem:[%s16820_s9 + $0xf0] ss:$8 sps:$4 sm:$0xff]  }
 0x62b   : > { %v6196_v15 = vpop.f32.mrf.mxu1  ;;  %8299 = vmatprep.subr.bf16.mxu0 %v12461_v1  ;;  %v12470_v1 = vld [vmem:[%s16820_s9 + $0xe4] ss:$8 sps:$4 sm:$0xff]  }
 0x62c   : > { %v6536_v3 = vpack.c.bf16 %v6434_v42, %v6432_v60  ;;  %v6197_v5 = vadd.f32 %v6196_v15, %v15188_v23  ;;  %v6435_v28 = vmax.f32 %v6195_v59, 0.0 }
 0x62d   : > { %v6198_v12 = vpop.f32.mrf.mxu1 }
 0x62e   : > { %v6199_v27 = vadd.f32 %v6198_v12, %v15191_v40  ;;  %6933 = vmatprep.mubr.bf16.mxu0 %v6536_v3  ;;  %v6436_v48 = vmax.f32 %v6197_v5, 0.0  ;;  %8300 = vmatpush1.bf16.msra.mxu0 %v12459_v54  ;;  %v12468_v54 = vld [vmem:[%s16820_s9 + $0xe0] ss:$8 sps:$4 sm:$0xff]  }
 0x62f   : > { %v6200_v52 = vpop.f32.mrf.mxu1  ;;  %6934 = vmatmul.mubr.bf16.gmra.mxu0 %v6535_v25  ;;  %8301 = vmatprep.subr.bf16.mxu0 %v12467_v30  ;;  %v12474_v30 = vld [vmem:[%s16820_s9 + $0xd0] ss:$8 sps:$4 sm:$0xff]  }
 0x630   : > { %v6201_v38 = vadd.f32 %v6200_v52, %v15188_v23  ;;  %v6437_v20 = vmax.f32 %v6199_v27, 0.0 }
 0x631   : > { %v6204_v51 = vpop.f32.mrf.mxu1 }
 0x632   : > { %v6438_v14 = vmax.f32 %v6201_v38, 0.0  ;;  %v6537_v36 = vpack.c.bf16 %v6437_v20, %v6435_v28  ;;  %v6205_v10 = vadd.f32 %v6204_v51, %v15191_v40  ;;  %8302 = vmatpush2.bf16.msra.mxu0 %v12465_v37 }
 0x633   : > { %v6206_v61 = vpop.f32.mrf.mxu1  ;;  %8303 = vmatprep.subr.bf16.mxu0 %v12470_v1 }
 0x634   : > { %v6538_v34 = vpack.c.bf16 %v6438_v14, %v6436_v48  ;;  %v6207_v9 = vadd.f32 %v6206_v61, %v15188_v23  ;;  %v6439_v13 = vmax.f32 %v6205_v10, 0.0 }
 0x635   : > { %v6208_v6 = vpop.f32.mrf.mxu1 }
 0x636   : > { %v6209_v53 = vadd.f32 %v6208_v6, %v15191_v40  ;;  %6943 = vmatprep.mubr.bf16.mxu0 %v6538_v34  ;;  %v6440_v18 = vmax.f32 %v6207_v9, 0.0  ;;  %8304 = vmatpush2.bf16.msra.mxu0 %v12468_v54 }
 0x637   : > { %v6210_v44 = vpop.f32.mrf.mxu1  ;;  %6944 = vmatmul.mubr.bf16.gmra.mxu0 %v6537_v36 }
 0x638   : > { %v6211_v22 = vadd.f32 %v6210_v44, %v15188_v23  ;;  %v6441_v0 = vmax.f32 %v6209_v53, 0.0 }
 0x639   : > { %v6214_v50 = vpop.f32.mrf.mxu1 }
 0x63a   : > { %v6442_v33 = vmax.f32 %v6211_v22, 0.0  ;;  %v6539_v7 = vpack.c.bf16 %v6441_v0, %v6439_v13  ;;  %v6215_v24 = vadd.f32 %v6214_v50, %v15191_v40 }
 0x63b   : > { %v6216_v4 = vpop.f32.mrf.mxu1 }
 0x63c   : > { %v6540_v55 = vpack.c.bf16 %v6442_v33, %v6440_v18  ;;  %v6217_v31 = vadd.f32 %v6216_v4, %v15188_v23  ;;  %v6443_v39 = vmax.f32 %v6215_v24, 0.0 }
 0x63d   : > { %v6218_v11 = vpop.f32.mrf.mxu1 }
 0x63e   : > { %v6219_v63 = vadd.f32 %v6218_v11, %v15191_v40  ;;  %6953 = vmatprep.mubr.bf16.mxu0 %v6540_v55  ;;  %v6444_v21 = vmax.f32 %v6217_v31, 0.0 }
 0x63f   : > { %v6220_v26 = vpop.f32.mrf.mxu1  ;;  %6954 = vmatmul.mubr.bf16.gmra.mxu0 %v6539_v7 }
 0x640   : > { %v6221_v57 = vadd.f32 %v6220_v26, %v15188_v23  ;;  %v6445_v46 = vmax.f32 %v6219_v63, 0.0 }
 0x641   : > { %v6224_v41 = vpop.f32.mrf.mxu1 }
 0x642   : > { %v6446_v49 = vmax.f32 %v6221_v57, 0.0  ;;  %v6541_v17 = vpack.c.bf16 %v6445_v46, %v6443_v39  ;;  %v6225_v47 = vadd.f32 %v6224_v41, %v15191_v40 }
 0x643   : > { %v6226_v62 = vpop.f32.mrf.mxu1 }
 0x644   : > { %v6542_v19 = vpack.c.bf16 %v6446_v49, %v6444_v21  ;;  %v6227_v8 = vadd.f32 %v6226_v62, %v15188_v23  ;;  %v6447_v43 = vmax.f32 %v6225_v47, 0.0 }
 0x645   : > { %v6228_v45 = vpop.f32.mrf.mxu1 }
 0x646   : > { %v6229_v2 = vadd.f32 %v6228_v45, %v15191_v40  ;;  %6963 = vmatprep.mubr.bf16.mxu0 %v6542_v19  ;;  %v6448_v60 = vmax.f32 %v6227_v8, 0.0 }
 0x647   : > { %v6230_v29 = vpop.f32.mrf.mxu1  ;;  %6964 = vmatmul.mubr.bf16.gmra.mxu0 %v6541_v17 }
 0x648   : > { %v6231_v32 = vadd.f32 %v6230_v29, %v15188_v23  ;;  %v6449_v35 = vmax.f32 %v6229_v2, 0.0 }
 0x649   : > { %v6234_v16 = vpop.f32.mrf.mxu1 }
 0x64a   : > { %v6450_v42 = vmax.f32 %v6231_v32, 0.0  ;;  %v6543_v25 = vpack.c.bf16 %v6449_v35, %v6447_v43  ;;  %v6235_v59 = vadd.f32 %v6234_v16, %v15191_v40 }
 0x64b   : > { %v6236_v15 = vpop.f32.mrf.mxu1 }
 0x64c   : > { %v6544_v3 = vpack.c.bf16 %v6450_v42, %v6448_v60  ;;  %v6237_v5 = vadd.f32 %v6236_v15, %v15188_v23  ;;  %v6451_v28 = vmax.f32 %v6235_v59, 0.0 }
 0x64d   : > { %v6238_v12 = vpop.f32.mrf.mxu1 }
 0x64e   : > { %v6239_v27 = vadd.f32 %v6238_v12, %v15191_v40  ;;  %6973 = vmatprep.mubr.bf16.mxu0 %v6544_v3  ;;  %v6452_v48 = vmax.f32 %v6237_v5, 0.0 }
 0x64f   : > { %v6240_v52 = vpop.f32.mrf.mxu1  ;;  %6974 = vmatmul.mubr.bf16.gmra.mxu0 %v6543_v25 }
 0x650   : > { %v6241_v38 = vadd.f32 %v6240_v52, %v15188_v23  ;;  %v6453_v20 = vmax.f32 %v6239_v27, 0.0 }
 0x651   : > { %v6244_v51 = vpop.f32.mrf.mxu1 }
 0x652   : > { %v6454_v14 = vmax.f32 %v6241_v38, 0.0  ;;  %v6545_v36 = vpack.c.bf16 %v6453_v20, %v6451_v28  ;;  %v6245_v10 = vadd.f32 %v6244_v51, %v15191_v40 }
 0x653   : > { %v6246_v61 = vpop.f32.mrf.mxu1 }
 0x654   : > { %v6546_v34 = vpack.c.bf16 %v6454_v14, %v6452_v48  ;;  %v6247_v9 = vadd.f32 %v6246_v61, %v15188_v23  ;;  %v6455_v13 = vmax.f32 %v6245_v10, 0.0 }
 0x655   : > { %v6248_v6 = vpop.f32.mrf.mxu1 }
 0x656   : > { %v6249_v53 = vadd.f32 %v6248_v6, %v15191_v40  ;;  %6983 = vmatprep.mubr.bf16.mxu0 %v6546_v34  ;;  %v6456_v18 = vmax.f32 %v6247_v9, 0.0 }
 0x657   : > { %v6250_v44 = vpop.f32.mrf.mxu1  ;;  %6984 = vmatmul.mubr.bf16.gmra.mxu0 %v6545_v36 }
 0x658   : > { %v6251_v22 = vadd.f32 %v6250_v44, %v15188_v23  ;;  %v6457_v0 = vmax.f32 %v6249_v53, 0.0 }
 0x659   : > { %v6254_v50 = vpop.f32.mrf.mxu1 }
 0x65a   : > { %v6458_v33 = vmax.f32 %v6251_v22, 0.0  ;;  %v6547_v7 = vpack.c.bf16 %v6457_v0, %v6455_v13  ;;  %v6255_v24 = vadd.f32 %v6254_v50, %v15191_v40 }
 0x65b   : > { %v6256_v4 = vpop.f32.mrf.mxu1 }
 0x65c   : > { %v6548_v55 = vpack.c.bf16 %v6458_v33, %v6456_v18  ;;  %v6257_v31 = vadd.f32 %v6256_v4, %v15188_v23  ;;  %v6459_v39 = vmax.f32 %v6255_v24, 0.0 }
 0x65d   : > { %v6258_v11 = vpop.f32.mrf.mxu1 }
 0x65e   : > { %v6259_v63 = vadd.f32 %v6258_v11, %v15191_v40  ;;  %6993 = vmatprep.mubr.bf16.mxu0 %v6548_v55  ;;  %v6460_v21 = vmax.f32 %v6257_v31, 0.0 }
 0x65f   : > { %v6260_v26 = vpop.f32.mrf.mxu1  ;;  %6994 = vmatmul.mubr.bf16.gmra.mxu0 %v6547_v7 }
 0x660   : > { %v6261_v57 = vadd.f32 %v6260_v26, %v15188_v23  ;;  %v6461_v46 = vmax.f32 %v6259_v63, 0.0 }
 0x661   : > { %v6264_v41 = vpop.f32.mrf.mxu1 }
 0x662   : > { %v6462_v49 = vmax.f32 %v6261_v57, 0.0  ;;  %v6549_v17 = vpack.c.bf16 %v6461_v46, %v6459_v39  ;;  %v6265_v47 = vadd.f32 %v6264_v41, %v15191_v40 }
 0x663   : > { %v6266_v62 = vpop.f32.mrf.mxu1 }
 0x664   : > { %v6550_v19 = vpack.c.bf16 %v6462_v49, %v6460_v21  ;;  %v6267_v8 = vadd.f32 %v6266_v62, %v15188_v23  ;;  %v6463_v43 = vmax.f32 %v6265_v47, 0.0 }
 0x665   : > { %v6268_v45 = vpop.f32.mrf.mxu1 }
 0x666   : > { %v6269_v2 = vadd.f32 %v6268_v45, %v15191_v40  ;;  %7003 = vmatprep.mubr.bf16.mxu0 %v6550_v19  ;;  %v6464_v60 = vmax.f32 %v6267_v8, 0.0 }
 0x667   : > { %v6270_v29 = vpop.f32.mrf.mxu1  ;;  %7004 = vmatmul.mubr.bf16.gmra.mxu0 %v6549_v17 }
 0x668   : > { %v6271_v32 = vadd.f32 %v6270_v29, %v15188_v23  ;;  %v6465_v35 = vmax.f32 %v6269_v2, 0.0 }
 0x669   : > { %v6274_v16 = vpop.f32.mrf.mxu1 }
 0x66a   : > { %v6466_v42 = vmax.f32 %v6271_v32, 0.0  ;;  %v6551_v25 = vpack.c.bf16 %v6465_v35, %v6463_v43  ;;  %v6275_v59 = vadd.f32 %v6274_v16, %v15191_v40 }
 0x66b   : > { %v6276_v15 = vpop.f32.mrf.mxu1 }
 0x66c   : > { %v6552_v3 = vpack.c.bf16 %v6466_v42, %v6464_v60  ;;  %v6277_v5 = vadd.f32 %v6276_v15, %v15188_v23  ;;  %v6467_v28 = vmax.f32 %v6275_v59, 0.0 }
 0x66d   : > { %v6278_v12 = vpop.f32.mrf.mxu1 }
 0x66e   : > { %v6279_v27 = vadd.f32 %v6278_v12, %v15191_v40  ;;  %7013 = vmatprep.mubr.bf16.mxu0 %v6552_v3  ;;  %v6468_v48 = vmax.f32 %v6277_v5, 0.0 }
 0x66f   : > { %v6280_v52 = vpop.f32.mrf.mxu1  ;;  %7014 = vmatmul.mubr.bf16.gmra.mxu0 %v6551_v25 }
 0x670   : > { %v6281_v38 = vadd.f32 %v6280_v52, %v15188_v23  ;;  %v6469_v20 = vmax.f32 %v6279_v27, 0.0 }
 0x671   : > { %v6284_v51 = vpop.f32.mrf.mxu1 }
 0x672   : > { %v6470_v14 = vmax.f32 %v6281_v38, 0.0  ;;  %v6553_v36 = vpack.c.bf16 %v6469_v20, %v6467_v28  ;;  %v6285_v10 = vadd.f32 %v6284_v51, %v15191_v40  ;;  %v11552_v51 = vld [vmem:[%s16816_s5 + $0xa] sm:$0x3] }
 0x673   : > { %v6286_v61 = vpop.f32.mrf.mxu1 }
 0x674   : > { %v6554_v34 = vpack.c.bf16 %v6470_v14, %v6468_v48  ;;  %v6287_v9 = vadd.f32 %v6286_v61, %v15188_v23  ;;  %v6471_v13 = vmax.f32 %v6285_v10, 0.0  ;;  %v12476_v48 = vld [vmem:[%s16820_s9 + $0xd4] ss:$8 sps:$4 sm:$0xff]  }
 0x675   : > { %v6288_v6 = vpop.f32.mrf.mxu1  ;;  %8305 = vmatprep.subr.bf16.mxu0 %v12476_v48  ;;  %v12479_v48 = vld [vmem:[%s16820_s9 + $0xc4] ss:$8 sps:$4 sm:$0xff]  }
 0x676   : > { %v6289_v53 = vadd.f32 %v6288_v6, %v15191_v40  ;;  %7023 = vmatprep.mubr.bf16.mxu0 %v6554_v34  ;;  %v6472_v18 = vmax.f32 %v6287_v9, 0.0  ;;  %v15424_v34 = vrot.slane %v11552_v51, %v13342_v58  ;;  %8306 = vmatpush2.bf16.msra.mxu0 %v12474_v30  ;;  %v12477_v30 = vld [vmem:[%s16820_s9 + $0xc0] ss:$8 sps:$4 sm:$0xff]  }
 0x677   : > { %v6290_v44 = vpop.f32.mrf.mxu1  ;;  %7024 = vmatmul.mubr.bf16.gmra.mxu0 %v6553_v36  ;;  %v15427_v36 = vrot.slane %v11552_v51, %v13337_v56  ;;  %8307 = vmatprep.subr.bf16.mxu0 %v12479_v48 }
 0x678   : > { %v6291_v22 = vadd.f32 %v6290_v44, %v15188_v23  ;;  %v6473_v0 = vmax.f32 %v6289_v53, 0.0 }
 0x679   : > { %v6294_v50 = vpop.f32.mrf.mxu1 }
 0x67a   : > { %v6474_v33 = vmax.f32 %v6291_v22, 0.0  ;;  %v6555_v7 = vpack.c.bf16 %v6473_v0, %v6471_v13  ;;  %v6295_v24 = vadd.f32 %v6294_v50, %v15191_v40  ;;  %8308 = vmatpush2.bf16.msra.mxu0 %v12477_v30 }
 0x67b   : > { %v6296_v4 = vpop.f32.mrf.mxu1 }
 0x67c   : > { %v6556_v55 = vpack.c.bf16 %v6474_v33, %v6472_v18  ;;  %v6297_v31 = vadd.f32 %v6296_v4, %v15188_v23  ;;  %v6475_v39 = vmax.f32 %v6295_v24, 0.0 }
 0x67d   : > { %v6298_v11 = vpop.f32.mrf.mxu1 }
 0x67e   : > { %v6299_v63 = vadd.f32 %v6298_v11, %v15191_v40  ;;  %7033 = vmatprep.mubr.bf16.mxu0 %v6556_v55  ;;  %v6476_v21 = vmax.f32 %v6297_v31, 0.0 }
 0x67f   : > { %v6300_v26 = vpop.f32.mrf.mxu1  ;;  %7034 = vmatmul.mubr.bf16.gmra.mxu0 %v6555_v7 }
 0x680   : > { %v6301_v57 = vadd.f32 %v6300_v26, %v15188_v23  ;;  %v6477_v46 = vmax.f32 %v6299_v63, 0.0 }
 0x681   : > { %v6304_v41 = vpop.f32.mrf.mxu1 }
 0x682   : > { %v6478_v49 = vmax.f32 %v6301_v57, 0.0  ;;  %v6557_v17 = vpack.c.bf16 %v6477_v46, %v6475_v39  ;;  %v6305_v47 = vadd.f32 %v6304_v41, %v15191_v40 }
 0x683   : > { %v6306_v62 = vpop.f32.mrf.mxu1 }
 0x684   : > { %v6558_v19 = vpack.c.bf16 %v6478_v49, %v6476_v21  ;;  %v6307_v8 = vadd.f32 %v6306_v62, %v15188_v23  ;;  %v6479_v43 = vmax.f32 %v6305_v47, 0.0  ;;  %v12455_v47 = vld [vmem:[%s16819_s8 + $0x64] ss:$8 sps:$4 sm:$0xff]  }
 0x685   : > { %v6308_v45 = vpop.f32.mrf.mxu1 }
 0x686   : > { %v6309_v2 = vadd.f32 %v6308_v45, %v15191_v40  ;;  %7043 = vmatprep.mubr.bf16.mxu0 %v6558_v19  ;;  %v6480_v60 = vmax.f32 %v6307_v8, 0.0 }
 0x687   : > { %v6310_v29 = vpop.f32.mrf.mxu1  ;;  %7044 = vmatmul.mubr.bf16.gmra.mxu0 %v6557_v17  ;;  %v12444_v17 = vld [vmem:[%s16819_s8 + $0x70] ss:$8 sps:$4 sm:$0xff]  }
 0x688   : > { %v6311_v32 = vadd.f32 %v6310_v29, %v15188_v23  ;;  %v6481_v35 = vmax.f32 %v6309_v2, 0.0 }
 0x689   : > { %v6314_v16 = vpop.f32.mrf.mxu1 }
 0x68a   : > { %v6482_v42 = vmax.f32 %v6311_v32, 0.0  ;;  %v6559_v25 = vpack.c.bf16 %v6481_v35, %v6479_v43  ;;  %v6315_v59 = vadd.f32 %v6314_v16, %v15191_v40 }
 0x68b   : > { %v6316_v15 = vpop.f32.mrf.mxu1 }
 0x68c   : > { %v6560_v3 = vpack.c.bf16 %v6482_v42, %v6480_v60  ;;  %v6317_v5 = vadd.f32 %v6316_v15, %v15188_v23  ;;  %v6483_v9 = vmax.f32 %v6315_v59, 0.0 }
 0x68d   : > { %v6318_v12 = vpop.f32.mrf.mxu1 }
 0x68e   : > { %v6319_v27 = vadd.f32 %v6318_v12, %v15191_v40  ;;  %7053 = vmatprep.mubr.bf16.mxu0 %v6560_v3  ;;  %v6484_v20 = vmax.f32 %v6317_v5, 0.0 }
 0x68f   : > { %v6320_v52 = vpop.f32.mrf.mxu1  ;;  %v6815_v37 = vpop.f32.mrf.mxu0  ;;  %7054 = vmatmul.mubr.bf16.gmra.mxu0 %v6559_v25 }
 0x690   : > { %v6321_v38 = vadd.f32 %v6320_v52, %v15188_v23  ;;  %v6485_v14 = vmax.f32 %v6319_v27, 0.0  ;;  %v6816_v4 = vadd.f32 %v6815_v37, %v15427_v36  ;;  %v12453_v27 = vld [vmem:[%s16819_s8 + $0x60] ss:$8 sps:$4 sm:$0xff]   ;;  %v12464_v52 = vld [vmem:[%s16819_s8 + $0x54] ss:$8 sps:$4 sm:$0xff]  }
 0x691   : > { %v6324_v28 = vpop.f32.mrf.mxu1  ;;  %v6817_v6 = vpop.f32.mrf.mxu0 }
 0x692   : > { %v6486_v61 = vmax.f32 %v6321_v38, 0.0  ;;  %v6561_v50 = vpack.c.bf16 %v6485_v14, %v6483_v9  ;;  %v6818_v18 = vadd.f32 %v6817_v6, %v15424_v34  ;;  %v6325_v63 = vadd.f32 %v6324_v28, %v15191_v40 }
 0x693   : > { %v6326_v53 = vpop.f32.mrf.mxu1  ;;  %v6819_v44 = vpop.f32.mrf.mxu0  ;;  %v7134_v21 = vmax.f32 %v6816_v4, 0.0  ;;  %v12473_v4 = vld [vmem:[%s16819_s8 + $0x44] ss:$8 sps:$4 sm:$0xff]  }
 0x694   : > { %v6562_v10 = vpack.c.bf16 %v6486_v61, %v6484_v20  ;;  %v6820_v22 = vadd.f32 %v6819_v44, %v15427_v36  ;;  %v6327_v11 = vadd.f32 %v6326_v53, %v15188_v23  ;;  %v7135_v41 = vmax.f32 %v6818_v18, 0.0 }
 0x695   : > { %v6328_v0 = vpop.f32.mrf.mxu1  ;;  %v6821_v33 = vpop.f32.mrf.mxu0  ;;  %v6487_v8 = vmax.f32 %v6325_v63, 0.0 }
 0x696   : > { %7063 = vmatprep.mubr.bf16.mxu0 %v6562_v10  ;;  %v6329_v13 = vadd.f32 %v6328_v0, %v15191_v40  ;;  %v6822_v55 = vadd.f32 %v6821_v33, %v15424_v34  ;;  %v7136_v26 = vmax.f32 %v6820_v22, 0.0  ;;  %v6488_v62 = vmax.f32 %v6327_v11, 0.0 }
 0x697   : > { %v6330_v7 = vpop.f32.mrf.mxu1  ;;  %v6825_v31 = vpop.f32.mrf.mxu0  ;;  %7064 = vmatmul.mubr.bf16.gmra.mxu0 %v6561_v50  ;;  %v12462_v50 = vld [vmem:[%s16819_s8 + $0x50] ss:$8 sps:$4 sm:$0xff]  }
 0x698   : > { %v7137_v24 = vmax.f32 %v6822_v55, 0.0  ;;  %v6331_v57 = vadd.f32 %v6330_v7, %v15188_v23  ;;  %v6489_v46 = vmax.f32 %v6329_v13, 0.0  ;;  %v7262_v2 = vpack.c.bf16 %v7136_v26, %v7134_v21 }
 0x699   : > { %v6334_v54 = vpop.f32.mrf.mxu1  ;;  %v6827_v1 = vpop.f32.mrf.mxu0  ;;  %v6826_v15 = vadd.f32 %v6825_v31, %v15427_v36 }
 0x69a   : > { %v6490_v49 = vmax.f32 %v6331_v57, 0.0  ;;  %v7263_v45 = vpack.c.bf16 %v7137_v24, %v7135_v41  ;;  %v6828_v32 = vadd.f32 %v6827_v1, %v15424_v34  ;;  %v6563_v42 = vpack.c.bf16 %v6489_v46, %v6487_v8  ;;  %v12471_v1 = vld [vmem:[%s16819_s8 + $0x40] ss:$8 sps:$4 sm:$0xff]  }
 0x69b   : > { %v6336_v39 = vpop.f32.mrf.mxu1  ;;  %v6829_v19 = vpop.f32.mrf.mxu0  ;;  %v6335_v59 = vadd.f32 %v6334_v54, %v15191_v40  ;;  %v7138_v28 = vmax.f32 %v6826_v15, 0.0 }
 0x69c   : > { %v6830_v29 = vadd.f32 %v6829_v19, %v15427_v36  ;;  %7564 = vmatprep.mubr.bf16.mxu1 %v7263_v45  ;;  %v6564_v35 = vpack.c.bf16 %v6490_v49, %v6488_v62  ;;  %v6337_v12 = vadd.f32 %v6336_v39, %v15188_v23  ;;  %v7139_v20 = vmax.f32 %v6828_v32, 0.0  ;;  %v12482_v39 = vld [vmem:[%s16819_s8 + $0x34] ss:$8 sps:$4 sm:$0xff]  }
 0x69d   : > { %v6338_v16 = vpop.f32.mrf.mxu1  ;;  %v6831_v60 = vpop.f32.mrf.mxu0  ;;  %7565 = vmatmul.mubr.bf16.vlgmr.msra.gmra.mxu1 %v7262_v2  ;;  %v6491_v18 = vmax.f32 %v6335_v59, 0.0 }
 0x69e   : > { %v6339_v43 = vadd.f32 %v6338_v16, %v15191_v40  ;;  %v6832_v3 = vadd.f32 %v6831_v60, %v15424_v34  ;;  %8911 = vmatpush1.bf16.msra.mxu1 %v12444_v17  ;;  %7073 = vmatprep.mubr.bf16.mxu0 %v6564_v35  ;;  %v7140_v38 = vmax.f32 %v6830_v29, 0.0  ;;  %v6492_v53 = vmax.f32 %v6337_v12, 0.0  ;;  %v12480_v35 = vld [vmem:[%s16819_s8 + $0x30] ss:$8 sps:$4 sm:$0xff]  }
 0x69f   : > { %v6340_v25 = vpop.f32.mrf.mxu1  ;;  %v6835_v5 = vpop.f32.mrf.mxu0  ;;  %7074 = vmatmul.mubr.bf16.gmra.mxu0 %v6563_v42  ;;  %8912 = vmatprep.subr.bf16.mxu1 %v12455_v47 }
 0x6a0   : > { %v7141_v51 = vmax.f32 %v6832_v3, 0.0  ;;  %v6341_v37 = vadd.f32 %v6340_v25, %v15188_v23  ;;  %v6493_v6 = vmax.f32 %v6339_v43, 0.0  ;;  %v7264_v0 = vpack.c.bf16 %v7140_v38, %v7138_v28  ;;  %v12483_v28 = vld [vmem:[%s16820_s9 + $0xb0] ss:$8 sps:$4 sm:$0xff]  }
 0x6a1   : > { %v6344_v14 = vpop.f32.mrf.mxu1  ;;  %v6837_v61 = vpop.f32.mrf.mxu0  ;;  %v6836_v63 = vadd.f32 %v6835_v5, %v15427_v36 }
 0x6a2   : > { %v6494_v9 = vmax.f32 %v6341_v37, 0.0  ;;  %v7265_v22 = vpack.c.bf16 %v7141_v51, %v7139_v20  ;;  %8913 = vmatpush1.bf16.msra.mxu1 %v12453_v27  ;;  %v6838_v13 = vadd.f32 %v6837_v61, %v15424_v34  ;;  %v6565_v31 = vpack.c.bf16 %v6493_v6, %v6491_v18  ;;  %v12485_v6 = vld [vmem:[%s16820_s9 + $0xb4] ss:$8 sps:$4 sm:$0xff]  }
 0x6a3   : > { %v6346_v44 = vpop.f32.mrf.mxu1  ;;  %v6839_v10 = vpop.f32.mrf.mxu0  ;;  %8914 = vmatprep.subr.bf16.mxu1 %v12464_v52  ;;  %v6345_v21 = vadd.f32 %v6344_v14, %v15191_v40  ;;  %v7142_v8 = vmax.f32 %v6836_v63, 0.0  ;;  %8309 = vmatprep.subr.bf16.mxu0 %v12485_v6  ;;  %v12486_v6 = vld [vmem:[%s16820_s9 + $0xa0] ss:$8 sps:$4 sm:$0xff]  }
 0x6a4   : > { %v6840_v33 = vadd.f32 %v6839_v10, %v15427_v36  ;;  %7574 = vmatprep.mubr.bf16.mxu1 %v7265_v22  ;;  %v6566_v7 = vpack.c.bf16 %v6494_v9, %v6492_v53  ;;  %v6347_v57 = vadd.f32 %v6346_v44, %v15188_v23  ;;  %v7143_v19 = vmax.f32 %v6838_v13, 0.0  ;;  %8310 = vmatpush2.bf16.msra.mxu0 %v12483_v28 }
 0x6a5   : > { %v6348_v55 = vpop.f32.mrf.mxu1  ;;  %v6841_v11 = vpop.f32.mrf.mxu0  ;;  %7575 = vmatmul.mubr.bf16.gmra.mxu1 %v7264_v0  ;;  %v6495_v42 = vmax.f32 %v6345_v21, 0.0 }
 0x6a6   : > { %v6349_v26 = vadd.f32 %v6348_v55, %v15191_v40  ;;  %v6842_v24 = vadd.f32 %v6841_v11, %v15424_v34  ;;  %7083 = vmatprep.mubr.bf16.mxu0 %v6566_v7  ;;  %8915 = vmatpush1.bf16.msra.mxu1 %v12462_v50  ;;  %v7144_v46 = vmax.f32 %v6840_v33, 0.0  ;;  %v6496_v47 = vmax.f32 %v6347_v57, 0.0 }
 0x6a7   : > { %v6350_v41 = vpop.f32.mrf.mxu1  ;;  %v6845_v54 = vpop.f32.mrf.mxu0  ;;  %7084 = vmatmul.mubr.bf16.gmra.mxu0 %v6565_v31  ;;  %8916 = vmatprep.subr.bf16.mxu1 %v12473_v4 }
 0x6a8   : > { %v7145_v49 = vmax.f32 %v6842_v24, 0.0  ;;  %v6351_v62 = vadd.f32 %v6350_v41, %v15188_v23  ;;  %v6497_v2 = vmax.f32 %v6349_v26, 0.0  ;;  %v7266_v15 = vpack.c.bf16 %v7144_v46, %v7142_v8 }
 0x6a9   : > { %v6354_v45 = vpop.f32.mrf.mxu1  ;;  %v6847_v17 = vpop.f32.mrf.mxu0  ;;  %v6846_v52 = vadd.f32 %v6845_v54, %v15427_v36 }
 0x6aa   : > { %v6498_v29 = vmax.f32 %v6351_v62, 0.0  ;;  %v7267_v60 = vpack.c.bf16 %v7145_v49, %v7143_v19  ;;  %8917 = vmatpush1.bf16.msra.mxu1 %v12471_v1  ;;  %v6848_v3 = vadd.f32 %v6847_v17, %v15424_v34  ;;  %v6567_v27 = vpack.c.bf16 %v6497_v2, %v6495_v42 }
 0x6ab   : > { %v6356_v32 = vpop.f32.mrf.mxu1  ;;  %v6849_v16 = vpop.f32.mrf.mxu0  ;;  %8918 = vmatprep.subr.bf16.mxu1 %v12482_v39  ;;  %v6355_v48 = vadd.f32 %v6354_v45, %v15191_v40  ;;  %v7146_v10 = vmax.f32 %v6846_v52, 0.0 }
 0x6ac   : > { %v6850_v43 = vadd.f32 %v6849_v16, %v15427_v36  ;;  %7584 = vmatprep.mubr.bf16.mxu1 %v7267_v60  ;;  %v6568_v5 = vpack.c.bf16 %v6498_v29, %v6496_v47  ;;  %v6357_v51 = vadd.f32 %v6356_v32, %v15188_v23  ;;  %v7147_v9 = vmax.f32 %v6848_v3, 0.0 }
 0x6ad   : > { %v6358_v12 = vpop.f32.mrf.mxu1  ;;  %v6851_v25 = vpop.f32.mrf.mxu0  ;;  %7585 = vmatmul.mubr.bf16.gmra.mxu1 %v7266_v15  ;;  %v6499_v13 = vmax.f32 %v6355_v48, 0.0 }
 0x6ae   : > { %v6359_v59 = vadd.f32 %v6358_v12, %v15191_v40  ;;  %v6852_v38 = vadd.f32 %v6851_v25, %v15424_v34  ;;  %7093 = vmatprep.mubr.bf16.mxu0 %v6568_v5  ;;  %8919 = vmatpush1.bf16.msra.mxu1 %v12480_v35  ;;  %v7148_v20 = vmax.f32 %v6850_v43, 0.0  ;;  %v6500_v18 = vmax.f32 %v6357_v51, 0.0 }
 0x6af   : > { %v6360_v37 = vpop.f32.mrf.mxu1  ;;  %v6855_v30 = vpop.f32.mrf.mxu0  ;;  %7094 = vmatmul.mubr.bf16.gmra.mxu0 %v6567_v27 }
 0x6b0   : > { %v7149_v14 = vmax.f32 %v6852_v38, 0.0  ;;  %v6361_v61 = vadd.f32 %v6360_v37, %v15188_v23  ;;  %v6501_v22 = vmax.f32 %v6359_v59, 0.0  ;;  %v7268_v55 = vpack.c.bf16 %v7148_v20, %v7146_v10  ;;  %v12489_v10 = vld [vmem:[%s16819_s8 + $0x20] ss:$8 sps:$4 sm:$0xff]  }
 0x6b1   : > { %v6364_v53 = vpop.f32.mrf.mxu1  ;;  %v6857_v44 = vpop.f32.mrf.mxu0  ;;  %v6856_v57 = vadd.f32 %v6855_v30, %v15427_v36 }
 0x6b2   : > { %v6502_v50 = vmax.f32 %v6361_v61, 0.0  ;;  %v7269_v4 = vpack.c.bf16 %v7149_v14, %v7147_v9  ;;  %v6858_v7 = vadd.f32 %v6857_v44, %v15424_v34  ;;  %v6569_v24 = vpack.c.bf16 %v6501_v22, %v6499_v13  ;;  %v12488_v9 = vld [vmem:[%s16820_s9 + $0xa4] ss:$8 sps:$4 sm:$0xff]  }
 0x6b3   : > { %v6366_v0 = vpop.f32.mrf.mxu1  ;;  %v6859_v33 = vpop.f32.mrf.mxu0  ;;  %v6365_v49 = vadd.f32 %v6364_v53, %v15191_v40  ;;  %v7150_v2 = vmax.f32 %v6856_v57, 0.0  ;;  %8311 = vmatprep.subr.bf16.mxu0 %v12488_v9 }
 0x6b4   : > { %v6860_v11 = vadd.f32 %v6859_v33, %v15427_v36  ;;  %7594 = vmatprep.mubr.bf16.mxu1 %v7269_v4  ;;  %v6570_v26 = vpack.c.bf16 %v6502_v50, %v6500_v18  ;;  %v6367_v1 = vadd.f32 %v6366_v0, %v15188_v23  ;;  %v7151_v45 = vmax.f32 %v6858_v7, 0.0  ;;  %8312 = vmatpush2.bf16.msra.mxu0 %v12486_v6 }
 0x6b5   : > { %v6368_v31 = vpop.f32.mrf.mxu1  ;;  %v6861_v63 = vpop.f32.mrf.mxu0  ;;  %7595 = vmatmul.mubr.bf16.gmra.mxu1 %v7268_v55  ;;  %v6503_v42 = vmax.f32 %v6365_v49, 0.0 }
 0x6b6   : > { %v6369_v41 = vadd.f32 %v6368_v31, %v15191_v40  ;;  %v6862_v54 = vadd.f32 %v6861_v63, %v15424_v34  ;;  %7103 = vmatprep.mubr.bf16.mxu0 %v6570_v26  ;;  %v7152_v62 = vmax.f32 %v6860_v11, 0.0  ;;  %v6504_v32 = vmax.f32 %v6367_v1, 0.0 }
 0x6b7   : > { %v6370_v21 = vpop.f32.mrf.mxu1  ;;  %v6865_v46 = vpop.f32.mrf.mxu0  ;;  %7104 = vmatmul.mubr.bf16.gmra.mxu0 %v6569_v24 }
 0x6b8   : > { %v7153_v39 = vmax.f32 %v6862_v54, 0.0  ;;  %v6371_v19 = vadd.f32 %v6370_v21, %v15188_v23  ;;  %v6505_v29 = vmax.f32 %v6369_v41, 0.0  ;;  %v7270_v15 = vpack.c.bf16 %v7152_v62, %v7150_v2 }
 0x6b9   : > { %v6374_v17 = vpop.f32.mrf.mxu1  ;;  %v6867_v8 = vpop.f32.mrf.mxu0  ;;  %v6866_v12 = vadd.f32 %v6865_v46, %v15427_v36 }
 0x6ba   : > { %v6506_v47 = vmax.f32 %v6371_v19, 0.0  ;;  %v7271_v35 = vpack.c.bf16 %v7153_v39, %v7151_v45  ;;  %v6868_v43 = vadd.f32 %v6867_v8, %v15424_v34  ;;  %v6571_v52 = vpack.c.bf16 %v6505_v29, %v6503_v42 }
 0x6bb   : > { %v6376_v16 = vpop.f32.mrf.mxu1  ;;  %v6869_v60 = vpop.f32.mrf.mxu0  ;;  %v6375_v20 = vadd.f32 %v6374_v17, %v15191_v40  ;;  %v7154_v53 = vmax.f32 %v6866_v12, 0.0 }
 0x6bc   : > { %v6870_v3 = vadd.f32 %v6869_v60, %v15427_v36  ;;  %7604 = vmatprep.mubr.bf16.mxu1 %v7271_v35  ;;  %v6572_v27 = vpack.c.bf16 %v6506_v47, %v6504_v32  ;;  %v6377_v59 = vadd.f32 %v6376_v16, %v15188_v23  ;;  %v7155_v14 = vmax.f32 %v6868_v43, 0.0  ;;  %v12492_v16 = vld [vmem:[%s16820_s9 + $0x90] ss:$8 sps:$4 sm:$0xff]   ;;  %v12494_v60 = vld [vmem:[%s16820_s9 + $0x94] ss:$8 sps:$4 sm:$0xff]  }
 0x6bd   : > { %v6378_v25 = vpop.f32.mrf.mxu1  ;;  %v6871_v5 = vpop.f32.mrf.mxu0  ;;  %7605 = vmatmul.mubr.bf16.gmra.mxu1 %v7270_v15  ;;  %v6507_v4 = vmax.f32 %v6375_v20, 0.0  ;;  %8313 = vmatprep.subr.bf16.mxu0 %v12494_v60 }
 0x6be   : > { %v6379_v38 = vadd.f32 %v6378_v25, %v15191_v40  ;;  %v6872_v51 = vadd.f32 %v6871_v5, %v15424_v34  ;;  %v7156_v37 = vmax.f32 %v6870_v3, 0.0  ;;  %7113 = vmatprep.mubr.bf16.mxu0 %v6572_v27  ;;  %v12491_v40 = vld [vmem:[%s16819_s8 + $0x24] ss:$8 sps:$4 sm:$0xff]   ;;  %8314 = vmatpush2.bf16.msra.mxu0 %v12492_v16 }
 0x6bf   : > { %v6380_v30 = vpop.f32.mrf.mxu1  ;;  %v6875_v48 = vpop.f32.mrf.mxu0  ;;  %7114 = vmatmul.mubr.bf16.gmra.mxu0 %v6571_v52  ;;  %8920 = vmatprep.subr.bf16.mxu1 %v12491_v40 }
 0x6c0   : > { %v7157_v61 = vmax.f32 %v6872_v51, 0.0  ;;  %v6381_v28 = vadd.f32 %v6380_v30, %v15188_v23  ;;  %v6508_v23 = vmax.f32 %v6377_v59, 0.0  ;;  %v6509_v22 = vmax.f32 %v6379_v38, 0.0  ;;  %8921 = vmatpush1.bf16.msra.mxu1 %v12489_v10 }
 0x6c1   : > { %v6877_v44 = vpop.f32.mrf.mxu0  ;;  %v7272_v0 = vpack.c.bf16 %v7156_v37, %v7154_v53  ;;  %v6876_v63 = vadd.f32 %v6875_v48, %v15427_v36 }
 0x6c2   : > { %v6510_v50 = vmax.f32 %v6381_v28, 0.0  ;;  %v7273_v18 = vpack.c.bf16 %v7157_v61, %v7155_v14  ;;  %v6878_v13 = vadd.f32 %v6877_v44, %v15424_v34  ;;  %v6573_v31 = vpack.c.bf16 %v6509_v22, %v6507_v4  ;;  %v12500_v4 = vld [vmem:[%s16819_s8 + $0x14] ss:$8 sps:$4 sm:$0xff]  }
 0x6c3   : > { %v6879_v33 = vpop.f32.mrf.mxu0  ;;  %v7158_v21 = vmax.f32 %v6876_v63, 0.0  ;;  %8922 = vmatprep.subr.bf16.mxu1 %v12500_v4 }
 0x6c4   : > { %v6880_v55 = vadd.f32 %v6879_v33, %v15427_v36  ;;  %7614 = vmatprep.mubr.bf16.mxu1 %v7273_v18  ;;  %v6574_v11 = vpack.c.bf16 %v6510_v50, %v6508_v23  ;;  %v7159_v57 = vmax.f32 %v6878_v13, 0.0  ;;  %v12495_v50 = vld [vmem:[%s16820_s9 + $0x80] ss:$8 sps:$4 sm:$0xff]   ;;  %v12497_v18 = vld [vmem:[%s16820_s9 + $0x84] ss:$8 sps:$4 sm:$0xff]  }
 0x6c5   : > { %v6881_v7 = vpop.f32.mrf.mxu0  ;;  %7615 = vmatmul.mubr.bf16.gmra.mxu1 %v7272_v0  ;;  %v12498_v33 = vld [vmem:[%s16819_s8 + $0x10] ss:$8 sps:$4 sm:$0xff]   ;;  %8315 = vmatprep.subr.bf16.mxu0 %v12497_v18 }
 0x6c6   : > { %v6882_v26 = vadd.f32 %v6881_v7, %v15424_v34  ;;  %7123 = vmatprep.mubr.bf16.mxu0 %v6574_v11  ;;  %v7160_v41 = vmax.f32 %v6880_v55, 0.0  ;;  %8316 = vmatpush2.bf16.msra.mxu0 %v12495_v50 }
 0x6c7   : > { %v6885_v24 = vpop.f32.mrf.mxu0  ;;  %7124 = vmatmul.mubr.bf16.gmra.mxu0 %v6573_v31  ;;  %8923 = vmatpush1.bf16.msra.mxu1 %v12498_v33  ;;  %v12504_v33 = vld [vmem:[%s16819_s8 + $0x4] ss:$8 sps:$4 sm:$0xff]  }
 0x6c8   : > { %v7161_v54 = vmax.f32 %v6882_v26, 0.0  ;;  %v7274_v39 = vpack.c.bf16 %v7160_v41, %v7158_v21  ;;  %v6886_v17 = vadd.f32 %v6885_v24, %v15427_v36  ;;  %v17023_v24 = vmov 0   ;;  %8924 = vmatprep.subr.bf16.mxu1 %v12504_v33 }
 0x6c9   : > { %v6887_v1 = vpop.f32.mrf.mxu0  ;;  %9858 = vmatprep.subr.bf16.mxu0 %v17023_v24 }
 0x6ca   : > { %v7275_v46 = vpack.c.bf16 %v7161_v54, %v7159_v57  ;;  %v6888_v49 = vadd.f32 %v6887_v1, %v15424_v34  ;;  %v7162_v42 = vmax.f32 %v6886_v17, 0.0 }
 0x6cb   : > { %v6889_v62 = vpop.f32.mrf.mxu0 }
 0x6cc   : > { %v6890_v19 = vadd.f32 %v6889_v62, %v15427_v36  ;;  %7624 = vmatprep.mubr.bf16.mxu1 %v7275_v46  ;;  %v7163_v2 = vmax.f32 %v6888_v49, 0.0 }
 0x6cd   : > { %v6891_v45 = vpop.f32.mrf.mxu0  ;;  %7625 = vmatmul.mubr.bf16.gmra.mxu1 %v7274_v39 }
 0x6ce   : > { %v6892_v8 = vadd.f32 %v6891_v45, %v15424_v34  ;;  %v7164_v47 = vmax.f32 %v6890_v19, 0.0 }
 0x6cf   : > { %v6895_v29 = vpop.f32.mrf.mxu0 }
 0x6d0   : > { %v7165_v32 = vmax.f32 %v6892_v8, 0.0  ;;  %v7276_v3 = vpack.c.bf16 %v7164_v47, %v7162_v42  ;;  %v6896_v27 = vadd.f32 %v6895_v29, %v15427_v36 }
 0x6d1   : > { %v6897_v35 = vpop.f32.mrf.mxu0 }
 0x6d2   : > { %v7277_v15 = vpack.c.bf16 %v7165_v32, %v7163_v2  ;;  %v6898_v12 = vadd.f32 %v6897_v35, %v15424_v34  ;;  %v7166_v48 = vmax.f32 %v6896_v27, 0.0 }
 0x6d3   : > { %v6899_v43 = vpop.f32.mrf.mxu0 }
 0x6d4   : > { %v6900_v25 = vadd.f32 %v6899_v43, %v15427_v36  ;;  %7634 = vmatprep.mubr.bf16.mxu1 %v7277_v15  ;;  %v7167_v38 = vmax.f32 %v6898_v12, 0.0 }
 0x6d5   : > { %v6901_v5 = vpop.f32.mrf.mxu0  ;;  %7635 = vmatmul.mubr.bf16.gmra.mxu1 %v7276_v3 }
 0x6d6   : > { %v6902_v52 = vadd.f32 %v6901_v5, %v15424_v34  ;;  %v7168_v51 = vmax.f32 %v6900_v25, 0.0 }
 0x6d7   : > { %v6905_v59 = vpop.f32.mrf.mxu0 }
 0x6d8   : > { %v7169_v37 = vmax.f32 %v6902_v52, 0.0  ;;  %v7278_v28 = vpack.c.bf16 %v7168_v51, %v7166_v48  ;;  %v6906_v53 = vadd.f32 %v6905_v59, %v15427_v36 }
 0x6d9   : > { %v6907_v30 = vpop.f32.mrf.mxu0 }
 0x6da   : > { %v7279_v20 = vpack.c.bf16 %v7169_v37, %v7167_v38  ;;  %v6908_v14 = vadd.f32 %v6907_v30, %v15424_v34  ;;  %v7170_v13 = vmax.f32 %v6906_v53, 0.0 }
 0x6db   : > { %v6909_v61 = vpop.f32.mrf.mxu0 }
 0x6dc   : > { %v6910_v6 = vadd.f32 %v6909_v61, %v15427_v36  ;;  %7644 = vmatprep.mubr.bf16.mxu1 %v7279_v20  ;;  %v7171_v10 = vmax.f32 %v6908_v14, 0.0 }
 0x6dd   : > { %v6911_v9 = vpop.f32.mrf.mxu0  ;;  %7645 = vmatmul.mubr.bf16.gmra.mxu1 %v7278_v28 }
 0x6de   : > { %v6912_v44 = vadd.f32 %v6911_v9, %v15424_v34  ;;  %v7172_v23 = vmax.f32 %v6910_v6, 0.0 }
 0x6df   : > { %v6915_v40 = vpop.f32.mrf.mxu0 }
 0x6e0   : > { %v7173_v22 = vmax.f32 %v6912_v44, 0.0  ;;  %v7280_v7 = vpack.c.bf16 %v7172_v23, %v7170_v13  ;;  %v6916_v57 = vadd.f32 %v6915_v40, %v15427_v36 }
 0x6e1   : > { %v6917_v0 = vpop.f32.mrf.mxu0 }
 0x6e2   : > { %v7281_v55 = vpack.c.bf16 %v7173_v22, %v7171_v10  ;;  %v6918_v31 = vadd.f32 %v6917_v0, %v15424_v34  ;;  %v7174_v62 = vmax.f32 %v6916_v57, 0.0  ;;  %v12502_v0 = vld [vmem:[%s16819_s8] ss:$8 sps:$4 sm:$0xff]  }
 0x6e3   : > { %v6919_v11 = vpop.f32.mrf.mxu0  ;;  %8925 = vmatpush1.bf16.msra.mxu1 %v12502_v0 }
 0x6e4   : > { %v6920_v63 = vadd.f32 %v6919_v11, %v15427_v36  ;;  %7654 = vmatprep.mubr.bf16.mxu1 %v7281_v55  ;;  %v7175_v1 = vmax.f32 %v6918_v31, 0.0 }
 0x6e5   : > { %v6921_v26 = vpop.f32.mrf.mxu0  ;;  %7655 = vmatmul.mubr.bf16.gmra.mxu1 %v7280_v7 }
 0x6e6   : > { %v6922_v41 = vadd.f32 %v6921_v26, %v15424_v34  ;;  %v7176_v21 = vmax.f32 %v6920_v63, 0.0 }
 0x6e7   : > { %v6925_v54 = vpop.f32.mrf.mxu0 }
 0x6e8   : > { %v7177_v46 = vmax.f32 %v6922_v41, 0.0  ;;  %v7282_v45 = vpack.c.bf16 %v7176_v21, %v7174_v62  ;;  %v6926_v29 = vadd.f32 %v6925_v54, %v15427_v36 }
 0x6e9   : > { %v6927_v49 = vpop.f32.mrf.mxu0 }
 0x6ea   : > { %v7283_v39 = vpack.c.bf16 %v7177_v46, %v7175_v1  ;;  %v6928_v17 = vadd.f32 %v6927_v49, %v15424_v34  ;;  %v7178_v15 = vmax.f32 %v6926_v29, 0.0 }
 0x6eb   : > { %v6929_v19 = vpop.f32.mrf.mxu0 }
 0x6ec   : > { %v6930_v8 = vadd.f32 %v6929_v19, %v15427_v36  ;;  %7664 = vmatprep.mubr.bf16.mxu1 %v7283_v39  ;;  %v7179_v16 = vmax.f32 %v6928_v17, 0.0 }
 0x6ed   : > { %v6931_v2 = vpop.f32.mrf.mxu0  ;;  %7665 = vmatmul.mubr.bf16.gmra.mxu1 %v7282_v45 }
 0x6ee   : > { %v6932_v47 = vadd.f32 %v6931_v2, %v15424_v34  ;;  %v7180_v60 = vmax.f32 %v6930_v8, 0.0 }
 0x6ef   : > { %v6935_v32 = vpop.f32.mrf.mxu0 }
 0x6f0   : > { %v7181_v35 = vmax.f32 %v6932_v47, 0.0  ;;  %v7284_v12 = vpack.c.bf16 %v7180_v60, %v7178_v15  ;;  %v6936_v52 = vadd.f32 %v6935_v32, %v15427_v36 }
 0x6f1   : > { %v6937_v42 = vpop.f32.mrf.mxu0 }
 0x6f2   : > { %v7285_v43 = vpack.c.bf16 %v7181_v35, %v7179_v16  ;;  %v6938_v25 = vadd.f32 %v6937_v42, %v15424_v34  ;;  %v7182_v20 = vmax.f32 %v6936_v52, 0.0 }
 0x6f3   : > { %v6939_v3 = vpop.f32.mrf.mxu0 }
 0x6f4   : > { %v6940_v5 = vadd.f32 %v6939_v3, %v15427_v36  ;;  %7674 = vmatprep.mubr.bf16.mxu1 %v7285_v43  ;;  %v7183_v51 = vmax.f32 %v6938_v25, 0.0 }
 0x6f5   : > { %v6941_v27 = vpop.f32.mrf.mxu0  ;;  %7675 = vmatmul.mubr.bf16.gmra.mxu1 %v7284_v12 }
 0x6f6   : > { %v6942_v59 = vadd.f32 %v6941_v27, %v15424_v34  ;;  %v7184_v37 = vmax.f32 %v6940_v5, 0.0 }
 0x6f7   : > { %v6945_v38 = vpop.f32.mrf.mxu0 }
 0x6f8   : > { %v7185_v30 = vmax.f32 %v6942_v59, 0.0  ;;  %v7286_v28 = vpack.c.bf16 %v7184_v37, %v7182_v20  ;;  %v6946_v44 = vadd.f32 %v6945_v38, %v15427_v36 }
 0x6f9   : > { %v6947_v48 = vpop.f32.mrf.mxu0 }
 0x6fa   : > { %v7287_v14 = vpack.c.bf16 %v7185_v30, %v7183_v51  ;;  %v6948_v6 = vadd.f32 %v6947_v48, %v15424_v34  ;;  %v7186_v4 = vmax.f32 %v6946_v44, 0.0 }
 0x6fb   : > { %v6949_v61 = vpop.f32.mrf.mxu0 }
 0x6fc   : > { %v6950_v9 = vadd.f32 %v6949_v61, %v15427_v36  ;;  %7684 = vmatprep.mubr.bf16.mxu1 %v7287_v14  ;;  %v7187_v23 = vmax.f32 %v6948_v6, 0.0 }
 0x6fd   : > { %v6951_v53 = vpop.f32.mrf.mxu0  ;;  %7685 = vmatmul.mubr.bf16.gmra.mxu1 %v7286_v28 }
 0x6fe   : > { %v6952_v10 = vadd.f32 %v6951_v53, %v15424_v34  ;;  %v7188_v22 = vmax.f32 %v6950_v9, 0.0 }
 0x6ff   : > { %v6955_v40 = vpop.f32.mrf.mxu0 }
 0x700   : > { %v7189_v50 = vmax.f32 %v6952_v10, 0.0  ;;  %v7288_v11 = vpack.c.bf16 %v7188_v22, %v7186_v4  ;;  %v6956_v26 = vadd.f32 %v6955_v40, %v15427_v36 }
 0x701   : > { %v6957_v18 = vpop.f32.mrf.mxu0 }
 0x702   : > { %v7289_v13 = vpack.c.bf16 %v7189_v50, %v7187_v23  ;;  %v6958_v7 = vadd.f32 %v6957_v18, %v15424_v34  ;;  %v7190_v49 = vmax.f32 %v6956_v26, 0.0 }
 0x703   : > { %v6959_v55 = vpop.f32.mrf.mxu0 }
 0x704   : > { %v6960_v31 = vadd.f32 %v6959_v55, %v15427_v36  ;;  %7694 = vmatprep.mubr.bf16.mxu1 %v7289_v13  ;;  %v7191_v54 = vmax.f32 %v6958_v7, 0.0 }
 0x705   : > { %v6961_v63 = vpop.f32.mrf.mxu0  ;;  %7695 = vmatmul.mubr.bf16.gmra.mxu1 %v7288_v11 }
 0x706   : > { %v6962_v57 = vadd.f32 %v6961_v63, %v15424_v34  ;;  %v7192_v1 = vmax.f32 %v6960_v31, 0.0 }
 0x707   : > { %v6965_v41 = vpop.f32.mrf.mxu0 }
 0x708   : > { %v7193_v21 = vmax.f32 %v6962_v57, 0.0  ;;  %v7290_v19 = vpack.c.bf16 %v7192_v1, %v7190_v49  ;;  %v6966_v2 = vadd.f32 %v6965_v41, %v15427_v36 }
 0x709   : > { %v6967_v46 = vpop.f32.mrf.mxu0 }
 0x70a   : > { %v7291_v62 = vpack.c.bf16 %v7193_v21, %v7191_v54  ;;  %v6968_v45 = vadd.f32 %v6967_v46, %v15424_v34  ;;  %v7194_v42 = vmax.f32 %v6966_v2, 0.0 }
 0x70b   : > { %v6969_v39 = vpop.f32.mrf.mxu0 }
 0x70c   : > { %v6970_v17 = vadd.f32 %v6969_v39, %v15427_v36  ;;  %7704 = vmatprep.mubr.bf16.mxu1 %v7291_v62  ;;  %v7195_v32 = vmax.f32 %v6968_v45, 0.0 }
 0x70d   : > { %v6971_v8 = vpop.f32.mrf.mxu0  ;;  %7705 = vmatmul.mubr.bf16.gmra.mxu1 %v7290_v19 }
 0x70e   : > { %v6972_v29 = vadd.f32 %v6971_v8, %v15424_v34  ;;  %v7196_v16 = vmax.f32 %v6970_v17, 0.0 }
 0x70f   : > { %v6975_v47 = vpop.f32.mrf.mxu0 }
 0x710   : > { %v7197_v60 = vmax.f32 %v6972_v29, 0.0  ;;  %v7292_v3 = vpack.c.bf16 %v7196_v16, %v7194_v42  ;;  %v6976_v27 = vadd.f32 %v6975_v47, %v15427_v36 }
 0x711   : > { %v6977_v35 = vpop.f32.mrf.mxu0 }
 0x712   : > { %v7293_v15 = vpack.c.bf16 %v7197_v60, %v7195_v32  ;;  %v6978_v12 = vadd.f32 %v6977_v35, %v15424_v34  ;;  %v7198_v48 = vmax.f32 %v6976_v27, 0.0 }
 0x713   : > { %v6979_v43 = vpop.f32.mrf.mxu0 }
 0x714   : > { %v6980_v25 = vadd.f32 %v6979_v43, %v15427_v36  ;;  %7714 = vmatprep.mubr.bf16.mxu1 %v7293_v15  ;;  %v7199_v38 = vmax.f32 %v6978_v12, 0.0 }
 0x715   : > { %v6981_v5 = vpop.f32.mrf.mxu0  ;;  %7715 = vmatmul.mubr.bf16.gmra.mxu1 %v7292_v3 }
 0x716   : > { %v6982_v52 = vadd.f32 %v6981_v5, %v15424_v34  ;;  %v7200_v51 = vmax.f32 %v6980_v25, 0.0 }
 0x717   : > { %v6985_v59 = vpop.f32.mrf.mxu0 }
 0x718   : > { %v7201_v37 = vmax.f32 %v6982_v52, 0.0  ;;  %v7294_v61 = vpack.c.bf16 %v7200_v51, %v7198_v48  ;;  %v6986_v53 = vadd.f32 %v6985_v59, %v15427_v36 }
 0x719   : > { %v6987_v30 = vpop.f32.mrf.mxu0 }
 0x71a   : > { %v7295_v20 = vpack.c.bf16 %v7201_v37, %v7199_v38  ;;  %v6988_v28 = vadd.f32 %v6987_v30, %v15424_v34  ;;  %v7202_v18 = vmax.f32 %v6986_v53, 0.0 }
 0x71b   : > { %v6989_v14 = vpop.f32.mrf.mxu0 }
 0x71c   : > { %v6990_v6 = vadd.f32 %v6989_v14, %v15427_v36  ;;  %7724 = vmatprep.mubr.bf16.mxu1 %v7295_v20  ;;  %v7203_v40 = vmax.f32 %v6988_v28, 0.0 }
 0x71d   : > { %v6991_v9 = vpop.f32.mrf.mxu0  ;;  %7725 = vmatmul.mubr.bf16.gmra.mxu1 %v7294_v61 }
 0x71e   : > { %v6992_v44 = vadd.f32 %v6991_v9, %v15424_v34  ;;  %v7204_v23 = vmax.f32 %v6990_v6, 0.0 }
 0x71f   : > { %v6995_v10 = vpop.f32.mrf.mxu0 }
 0x720   : > { %v7205_v22 = vmax.f32 %v6992_v44, 0.0  ;;  %v7296_v4 = vpack.c.bf16 %v7204_v23, %v7202_v18  ;;  %v6996_v7 = vadd.f32 %v6995_v10, %v15427_v36 }
 0x721   : > { %v6997_v50 = vpop.f32.mrf.mxu0 }
 0x722   : > { %v7297_v0 = vpack.c.bf16 %v7205_v22, %v7203_v40  ;;  %v6998_v13 = vadd.f32 %v6997_v50, %v15424_v34  ;;  %v7206_v1 = vmax.f32 %v6996_v7, 0.0 }
 0x723   : > { %v6999_v33 = vpop.f32.mrf.mxu0 }
 0x724   : > { %v7000_v55 = vadd.f32 %v6999_v33, %v15427_v36  ;;  %7734 = vmatprep.mubr.bf16.mxu1 %v7297_v0  ;;  %v7207_v26 = vmax.f32 %v6998_v13, 0.0 }
 0x725   : > { %v7001_v11 = vpop.f32.mrf.mxu0  ;;  %7735 = vmatmul.mubr.bf16.gmra.mxu1 %v7296_v4 }
 0x726   : > { %v7002_v31 = vadd.f32 %v7001_v11, %v15424_v34  ;;  %v7208_v57 = vmax.f32 %v7000_v55, 0.0 }
 0x727   : > { %v7005_v63 = vpop.f32.mrf.mxu0 }
 0x728   : > { %v7209_v41 = vmax.f32 %v7002_v31, 0.0  ;;  %v7298_v49 = vpack.c.bf16 %v7208_v57, %v7206_v1  ;;  %v7006_v45 = vadd.f32 %v7005_v63, %v15427_v36 }
 0x729   : > { %v7007_v54 = vpop.f32.mrf.mxu0 }
 0x72a   : > { %v7299_v21 = vpack.c.bf16 %v7209_v41, %v7207_v26  ;;  %v7008_v62 = vadd.f32 %v7007_v54, %v15424_v34  ;;  %v7210_v16 = vmax.f32 %v7006_v45, 0.0 }
 0x72b   : > { %v7009_v46 = vpop.f32.mrf.mxu0 }
 0x72c   : > { %v7010_v39 = vadd.f32 %v7009_v46, %v15427_v36  ;;  %7744 = vmatprep.mubr.bf16.mxu1 %v7299_v21  ;;  %v7211_v2 = vmax.f32 %v7008_v62, 0.0 }
 0x72d   : > { %v7011_v19 = vpop.f32.mrf.mxu0  ;;  %7745 = vmatmul.mubr.bf16.gmra.mxu1 %v7298_v49 }
 0x72e   : > { %v7012_v17 = vadd.f32 %v7011_v19, %v15424_v34  ;;  %v7212_v29 = vmax.f32 %v7010_v39, 0.0 }
 0x72f   : > { %v7015_v8 = vpop.f32.mrf.mxu0 }
 0x730   : > { %v7213_v47 = vmax.f32 %v7012_v17, 0.0  ;;  %v7300_v42 = vpack.c.bf16 %v7212_v29, %v7210_v16  ;;  %v7016_v12 = vadd.f32 %v7015_v8, %v15427_v36 }
 0x731   : > { %v7017_v32 = vpop.f32.mrf.mxu0 }
 0x732   : > { %v7301_v60 = vpack.c.bf16 %v7213_v47, %v7211_v2  ;;  %v7018_v15 = vadd.f32 %v7017_v32, %v15424_v34  ;;  %v7214_v51 = vmax.f32 %v7016_v12, 0.0 }
 0x733   : > { %v7019_v35 = vpop.f32.mrf.mxu0 }
 0x734   : > { %v7020_v43 = vadd.f32 %v7019_v35, %v15427_v36  ;;  %7754 = vmatprep.mubr.bf16.mxu1 %v7301_v60  ;;  %v7215_v27 = vmax.f32 %v7018_v15, 0.0 }
 0x735   : > { %v7021_v3 = vpop.f32.mrf.mxu0  ;;  %7755 = vmatmul.mubr.bf16.gmra.mxu1 %v7300_v42 }
 0x736   : > { %v7022_v25 = vadd.f32 %v7021_v3, %v15424_v34  ;;  %v7216_v52 = vmax.f32 %v7020_v43, 0.0 }
 0x737   : > { %v7025_v5 = vpop.f32.mrf.mxu0 }
 0x738   : > { %v7217_v59 = vmax.f32 %v7022_v25, 0.0  ;;  %v7302_v48 = vpack.c.bf16 %v7216_v52, %v7214_v51  ;;  %v7026_v28 = vadd.f32 %v7025_v5, %v15427_v36 }
 0x739   : > { %v7027_v38 = vpop.f32.mrf.mxu0 }
 0x73a   : > { %v7303_v37 = vpack.c.bf16 %v7217_v59, %v7215_v27  ;;  %v7028_v20 = vadd.f32 %v7027_v38, %v15424_v34  ;;  %v7218_v23 = vmax.f32 %v7026_v28, 0.0 }
 0x73b   : > { %v7029_v30 = vpop.f32.mrf.mxu0 }
 0x73c   : > { %v7030_v14 = vadd.f32 %v7029_v30, %v15427_v36  ;;  %7764 = vmatprep.mubr.bf16.mxu1 %v7303_v37  ;;  %v7219_v53 = vmax.f32 %v7028_v20, 0.0 }
 0x73d   : > { %v7031_v61 = vpop.f32.mrf.mxu0  ;;  %7765 = vmatmul.mubr.bf16.gmra.mxu1 %v7302_v48 }
 0x73e   : > { %v7032_v6 = vadd.f32 %v7031_v61, %v15424_v34  ;;  %v7220_v44 = vmax.f32 %v7030_v14, 0.0  ;;  %v11617_v61 = vld [vmem:[%s16816_s5 + $0xc] sm:$0x3] }
 0x73f   : > { %v7035_v9 = vpop.f32.mrf.mxu0 }
 0x740   : > { %v7221_v10 = vmax.f32 %v7032_v6, 0.0  ;;  %v7304_v18 = vpack.c.bf16 %v7220_v44, %v7218_v23  ;;  %v7036_v13 = vadd.f32 %v7035_v9, %v15427_v36  ;;  %v15640_v23 = vrot.slane %v11617_v61, %v13337_v56 }
 0x741   : > { %v7037_v40 = vpop.f32.mrf.mxu0 }
 0x742   : > { %v7305_v22 = vpack.c.bf16 %v7221_v10, %v7219_v53  ;;  %v7038_v0 = vadd.f32 %v7037_v40, %v15424_v34  ;;  %v7222_v57 = vmax.f32 %v7036_v13, 0.0  ;;  %v15637_v10 = vrot.slane %v11617_v61, %v13342_v58 }
 0x743   : > { %v7039_v50 = vpop.f32.mrf.mxu0 }
 0x744   : > { %v7040_v33 = vadd.f32 %v7039_v50, %v15427_v36  ;;  %7774 = vmatprep.mubr.bf16.mxu1 %v7305_v22  ;;  %v7223_v7 = vmax.f32 %v7038_v0, 0.0 }
 0x745   : > { %v7041_v4 = vpop.f32.mrf.mxu0  ;;  %7775 = vmatmul.mubr.bf16.gmra.mxu1 %v7304_v18 }
 0x746   : > { %v7042_v55 = vadd.f32 %v7041_v4, %v15424_v34  ;;  %v7224_v31 = vmax.f32 %v7040_v33, 0.0 }
 0x747   : > { %v7045_v11 = vpop.f32.mrf.mxu0 }
 0x748   : > { %v7225_v63 = vmax.f32 %v7042_v55, 0.0  ;;  %v7306_v1 = vpack.c.bf16 %v7224_v31, %v7222_v57  ;;  %v7046_v62 = vadd.f32 %v7045_v11, %v15427_v36 }
 0x749   : > { %v7047_v26 = vpop.f32.mrf.mxu0 }
 0x74a   : > { %v7307_v41 = vpack.c.bf16 %v7225_v63, %v7223_v7  ;;  %v7048_v21 = vadd.f32 %v7047_v26, %v15424_v34  ;;  %v7226_v29 = vmax.f32 %v7046_v62, 0.0 }
 0x74b   : > { %v7049_v54 = vpop.f32.mrf.mxu0 }
 0x74c   : > { %v7050_v46 = vadd.f32 %v7049_v54, %v15427_v36  ;;  %7784 = vmatprep.mubr.bf16.mxu1 %v7307_v41  ;;  %v7227_v45 = vmax.f32 %v7048_v21, 0.0 }
 0x74d   : > { %v7051_v49 = vpop.f32.mrf.mxu0  ;;  %7785 = vmatmul.mubr.bf16.gmra.mxu1 %v7306_v1 }
 0x74e   : > { %v7052_v39 = vadd.f32 %v7051_v49, %v15424_v34  ;;  %v7228_v17 = vmax.f32 %v7050_v46, 0.0 }
 0x74f   : > { %v7055_v19 = vpop.f32.mrf.mxu0 }
 0x750   : > { %v7229_v8 = vmax.f32 %v7052_v39, 0.0  ;;  %v7308_v16 = vpack.c.bf16 %v7228_v17, %v7226_v29  ;;  %v7056_v15 = vadd.f32 %v7055_v19, %v15427_v36 }
 0x751   : > { %v7057_v2 = vpop.f32.mrf.mxu0 }
 0x752   : > { %v7309_v47 = vpack.c.bf16 %v7229_v8, %v7227_v45  ;;  %v7058_v60 = vadd.f32 %v7057_v2, %v15424_v34  ;;  %v7230_v52 = vmax.f32 %v7056_v15, 0.0 }
 0x753   : > { %v7059_v32 = vpop.f32.mrf.mxu0 }
 0x754   : > { %v7060_v35 = vadd.f32 %v7059_v32, %v15427_v36  ;;  %7794 = vmatprep.mubr.bf16.mxu1 %v7309_v47  ;;  %v7231_v12 = vmax.f32 %v7058_v60, 0.0  ;;  %v12501_v32 = vld [vmem:[%s16822_s11 + $0x38] sm:$0xff]  }
 0x755   : > { %v7061_v42 = vpop.f32.mrf.mxu0  ;;  %7795 = vmatmul.mubr.bf16.gmra.mxu1 %v7308_v16 }
 0x756   : > { %v7062_v43 = vadd.f32 %v7061_v42, %v15424_v34  ;;  %v7232_v25 = vmax.f32 %v7060_v35, 0.0 }
 0x757   : > { %v7065_v3 = vpop.f32.mrf.mxu0 }
 0x758   : > { %v7233_v5 = vmax.f32 %v7062_v43, 0.0  ;;  %v7310_v51 = vpack.c.bf16 %v7232_v25, %v7230_v52  ;;  %v7066_v20 = vadd.f32 %v7065_v3, %v15427_v36 }
 0x759   : > { %v7067_v27 = vpop.f32.mrf.mxu0 }
 0x75a   : > { %v7311_v59 = vpack.c.bf16 %v7233_v5, %v7231_v12  ;;  %v7068_v37 = vadd.f32 %v7067_v27, %v15424_v34  ;;  %v7234_v22 = vmax.f32 %v7066_v20, 0.0 }
 0x75b   : > { %v7069_v38 = vpop.f32.mrf.mxu0 }
 0x75c   : > { %v7070_v30 = vadd.f32 %v7069_v38, %v15427_v36  ;;  %7804 = vmatprep.mubr.bf16.mxu1 %v7311_v59  ;;  %v7235_v6 = vmax.f32 %v7068_v37, 0.0 }
 0x75d   : > { %v7071_v48 = vpop.f32.mrf.mxu0  ;;  %v7566_v28 = vpop.f32.mrf.mxu1  ;;  %7805 = vmatmul.mubr.bf16.gmra.mxu1 %v7310_v51  ;;  %v12505_v51 = vld [vmem:[%s16822_s11 + $0x30] sm:$0xff]  }
 0x75e   : > { %v7072_v14 = vadd.f32 %v7071_v48, %v15424_v34  ;;  %v7236_v9 = vmax.f32 %v7070_v30, 0.0  ;;  %v7567_v7 = vadd.f32 %v7566_v28, %v15640_v23 }
 0x75f   : > { %v7075_v44 = vpop.f32.mrf.mxu0  ;;  %v7568_v40 = vpop.f32.mrf.mxu1 }
 0x760   : > { %v7237_v53 = vmax.f32 %v7072_v14, 0.0  ;;  %v7312_v4 = vpack.c.bf16 %v7236_v9, %v7234_v22  ;;  %v7569_v13 = vadd.f32 %v7568_v40, %v15637_v10  ;;  %v7076_v54 = vadd.f32 %v7075_v44, %v15427_v36 }
 0x761   : > { %v7077_v50 = vpop.f32.mrf.mxu0  ;;  %v7570_v18 = vpop.f32.mrf.mxu1  ;;  %v7885_v19 = vmax.f32 %v7567_v7, 0.0 }
 0x762   : > { %v7313_v0 = vpack.c.bf16 %v7237_v53, %v7235_v6  ;;  %v7571_v33 = vadd.f32 %v7570_v18, %v15640_v23  ;;  %v7078_v26 = vadd.f32 %v7077_v50, %v15424_v34  ;;  %v7886_v49 = vmax.f32 %v7569_v13, 0.0  ;;  %v12506_v18 = vld [vmem:[%s16822_s11 + $0x28] sm:$0xff]  }
 0x763   : > { %v7079_v55 = vpop.f32.mrf.mxu0  ;;  %v7572_v11 = vpop.f32.mrf.mxu1  ;;  %v7238_v16 = vmax.f32 %v7076_v54, 0.0 }
 0x764   : > { %7814 = vmatprep.mubr.bf16.mxu1 %v7313_v0  ;;  %v7080_v31 = vadd.f32 %v7079_v55, %v15427_v36  ;;  %v7573_v63 = vadd.f32 %v7572_v11, %v15637_v10  ;;  %v7887_v1 = vmax.f32 %v7571_v33, 0.0  ;;  %v7239_v8 = vmax.f32 %v7078_v26, 0.0 }
 0x765   : > { %v7081_v57 = vpop.f32.mrf.mxu0  ;;  %v7576_v41 = vpop.f32.mrf.mxu1  ;;  %7815 = vmatmul.mubr.bf16.gmra.mxu1 %v7312_v4 }
 0x766   : > { %v7888_v21 = vmax.f32 %v7573_v63, 0.0  ;;  %v7082_v46 = vadd.f32 %v7081_v57, %v15424_v34  ;;  %v7240_v45 = vmax.f32 %v7080_v31, 0.0  ;;  %v8013_v60 = vpack.c.bf16 %v7887_v1, %v7885_v19 }
 0x767   : > { %v7085_v62 = vpop.f32.mrf.mxu0  ;;  %v7578_v39 = vpop.f32.mrf.mxu1  ;;  %v7577_v25 = vadd.f32 %v7576_v41, %v15640_v23 }
 0x768   : > { %v7241_v17 = vmax.f32 %v7082_v46, 0.0  ;;  %v8014_v47 = vpack.c.bf16 %v7888_v21, %v7886_v49  ;;  %v7579_v42 = vadd.f32 %v7578_v39, %v15637_v10  ;;  %v7314_v12 = vpack.c.bf16 %v7240_v45, %v7238_v16  ;;  %v12508_v21 = vld [vmem:[%s16822_s11 + $0x20] sm:$0xff]  }
 0x769   : > { %v7087_v2 = vpop.f32.mrf.mxu0  ;;  %v7580_v29 = vpop.f32.mrf.mxu1  ;;  %v7086_v37 = vadd.f32 %v7085_v62, %v15427_v36  ;;  %v7889_v6 = vmax.f32 %v7577_v25, 0.0 }
 0x76a   : > { %v7581_v35 = vadd.f32 %v7580_v29, %v15640_v23  ;;  %8317 = vmatprep.mubr.bf16.mxu0 %v8014_v47  ;;  %v7315_v3 = vpack.c.bf16 %v7241_v17, %v7239_v8  ;;  %v7088_v52 = vadd.f32 %v7087_v2, %v15424_v34  ;;  %v7890_v14 = vmax.f32 %v7579_v42, 0.0 }
 0x76b   : > { %v7089_v15 = vpop.f32.mrf.mxu0  ;;  %v7582_v43 = vpop.f32.mrf.mxu1  ;;  %8318 = vmatmul.mubr.bf16.vlgmr.msra.gmra.mxu0 %v8013_v60  ;;  %v7242_v0 = vmax.f32 %v7086_v37, 0.0 }
 0x76c   : > { %v7090_v5 = vadd.f32 %v7089_v15, %v15427_v36  ;;  %v7583_v27 = vadd.f32 %v7582_v43, %v15637_v10  ;;  %7824 = vmatprep.mubr.bf16.mxu1 %v7315_v3  ;;  %9859 = vmatpush1.bf16.msra.mxu0 %v12501_v32  ;;  %v7891_v30 = vmax.f32 %v7581_v35, 0.0  ;;  %v7243_v44 = vmax.f32 %v7088_v52, 0.0  ;;  %v12511_v35 = vld [vmem:[%s16822_s11 + $0x18] sm:$0xff]  }
 0x76d   : > { %v7091_v59 = vpop.f32.mrf.mxu0  ;;  %v7586_v38 = vpop.f32.mrf.mxu1  ;;  %7825 = vmatmul.mubr.bf16.gmra.mxu1 %v7314_v12  ;;  %9860 = vmatprep.subr.bf16.mxu0 %v17023_v24 }
 0x76e   : > { %v7892_v48 = vmax.f32 %v7583_v27, 0.0  ;;  %v7092_v20 = vadd.f32 %v7091_v59, %v15424_v34  ;;  %v7244_v9 = vmax.f32 %v7090_v5, 0.0  ;;  %v8015_v33 = vpack.c.bf16 %v7891_v30, %v7889_v6 }
 0x76f   : > { %v7095_v61 = vpop.f32.mrf.mxu0  ;;  %v7588_v28 = vpop.f32.mrf.mxu1  ;;  %v7587_v63 = vadd.f32 %v7586_v38, %v15640_v23 }
 0x770   : > { %v7245_v53 = vmax.f32 %v7092_v20, 0.0  ;;  %v8016_v50 = vpack.c.bf16 %v7892_v48, %v7890_v14  ;;  %9861 = vmatpush1.bf16.msra.mxu0 %v12505_v51  ;;  %v7589_v13 = vadd.f32 %v7588_v28, %v15637_v10  ;;  %v7316_v31 = vpack.c.bf16 %v7244_v9, %v7242_v0  ;;  %v12514_v48 = vld [vmem:[%s16822_s11 + $0x10] sm:$0xff]  }
 0x771   : > { %v7097_v40 = vpop.f32.mrf.mxu0  ;;  %v7590_v22 = vpop.f32.mrf.mxu1  ;;  %9862 = vmatprep.subr.bf16.mxu0 %v17023_v24  ;;  %v7096_v46 = vadd.f32 %v7095_v61, %v15427_v36  ;;  %v7893_v8 = vmax.f32 %v7587_v63, 0.0 }
 0x772   : > { %v7591_v4 = vadd.f32 %v7590_v22, %v15640_v23  ;;  %8327 = vmatprep.mubr.bf16.mxu0 %v8016_v50  ;;  %v7317_v7 = vpack.c.bf16 %v7245_v53, %v7243_v44  ;;  %v7098_v41 = vadd.f32 %v7097_v40, %v15424_v34  ;;  %v7894_v19 = vmax.f32 %v7589_v13, 0.0 }
 0x773   : > { %v7099_v55 = vpop.f32.mrf.mxu0  ;;  %v7592_v11 = vpop.f32.mrf.mxu1  ;;  %8328 = vmatmul.mubr.bf16.gmra.mxu0 %v8015_v33  ;;  %v7246_v42 = vmax.f32 %v7096_v46, 0.0 }
 0x774   : > { %v7100_v26 = vadd.f32 %v7099_v55, %v15427_v36  ;;  %v7593_v57 = vadd.f32 %v7592_v11, %v15637_v10  ;;  %7834 = vmatprep.mubr.bf16.mxu1 %v7317_v7  ;;  %9863 = vmatpush1.bf16.msra.mxu0 %v12506_v18  ;;  %v7895_v49 = vmax.f32 %v7591_v4, 0.0  ;;  %v7247_v47 = vmax.f32 %v7098_v41, 0.0  ;;  %v12517_v4 = vld [vmem:[%s16822_s11 + $0x8] sm:$0xff]  }
 0x775   : > { %v7101_v54 = vpop.f32.mrf.mxu0  ;;  %v7596_v1 = vpop.f32.mrf.mxu1  ;;  %7835 = vmatmul.mubr.bf16.gmra.mxu1 %v7316_v31  ;;  %9864 = vmatprep.subr.bf16.mxu0 %v17023_v24 }
 0x776   : > { %v7896_v62 = vmax.f32 %v7593_v57, 0.0  ;;  %v7102_v39 = vadd.f32 %v7101_v54, %v15424_v34  ;;  %v7248_v2 = vmax.f32 %v7100_v26, 0.0  ;;  %v8017_v15 = vpack.c.bf16 %v7895_v49, %v7893_v8 }
 0x777   : > { %v7105_v45 = vpop.f32.mrf.mxu0  ;;  %v7598_v17 = vpop.f32.mrf.mxu1  ;;  %v7597_v52 = vadd.f32 %v7596_v1, %v15640_v23 }
 0x778   : > { %v7249_v29 = vmax.f32 %v7102_v39, 0.0  ;;  %v8018_v60 = vpack.c.bf16 %v7896_v62, %v7894_v19  ;;  %9865 = vmatpush1.bf16.msra.mxu0 %v12508_v21  ;;  %v7599_v3 = vadd.f32 %v7598_v17, %v15637_v10  ;;  %v7318_v27 = vpack.c.bf16 %v7248_v2, %v7246_v42  ;;  %v12520_v62 = vld [vmem:[%s16822_s11] sm:$0xff]  }
 0x779   : > { %v7107_v32 = vpop.f32.mrf.mxu0  ;;  %v7600_v16 = vpop.f32.mrf.mxu1  ;;  %9866 = vmatprep.subr.bf16.mxu0 %v17023_v24  ;;  %v7106_v20 = vadd.f32 %v7105_v45, %v15427_v36  ;;  %v7897_v44 = vmax.f32 %v7597_v52, 0.0 }
 0x77a   : > { %v7601_v43 = vadd.f32 %v7600_v16, %v15640_v23  ;;  %8337 = vmatprep.mubr.bf16.mxu0 %v8018_v60  ;;  %v7319_v5 = vpack.c.bf16 %v7249_v29, %v7247_v47  ;;  %v7108_v51 = vadd.f32 %v7107_v32, %v15424_v34  ;;  %v7898_v6 = vmax.f32 %v7599_v3, 0.0 }
 0x77b   : > { %v7109_v12 = vpop.f32.mrf.mxu0  ;;  %v7602_v25 = vpop.f32.mrf.mxu1  ;;  %8338 = vmatmul.mubr.bf16.gmra.mxu0 %v8017_v15  ;;  %v7250_v13 = vmax.f32 %v7106_v20, 0.0 }
 0x77c   : > { %v7110_v59 = vadd.f32 %v7109_v12, %v15427_v36  ;;  %v7603_v38 = vadd.f32 %v7602_v25, %v15637_v10  ;;  %7844 = vmatprep.mubr.bf16.mxu1 %v7319_v5  ;;  %9867 = vmatpush1.bf16.msra.mxu0 %v12511_v35  ;;  %v7899_v14 = vmax.f32 %v7601_v43, 0.0  ;;  %v7251_v50 = vmax.f32 %v7108_v51, 0.0  ;;  %v12523_v43 = vld [vmem:[%s16822_s11 + $0x78] sm:$0xff]  }
 0x77d   : > { %v7111_v37 = vpop.f32.mrf.mxu0  ;;  %v7606_v30 = vpop.f32.mrf.mxu1  ;;  %7845 = vmatmul.mubr.bf16.gmra.mxu1 %v7318_v27  ;;  %9868 = vmatprep.subr.bf16.mxu0 %v17023_v24 }
 0x77e   : > { %v7900_v61 = vmax.f32 %v7603_v38, 0.0  ;;  %v7112_v28 = vadd.f32 %v7111_v37, %v15424_v34  ;;  %v7252_v40 = vmax.f32 %v7110_v59, 0.0  ;;  %v8019_v55 = vpack.c.bf16 %v7899_v14, %v7897_v44 }
 0x77f   : > { %v7115_v9 = vpop.f32.mrf.mxu0  ;;  %v7608_v53 = vpop.f32.mrf.mxu1  ;;  %v7607_v41 = vadd.f32 %v7606_v30, %v15640_v23 }
 0x780   : > { %v7253_v22 = vmax.f32 %v7112_v28, 0.0  ;;  %v8020_v33 = vpack.c.bf16 %v7900_v61, %v7898_v6  ;;  %9869 = vmatpush1.bf16.msra.mxu0 %v12514_v48  ;;  %v7609_v7 = vadd.f32 %v7608_v53, %v15637_v10  ;;  %v7320_v57 = vpack.c.bf16 %v7252_v40, %v7250_v13  ;;  %v12526_v28 = vld [vmem:[%s16822_s11 + $0x70] sm:$0xff]  }
 0x781   : > { %v7117_v18 = vpop.f32.mrf.mxu0  ;;  %v7610_v0 = vpop.f32.mrf.mxu1  ;;  %9870 = vmatprep.subr.bf16.mxu0 %v17023_v24  ;;  %v7116_v39 = vadd.f32 %v7115_v9, %v15427_v36  ;;  %v7901_v47 = vmax.f32 %v7607_v41, 0.0 }
 0x782   : > { %v7611_v11 = vadd.f32 %v7610_v0, %v15640_v23  ;;  %8347 = vmatprep.mubr.bf16.mxu0 %v8020_v33  ;;  %v7321_v26 = vpack.c.bf16 %v7253_v22, %v7251_v50  ;;  %v7118_v21 = vadd.f32 %v7117_v18, %v15424_v34  ;;  %v7902_v8 = vmax.f32 %v7609_v7, 0.0 }
 0x783   : > { %v7119_v31 = vpop.f32.mrf.mxu0  ;;  %v7612_v63 = vpop.f32.mrf.mxu1  ;;  %8348 = vmatmul.mubr.bf16.gmra.mxu0 %v8019_v55  ;;  %v7254_v3 = vmax.f32 %v7116_v39, 0.0 }
 0x784   : > { %v7120_v54 = vadd.f32 %v7119_v31, %v15427_v36  ;;  %v7613_v1 = vadd.f32 %v7612_v63, %v15637_v10  ;;  %7854 = vmatprep.mubr.bf16.mxu1 %v7321_v26  ;;  %9871 = vmatpush1.bf16.msra.mxu0 %v12517_v4  ;;  %v7903_v19 = vmax.f32 %v7611_v11, 0.0  ;;  %v7255_v60 = vmax.f32 %v7118_v21, 0.0 }
 0x785   : > { %v7121_v46 = vpop.f32.mrf.mxu0  ;;  %v7616_v49 = vpop.f32.mrf.mxu1  ;;  %7855 = vmatmul.mubr.bf16.gmra.mxu1 %v7320_v57  ;;  %9872 = vmatprep.subr.bf16.mxu0 %v17023_v24 }
 0x786   : > { %v7904_v45 = vmax.f32 %v7613_v1, 0.0  ;;  %v7122_v17 = vadd.f32 %v7121_v46, %v15424_v34  ;;  %v7256_v32 = vmax.f32 %v7120_v54, 0.0  ;;  %v8021_v12 = vpack.c.bf16 %v7903_v19, %v7901_v47 }
 0x787   : > { %v7125_v2 = vpop.f32.mrf.mxu0  ;;  %v7618_v29 = vpop.f32.mrf.mxu1  ;;  %v7617_v27 = vadd.f32 %v7616_v49, %v15640_v23 }
 0x788   : > { %v7257_v16 = vmax.f32 %v7122_v17, 0.0  ;;  %v8022_v15 = vpack.c.bf16 %v7904_v45, %v7902_v8  ;;  %9873 = vmatpush1.bf16.msra.mxu0 %v12520_v62  ;;  %v7619_v25 = vadd.f32 %v7618_v29, %v15637_v10  ;;  %v7322_v51 = vpack.c.bf16 %v7256_v32, %v7254_v3  ;;  %v12507_v8 = vld [vmem:[%s13280_s27] sm:$0xff]  }
 0x789   : > { %v7127_v35 = vpop.f32.mrf.mxu0  ;;  %v7620_v42 = vpop.f32.mrf.mxu1  ;;  %9874 = vmatprep.subr.bf16.mxu0 %v17023_v24  ;;  %v7126_v6 = vadd.f32 %v7125_v2, %v15427_v36  ;;  %v7905_v40 = vmax.f32 %v7617_v27, 0.0  ;;  %v12532_v3 = vld [vmem:[%s16822_s11 + $0x60] sm:$0xff]  }
 0x78a   : > { %v7621_v5 = vadd.f32 %v7620_v42, %v15640_v23  ;;  %8357 = vmatprep.mubr.bf16.mxu0 %v8022_v15  ;;  %v7323_v38 = vpack.c.bf16 %v7257_v16, %v7255_v60  ;;  %v7128_v37 = vadd.f32 %v7127_v35, %v15424_v34  ;;  %v7906_v9 = vmax.f32 %v7619_v25, 0.0 }
 0x78b   : > { %v7129_v52 = vpop.f32.mrf.mxu0  ;;  %v7622_v59 = vpop.f32.mrf.mxu1  ;;  %8358 = vmatmul.mubr.bf16.gmra.mxu0 %v8021_v12  ;;  %v7258_v55 = vmax.f32 %v7126_v6, 0.0 }
 0x78c   : > { %v7130_v30 = vadd.f32 %v7129_v52, %v15427_v36  ;;  %v7623_v48 = vadd.f32 %v7622_v59, %v15637_v10  ;;  %v7907_v20 = vmax.f32 %v7621_v5, 0.0  ;;  %7864 = vmatprep.mubr.bf16.mxu1 %v7323_v38  ;;  %9875 = vmatpush2.bf16.msra.mxu0 %v12523_v43  ;;  %v7259_v50 = vmax.f32 %v7128_v37, 0.0  ;;  %v12529_v36 = vld [vmem:[%s16822_s11 + $0x68] sm:$0xff]  }
 0x78d   : > { %v7131_v14 = vpop.f32.mrf.mxu0  ;;  %v7626_v61 = vpop.f32.mrf.mxu1  ;;  %7865 = vmatmul.mubr.bf16.gmra.mxu1 %v7322_v51  ;;  %9876 = vmatprep.subr.bf16.mxu0 %v17023_v24  ;;  %v12509_v52 = vld [vmem:[%s13280_s27 + $0x8] sm:$0xff]  }
 0x78e   : > { %v7908_v53 = vmax.f32 %v7623_v48, 0.0  ;;  %v7132_v44 = vadd.f32 %v7131_v14, %v15424_v34  ;;  %v7260_v18 = vmax.f32 %v7130_v30, 0.0  ;;  %v8023_v4 = vpack.c.bf16 %v7907_v20, %v7905_v40  ;;  %v12510_v40 = vld [vmem:[%s13280_s27 + $0x10] sm:$0xff]  }
 0x78f   : > { %v7628_v22 = vpop.f32.mrf.mxu1  ;;  %v7627_v26 = vadd.f32 %v7626_v61, %v15640_v23 }
 0x790   : > { %v7261_v0 = vmax.f32 %v7132_v44, 0.0  ;;  %v8024_v33 = vpack.c.bf16 %v7908_v53, %v7906_v9  ;;  %9877 = vmatpush2.bf16.msra.mxu0 %v12526_v28  ;;  %v7629_v11 = vadd.f32 %v7628_v22, %v15637_v10  ;;  %v7324_v63 = vpack.c.bf16 %v7260_v18, %v7258_v55 }
 0x791   : > { %v7630_v13 = vpop.f32.mrf.mxu1  ;;  %9878 = vmatprep.subr.bf16.mxu0 %v17023_v24  ;;  %v7909_v49 = vmax.f32 %v7627_v26, 0.0 }
 0x792   : > { %v7631_v34 = vadd.f32 %v7630_v13, %v15640_v23  ;;  %8367 = vmatprep.mubr.bf16.mxu0 %v8024_v33  ;;  %v7325_v7 = vpack.c.bf16 %v7261_v0, %v7259_v50  ;;  %v7910_v54 = vmax.f32 %v7629_v11, 0.0 }
 0x793   : > { %v7632_v31 = vpop.f32.mrf.mxu1  ;;  %8368 = vmatmul.mubr.bf16.gmra.mxu0 %v8023_v4 }
 0x794   : > { %v7633_v57 = vadd.f32 %v7632_v31, %v15637_v10  ;;  %7874 = vmatprep.mubr.bf16.mxu1 %v7325_v7  ;;  %9879 = vmatpush2.bf16.msra.mxu0 %v12529_v36  ;;  %v7911_v1 = vmax.f32 %v7631_v34, 0.0  ;;  %v12535_v7 = vld [vmem:[%s16822_s11 + $0x58] sm:$0xff]  }
 0x795   : > { %v7636_v41 = vpop.f32.mrf.mxu1  ;;  %7875 = vmatmul.mubr.bf16.gmra.mxu1 %v7324_v63  ;;  %9880 = vmatprep.subr.bf16.mxu0 %v17023_v24 }
 0x796   : > { %v7912_v21 = vmax.f32 %v7633_v57, 0.0  ;;  %8942 = vmatprep.mubr.bf16.mxu1 %v17023_v24  ;;  %v8025_v19 = vpack.c.bf16 %v7911_v1, %v7909_v49  ;;  %v7637_v29 = vadd.f32 %v7636_v41, %v15640_v23  ;;  %v12512_v57 = vld [vmem:[%s13280_s27 + $0x18] sm:$0xff]  }
 0x797   : > { %v7638_v46 = vpop.f32.mrf.mxu1 }
 0x798   : > { %v8026_v62 = vpack.c.bf16 %v7912_v21, %v7910_v54  ;;  %v7639_v45 = vadd.f32 %v7638_v46, %v15637_v10  ;;  %v7913_v15 = vmax.f32 %v7637_v29, 0.0  ;;  %9881 = vmatpush2.bf16.msra.mxu0 %v12532_v3 }
 0x799   : > { %v7640_v39 = vpop.f32.mrf.mxu1  ;;  %9882 = vmatprep.subr.bf16.mxu0 %v17023_v24 }
 0x79a   : > { %v7641_v17 = vadd.f32 %v7640_v39, %v15640_v23  ;;  %8377 = vmatprep.mubr.bf16.mxu0 %v8026_v62  ;;  %v7914_v16 = vmax.f32 %v7639_v45, 0.0 }
 0x79b   : > { %v7642_v2 = vpop.f32.mrf.mxu1  ;;  %8378 = vmatmul.mubr.bf16.gmra.mxu0 %v8025_v19 }
 0x79c   : > { %v7643_v47 = vadd.f32 %v7642_v2, %v15637_v10  ;;  %v7915_v60 = vmax.f32 %v7641_v17, 0.0  ;;  %9883 = vmatpush2.bf16.msra.mxu0 %v12535_v7 }
 0x79d   : > { %v7646_v32 = vpop.f32.mrf.mxu1  ;;  %8943 = vmatmul.mubr.bf16.vlgmr.msra.gmra.mxu1 %v12507_v8  ;;  %9884 = vmatprep.subr.bf16.mxu0 %v17023_v24 }
 0x79e   : > { %v7916_v35 = vmax.f32 %v7643_v47, 0.0  ;;  %8952 = vmatprep.mubr.bf16.mxu1 %v17023_v24  ;;  %v8027_v25 = vpack.c.bf16 %v7915_v60, %v7913_v15  ;;  %v7647_v38 = vadd.f32 %v7646_v32, %v15640_v23  ;;  %v12513_v47 = vld [vmem:[%s13280_s27 + $0x20] sm:$0xff]  }
 0x79f   : > { %v7648_v42 = vpop.f32.mrf.mxu1 }
 0x7a0   : > { %v8028_v43 = vpack.c.bf16 %v7916_v35, %v7914_v16  ;;  %v7649_v5 = vadd.f32 %v7648_v42, %v15637_v10  ;;  %v7917_v61 = vmax.f32 %v7647_v38, 0.0 }
 0x7a1   : > { %v7650_v12 = vpop.f32.mrf.mxu1 }
 0x7a2   : > { %v7651_v27 = vadd.f32 %v7650_v12, %v15640_v23  ;;  %8387 = vmatprep.mubr.bf16.mxu0 %v8028_v43  ;;  %v7918_v30 = vmax.f32 %v7649_v5, 0.0 }
 0x7a3   : > { %v7652_v59 = vpop.f32.mrf.mxu1  ;;  %8388 = vmatmul.mubr.bf16.gmra.mxu0 %v8027_v25 }
 0x7a4   : > { %v7653_v51 = vadd.f32 %v7652_v59, %v15637_v10  ;;  %v7919_v48 = vmax.f32 %v7651_v27, 0.0  ;;  %v12538_v27 = vld [vmem:[%s16822_s11 + $0x50] sm:$0xff]  }
 0x7a5   : > { %v7656_v37 = vpop.f32.mrf.mxu1  ;;  %8953 = vmatmul.mubr.bf16.gmra.mxu1 %v12509_v52  ;;  %9885 = vmatpush2.bf16.msra.mxu0 %v12538_v27 }
 0x7a6   : > { %v7920_v20 = vmax.f32 %v7653_v51, 0.0  ;;  %8962 = vmatprep.mubr.bf16.mxu1 %v17023_v24  ;;  %v8029_v9 = vpack.c.bf16 %v7919_v48, %v7917_v61  ;;  %v7657_v50 = vadd.f32 %v7656_v37, %v15640_v23  ;;  %v12515_v51 = vld [vmem:[%s13280_s27 + $0x28] sm:$0xff]   ;;  %9886 = vmatprep.subr.bf16.mxu0 %v17023_v24 }
 0x7a7   : > { %v7658_v14 = vpop.f32.mrf.mxu1 }
 0x7a8   : > { %v8030_v28 = vpack.c.bf16 %v7920_v20, %v7918_v30  ;;  %v7659_v53 = vadd.f32 %v7658_v14, %v15637_v10  ;;  %v7921_v55 = vmax.f32 %v7657_v50, 0.0 }
 0x7a9   : > { %v7660_v6 = vpop.f32.mrf.mxu1 }
 0x7aa   : > { %v7661_v44 = vadd.f32 %v7660_v6, %v15640_v23  ;;  %8397 = vmatprep.mubr.bf16.mxu0 %v8030_v28  ;;  %v7922_v33 = vmax.f32 %v7659_v53, 0.0 }
 0x7ab   : > { %v7662_v22 = vpop.f32.mrf.mxu1  ;;  %8398 = vmatmul.mubr.bf16.gmra.mxu0 %v8029_v9 }
 0x7ac   : > { %v7663_v18 = vadd.f32 %v7662_v22, %v15637_v10  ;;  %v7923_v4 = vmax.f32 %v7661_v44, 0.0 }
 0x7ad   : > { %v7666_v0 = vpop.f32.mrf.mxu1  ;;  %8963 = vmatmul.mubr.bf16.gmra.mxu1 %v12510_v40 }
 0x7ae   : > { %v7924_v13 = vmax.f32 %v7663_v18, 0.0  ;;  %8972 = vmatprep.mubr.bf16.mxu1 %v17023_v24  ;;  %v8031_v31 = vpack.c.bf16 %v7923_v4, %v7921_v55  ;;  %v7667_v54 = vadd.f32 %v7666_v0, %v15640_v23  ;;  %v12516_v18 = vld [vmem:[%s13280_s27 + $0x30] sm:$0xff]  }
 0x7af   : > { %v7668_v36 = vpop.f32.mrf.mxu1 }
 0x7b0   : > { %v8032_v11 = vpack.c.bf16 %v7924_v13, %v7922_v33  ;;  %v7669_v63 = vadd.f32 %v7668_v36, %v15637_v10  ;;  %v7925_v19 = vmax.f32 %v7667_v54, 0.0 }
 0x7b1   : > { %v7670_v34 = vpop.f32.mrf.mxu1 }
 0x7b2   : > { %v7671_v26 = vadd.f32 %v7670_v34, %v15640_v23  ;;  %8407 = vmatprep.mubr.bf16.mxu0 %v8032_v11  ;;  %v7926_v46 = vmax.f32 %v7669_v63, 0.0 }
 0x7b3   : > { %v7672_v41 = vpop.f32.mrf.mxu1  ;;  %8408 = vmatmul.mubr.bf16.gmra.mxu0 %v8031_v31 }
 0x7b4   : > { %v7673_v1 = vadd.f32 %v7672_v41, %v15637_v10  ;;  %v7927_v49 = vmax.f32 %v7671_v26, 0.0  ;;  %v12541_v26 = vld [vmem:[%s16822_s11 + $0x48] sm:$0xff]  }
 0x7b5   : > { %v7676_v21 = vpop.f32.mrf.mxu1  ;;  %8973 = vmatmul.mubr.bf16.gmra.mxu1 %v12512_v57  ;;  %9887 = vmatpush2.bf16.msra.mxu0 %v12541_v26 }
 0x7b6   : > { %v7928_v62 = vmax.f32 %v7673_v1, 0.0  ;;  %8982 = vmatprep.mubr.bf16.mxu1 %v17023_v24  ;;  %v8033_v8 = vpack.c.bf16 %v7927_v49, %v7925_v19  ;;  %v7677_v16 = vadd.f32 %v7676_v21, %v15640_v23  ;;  %v12518_v1 = vld [vmem:[%s13280_s27 + $0x38] sm:$0xff]   ;;  %9888 = vmatprep.subr.bf16.mxu0 %v17023_v24 }
 0x7b7   : > { %v7678_v39 = vpop.f32.mrf.mxu1 }
 0x7b8   : > { %v8034_v45 = vpack.c.bf16 %v7928_v62, %v7926_v46  ;;  %v7679_v2 = vadd.f32 %v7678_v39, %v15637_v10  ;;  %v7929_v12 = vmax.f32 %v7677_v16, 0.0 }
 0x7b9   : > { %v7680_v17 = vpop.f32.mrf.mxu1 }
 0x7ba   : > { %v7681_v29 = vadd.f32 %v7680_v17, %v15640_v23  ;;  %8417 = vmatprep.mubr.bf16.mxu0 %v8034_v45  ;;  %v7930_v42 = vmax.f32 %v7679_v2, 0.0 }
 0x7bb   : > { %v7682_v32 = vpop.f32.mrf.mxu1  ;;  %8418 = vmatmul.mubr.bf16.gmra.mxu0 %v8033_v8 }
 0x7bc   : > { %v7683_v60 = vadd.f32 %v7682_v32, %v15637_v10  ;;  %v7931_v15 = vmax.f32 %v7681_v29, 0.0 }
 0x7bd   : > { %v7686_v35 = vpop.f32.mrf.mxu1  ;;  %8983 = vmatmul.mubr.bf16.gmra.mxu1 %v12513_v47 }
 0x7be   : > { %v7932_v43 = vmax.f32 %v7683_v60, 0.0  ;;  %8992 = vmatprep.mubr.bf16.mxu1 %v17023_v24  ;;  %v8035_v52 = vpack.c.bf16 %v7931_v15, %v7929_v12  ;;  %v7687_v30 = vadd.f32 %v7686_v35, %v15640_v23  ;;  %v12519_v60 = vld [vmem:[%s13280_s27 + $0x40] sm:$0xff]  }
 0x7bf   : > { %v7688_v3 = vpop.f32.mrf.mxu1 }
 0x7c0   : > { %v8036_v25 = vpack.c.bf16 %v7932_v43, %v7930_v42  ;;  %v7689_v59 = vadd.f32 %v7688_v3, %v15637_v10  ;;  %v7933_v9 = vmax.f32 %v7687_v30, 0.0  ;;  %v12521_v30 = vld [vmem:[%s13280_s27 + $0x48] sm:$0xff]  }
 0x7c1   : > { %v7690_v5 = vpop.f32.mrf.mxu1 }
 0x7c2   : > { %v7691_v38 = vadd.f32 %v7690_v5, %v15640_v23  ;;  %8427 = vmatprep.mubr.bf16.mxu0 %v8036_v25  ;;  %v7934_v14 = vmax.f32 %v7689_v59, 0.0 }
 0x7c3   : > { %v7692_v37 = vpop.f32.mrf.mxu1  ;;  %8428 = vmatmul.mubr.bf16.gmra.mxu0 %v8035_v52 }
 0x7c4   : > { %v7693_v48 = vadd.f32 %v7692_v37, %v15637_v10  ;;  %v7935_v61 = vmax.f32 %v7691_v38, 0.0 }
 0x7c5   : > { %v7696_v20 = vpop.f32.mrf.mxu1  ;;  %8993 = vmatmul.mubr.bf16.gmra.mxu1 %v12515_v51 }
 0x7c6   : > { %v7936_v28 = vmax.f32 %v7693_v48, 0.0  ;;  %9002 = vmatprep.mubr.bf16.mxu1 %v17023_v24  ;;  %v8037_v40 = vpack.c.bf16 %v7935_v61, %v7933_v9  ;;  %v7697_v33 = vadd.f32 %v7696_v20, %v15640_v23 }
 0x7c7   : > { %v7698_v6 = vpop.f32.mrf.mxu1 }
 0x7c8   : > { %v8038_v53 = vpack.c.bf16 %v7936_v28, %v7934_v14  ;;  %v7699_v22 = vadd.f32 %v7698_v6, %v15637_v10  ;;  %v7937_v7 = vmax.f32 %v7697_v33, 0.0  ;;  %v12544_v28 = vld [vmem:[%s16822_s11 + $0x40] sm:$0xff]  }
 0x7c9   : > { %v7700_v44 = vpop.f32.mrf.mxu1  ;;  %9889 = vmatpush2.bf16.msra.mxu0 %v12544_v28 }
 0x7ca   : > { %v7701_v50 = vadd.f32 %v7700_v44, %v15640_v23  ;;  %8437 = vmatprep.mubr.bf16.mxu0 %v8038_v53  ;;  %v7938_v36 = vmax.f32 %v7699_v22, 0.0 }
 0x7cb   : > { %v7702_v0 = vpop.f32.mrf.mxu1  ;;  %8438 = vmatmul.mubr.bf16.gmra.mxu0 %v8037_v40 }
 0x7cc   : > { %v7703_v4 = vadd.f32 %v7702_v0, %v15637_v10  ;;  %v7939_v55 = vmax.f32 %v7701_v50, 0.0 }
 0x7cd   : > { %v7706_v13 = vpop.f32.mrf.mxu1  ;;  %9003 = vmatmul.mubr.bf16.gmra.mxu1 %v12516_v18 }
 0x7ce   : > { %v7940_v11 = vmax.f32 %v7703_v4, 0.0  ;;  %9012 = vmatprep.mubr.bf16.mxu1 %v17023_v24  ;;  %v8039_v57 = vpack.c.bf16 %v7939_v55, %v7937_v7  ;;  %v7707_v46 = vadd.f32 %v7706_v13, %v15640_v23  ;;  %v12522_v4 = vld [vmem:[%s13280_s27 + $0x50] sm:$0xff]  }
 0x7cf   : > { %v7708_v34 = vpop.f32.mrf.mxu1 }
 0x7d0   : > { %v8040_v31 = vpack.c.bf16 %v7940_v11, %v7938_v36  ;;  %v7709_v41 = vadd.f32 %v7708_v34, %v15637_v10  ;;  %v7941_v8 = vmax.f32 %v7707_v46, 0.0  ;;  %v12524_v46 = vld [vmem:[%s13280_s27 + $0x58] sm:$0xff]  }
 0x7d1   : > { %v7710_v63 = vpop.f32.mrf.mxu1 }
 0x7d2   : > { %v7711_v54 = vadd.f32 %v7710_v63, %v15640_v23  ;;  %8447 = vmatprep.mubr.bf16.mxu0 %v8040_v31  ;;  %v7942_v39 = vmax.f32 %v7709_v41, 0.0 }
 0x7d3   : > { %v7712_v21 = vpop.f32.mrf.mxu1  ;;  %8448 = vmatmul.mubr.bf16.gmra.mxu0 %v8039_v57 }
 0x7d4   : > { %v7713_v49 = vadd.f32 %v7712_v21, %v15637_v10  ;;  %v7943_v19 = vmax.f32 %v7711_v54, 0.0 }
 0x7d5   : > { %v7716_v62 = vpop.f32.mrf.mxu1  ;;  %9013 = vmatmul.mubr.bf16.gmra.mxu1 %v12518_v1 }
 0x7d6   : > { %v7944_v45 = vmax.f32 %v7713_v49, 0.0  ;;  %9022 = vmatprep.mubr.bf16.mxu1 %v17023_v24  ;;  %v8041_v47 = vpack.c.bf16 %v7943_v19, %v7941_v8  ;;  %v7717_v42 = vadd.f32 %v7716_v62, %v15640_v23 }
 0x7d7   : > { %v7718_v17 = vpop.f32.mrf.mxu1 }
 0x7d8   : > { %v8042_v2 = vpack.c.bf16 %v7944_v45, %v7942_v39  ;;  %v7719_v32 = vadd.f32 %v7718_v17, %v15637_v10  ;;  %v7945_v27 = vmax.f32 %v7717_v42, 0.0  ;;  %v12525_v42 = vld [vmem:[%s13280_s27 + $0x60] sm:$0xff]  }
 0x7d9   : > { %v7720_v29 = vpop.f32.mrf.mxu1 }
 0x7da   : > { %v7721_v16 = vadd.f32 %v7720_v29, %v15640_v23  ;;  %8457 = vmatprep.mubr.bf16.mxu0 %v8042_v2  ;;  %v7946_v3 = vmax.f32 %v7719_v32, 0.0 }
 0x7db   : > { %v7722_v35 = vpop.f32.mrf.mxu1  ;;  %8458 = vmatmul.mubr.bf16.gmra.mxu0 %v8041_v47 }
 0x7dc   : > { %v7723_v15 = vadd.f32 %v7722_v35, %v15637_v10  ;;  %v7947_v12 = vmax.f32 %v7721_v16, 0.0 }
 0x7dd   : > { %v7726_v43 = vpop.f32.mrf.mxu1  ;;  %9023 = vmatmul.mubr.bf16.gmra.mxu1 %v12519_v60 }
 0x7de   : > { %v7948_v25 = vmax.f32 %v7723_v15, 0.0  ;;  %9032 = vmatprep.mubr.bf16.mxu1 %v17023_v24  ;;  %v8043_v38 = vpack.c.bf16 %v7947_v12, %v7945_v27  ;;  %v7727_v20 = vadd.f32 %v7726_v43, %v15640_v23 }
 0x7df   : > { %v7728_v5 = vpop.f32.mrf.mxu1 }
 0x7e0   : > { %v8044_v52 = vpack.c.bf16 %v7948_v25, %v7946_v3  ;;  %v7729_v51 = vadd.f32 %v7728_v5, %v15637_v10  ;;  %v7949_v40 = vmax.f32 %v7727_v20, 0.0  ;;  %v12527_v20 = vld [vmem:[%s13280_s27 + $0x68] sm:$0xff]  }
 0x7e1   : > { %v7730_v59 = vpop.f32.mrf.mxu1 }
 0x7e2   : > { %v7731_v37 = vadd.f32 %v7730_v59, %v15640_v23  ;;  %8467 = vmatprep.mubr.bf16.mxu0 %v8044_v52  ;;  %v7950_v6 = vmax.f32 %v7729_v51, 0.0 }
 0x7e3   : > { %v7732_v48 = vpop.f32.mrf.mxu1  ;;  %8468 = vmatmul.mubr.bf16.gmra.mxu0 %v8043_v38 }
 0x7e4   : > { %v7733_v14 = vadd.f32 %v7732_v48, %v15637_v10  ;;  %v7951_v9 = vmax.f32 %v7731_v37, 0.0 }
 0x7e5   : > { %v7736_v61 = vpop.f32.mrf.mxu1  ;;  %9033 = vmatmul.mubr.bf16.gmra.mxu1 %v12521_v30 }
 0x7e6   : > { %v7952_v53 = vmax.f32 %v7733_v14, 0.0  ;;  %9042 = vmatprep.mubr.bf16.mxu1 %v17023_v24  ;;  %v8045_v18 = vpack.c.bf16 %v7951_v9, %v7949_v40  ;;  %v7737_v36 = vadd.f32 %v7736_v61, %v15640_v23 }
 0x7e7   : > { %v7738_v44 = vpop.f32.mrf.mxu1 }
 0x7e8   : > { %v8046_v22 = vpack.c.bf16 %v7952_v53, %v7950_v6  ;;  %v7739_v0 = vadd.f32 %v7738_v44, %v15637_v10  ;;  %v7953_v26 = vmax.f32 %v7737_v36, 0.0 }
 0x7e9   : > { %v7740_v50 = vpop.f32.mrf.mxu1 }
 0x7ea   : > { %v7741_v33 = vadd.f32 %v7740_v50, %v15640_v23  ;;  %8477 = vmatprep.mubr.bf16.mxu0 %v8046_v22  ;;  %v7954_v34 = vmax.f32 %v7739_v0, 0.0 }
 0x7eb   : > { %v7742_v13 = vpop.f32.mrf.mxu1  ;;  %8478 = vmatmul.mubr.bf16.gmra.mxu0 %v8045_v18 }
 0x7ec   : > { %v7743_v55 = vadd.f32 %v7742_v13, %v15637_v10  ;;  %v7955_v7 = vmax.f32 %v7741_v33, 0.0  ;;  %v12528_v13 = vld [vmem:[%s13280_s27 + $0x70] sm:$0xff]  }
 0x7ed   : > { %v7746_v11 = vpop.f32.mrf.mxu1  ;;  %9043 = vmatmul.mubr.bf16.gmra.mxu1 %v12522_v4 }
 0x7ee   : > { %v7956_v31 = vmax.f32 %v7743_v55, 0.0  ;;  %9052 = vmatprep.mubr.bf16.mxu1 %v17023_v24  ;;  %v8047_v54 = vpack.c.bf16 %v7955_v7, %v7953_v26  ;;  %v7747_v62 = vadd.f32 %v7746_v11, %v15640_v23 }
 0x7ef   : > { %v7748_v63 = vpop.f32.mrf.mxu1 }
 0x7f0   : > { %v8048_v57 = vpack.c.bf16 %v7956_v31, %v7954_v34  ;;  %v7749_v1 = vadd.f32 %v7748_v63, %v15637_v10  ;;  %v7957_v29 = vmax.f32 %v7747_v62, 0.0 }
 0x7f1   : > { %v7750_v41 = vpop.f32.mrf.mxu1 }
 0x7f2   : > { %v7751_v21 = vadd.f32 %v7750_v41, %v15640_v23  ;;  %8487 = vmatprep.mubr.bf16.mxu0 %v8048_v57  ;;  %v7958_v45 = vmax.f32 %v7749_v1, 0.0 }
 0x7f3   : > { %v7752_v49 = vpop.f32.mrf.mxu1  ;;  %8488 = vmatmul.mubr.bf16.gmra.mxu0 %v8047_v54 }
 0x7f4   : > { %v7753_v39 = vadd.f32 %v7752_v49, %v15637_v10  ;;  %v7959_v17 = vmax.f32 %v7751_v21, 0.0  ;;  %v12530_v49 = vld [vmem:[%s13280_s27 + $0x78] sm:$0xff]  }
 0x7f5   : > { %v7756_v19 = vpop.f32.mrf.mxu1  ;;  %9053 = vmatmul.mubr.bf16.gmra.mxu1 %v12524_v46 }
 0x7f6   : > { %v7960_v8 = vmax.f32 %v7753_v39, 0.0  ;;  %9062 = vmatprep.mubr.bf16.mxu1 %v17023_v24  ;;  %v8049_v16 = vpack.c.bf16 %v7959_v17, %v7957_v29  ;;  %v7757_v43 = vadd.f32 %v7756_v19, %v15640_v23 }
 0x7f7   : > { %v7758_v2 = vpop.f32.mrf.mxu1 }
 0x7f8   : > { %v8050_v47 = vpack.c.bf16 %v7960_v8, %v7958_v45  ;;  %v7759_v60 = vadd.f32 %v7758_v2, %v15637_v10  ;;  %v7961_v59 = vmax.f32 %v7757_v43, 0.0 }
 0x7f9   : > { %v7760_v32 = vpop.f32.mrf.mxu1 }
 0x7fa   : > { %v7761_v35 = vadd.f32 %v7760_v32, %v15640_v23  ;;  %8497 = vmatprep.mubr.bf16.mxu0 %v8050_v47  ;;  %v7962_v25 = vmax.f32 %v7759_v60, 0.0 }
 0x7fb   : > { %v7762_v15 = vpop.f32.mrf.mxu1  ;;  %8498 = vmatmul.mubr.bf16.gmra.mxu0 %v8049_v16 }
 0x7fc   : > { %v7763_v3 = vadd.f32 %v7762_v15, %v15637_v10  ;;  %v7963_v5 = vmax.f32 %v7761_v35, 0.0  ;;  %v12531_v15 = vld [vmem:[%s13280_s27 + $0x80] sm:$0xff]  }
 0x7fd   : > { %v7766_v12 = vpop.f32.mrf.mxu1  ;;  %9063 = vmatmul.mubr.bf16.gmra.mxu1 %v12525_v42 }
 0x7fe   : > { %v7964_v27 = vmax.f32 %v7763_v3, 0.0  ;;  %9072 = vmatprep.mubr.bf16.mxu1 %v17023_v24  ;;  %v8051_v37 = vpack.c.bf16 %v7963_v5, %v7961_v59  ;;  %v7767_v61 = vadd.f32 %v7766_v12, %v15640_v23 }
 0x7ff   : > { %v7768_v52 = vpop.f32.mrf.mxu1 }
 0x800   : > { %v8052_v38 = vpack.c.bf16 %v7964_v27, %v7962_v25  ;;  %v7769_v30 = vadd.f32 %v7768_v52, %v15637_v10  ;;  %v7965_v22 = vmax.f32 %v7767_v61, 0.0 }
 0x801   : > { %v7770_v51 = vpop.f32.mrf.mxu1 }
 0x802   : > { %v7771_v48 = vadd.f32 %v7770_v51, %v15640_v23  ;;  %8507 = vmatprep.mubr.bf16.mxu0 %v8052_v38  ;;  %v7966_v9 = vmax.f32 %v7769_v30, 0.0 }
 0x803   : > { %v7772_v14 = vpop.f32.mrf.mxu1  ;;  %8508 = vmatmul.mubr.bf16.gmra.mxu0 %v8051_v37 }
 0x804   : > { %v7773_v28 = vadd.f32 %v7772_v14, %v15637_v10  ;;  %v7967_v53 = vmax.f32 %v7771_v48, 0.0  ;;  %v12533_v14 = vld [vmem:[%s13280_s27 + $0x88] sm:$0xff]  }
 0x805   : > { %v7776_v6 = vpop.f32.mrf.mxu1  ;;  %9073 = vmatmul.mubr.bf16.gmra.mxu1 %v12527_v20 }
 0x806   : > { %v7968_v44 = vmax.f32 %v7773_v28, 0.0  ;;  %9082 = vmatprep.mubr.bf16.mxu1 %v17023_v24  ;;  %v8053_v0 = vpack.c.bf16 %v7967_v53, %v7965_v22  ;;  %v7777_v55 = vadd.f32 %v7776_v6, %v15640_v23 }
 0x807   : > { %v7778_v40 = vpop.f32.mrf.mxu1 }
 0x808   : > { %v8054_v50 = vpack.c.bf16 %v7968_v44, %v7966_v9  ;;  %v7779_v33 = vadd.f32 %v7778_v40, %v15637_v10  ;;  %v7969_v57 = vmax.f32 %v7777_v55, 0.0 }
 0x809   : > { %v7780_v18 = vpop.f32.mrf.mxu1 }
 0x80a   : > { %v7781_v4 = vadd.f32 %v7780_v18, %v15640_v23  ;;  %8517 = vmatprep.mubr.bf16.mxu0 %v8054_v50  ;;  %v7970_v7 = vmax.f32 %v7779_v33, 0.0 }
 0x80b   : > { %v7782_v36 = vpop.f32.mrf.mxu1  ;;  %8518 = vmatmul.mubr.bf16.gmra.mxu0 %v8053_v0 }
 0x80c   : > { %v7783_v11 = vadd.f32 %v7782_v36, %v15637_v10  ;;  %v7971_v31 = vmax.f32 %v7781_v4, 0.0  ;;  %v12534_v36 = vld [vmem:[%s13280_s27 + $0x90] sm:$0xff]  }
 0x80d   : > { %v7786_v34 = vpop.f32.mrf.mxu1  ;;  %9083 = vmatmul.mubr.bf16.gmra.mxu1 %v12528_v13 }
 0x80e   : > { %v7972_v63 = vmax.f32 %v7783_v11, 0.0  ;;  %9092 = vmatprep.mubr.bf16.mxu1 %v17023_v24  ;;  %v8055_v1 = vpack.c.bf16 %v7971_v31, %v7969_v57  ;;  %v7787_v39 = vadd.f32 %v7786_v34, %v15640_v23 }
 0x80f   : > { %v7788_v26 = vpop.f32.mrf.mxu1 }
 0x810   : > { %v8056_v41 = vpack.c.bf16 %v7972_v63, %v7970_v7  ;;  %v7789_v21 = vadd.f32 %v7788_v26, %v15637_v10  ;;  %v7973_v47 = vmax.f32 %v7787_v39, 0.0 }
 0x811   : > { %v7790_v54 = vpop.f32.mrf.mxu1 }
 0x812   : > { %v7791_v46 = vadd.f32 %v7790_v54, %v15640_v23  ;;  %8527 = vmatprep.mubr.bf16.mxu0 %v8056_v41  ;;  %v7974_v17 = vmax.f32 %v7789_v21, 0.0 }
 0x813   : > { %v7792_v62 = vpop.f32.mrf.mxu1  ;;  %8528 = vmatmul.mubr.bf16.gmra.mxu0 %v8055_v1 }
 0x814   : > { %v7793_v19 = vadd.f32 %v7792_v62, %v15637_v10  ;;  %v7975_v8 = vmax.f32 %v7791_v46, 0.0 }
 0x815   : > { %v7796_v45 = vpop.f32.mrf.mxu1  ;;  %9093 = vmatmul.mubr.bf16.gmra.mxu1 %v12530_v49 }
 0x816   : > { %v7976_v2 = vmax.f32 %v7793_v19, 0.0  ;;  %9102 = vmatprep.mubr.bf16.mxu1 %v17023_v24  ;;  %v8057_v60 = vpack.c.bf16 %v7975_v8, %v7973_v47  ;;  %v7797_v3 = vadd.f32 %v7796_v45, %v15640_v23  ;;  %v12536_v19 = vld [vmem:[%s13280_s27 + $0x98] sm:$0xff]  }
 0x817   : > { %v7798_v29 = vpop.f32.mrf.mxu1 }
 0x818   : > { %v8058_v32 = vpack.c.bf16 %v7976_v2, %v7974_v17  ;;  %v7799_v35 = vadd.f32 %v7798_v29, %v15637_v10  ;;  %v7977_v38 = vmax.f32 %v7797_v3, 0.0 }
 0x819   : > { %v7800_v16 = vpop.f32.mrf.mxu1 }
 0x81a   : > { %v7801_v42 = vadd.f32 %v7800_v16, %v15640_v23  ;;  %8537 = vmatprep.mubr.bf16.mxu0 %v8058_v32  ;;  %v7978_v5 = vmax.f32 %v7799_v35, 0.0 }
 0x81b   : > { %v7802_v43 = vpop.f32.mrf.mxu1  ;;  %8538 = vmatmul.mubr.bf16.gmra.mxu0 %v8057_v60 }
 0x81c   : > { %v7803_v12 = vadd.f32 %v7802_v43, %v15637_v10  ;;  %v7979_v27 = vmax.f32 %v7801_v42, 0.0 }
 0x81d   : > { %v7806_v25 = vpop.f32.mrf.mxu1  ;;  %9103 = vmatmul.mubr.bf16.gmra.mxu1 %v12531_v15 }
 0x81e   : > { %v7980_v52 = vmax.f32 %v7803_v12, 0.0  ;;  %9112 = vmatprep.mubr.bf16.mxu1 %v17023_v24  ;;  %v8059_v30 = vpack.c.bf16 %v7979_v27, %v7977_v38  ;;  %v7807_v28 = vadd.f32 %v7806_v25, %v15640_v23 }
 0x81f   : > { %v7808_v59 = vpop.f32.mrf.mxu1 }
 0x820   : > { %v8060_v51 = vpack.c.bf16 %v7980_v52, %v7978_v5  ;;  %v7809_v48 = vadd.f32 %v7808_v59, %v15637_v10  ;;  %v7981_v50 = vmax.f32 %v7807_v28, 0.0  ;;  %v12537_v52 = vld [vmem:[%s13280_s27 + $0xa0] sm:$0xff]  }
 0x821   : > { %v7810_v37 = vpop.f32.mrf.mxu1 }
 0x822   : > { %v7811_v20 = vadd.f32 %v7810_v37, %v15640_v23  ;;  %8547 = vmatprep.mubr.bf16.mxu0 %v8060_v51  ;;  %v7982_v53 = vmax.f32 %v7809_v48, 0.0 }
 0x823   : > { %v7812_v61 = vpop.f32.mrf.mxu1  ;;  %8548 = vmatmul.mubr.bf16.gmra.mxu0 %v8059_v30 }
 0x824   : > { %v7813_v6 = vadd.f32 %v7812_v61, %v15637_v10  ;;  %v7983_v44 = vmax.f32 %v7811_v20, 0.0 }
 0x825   : > { %v7816_v9 = vpop.f32.mrf.mxu1  ;;  %9113 = vmatmul.mubr.bf16.gmra.mxu1 %v12533_v14 }
 0x826   : > { %v7984_v40 = vmax.f32 %v7813_v6, 0.0  ;;  %9122 = vmatprep.mubr.bf16.mxu1 %v17023_v24  ;;  %v8061_v33 = vpack.c.bf16 %v7983_v44, %v7981_v50  ;;  %v7817_v11 = vadd.f32 %v7816_v9, %v15640_v23  ;;  %v12552_v9 = vld [vmem:[%s16824_s13 + $0x38] sm:$0xff]  }
 0x827   : > { %v7818_v22 = vpop.f32.mrf.mxu1  ;;  %11862 = vmatprep.subr.bf16.mxu1 %v12552_v9 }
 0x828   : > { %v8062_v18 = vpack.c.bf16 %v7984_v40, %v7982_v53  ;;  %v7819_v4 = vadd.f32 %v7818_v22, %v15637_v10  ;;  %v7985_v54 = vmax.f32 %v7817_v11, 0.0  ;;  %11863 = vmatpush3.bf16.msra.mxu1 %v12552_v9 }
 0x829   : > { %v7820_v0 = vpop.f32.mrf.mxu1 }
 0x82a   : > { %v7821_v13 = vadd.f32 %v7820_v0, %v15640_v23  ;;  %8557 = vmatprep.mubr.bf16.mxu0 %v8062_v18  ;;  %v7986_v31 = vmax.f32 %v7819_v4, 0.0 }
 0x82b   : > { %v7822_v55 = vpop.f32.mrf.mxu1  ;;  %v15871_v7 = vpop.f32.mrf.mxu0  ;;  %8558 = vmatmul.mubr.bf16.gmra.mxu0 %v8061_v33  ;;  %v12539_v33 = vld [vmem:[%s13280_s27 + $0xa8] sm:$0xff]  }
 0x82c   : > { %v7823_v34 = vadd.f32 %v7822_v55, %v15637_v10  ;;  %v7987_v63 = vmax.f32 %v7821_v13, 0.0 }
 0x82d   : > { %v7826_v57 = vpop.f32.mrf.mxu1  ;;  %v15873_v41 = vpop.f32.mrf.mxu0  ;;  %9123 = vmatmul.mubr.bf16.gmra.mxu1 %v12534_v36 }
 0x82e   : > { %v7988_v26 = vmax.f32 %v7823_v34, 0.0  ;;  %9132 = vmatprep.mubr.bf16.mxu1 %v17023_v24  ;;  %v8063_v49 = vpack.c.bf16 %v7987_v63, %v7985_v54  ;;  %v7827_v8 = vadd.f32 %v7826_v57, %v15640_v23 }
 0x82f   : > { %v7828_v1 = vpop.f32.mrf.mxu1  ;;  %v15876_v21 = vpop.f32.mrf.mxu0 }
 0x830   : > { %v8064_v46 = vpack.c.bf16 %v7988_v26, %v7986_v31  ;;  %v7829_v45 = vadd.f32 %v7828_v1, %v15637_v10  ;;  %v7989_v15 = vmax.f32 %v7827_v8, 0.0  ;;  %v12540_v8 = vld [vmem:[%s13280_s27 + $0xb0] sm:$0xff]  }
 0x831   : > { %v7830_v62 = vpop.f32.mrf.mxu1  ;;  %v15878_v39 = vpop.f32.mrf.mxu0 }
 0x832   : > { %8567 = vmatprep.mubr.bf16.mxu0 %v8064_v46  ;;  %v7831_v17 = vadd.f32 %v7830_v62, %v15640_v23  ;;  %v7990_v35 = vmax.f32 %v7829_v45, 0.0 }
 0x833   : > { %v7832_v2 = vpop.f32.mrf.mxu1  ;;  %v15884_v29 = vpop.f32.mrf.mxu0  ;;  %8568 = vmatmul.mubr.bf16.gmra.mxu0 %v8063_v49 }
 0x834   : > { %v7833_v47 = vadd.f32 %v7832_v2, %v15637_v10  ;;  %v7991_v32 = vmax.f32 %v7831_v17, 0.0 }
 0x835   : > { %v7836_v16 = vpop.f32.mrf.mxu1  ;;  %v15887_v60 = vpop.f32.mrf.mxu0  ;;  %9133 = vmatmul.mubr.bf16.gmra.mxu1 %v12536_v19 }
 0x836   : > { %v7992_v42 = vmax.f32 %v7833_v47, 0.0  ;;  %9142 = vmatprep.mubr.bf16.mxu1 %v17023_v24  ;;  %v8065_v25 = vpack.c.bf16 %v7991_v32, %v7989_v15  ;;  %v7837_v51 = vadd.f32 %v7836_v16, %v15640_v23 }
 0x837   : > { %v7838_v43 = vpop.f32.mrf.mxu1  ;;  %v15890_v3 = vpop.f32.mrf.mxu0 }
 0x838   : > { %v8066_v12 = vpack.c.bf16 %v7992_v42, %v7990_v35  ;;  %v7839_v59 = vadd.f32 %v7838_v43, %v15637_v10  ;;  %v7993_v53 = vmax.f32 %v7837_v51, 0.0 }
 0x839   : > { %v7840_v5 = vpop.f32.mrf.mxu1  ;;  %v15892_v27 = vpop.f32.mrf.mxu0 }
 0x83a   : > { %v7841_v38 = vadd.f32 %v7840_v5, %v15640_v23  ;;  %8577 = vmatprep.mubr.bf16.mxu0 %v8066_v12  ;;  %v7994_v28 = vmax.f32 %v7839_v59, 0.0 }
 0x83b   : > { %v7842_v37 = vpop.f32.mrf.mxu1  ;;  %v15898_v30 = vpop.f32.mrf.mxu0  ;;  %8578 = vmatmul.mubr.bf16.gmra.mxu0 %v8065_v25 }
 0x83c   : > { %v7843_v48 = vadd.f32 %v7842_v37, %v15637_v10  ;;  %v7995_v20 = vmax.f32 %v7841_v38, 0.0 }
 0x83d   : > { %v7846_v14 = vpop.f32.mrf.mxu1  ;;  %v15901_v61 = vpop.f32.mrf.mxu0  ;;  %9143 = vmatmul.mubr.bf16.gmra.mxu1 %v12537_v52 }
 0x83e   : > { %v7996_v6 = vmax.f32 %v7843_v48, 0.0  ;;  %9152 = vmatprep.mubr.bf16.mxu1 %v17023_v24  ;;  %v8067_v50 = vpack.c.bf16 %v7995_v20, %v7993_v53  ;;  %v7847_v36 = vadd.f32 %v7846_v14, %v15640_v23  ;;  %v12542_v14 = vld [vmem:[%s13280_s27 + $0xb8] sm:$0xff]  }
 0x83f   : > { %v7848_v44 = vpop.f32.mrf.mxu1  ;;  %v15907_v40 = vpop.f32.mrf.mxu0 }
 0x840   : > { %v8068_v22 = vpack.c.bf16 %v7996_v6, %v7994_v28  ;;  %v7849_v4 = vadd.f32 %v7848_v44, %v15637_v10  ;;  %v7997_v1 = vmax.f32 %v7847_v36, 0.0 }
 0x841   : > { %v7850_v18 = vpop.f32.mrf.mxu1  ;;  %v15909_v0 = vpop.f32.mrf.mxu0 }
 0x842   : > { %v7851_v13 = vadd.f32 %v7850_v18, %v15640_v23  ;;  %8587 = vmatprep.mubr.bf16.mxu0 %v8068_v22  ;;  %v7998_v57 = vmax.f32 %v7849_v4, 0.0 }
 0x843   : > { %v7852_v55 = vpop.f32.mrf.mxu1  ;;  %v15915_v11 = vpop.f32.mrf.mxu0  ;;  %8588 = vmatmul.mubr.bf16.gmra.mxu0 %v8067_v50 }
 0x844   : > { %v7853_v34 = vadd.f32 %v7852_v55, %v15637_v10  ;;  %v7999_v31 = vmax.f32 %v7851_v13, 0.0 }
 0x845   : > { %v7856_v63 = vpop.f32.mrf.mxu1  ;;  %v15918_v26 = vpop.f32.mrf.mxu0  ;;  %9153 = vmatmul.mubr.bf16.gmra.mxu1 %v12539_v33 }
 0x846   : > { %v8000_v54 = vmax.f32 %v7853_v34, 0.0  ;;  %9162 = vmatprep.mubr.bf16.mxu1 %v17023_v24  ;;  %v8069_v19 = vpack.c.bf16 %v7999_v31, %v7997_v1  ;;  %v7857_v32 = vadd.f32 %v7856_v63, %v15640_v23  ;;  %v9263_v1 = vld [vmem:[%s16821_s10] sm:$0x3] }
 0x847   : > { %v7858_v46 = vpop.f32.mrf.mxu1  ;;  %v15921_v49 = vpop.f32.mrf.mxu0 }
 0x848   : > { %v8070_v62 = vpack.c.bf16 %v8000_v54, %v7998_v57  ;;  %v7859_v2 = vadd.f32 %v7858_v46, %v15637_v10  ;;  %v8001_v52 = vmax.f32 %v7857_v32, 0.0  ;;  %v12543_v46 = vld [vmem:[%s13280_s27 + $0xc0] sm:$0xff]   ;;  %v15964_v32 = vrot.slane %v9263_v1, %v13337_v56  ;;  %v12553_v56 = vld [vmem:[%s16824_s13 + $0x30] sm:$0xff]  }
 0x849   : > { %v7860_v45 = vpop.f32.mrf.mxu1  ;;  %v15923_v17 = vpop.f32.mrf.mxu0  ;;  %11864 = vmatprep.subr.bf16.mxu1 %v12553_v56 }
 0x84a   : > { %v7861_v47 = vadd.f32 %v7860_v45, %v15640_v23  ;;  %8597 = vmatprep.mubr.bf16.mxu0 %v8070_v62  ;;  %v8002_v25 = vmax.f32 %v7859_v2, 0.0  ;;  %11865 = vmatpush3.bf16.msra.mxu1 %v12553_v56 }
 0x84b   : > { %v7862_v16 = vpop.f32.mrf.mxu1  ;;  %v15929_v35 = vpop.f32.mrf.mxu0  ;;  %8598 = vmatmul.mubr.bf16.gmra.mxu0 %v8069_v19 }
 0x84c   : > { %v7863_v42 = vadd.f32 %v7862_v16, %v15637_v10  ;;  %v8003_v15 = vmax.f32 %v7861_v47, 0.0 }
 0x84d   : > { %v7866_v43 = vpop.f32.mrf.mxu1  ;;  %v15932_v12 = vpop.f32.mrf.mxu0  ;;  %9163 = vmatmul.mubr.bf16.gmra.mxu1 %v12540_v8 }
 0x84e   : > { %v8004_v5 = vmax.f32 %v7863_v42, 0.0  ;;  %9172 = vmatprep.mubr.bf16.mxu1 %v17023_v24  ;;  %v8071_v37 = vpack.c.bf16 %v8003_v15, %v8001_v52  ;;  %v7867_v9 = vadd.f32 %v7866_v43, %v15640_v23 }
 0x84f   : > { %v7868_v59 = vpop.f32.mrf.mxu1  ;;  %v15935_v38 = vpop.f32.mrf.mxu0 }
 0x850   : > { %v8072_v51 = vpack.c.bf16 %v8004_v5, %v8002_v25  ;;  %v7869_v28 = vadd.f32 %v7868_v59, %v15637_v10  ;;  %v8005_v36 = vmax.f32 %v7867_v9, 0.0  ;;  %v15971_v5 = vrot.slane %v9263_v1, %v13342_v58 }
 0x851   : > { %v7870_v48 = vpop.f32.mrf.mxu1  ;;  %v15937_v20 = vpop.f32.mrf.mxu0 }
 0x852   : > { %v7871_v6 = vadd.f32 %v7870_v48, %v15640_v23  ;;  %8607 = vmatprep.mubr.bf16.mxu0 %v8072_v51  ;;  %v8006_v4 = vmax.f32 %v7869_v28, 0.0  ;;  %v12545_v28 = vld [vmem:[%s13280_s27 + $0xc8] sm:$0xff]  }
 0x853   : > { %v7872_v53 = vpop.f32.mrf.mxu1  ;;  %v15943_v44 = vpop.f32.mrf.mxu0  ;;  %8608 = vmatmul.mubr.bf16.gmra.mxu0 %v8071_v37 }
 0x854   : > { %v7873_v22 = vadd.f32 %v7872_v53, %v15637_v10  ;;  %v8007_v50 = vmax.f32 %v7871_v6, 0.0 }
 0x855   : > { %v7876_v18 = vpop.f32.mrf.mxu1  ;;  %v15946_v33 = vpop.f32.mrf.mxu0  ;;  %9173 = vmatmul.mubr.bf16.gmra.mxu1 %v12542_v14 }
 0x856   : > { %v8008_v13 = vmax.f32 %v7873_v22, 0.0  ;;  %9182 = vmatprep.mubr.bf16.mxu1 %v17023_v24  ;;  %v8073_v63 = vpack.c.bf16 %v8007_v50, %v8005_v36  ;;  %v7877_v45 = vadd.f32 %v7876_v18, %v15640_v23 }
 0x857   : > { %v7878_v55 = vpop.f32.mrf.mxu1  ;;  %v15949_v34 = vpop.f32.mrf.mxu0 }
 0x858   : > { %v8074_v31 = vpack.c.bf16 %v8008_v13, %v8006_v4  ;;  %v7879_v62 = vadd.f32 %v7878_v55, %v15637_v10 }
 0x859   : > { %v7880_v57 = vpop.f32.mrf.mxu1  ;;  %v15951_v54 = vpop.f32.mrf.mxu0 }
 0x85a   : > { %v7881_v19 = vadd.f32 %v7880_v57, %v15640_v23  ;;  %8617 = vmatprep.mubr.bf16.mxu0 %v8074_v31  ;;  %v8010_v43 = vmax.f32 %v7879_v62, 0.0 }
 0x85b   : > { %v7882_v8 = vpop.f32.mrf.mxu1  ;;  %v15960_v2 = vpop.f32.mrf.mxu0  ;;  %8618 = vmatmul.mubr.bf16.gmra.mxu0 %v8073_v63 }
 0x85c   : > { %v7883_v47 = vadd.f32 %v7882_v8, %v15637_v10  ;;  %v8011_v16 = vmax.f32 %v7881_v19, 0.0  ;;  %v8009_v10 = vmax.f32 %v7877_v45, 0.0  ;;  %v12546_v45 = vld [vmem:[%s13280_s27 + $0xd0] sm:$0xff]  }
 0x85d   : > { %v15966_v42 = vpop.f32.mrf.mxu0  ;;  %v8944_v15 = vpop.f32.mrf.mxu1  ;;  %9183 = vmatmul.mubr.bf16.gmra.mxu1 %v12543_v46 }
 0x85e   : > { %v8012_v25 = vmax.f32 %v7883_v47, 0.0  ;;  %v8945_v23 = vadd.f32 %v8944_v15, %v15871_v7  ;;  %9192 = vmatprep.mubr.bf16.mxu1 %v17023_v24  ;;  %v8075_v7 = vpack.c.bf16 %v8011_v16, %v8009_v10 }
 0x85f   : > { %v15977_v52 = vpop.f32.mrf.mxu0  ;;  %v8946_v59 = vpop.f32.mrf.mxu1 }
 0x860   : > { %v9275_v51 = vadd.f32 %v15964_v32, %v8945_v23  ;;  %v8947_v37 = vadd.f32 %v8946_v59, %v15873_v41  ;;  %v8076_v48 = vpack.c.bf16 %v8012_v25, %v8010_v43 }
 0x861   : > { %v15986_v58 = vpop.f32.mrf.mxu0  ;;  %v8948_v14 = vpop.f32.mrf.mxu1 }
 0x862   : > { %v9403_v6 = vmax.f32 %v9275_v51, 0.0  ;;  %v9276_v9 = vadd.f32 %v15971_v5, %v8947_v37  ;;  %v8949_v41 = vadd.f32 %v8948_v14, %v15876_v21  ;;  %8627 = vmatprep.mubr.bf16.mxu0 %v8076_v48 }
 0x863   : > { %v15991_v53 = vpop.f32.mrf.mxu0  ;;  %8628 = vmatmul.mubr.bf16.gmra.mxu0 %v8075_v7  ;;  %v8950_v22 = vpop.f32.mrf.mxu1 }
 0x864   : > { %9531 = vst [vmem:[%s15984_s17] sm:$0xff] %v9403_v6  ;;  %v9404_v50 = vmax.f32 %v9276_v9, 0.0  ;;  %v9277_v18 = vadd.f32 %v15964_v32, %v8949_v41  ;;  %v8951_v4 = vadd.f32 %v8950_v22, %v15878_v39  ;;  %v12547_v41 = vld [vmem:[%s13280_s27 + $0xd8] sm:$0xff]  }
 0x865   : > { %v15996_v13 = vpop.f32.mrf.mxu0  ;;  %v8954_v36 = vpop.f32.mrf.mxu1  ;;  %9193 = vmatmul.mubr.bf16.gmra.mxu1 %v12545_v28 }
 0x866   : > { %9532 = vst [vmem:[%s15984_s17 + $0x8] sm:$0xff] %v9404_v50  ;;  %v9405_v21 = vmax.f32 %v9277_v18, 0.0  ;;  %v9278_v55 = vadd.f32 %v15971_v5, %v8951_v4  ;;  %v8955_v31 = vadd.f32 %v8954_v36, %v15884_v29  ;;  %9202 = vmatprep.mubr.bf16.mxu1 %v17023_v24 }
 0x867   : > { %v16002_v63 = vpop.f32.mrf.mxu0  ;;  %v8956_v57 = vpop.f32.mrf.mxu1 }
 0x868   : > { %9533 = vst [vmem:[%s15984_s17 + $0x18] sm:$0xff] %v9405_v21  ;;  %v9406_v39 = vmax.f32 %v9278_v55, 0.0  ;;  %v9279_v1 = vadd.f32 %v15964_v32, %v8955_v31  ;;  %v8957_v46 = vadd.f32 %v8956_v57, %v15887_v60  ;;  %v9659_v15 = vpack.c.bf16 %v9405_v21, %v9403_v6 }
 0x869   : > { %v16007_v62 = vpop.f32.mrf.mxu0  ;;  %v8958_v19 = vpop.f32.mrf.mxu1 }
 0x86a   : > { %9534 = vst [vmem:[%s15984_s17 + $0x20] sm:$0xff] %v9406_v39  ;;  %v9407_v8 = vmax.f32 %v9279_v1, 0.0  ;;  %v9280_v29 = vadd.f32 %v15971_v5, %v8957_v46  ;;  %v8959_v47 = vadd.f32 %v8958_v19, %v15890_v3  ;;  %v9660_v16 = vpack.c.bf16 %v9406_v39, %v9404_v50 }
 0x86b   : > { %v16013_v43 = vpop.f32.mrf.mxu0  ;;  %v8960_v25 = vpop.f32.mrf.mxu1 }
 0x86c   : > { %9535 = vst [vmem:[%s15984_s17 + $0x30] sm:$0xff] %v9407_v8  ;;  %v9408_v23 = vmax.f32 %v9280_v29, 0.0  ;;  %v9281_v60 = vadd.f32 %v15964_v32, %v8959_v47  ;;  %v8961_v56 = vadd.f32 %v8960_v25, %v15892_v27  ;;  %9890 = vmatprep.mubr.bf16.mxu0 %v9660_v16 }
 0x86d   : > { %v16018_v10 = vpop.f32.mrf.mxu0  ;;  %v8964_v59 = vpop.f32.mrf.mxu1  ;;  %9203 = vmatmul.mubr.bf16.gmra.mxu1 %v12546_v45  ;;  %9891 = vmatmul.mubr.bf16.vlgmr.msra.gmra.mxu0 %v9659_v15  ;;  %v12548_v15 = vld [vmem:[%s13280_s27 + $0xe0] sm:$0xff]  }
 0x86e   : > { %9536 = vst [vmem:[%s15984_s17 + $0x38] sm:$0xff] %v9408_v23  ;;  %v9409_v3 = vmax.f32 %v9281_v60, 0.0  ;;  %v9282_v51 = vadd.f32 %v15971_v5, %v8961_v56  ;;  %v8965_v37 = vadd.f32 %v8964_v59, %v15898_v30  ;;  %9212 = vmatprep.mubr.bf16.mxu1 %v17023_v24 }
 0x86f   : > { %v16024_v48 = vpop.f32.mrf.mxu0  ;;  %v8966_v7 = vpop.f32.mrf.mxu1 }
 0x870   : > { %9537 = vst [vmem:[%s15984_s17 + $0x48] sm:$0xff] %v9409_v3  ;;  %v9410_v27 = vmax.f32 %v9282_v51, 0.0  ;;  %v9283_v14 = vadd.f32 %v15964_v32, %v8965_v37  ;;  %v8967_v28 = vadd.f32 %v8966_v7, %v15901_v61  ;;  %v9661_v4 = vpack.c.bf16 %v9409_v3, %v9407_v8 }
 0x871   : > { %v16029_v6 = vpop.f32.mrf.mxu0  ;;  %v8968_v9 = vpop.f32.mrf.mxu1 }
 0x872   : > { %9538 = vst [vmem:[%s15984_s17 + $0x50] sm:$0xff] %v9410_v27  ;;  %v9411_v22 = vmax.f32 %v9283_v14, 0.0  ;;  %v9284_v30 = vadd.f32 %v15971_v5, %v8967_v28  ;;  %v8969_v50 = vadd.f32 %v8968_v9, %v15907_v40  ;;  %v9662_v18 = vpack.c.bf16 %v9410_v27, %v9408_v23 }
 0x873   : > { %v16035_v36 = vpop.f32.mrf.mxu0  ;;  %v8970_v21 = vpop.f32.mrf.mxu1 }
 0x874   : > { %9539 = vst [vmem:[%s15984_s17 + $0x60] sm:$0xff] %v9411_v22  ;;  %v9412_v55 = vmax.f32 %v9284_v30, 0.0  ;;  %v9285_v61 = vadd.f32 %v15964_v32, %v8969_v50  ;;  %v8971_v31 = vadd.f32 %v8970_v21, %v15909_v0  ;;  %9898 = vmatprep.mubr.bf16.mxu0 %v9662_v18 }
 0x875   : > { %v16040_v57 = vpop.f32.mrf.mxu0  ;;  %v8974_v39 = vpop.f32.mrf.mxu1  ;;  %9213 = vmatmul.mubr.bf16.gmra.mxu1 %v12547_v41  ;;  %9899 = vmatmul.mubr.bf16.gmra.mxu0 %v9661_v4  ;;  %v12549_v4 = vld [vmem:[%s13280_s27 + $0xe8] sm:$0xff]  }
 0x876   : > { %9540 = vst [vmem:[%s15984_s17 + $0x68] sm:$0xff] %v9412_v55  ;;  %v9413_v40 = vmax.f32 %v9285_v61, 0.0  ;;  %v9286_v1 = vadd.f32 %v15971_v5, %v8971_v31  ;;  %v8975_v46 = vadd.f32 %v8974_v39, %v15915_v11  ;;  %9222 = vmatprep.mubr.bf16.mxu1 %v17023_v24 }
 0x877   : > { %v16046_v19 = vpop.f32.mrf.mxu0  ;;  %v8976_v45 = vpop.f32.mrf.mxu1 }
 0x878   : > { %9541 = vst [vmem:[%s15984_s17 + $0x78] sm:$0xff] %v9413_v40  ;;  %v9414_v0 = vmax.f32 %v9286_v1, 0.0  ;;  %v9287_v8 = vadd.f32 %v15964_v32, %v8975_v46  ;;  %v8977_v29 = vadd.f32 %v8976_v45, %v15918_v26  ;;  %v9663_v56 = vpack.c.bf16 %v9413_v40, %v9411_v22 }
 0x879   : > { %v16051_v47 = vpop.f32.mrf.mxu0  ;;  %v8978_v16 = vpop.f32.mrf.mxu1 }
 0x87a   : > { %9542 = vst [vmem:[%s15984_s17 + $0x80] sm:$0xff] %v9414_v0  ;;  %v9415_v25 = vmax.f32 %v9287_v8, 0.0  ;;  %v9288_v11 = vadd.f32 %v15971_v5, %v8977_v29  ;;  %v8979_v23 = vadd.f32 %v8978_v16, %v15921_v49  ;;  %v9664_v60 = vpack.c.bf16 %v9414_v0, %v9412_v55 }
 0x87b   : > { %v16057_v59 = vpop.f32.mrf.mxu0  ;;  %v8980_v3 = vpop.f32.mrf.mxu1 }
 0x87c   : > { %9543 = vst [vmem:[%s15984_s17 + $0x90] sm:$0xff] %v9415_v25  ;;  %v9416_v51 = vmax.f32 %v9288_v11, 0.0  ;;  %v9289_v26 = vadd.f32 %v15964_v32, %v8979_v23  ;;  %v8981_v37 = vadd.f32 %v8980_v3, %v15923_v17  ;;  %9906 = vmatprep.mubr.bf16.mxu0 %v9664_v60  ;;  %v12554_v17 = vld [vmem:[%s16824_s13 + $0x28] sm:$0xff]   ;;  %v12550_v3 = vld [vmem:[%s13280_s27 + $0xf0] sm:$0xff]  }
 0x87d   : > { %v16062_v7 = vpop.f32.mrf.mxu0  ;;  %v8984_v27 = vpop.f32.mrf.mxu1  ;;  %9223 = vmatmul.mubr.bf16.gmra.mxu1 %v12548_v15  ;;  %9907 = vmatmul.mubr.bf16.gmra.mxu0 %v9663_v56 }
 0x87e   : > { %9544 = vst [vmem:[%s15984_s17 + $0x98] sm:$0xff] %v9416_v51  ;;  %v9417_v49 = vmax.f32 %v9289_v26, 0.0  ;;  %v9290_v14 = vadd.f32 %v15971_v5, %v8981_v37  ;;  %v8985_v28 = vadd.f32 %v8984_v27, %v15929_v35  ;;  %9232 = vmatprep.mubr.bf16.mxu1 %v17023_v24  ;;  %11866 = vmatprep.subr.bf16.mxu1 %v12554_v17 }
 0x87f   : > { %v16071_v9 = vpop.f32.mrf.mxu0  ;;  %v8986_v41 = vpop.f32.mrf.mxu1  ;;  %11867 = vmatpush3.bf16.msra.mxu1 %v12554_v17 }
 0x880   : > { %9545 = vst [vmem:[%s15984_s17 + $0xa8] sm:$0xff] %v9417_v49  ;;  %v9418_v22 = vmax.f32 %v9290_v14, 0.0  ;;  %v9291_v30 = vadd.f32 %v15964_v32, %v8985_v28  ;;  %v8987_v50 = vadd.f32 %v8986_v41, %v15932_v12  ;;  %v9665_v39 = vpack.c.bf16 %v9417_v49, %v9415_v25 }
 0x881   : > { %v16076_v18 = vpop.f32.mrf.mxu0  ;;  %v8988_v35 = vpop.f32.mrf.mxu1 }
 0x882   : > { %9546 = vst [vmem:[%s15984_s17 + $0xb0] sm:$0xff] %v9418_v22  ;;  %v9419_v21 = vmax.f32 %v9291_v30, 0.0  ;;  %v9292_v55 = vadd.f32 %v15971_v5, %v8987_v50  ;;  %v8989_v61 = vadd.f32 %v8988_v35, %v15935_v38  ;;  %v9666_v31 = vpack.c.bf16 %v9418_v22, %v9416_v51 }
 0x883   : > { %v16082_v40 = vpop.f32.mrf.mxu0  ;;  %v8990_v1 = vpop.f32.mrf.mxu1 }
 0x884   : > { %9547 = vst [vmem:[%s15984_s17 + $0xc0] sm:$0xff] %v9419_v21  ;;  %v9420_v12 = vmax.f32 %v9292_v55, 0.0  ;;  %v9293_v46 = vadd.f32 %v15964_v32, %v8989_v61  ;;  %v8991_v45 = vadd.f32 %v8990_v1, %v15937_v20  ;;  %9914 = vmatprep.mubr.bf16.mxu0 %v9666_v31 }
 0x885   : > { %v16087_v0 = vpop.f32.mrf.mxu0  ;;  %v8994_v8 = vpop.f32.mrf.mxu1  ;;  %9233 = vmatmul.mubr.bf16.gmra.mxu1 %v12549_v4  ;;  %9915 = vmatmul.mubr.bf16.gmra.mxu0 %v9665_v39  ;;  %v12551_v39 = vld [vmem:[%s13280_s27 + $0xf8] sm:$0xff]  }
 0x886   : > { %9548 = vst [vmem:[%s15984_s17 + $0xc8] sm:$0xff] %v9420_v12  ;;  %v9421_v38 = vmax.f32 %v9293_v46, 0.0  ;;  %v9294_v29 = vadd.f32 %v15971_v5, %v8991_v45  ;;  %v8995_v16 = vadd.f32 %v8994_v8, %v15943_v44  ;;  %9242 = vmatprep.mubr.bf16.mxu1 %v17023_v24 }
 0x887   : > { %v16093_v15 = vpop.f32.mrf.mxu0  ;;  %v8996_v25 = vpop.f32.mrf.mxu1 }
 0x888   : > { %9549 = vst [vmem:[%s15984_s17 + $0xd8] sm:$0xff] %v9421_v38  ;;  %v9422_v20 = vmax.f32 %v9294_v29, 0.0  ;;  %v9295_v11 = vadd.f32 %v15964_v32, %v8995_v16  ;;  %v8997_v23 = vadd.f32 %v8996_v25, %v15946_v33  ;;  %v9667_v27 = vpack.c.bf16 %v9421_v38, %v9419_v21 }
 0x889   : > { %v16098_v60 = vpop.f32.mrf.mxu0  ;;  %v8998_v56 = vpop.f32.mrf.mxu1 }
 0x88a   : > { %9550 = vst [vmem:[%s15984_s17 + $0xe0] sm:$0xff] %v9422_v20  ;;  %v9423_v51 = vmax.f32 %v9295_v11, 0.0  ;;  %v9296_v44 = vadd.f32 %v15971_v5, %v8997_v23  ;;  %v8999_v26 = vadd.f32 %v8998_v56, %v15949_v34  ;;  %v9668_v37 = vpack.c.bf16 %v9422_v20, %v9420_v12 }
 0x88b   : > { %v16104_v49 = vpop.f32.mrf.mxu0  ;;  %v9000_v14 = vpop.f32.mrf.mxu1 }
 0x88c   : > { %9551 = vst [vmem:[%s15984_s17 + $0xf0] sm:$0xff] %v9423_v51  ;;  %v9424_v28 = vmax.f32 %v9296_v44, 0.0  ;;  %v9297_v33 = vadd.f32 %v15964_v32, %v8999_v26  ;;  %v9001_v17 = vadd.f32 %v9000_v14, %v15951_v54  ;;  %9922 = vmatprep.mubr.bf16.mxu0 %v9668_v37 }
 0x88d   : > { %v16109_v41 = vpop.f32.mrf.mxu0  ;;  %v9004_v22 = vpop.f32.mrf.mxu1  ;;  %9243 = vmatmul.mubr.bf16.gmra.mxu1 %v12550_v3  ;;  %9923 = vmatmul.mubr.bf16.gmra.mxu0 %v9667_v27 }
 0x88e   : > { %9552 = vst [vmem:[%s15984_s17 + $0xf8] sm:$0xff] %v9424_v28  ;;  %v9425_v34 = vmax.f32 %v9297_v33, 0.0  ;;  %v9298_v30 = vadd.f32 %v15971_v5, %v9001_v17  ;;  %v9005_v50 = vadd.f32 %v9004_v22, %v15960_v2  ;;  %9252 = vmatprep.mubr.bf16.mxu1 %v17023_v24 }
 0x88f   : > { %v16115_v35 = vpop.f32.mrf.mxu0  ;;  %v9006_v4 = vpop.f32.mrf.mxu1 }
 0x890   : > { %9553 = vst [vmem:[%s15984_s17 + $0x108] sm:$0xff] %v9425_v34  ;;  %v9426_v54 = vmax.f32 %v9298_v30, 0.0  ;;  %v9299_v21 = vadd.f32 %v15964_v32, %v9005_v50  ;;  %v9007_v55 = vadd.f32 %v9006_v4, %v15966_v42  ;;  %v9669_v46 = vpack.c.bf16 %v9425_v34, %v9423_v51 }
 0x891   : > { %v16120_v61 = vpop.f32.mrf.mxu0  ;;  %v9008_v31 = vpop.f32.mrf.mxu1 }
 0x892   : > { %9554 = vst [vmem:[%s15984_s17 + $0x110] sm:$0xff] %v9426_v54  ;;  %v9427_v1 = vmax.f32 %v9299_v21, 0.0  ;;  %v9300_v2 = vadd.f32 %v15971_v5, %v9007_v55  ;;  %v9009_v24 = vadd.f32 %v9008_v31, %v15977_v52  ;;  %v9670_v12 = vpack.c.bf16 %v9426_v54, %v9424_v28  ;;  %v12555_v21 = vld [vmem:[%s16824_s13 + $0x20] sm:$0xff]  }
 0x893   : > { %v16126_v45 = vpop.f32.mrf.mxu0  ;;  %v9010_v8 = vpop.f32.mrf.mxu1  ;;  %11868 = vmatprep.subr.bf16.mxu1 %v12555_v21 }
 0x894   : > { %9555 = vst [vmem:[%s15984_s17 + $0x120] sm:$0xff] %v9427_v1  ;;  %v9428_v38 = vmax.f32 %v9300_v2, 0.0  ;;  %v9301_v42 = vadd.f32 %v15964_v32, %v9009_v24  ;;  %v9011_v29 = vadd.f32 %v9010_v8, %v15986_v58  ;;  %9930 = vmatprep.mubr.bf16.mxu0 %v9670_v12  ;;  %11869 = vmatpush3.bf16.msra.mxu1 %v12555_v21 }
 0x895   : > { %v16131_v16 = vpop.f32.mrf.mxu0  ;;  %v9014_v25 = vpop.f32.mrf.mxu1  ;;  %9253 = vmatmul.mubr.bf16.gmra.mxu1 %v12551_v39  ;;  %9931 = vmatmul.mubr.bf16.gmra.mxu0 %v9669_v46 }
 0x896   : > { %9556 = vst [vmem:[%s15984_s17 + $0x128] sm:$0xff] %v9428_v38  ;;  %v9429_v52 = vmax.f32 %v9301_v42, 0.0  ;;  %v9302_v20 = vadd.f32 %v15971_v5, %v9011_v29  ;;  %v9015_v11 = vadd.f32 %v9014_v25, %v15991_v53 }
 0x897   : > { %v16136_v23 = vpop.f32.mrf.mxu0  ;;  %v9016_v56 = vpop.f32.mrf.mxu1 }
 0x898   : > { %9557 = vst [vmem:[%s15984_s17 + $0x138] sm:$0xff] %v9429_v52  ;;  %v9430_v3 = vmax.f32 %v9302_v20, 0.0  ;;  %v9303_v58 = vadd.f32 %v15964_v32, %v9015_v11  ;;  %v9017_v51 = vadd.f32 %v9016_v56, %v15996_v13  ;;  %v9671_v28 = vpack.c.bf16 %v9429_v52, %v9427_v1 }
 0x899   : > { %v16141_v44 = vpop.f32.mrf.mxu0  ;;  %v9018_v26 = vpop.f32.mrf.mxu1 }
 0x89a   : > { %9558 = vst [vmem:[%s15984_s17 + $0x140] sm:$0xff] %v9430_v3  ;;  %v9431_v37 = vmax.f32 %v9303_v58, 0.0  ;;  %v9304_v27 = vadd.f32 %v15971_v5, %v9017_v51  ;;  %v9019_v53 = vadd.f32 %v9018_v26, %v16002_v63  ;;  %v9672_v14 = vpack.c.bf16 %v9430_v3, %v9428_v38 }
 0x89b   : > { %v16146_v33 = vpop.f32.mrf.mxu0  ;;  %v9020_v17 = vpop.f32.mrf.mxu1 }
 0x89c   : > { %9559 = vst [vmem:[%s15984_s17 + $0x150] sm:$0xff] %v9431_v37  ;;  %v9432_v22 = vmax.f32 %v9304_v27, 0.0  ;;  %v9305_v13 = vadd.f32 %v15964_v32, %v9019_v53  ;;  %v9021_v34 = vadd.f32 %v9020_v17, %v16007_v62  ;;  %9938 = vmatprep.mubr.bf16.mxu0 %v9672_v14 }
 0x89d   : > { %v16151_v30 = vpop.f32.mrf.mxu0  ;;  %v9024_v50 = vpop.f32.mrf.mxu1  ;;  %9939 = vmatmul.mubr.bf16.gmra.mxu0 %v9671_v28 }
 0x89e   : > { %9560 = vst [vmem:[%s15984_s17 + $0x158] sm:$0xff] %v9432_v22  ;;  %v9433_v63 = vmax.f32 %v9305_v13, 0.0  ;;  %v9306_v4 = vadd.f32 %v15971_v5, %v9021_v34  ;;  %v9025_v54 = vadd.f32 %v9024_v50, %v16013_v43 }
 0x89f   : > { %v16159_v55 = vpop.f32.mrf.mxu0  ;;  %v9026_v31 = vpop.f32.mrf.mxu1 }
 0x8a0   : > { %9561 = vst [vmem:[%s15984_s17 + $0x168] sm:$0xff] %v9433_v63  ;;  %v9434_v62 = vmax.f32 %v9306_v4, 0.0  ;;  %v9307_v39 = vadd.f32 %v15964_v32, %v9025_v54  ;;  %v9027_v1 = vadd.f32 %v9026_v31, %v16018_v10  ;;  %v9673_v38 = vpack.c.bf16 %v9433_v63, %v9431_v37 }
 0x8a1   : > { %v16164_v2 = vpop.f32.mrf.mxu0  ;;  %v9028_v24 = vpop.f32.mrf.mxu1 }
 0x8a2   : > { %9562 = vst [vmem:[%s15984_s17 + $0x170] sm:$0xff] %v9434_v62  ;;  %v9435_v43 = vmax.f32 %v9307_v39, 0.0  ;;  %v9308_v12 = vadd.f32 %v15971_v5, %v9027_v1  ;;  %v9029_v46 = vadd.f32 %v9028_v24, %v16024_v48  ;;  %v9674_v8 = vpack.c.bf16 %v9434_v62, %v9432_v22  ;;  %v12556_v1 = vld [vmem:[%s16824_s13 + $0x18] sm:$0xff]  }
 0x8a3   : > { %v16169_v42 = vpop.f32.mrf.mxu0  ;;  %v9030_v29 = vpop.f32.mrf.mxu1  ;;  %11870 = vmatprep.subr.bf16.mxu1 %v12556_v1 }
 0x8a4   : > { %9563 = vst [vmem:[%s15984_s17 + $0x180] sm:$0xff] %v9435_v43  ;;  %v9436_v10 = vmax.f32 %v9308_v12, 0.0  ;;  %v9309_v25 = vadd.f32 %v15964_v32, %v9029_v46  ;;  %v9031_v52 = vadd.f32 %v9030_v29, %v16029_v6  ;;  %9946 = vmatprep.mubr.bf16.mxu0 %v9674_v8  ;;  %11871 = vmatpush3.bf16.msra.mxu1 %v12556_v1 }
 0x8a5   : > { %v16174_v20 = vpop.f32.mrf.mxu0  ;;  %v9034_v11 = vpop.f32.mrf.mxu1  ;;  %9947 = vmatmul.mubr.bf16.gmra.mxu0 %v9673_v38 }
 0x8a6   : > { %9564 = vst [vmem:[%s15984_s17 + $0x188] sm:$0xff] %v9436_v10  ;;  %v9437_v48 = vmax.f32 %v9309_v25, 0.0  ;;  %v9310_v56 = vadd.f32 %v15971_v5, %v9031_v52  ;;  %v9035_v3 = vadd.f32 %v9034_v11, %v16035_v36 }
 0x8a7   : > { %v16179_v58 = vpop.f32.mrf.mxu0  ;;  %v9036_v51 = vpop.f32.mrf.mxu1 }
 0x8a8   : > { %9565 = vst [vmem:[%s15984_s17 + $0x198] sm:$0xff] %v9437_v48  ;;  %v9438_v26 = vmax.f32 %v9310_v56, 0.0  ;;  %v9311_v6 = vadd.f32 %v15964_v32, %v9035_v3  ;;  %v9037_v37 = vadd.f32 %v9036_v51, %v16040_v57  ;;  %v9675_v22 = vpack.c.bf16 %v9437_v48, %v9435_v43 }
 0x8a9   : > { %v16184_v27 = vpop.f32.mrf.mxu0  ;;  %v9038_v53 = vpop.f32.mrf.mxu1 }
 0x8aa   : > { %9566 = vst [vmem:[%s15984_s17 + $0x1a0] sm:$0xff] %v9438_v26  ;;  %v9439_v14 = vmax.f32 %v9311_v6, 0.0  ;;  %v9312_v28 = vadd.f32 %v15971_v5, %v9037_v37  ;;  %v9039_v36 = vadd.f32 %v9038_v53, %v16046_v19  ;;  %v9676_v17 = vpack.c.bf16 %v9438_v26, %v9436_v10 }
 0x8ab   : > { %v16189_v13 = vpop.f32.mrf.mxu0  ;;  %v9040_v34 = vpop.f32.mrf.mxu1 }
 0x8ac   : > { %9567 = vst [vmem:[%s15984_s17 + $0x1b0] sm:$0xff] %v9439_v14  ;;  %v9440_v50 = vmax.f32 %v9312_v28, 0.0  ;;  %v9313_v57 = vadd.f32 %v15964_v32, %v9039_v36  ;;  %v9041_v63 = vadd.f32 %v9040_v34, %v16051_v47  ;;  %9954 = vmatprep.mubr.bf16.mxu0 %v9676_v17 }
 0x8ad   : > { %v16194_v4 = vpop.f32.mrf.mxu0  ;;  %v9044_v54 = vpop.f32.mrf.mxu1  ;;  %9955 = vmatmul.mubr.bf16.gmra.mxu0 %v9675_v22 }
 0x8ae   : > { %9568 = vst [vmem:[%s15984_s17 + $0x1b8] sm:$0xff] %v9440_v50  ;;  %v9441_v19 = vmax.f32 %v9313_v57, 0.0  ;;  %v9314_v21 = vadd.f32 %v15971_v5, %v9041_v63  ;;  %v9045_v31 = vadd.f32 %v9044_v54, %v16057_v59 }
 0x8af   : > { %v16199_v62 = vpop.f32.mrf.mxu0  ;;  %v9046_v39 = vpop.f32.mrf.mxu1 }
 0x8b0   : > { %9569 = vst [vmem:[%s15984_s17 + $0x1c8] sm:$0xff] %v9441_v19  ;;  %v9442_v47 = vmax.f32 %v9314_v21, 0.0  ;;  %v9315_v24 = vadd.f32 %v15964_v32, %v9045_v31  ;;  %v9047_v43 = vadd.f32 %v9046_v39, %v16062_v7  ;;  %v9677_v10 = vpack.c.bf16 %v9441_v19, %v9439_v14  ;;  %v12557_v7 = vld [vmem:[%s16824_s13 + $0x10] sm:$0xff]  }
 0x8b1   : > { %v16207_v12 = vpop.f32.mrf.mxu0  ;;  %v9048_v46 = vpop.f32.mrf.mxu1  ;;  %11872 = vmatprep.subr.bf16.mxu1 %v12557_v7 }
 0x8b2   : > { %9570 = vst [vmem:[%s15984_s17 + $0x1d0] sm:$0xff] %v9442_v47  ;;  %v9443_v59 = vmax.f32 %v9315_v24, 0.0  ;;  %v9316_v8 = vadd.f32 %v15971_v5, %v9047_v43  ;;  %v9049_v38 = vadd.f32 %v9048_v46, %v16071_v9  ;;  %v9678_v29 = vpack.c.bf16 %v9442_v47, %v9440_v50  ;;  %11873 = vmatpush3.bf16.msra.mxu1 %v12557_v7 }
 0x8b3   : > { %v16212_v25 = vpop.f32.mrf.mxu0  ;;  %v9050_v52 = vpop.f32.mrf.mxu1 }
 0x8b4   : > { %9571 = vst [vmem:[%s15984_s17 + $0x1e0] sm:$0xff] %v9443_v59  ;;  %v9444_v11 = vmax.f32 %v9316_v8, 0.0  ;;  %v9317_v48 = vadd.f32 %v15964_v32, %v9049_v38  ;;  %v9051_v56 = vadd.f32 %v9050_v52, %v16076_v18  ;;  %9962 = vmatprep.mubr.bf16.mxu0 %v9678_v29  ;;  %v12558_v18 = vld [vmem:[%s16824_s13 + $0x8] sm:$0xff]  }
 0x8b5   : > { %v16220_v9 = vpop.f32.mrf.mxu0  ;;  %v9054_v3 = vpop.f32.mrf.mxu1  ;;  %9963 = vmatmul.mubr.bf16.gmra.mxu0 %v9677_v10  ;;  %11874 = vmatprep.subr.bf16.mxu1 %v12558_v18 }
 0x8b6   : > { %9572 = vst [vmem:[%s15984_s17 + $0x1e8] sm:$0xff] %v9444_v11  ;;  %v9445_v51 = vmax.f32 %v9317_v48, 0.0  ;;  %v9318_v26 = vadd.f32 %v15971_v5, %v9051_v56  ;;  %v9055_v6 = vadd.f32 %v9054_v3, %v16082_v40  ;;  %11875 = vmatpush3.bf16.msra.mxu1 %v12558_v18 }
 0x8b7   : > { %v16225_v37 = vpop.f32.mrf.mxu0  ;;  %v9056_v53 = vpop.f32.mrf.mxu1 }
 0x8b8   : > { %9573 = vst [vmem:[%s15984_s17 + $0x1f8] sm:$0xff] %v9445_v51  ;;  %v9446_v14 = vmax.f32 %v9318_v26, 0.0  ;;  %v9319_v28 = vadd.f32 %v15964_v32, %v9055_v6  ;;  %v9057_v36 = vadd.f32 %v9056_v53, %v16087_v0  ;;  %v9679_v63 = vpack.c.bf16 %v9445_v51, %v9443_v59  ;;  %v12559_v0 = vld [vmem:[%s16824_s13] sm:$0xff]  }
 0x8b9   : > { %v16233_v17 = vpop.f32.mrf.mxu0  ;;  %v9058_v22 = vpop.f32.mrf.mxu1  ;;  %11876 = vmatprep.subr.bf16.mxu1 %v12559_v0 }
 0x8ba   : > { %9574 = vst [vmem:[%s15984_s17 + $0x200] sm:$0xff] %v9446_v14  ;;  %v9447_v40 = vmax.f32 %v9319_v28, 0.0  ;;  %v9320_v34 = vadd.f32 %v15971_v5, %v9057_v36  ;;  %v9059_v50 = vadd.f32 %v9058_v22, %v16093_v15  ;;  %v9680_v57 = vpack.c.bf16 %v9446_v14, %v9444_v11  ;;  %11877 = vmatpush3.bf16.msra.mxu1 %v12559_v0 }
 0x8bb   : > { %v16238_v54 = vpop.f32.mrf.mxu0  ;;  %v9060_v19 = vpop.f32.mrf.mxu1 }
 0x8bc   : > { %9575 = vst [vmem:[%s15984_s17 + $0x210] sm:$0xff] %v9447_v40  ;;  %v9448_v21 = vmax.f32 %v9320_v34, 0.0  ;;  %v9321_v31 = vadd.f32 %v15964_v32, %v9059_v50  ;;  %v9061_v39 = vadd.f32 %v9060_v19, %v16098_v60  ;;  %9970 = vmatprep.mubr.bf16.mxu0 %v9680_v57 }
 0x8bd   : > { %v16246_v15 = vpop.f32.mrf.mxu0  ;;  %v9064_v1 = vpop.f32.mrf.mxu1  ;;  %9971 = vmatmul.mubr.bf16.gmra.mxu0 %v9679_v63 }
 0x8be   : > { %9576 = vst [vmem:[%s15984_s17 + $0x218] sm:$0xff] %v9448_v21  ;;  %v9449_v47 = vmax.f32 %v9321_v31, 0.0  ;;  %v9322_v24 = vadd.f32 %v15971_v5, %v9061_v39  ;;  %v9065_v43 = vadd.f32 %v9064_v1, %v16104_v49 }
 0x8bf   : > { %v16251_v46 = vpop.f32.mrf.mxu0  ;;  %v9066_v59 = vpop.f32.mrf.mxu1 }
 0x8c0   : > { %9577 = vst [vmem:[%s15984_s17 + $0x228] sm:$0xff] %v9449_v47  ;;  %v9450_v60 = vmax.f32 %v9322_v24, 0.0  ;;  %v9323_v8 = vadd.f32 %v15964_v32, %v9065_v43  ;;  %v9067_v38 = vadd.f32 %v9066_v59, %v16109_v41  ;;  %v9681_v48 = vpack.c.bf16 %v9449_v47, %v9447_v40 }
 0x8c1   : > { %v16256_v29 = vpop.f32.mrf.mxu0  ;;  %v9068_v10 = vpop.f32.mrf.mxu1 }
 0x8c2   : > { %9578 = vst [vmem:[%s15984_s17 + $0x230] sm:$0xff] %v9450_v60  ;;  %v9451_v52 = vmax.f32 %v9323_v8, 0.0  ;;  %v9324_v7 = vadd.f32 %v15971_v5, %v9067_v38  ;;  %v9069_v49 = vadd.f32 %v9068_v10, %v16115_v35  ;;  %v9682_v11 = vpack.c.bf16 %v9450_v60, %v9448_v21 }
 0x8c3   : > { %v16261_v56 = vpop.f32.mrf.mxu0  ;;  %v9070_v3 = vpop.f32.mrf.mxu1 }
 0x8c4   : > { %9579 = vst [vmem:[%s15984_s17 + $0x240] sm:$0xff] %v9451_v52  ;;  %v9452_v51 = vmax.f32 %v9324_v7, 0.0  ;;  %v9325_v41 = vadd.f32 %v15964_v32, %v9069_v49  ;;  %v9071_v26 = vadd.f32 %v9070_v3, %v16120_v61  ;;  %9978 = vmatprep.mubr.bf16.mxu0 %v9682_v11 }
 0x8c5   : > { %v16266_v6 = vpop.f32.mrf.mxu0  ;;  %v9074_v53 = vpop.f32.mrf.mxu1  ;;  %9979 = vmatmul.mubr.bf16.gmra.mxu0 %v9681_v48 }
 0x8c6   : > { %9580 = vst [vmem:[%s15984_s17 + $0x248] sm:$0xff] %v9452_v51  ;;  %v9453_v35 = vmax.f32 %v9325_v41, 0.0  ;;  %v9326_v18 = vadd.f32 %v15971_v5, %v9071_v26  ;;  %v9075_v14 = vadd.f32 %v9074_v53, %v16126_v45 }
 0x8c7   : > { %v16271_v28 = vpop.f32.mrf.mxu0  ;;  %v9076_v36 = vpop.f32.mrf.mxu1 }
 0x8c8   : > { %9581 = vst [vmem:[%s15984_s17 + $0x258] sm:$0xff] %v9453_v35  ;;  %v9454_v22 = vmax.f32 %v9326_v18, 0.0  ;;  %v9327_v61 = vadd.f32 %v15964_v32, %v9075_v14  ;;  %v9077_v40 = vadd.f32 %v9076_v36, %v16131_v16  ;;  %v9683_v0 = vpack.c.bf16 %v9453_v35, %v9451_v52 }
 0x8c9   : > { %v16276_v34 = vpop.f32.mrf.mxu0  ;;  %v9078_v50 = vpop.f32.mrf.mxu1 }
 0x8ca   : > { %9582 = vst [vmem:[%s15984_s17 + $0x260] sm:$0xff] %v9454_v22  ;;  %v9455_v57 = vmax.f32 %v9327_v61, 0.0  ;;  %v9328_v63 = vadd.f32 %v15971_v5, %v9077_v40  ;;  %v9079_v45 = vadd.f32 %v9078_v50, %v16136_v23  ;;  %v9684_v19 = vpack.c.bf16 %v9454_v22, %v9452_v51 }
 0x8cb   : > { %v16281_v21 = vpop.f32.mrf.mxu0  ;;  %v9080_v31 = vpop.f32.mrf.mxu1 }
 0x8cc   : > { %9583 = vst [vmem:[%s15984_s17 + $0x270] sm:$0xff] %v9455_v57  ;;  %v9456_v39 = vmax.f32 %v9328_v63, 0.0  ;;  %v9329_v16 = vadd.f32 %v15964_v32, %v9079_v45  ;;  %v9081_v1 = vadd.f32 %v9080_v31, %v16141_v44  ;;  %9986 = vmatprep.mubr.bf16.mxu0 %v9684_v19 }
 0x8cd   : > { %v16286_v47 = vpop.f32.mrf.mxu0  ;;  %v9084_v24 = vpop.f32.mrf.mxu1  ;;  %9987 = vmatmul.mubr.bf16.gmra.mxu0 %v9683_v0 }
 0x8ce   : > { %9584 = vst [vmem:[%s15984_s17 + $0x278] sm:$0xff] %v9456_v39  ;;  %v9457_v23 = vmax.f32 %v9329_v16, 0.0  ;;  %v9330_v43 = vadd.f32 %v15971_v5, %v9081_v1  ;;  %v9085_v59 = vadd.f32 %v9084_v24, %v16146_v33 }
 0x8cf   : > { %v16291_v60 = vpop.f32.mrf.mxu0  ;;  %v9086_v8 = vpop.f32.mrf.mxu1 }
 0x8d0   : > { %9585 = vst [vmem:[%s15984_s17 + $0x288] sm:$0xff] %v9457_v23  ;;  %v9458_v38 = vmax.f32 %v9330_v43, 0.0  ;;  %v9331_v44 = vadd.f32 %v15964_v32, %v9085_v59  ;;  %v9087_v10 = vadd.f32 %v9086_v8, %v16151_v30  ;;  %v9685_v3 = vpack.c.bf16 %v9457_v23, %v9455_v57 }
 0x8d1   : > { %v16296_v52 = vpop.f32.mrf.mxu0  ;;  %v9088_v7 = vpop.f32.mrf.mxu1 }
 0x8d2   : > { %9586 = vst [vmem:[%s15984_s17 + $0x290] sm:$0xff] %v9458_v38  ;;  %v9459_v49 = vmax.f32 %v9331_v44, 0.0  ;;  %v9332_v11 = vadd.f32 %v15971_v5, %v9087_v10  ;;  %v9089_v33 = vadd.f32 %v9088_v7, %v16159_v55  ;;  %v9686_v48 = vpack.c.bf16 %v9458_v38, %v9456_v39 }
 0x8d3   : > { %v16301_v51 = vpop.f32.mrf.mxu0  ;;  %v9090_v41 = vpop.f32.mrf.mxu1 }
 0x8d4   : > { %9587 = vst [vmem:[%s15984_s17 + $0x2a0] sm:$0xff] %v9459_v49  ;;  %v9460_v26 = vmax.f32 %v9332_v11, 0.0  ;;  %v9333_v30 = vadd.f32 %v15964_v32, %v9089_v33  ;;  %v9091_v53 = vadd.f32 %v9090_v41, %v16164_v2  ;;  %9994 = vmatprep.mubr.bf16.mxu0 %v9686_v48 }
 0x8d5   : > { %v16306_v35 = vpop.f32.mrf.mxu0  ;;  %v9094_v18 = vpop.f32.mrf.mxu1  ;;  %9995 = vmatmul.mubr.bf16.gmra.mxu0 %v9685_v3 }
 0x8d6   : > { %9588 = vst [vmem:[%s15984_s17 + $0x2a8] sm:$0xff] %v9460_v26  ;;  %v9461_v55 = vmax.f32 %v9333_v30, 0.0  ;;  %v9334_v14 = vadd.f32 %v15971_v5, %v9091_v53  ;;  %v9095_v36 = vadd.f32 %v9094_v18, %v16169_v42 }
 0x8d7   : > { %v16311_v22 = vpop.f32.mrf.mxu0  ;;  %v9096_v61 = vpop.f32.mrf.mxu1 }
 0x8d8   : > { %9589 = vst [vmem:[%s15984_s17 + $0x2b8] sm:$0xff] %v9461_v55  ;;  %v9462_v40 = vmax.f32 %v9334_v14, 0.0  ;;  %v9335_v2 = vadd.f32 %v15964_v32, %v9095_v36  ;;  %v9097_v50 = vadd.f32 %v9096_v61, %v16174_v20  ;;  %v9687_v31 = vpack.c.bf16 %v9461_v55, %v9459_v49 }
 0x8d9   : > { %v16316_v57 = vpop.f32.mrf.mxu0  ;;  %v9098_v63 = vpop.f32.mrf.mxu1 }
 0x8da   : > { %9590 = vst [vmem:[%s15984_s17 + $0x2c0] sm:$0xff] %v9462_v40  ;;  %v9463_v45 = vmax.f32 %v9335_v2, 0.0  ;;  %v9336_v19 = vadd.f32 %v15971_v5, %v9097_v50  ;;  %v9099_v42 = vadd.f32 %v9098_v63, %v16179_v58  ;;  %v9688_v0 = vpack.c.bf16 %v9462_v40, %v9460_v26 }
 0x8db   : > { %v16321_v39 = vpop.f32.mrf.mxu0  ;;  %v9100_v16 = vpop.f32.mrf.mxu1 }
 0x8dc   : > { %9591 = vst [vmem:[%s15984_s17 + $0x2d0] sm:$0xff] %v9463_v45  ;;  %v9464_v1 = vmax.f32 %v9336_v19, 0.0  ;;  %v9337_v20 = vadd.f32 %v15964_v32, %v9099_v42  ;;  %v9101_v24 = vadd.f32 %v9100_v16, %v16184_v27  ;;  %10002 = vmatprep.mubr.bf16.mxu0 %v9688_v0 }
 0x8dd   : > { %v16326_v23 = vpop.f32.mrf.mxu0  ;;  %v9104_v43 = vpop.f32.mrf.mxu1  ;;  %10003 = vmatmul.mubr.bf16.gmra.mxu0 %v9687_v31 }
 0x8de   : > { %9592 = vst [vmem:[%s15984_s17 + $0x2d8] sm:$0xff] %v9464_v1  ;;  %v9465_v58 = vmax.f32 %v9337_v20, 0.0  ;;  %v9338_v59 = vadd.f32 %v15971_v5, %v9101_v24  ;;  %v9105_v8 = vadd.f32 %v9104_v43, %v16189_v13 }
 0x8df   : > { %v16331_v38 = vpop.f32.mrf.mxu0  ;;  %v9106_v44 = vpop.f32.mrf.mxu1 }
 0x8e0   : > { %9593 = vst [vmem:[%s15984_s17 + $0x2e8] sm:$0xff] %v9465_v58  ;;  %v9466_v10 = vmax.f32 %v9338_v59, 0.0  ;;  %v9339_v27 = vadd.f32 %v15964_v32, %v9105_v8  ;;  %v9107_v7 = vadd.f32 %v9106_v44, %v16194_v4  ;;  %v9689_v41 = vpack.c.bf16 %v9465_v58, %v9463_v45 }
 0x8e1   : > { %v16336_v49 = vpop.f32.mrf.mxu0  ;;  %v9108_v11 = vpop.f32.mrf.mxu1 }
 0x8e2   : > { %9594 = vst [vmem:[%s15984_s17 + $0x2f0] sm:$0xff] %v9466_v10  ;;  %v9467_v33 = vmax.f32 %v9339_v27, 0.0  ;;  %v9340_v48 = vadd.f32 %v15971_v5, %v9107_v7  ;;  %v9109_v13 = vadd.f32 %v9108_v11, %v16199_v62  ;;  %v9690_v3 = vpack.c.bf16 %v9466_v10, %v9464_v1 }
 0x8e3   : > { %v16341_v26 = vpop.f32.mrf.mxu0  ;;  %v9110_v30 = vpop.f32.mrf.mxu1 }
 0x8e4   : > { %9595 = vst [vmem:[%s15984_s17 + $0x300] sm:$0xff] %v9467_v33  ;;  %v9468_v53 = vmax.f32 %v9340_v48, 0.0  ;;  %v9341_v4 = vadd.f32 %v15964_v32, %v9109_v13  ;;  %v9111_v18 = vadd.f32 %v9110_v30, %v16207_v12  ;;  %10010 = vmatprep.mubr.bf16.mxu0 %v9690_v3 }
 0x8e5   : > { %v16346_v55 = vpop.f32.mrf.mxu0  ;;  %v9114_v14 = vpop.f32.mrf.mxu1  ;;  %10011 = vmatmul.mubr.bf16.gmra.mxu0 %v9689_v41 }
 0x8e6   : > { %9596 = vst [vmem:[%s15984_s17 + $0x308] sm:$0xff] %v9468_v53  ;;  %v9469_v62 = vmax.f32 %v9341_v4, 0.0  ;;  %v9342_v36 = vadd.f32 %v15971_v5, %v9111_v18  ;;  %v9115_v61 = vadd.f32 %v9114_v14, %v16212_v25 }
 0x8e7   : > { %v16351_v40 = vpop.f32.mrf.mxu0  ;;  %v9116_v2 = vpop.f32.mrf.mxu1 }
 0x8e8   : > { %9597 = vst [vmem:[%s15984_s17 + $0x318] sm:$0xff] %v9469_v62  ;;  %v9470_v50 = vmax.f32 %v9342_v36, 0.0  ;;  %v9343_v12 = vadd.f32 %v15964_v32, %v9115_v61  ;;  %v9117_v63 = vadd.f32 %v9116_v2, %v16220_v9  ;;  %v9691_v16 = vpack.c.bf16 %v9469_v62, %v9467_v33 }
 0x8e9   : > { %v16356_v45 = vpop.f32.mrf.mxu0  ;;  %v9118_v19 = vpop.f32.mrf.mxu1 }
 0x8ea   : > { %9598 = vst [vmem:[%s15984_s17 + $0x320] sm:$0xff] %v9470_v50  ;;  %v9471_v42 = vmax.f32 %v9343_v12, 0.0  ;;  %v9344_v0 = vadd.f32 %v15971_v5, %v9117_v63  ;;  %v9119_v25 = vadd.f32 %v9118_v19, %v16225_v37  ;;  %v9692_v31 = vpack.c.bf16 %v9470_v50, %v9468_v53 }
 0x8eb   : > { %v16361_v1 = vpop.f32.mrf.mxu0  ;;  %v9120_v20 = vpop.f32.mrf.mxu1 }
 0x8ec   : > { %9599 = vst [vmem:[%s15984_s17 + $0x330] sm:$0xff] %v9471_v42  ;;  %v9472_v24 = vmax.f32 %v9344_v0, 0.0  ;;  %v9345_v9 = vadd.f32 %v15964_v32, %v9119_v25  ;;  %v9121_v43 = vadd.f32 %v9120_v20, %v16233_v17  ;;  %10018 = vmatprep.mubr.bf16.mxu0 %v9692_v31 }
 0x8ed   : > { %v16366_v58 = vpop.f32.mrf.mxu0  ;;  %v9124_v59 = vpop.f32.mrf.mxu1  ;;  %10019 = vmatmul.mubr.bf16.gmra.mxu0 %v9691_v16 }
 0x8ee   : > { %9600 = vst [vmem:[%s15984_s17 + $0x338] sm:$0xff] %v9472_v24  ;;  %v9473_v37 = vmax.f32 %v9345_v9, 0.0  ;;  %v9346_v8 = vadd.f32 %v15971_v5, %v9121_v43  ;;  %v9125_v44 = vadd.f32 %v9124_v59, %v16238_v54 }
 0x8ef   : > { %v16371_v10 = vpop.f32.mrf.mxu0  ;;  %v9126_v27 = vpop.f32.mrf.mxu1 }
 0x8f0   : > { %9601 = vst [vmem:[%s15984_s17 + $0x348] sm:$0xff] %v9473_v37  ;;  %v9474_v7 = vmax.f32 %v9346_v8, 0.0  ;;  %v9347_v17 = vadd.f32 %v15964_v32, %v9125_v44  ;;  %v9127_v11 = vadd.f32 %v9126_v27, %v16246_v15  ;;  %v9693_v30 = vpack.c.bf16 %v9473_v37, %v9471_v42 }
 0x8f1   : > { %v16376_v33 = vpop.f32.mrf.mxu0  ;;  %v9128_v48 = vpop.f32.mrf.mxu1 }
 0x8f2   : > { %9602 = vst [vmem:[%s15984_s17 + $0x350] sm:$0xff] %v9474_v7  ;;  %v9475_v13 = vmax.f32 %v9347_v17, 0.0  ;;  %v9348_v3 = vadd.f32 %v15971_v5, %v9127_v11  ;;  %v9129_v54 = vadd.f32 %v9128_v48, %v16251_v46  ;;  %v9694_v41 = vpack.c.bf16 %v9474_v7, %v9472_v24 }
 0x8f3   : > { %v16381_v53 = vpop.f32.mrf.mxu0  ;;  %v9130_v4 = vpop.f32.mrf.mxu1 }
 0x8f4   : > { %9603 = vst [vmem:[%s15984_s17 + $0x360] sm:$0xff] %v9475_v13  ;;  %v9476_v18 = vmax.f32 %v9348_v3, 0.0  ;;  %v9349_v15 = vadd.f32 %v15964_v32, %v9129_v54  ;;  %v9131_v14 = vadd.f32 %v9130_v4, %v16256_v29  ;;  %10026 = vmatprep.mubr.bf16.mxu0 %v9694_v41 }
 0x8f5   : > { %v16386_v62 = vpop.f32.mrf.mxu0  ;;  %v9134_v36 = vpop.f32.mrf.mxu1  ;;  %10027 = vmatmul.mubr.bf16.gmra.mxu0 %v9693_v30 }
 0x8f6   : > { %9604 = vst [vmem:[%s15984_s17 + $0x368] sm:$0xff] %v9476_v18  ;;  %v9477_v46 = vmax.f32 %v9349_v15, 0.0  ;;  %v9350_v61 = vadd.f32 %v15971_v5, %v9131_v14  ;;  %v9135_v2 = vadd.f32 %v9134_v36, %v16261_v56 }
 0x8f7   : > { %v16391_v50 = vpop.f32.mrf.mxu0  ;;  %v9136_v12 = vpop.f32.mrf.mxu1 }
 0x8f8   : > { %9605 = vst [vmem:[%s15984_s17 + $0x378] sm:$0xff] %v9477_v46  ;;  %v9478_v63 = vmax.f32 %v9350_v61, 0.0  ;;  %v9351_v29 = vadd.f32 %v15964_v32, %v9135_v2  ;;  %v9137_v19 = vadd.f32 %v9136_v12, %v16266_v6  ;;  %v9695_v20 = vpack.c.bf16 %v9477_v46, %v9475_v13 }
 0x8f9   : > { %v16396_v42 = vpop.f32.mrf.mxu0  ;;  %v9138_v0 = vpop.f32.mrf.mxu1 }
 0x8fa   : > { %9606 = vst [vmem:[%s15984_s17 + $0x380] sm:$0xff] %v9478_v63  ;;  %v9479_v25 = vmax.f32 %v9351_v29, 0.0  ;;  %v9352_v31 = vadd.f32 %v15971_v5, %v9137_v19  ;;  %v9139_v56 = vadd.f32 %v9138_v0, %v16271_v28  ;;  %v9696_v16 = vpack.c.bf16 %v9478_v63, %v9476_v18 }
 0x8fb   : > { %v16401_v24 = vpop.f32.mrf.mxu0  ;;  %v9140_v9 = vpop.f32.mrf.mxu1 }
 0x8fc   : > { %9607 = vst [vmem:[%s15984_s17 + $0x390] sm:$0xff] %v9479_v25  ;;  %v9480_v43 = vmax.f32 %v9352_v31, 0.0  ;;  %v9353_v6 = vadd.f32 %v15964_v32, %v9139_v56  ;;  %v9141_v59 = vadd.f32 %v9140_v9, %v16276_v34  ;;  %10034 = vmatprep.mubr.bf16.mxu0 %v9696_v16 }
 0x8fd   : > { %v16406_v37 = vpop.f32.mrf.mxu0  ;;  %v9144_v8 = vpop.f32.mrf.mxu1  ;;  %10035 = vmatmul.mubr.bf16.gmra.mxu0 %v9695_v20 }
 0x8fe   : > { %9608 = vst [vmem:[%s15984_s17 + $0x398] sm:$0xff] %v9480_v43  ;;  %v9481_v28 = vmax.f32 %v9353_v6, 0.0  ;;  %v9354_v44 = vadd.f32 %v15971_v5, %v9141_v59  ;;  %v9145_v27 = vadd.f32 %v9144_v8, %v16281_v21 }
 0x8ff   : > { %v16411_v7 = vpop.f32.mrf.mxu0  ;;  %v9146_v17 = vpop.f32.mrf.mxu1 }
 0x900   : > { %9609 = vst [vmem:[%s15984_s17 + $0x3a8] sm:$0xff] %v9481_v28  ;;  %v9482_v11 = vmax.f32 %v9354_v44, 0.0  ;;  %v9355_v34 = vadd.f32 %v15964_v32, %v9145_v27  ;;  %v9147_v48 = vadd.f32 %v9146_v17, %v16286_v47  ;;  %v9697_v4 = vpack.c.bf16 %v9481_v28, %v9479_v25 }
 0x901   : > { %v16416_v13 = vpop.f32.mrf.mxu0  ;;  %v9148_v3 = vpop.f32.mrf.mxu1 }
 0x902   : > { %9610 = vst [vmem:[%s15984_s17 + $0x3b0] sm:$0xff] %v9482_v11  ;;  %v9483_v54 = vmax.f32 %v9355_v34, 0.0  ;;  %v9356_v41 = vadd.f32 %v15971_v5, %v9147_v48  ;;  %v9149_v21 = vadd.f32 %v9148_v3, %v16291_v60  ;;  %v9698_v30 = vpack.c.bf16 %v9482_v11, %v9480_v43 }
 0x903   : > { %v16421_v18 = vpop.f32.mrf.mxu0  ;;  %v9150_v15 = vpop.f32.mrf.mxu1 }
 0x904   : > { %9611 = vst [vmem:[%s15984_s17 + $0x3c0] sm:$0xff] %v9483_v54  ;;  %v9484_v14 = vmax.f32 %v9356_v41, 0.0  ;;  %v9357_v47 = vadd.f32 %v15964_v32, %v9149_v21  ;;  %v9151_v36 = vadd.f32 %v9150_v15, %v16296_v52  ;;  %10042 = vmatprep.mubr.bf16.mxu0 %v9698_v30 }
 0x905   : > { %v16426_v46 = vpop.f32.mrf.mxu0  ;;  %v9154_v61 = vpop.f32.mrf.mxu1  ;;  %10043 = vmatmul.mubr.bf16.gmra.mxu0 %v9697_v4 }
 0x906   : > { %9612 = vst [vmem:[%s15984_s17 + $0x3c8] sm:$0xff] %v9484_v14  ;;  %v9485_v60 = vmax.f32 %v9357_v47, 0.0  ;;  %v9358_v2 = vadd.f32 %v15971_v5, %v9151_v36  ;;  %v9155_v12 = vadd.f32 %v9154_v61, %v16301_v51 }
 0x907   : > { %v16431_v63 = vpop.f32.mrf.mxu0  ;;  %v9156_v29 = vpop.f32.mrf.mxu1 }
 0x908   : > { %9613 = vst [vmem:[%s15984_s17 + $0x3d8] sm:$0xff] %v9485_v60  ;;  %v9486_v19 = vmax.f32 %v9358_v2, 0.0  ;;  %v9359_v52 = vadd.f32 %v15964_v32, %v9155_v12  ;;  %v9157_v0 = vadd.f32 %v9156_v29, %v16306_v35  ;;  %v9699_v9 = vpack.c.bf16 %v9485_v60, %v9483_v54 }
 0x909   : > { %v16436_v25 = vpop.f32.mrf.mxu0  ;;  %v9158_v31 = vpop.f32.mrf.mxu1 }
 0x90a   : > { %9614 = vst [vmem:[%s15984_s17 + $0x3e0] sm:$0xff] %v9486_v19  ;;  %v9487_v56 = vmax.f32 %v9359_v52, 0.0  ;;  %v9360_v16 = vadd.f32 %v15971_v5, %v9157_v0  ;;  %v9159_v51 = vadd.f32 %v9158_v31, %v16311_v22  ;;  %v9700_v20 = vpack.c.bf16 %v9486_v19, %v9484_v14 }
 0x90b   : > { %v16441_v43 = vpop.f32.mrf.mxu0  ;;  %v9160_v6 = vpop.f32.mrf.mxu1 }
 0x90c   : > { %9615 = vst [vmem:[%s15984_s17 + $0x3f0] sm:$0xff] %v9487_v56  ;;  %v9488_v59 = vmax.f32 %v9360_v16, 0.0  ;;  %v9361_v35 = vadd.f32 %v15964_v32, %v9159_v51  ;;  %v9161_v8 = vadd.f32 %v9160_v6, %v16316_v57  ;;  %10050 = vmatprep.mubr.bf16.mxu0 %v9700_v20 }
 0x90d   : > { %v16446_v28 = vpop.f32.mrf.mxu0  ;;  %v9164_v44 = vpop.f32.mrf.mxu1  ;;  %10051 = vmatmul.mubr.bf16.gmra.mxu0 %v9699_v9 }
 0x90e   : > { %9616 = vst [vmem:[%s15984_s17 + $0x3f8] sm:$0xff] %v9488_v59  ;;  %v9489_v22 = vmax.f32 %v9361_v35, 0.0  ;;  %v9362_v27 = vadd.f32 %v15971_v5, %v9161_v8  ;;  %v9165_v17 = vadd.f32 %v9164_v44, %v16321_v39 }
 0x90f   : > { %v16451_v11 = vpop.f32.mrf.mxu0  ;;  %v9166_v34 = vpop.f32.mrf.mxu1 }
 0x910   : > { %9617 = vst [vmem:[%s15984_s17 + $0x408] sm:$0xff] %v9489_v22  ;;  %v9490_v48 = vmax.f32 %v9362_v27, 0.0  ;;  %v9363_v57 = vadd.f32 %v15964_v32, %v9165_v17  ;;  %v9167_v3 = vadd.f32 %v9166_v34, %v16326_v23  ;;  %v9701_v15 = vpack.c.bf16 %v9489_v22, %v9487_v56 }
 0x911   : > { %v16456_v54 = vpop.f32.mrf.mxu0  ;;  %v9168_v41 = vpop.f32.mrf.mxu1 }
 0x912   : > { %9618 = vst [vmem:[%s15984_s17 + $0x410] sm:$0xff] %v9490_v48  ;;  %v9491_v21 = vmax.f32 %v9363_v57, 0.0  ;;  %v9364_v30 = vadd.f32 %v15971_v5, %v9167_v3  ;;  %v9169_v39 = vadd.f32 %v9168_v41, %v16331_v38  ;;  %v9702_v4 = vpack.c.bf16 %v9490_v48, %v9488_v59 }
 0x913   : > { %v16461_v14 = vpop.f32.mrf.mxu0  ;;  %v9170_v47 = vpop.f32.mrf.mxu1 }
 0x914   : > { %9619 = vst [vmem:[%s15984_s17 + $0x420] sm:$0xff] %v9491_v21  ;;  %v9492_v36 = vmax.f32 %v9364_v30, 0.0  ;;  %v9365_v23 = vadd.f32 %v15964_v32, %v9169_v39  ;;  %v9171_v61 = vadd.f32 %v9170_v47, %v16336_v49  ;;  %10058 = vmatprep.mubr.bf16.mxu0 %v9702_v4 }
 0x915   : > { %v16466_v60 = vpop.f32.mrf.mxu0  ;;  %v9174_v2 = vpop.f32.mrf.mxu1  ;;  %10059 = vmatmul.mubr.bf16.gmra.mxu0 %v9701_v15 }
 0x916   : > { %9620 = vst [vmem:[%s15984_s17 + $0x428] sm:$0xff] %v9492_v36  ;;  %v9493_v38 = vmax.f32 %v9365_v23, 0.0  ;;  %v9366_v12 = vadd.f32 %v15971_v5, %v9171_v61  ;;  %v9175_v29 = vadd.f32 %v9174_v2, %v16341_v26 }
 0x917   : > { %v16471_v19 = vpop.f32.mrf.mxu0  ;;  %v9176_v52 = vpop.f32.mrf.mxu1 }
 0x918   : > { %9621 = vst [vmem:[%s15984_s17 + $0x438] sm:$0xff] %v9493_v38  ;;  %v9494_v0 = vmax.f32 %v9366_v12, 0.0  ;;  %v9367_v49 = vadd.f32 %v15964_v32, %v9175_v29  ;;  %v9177_v31 = vadd.f32 %v9176_v52, %v16346_v55  ;;  %v9703_v6 = vpack.c.bf16 %v9493_v38, %v9491_v21 }
 0x919   : > { %v16476_v56 = vpop.f32.mrf.mxu0  ;;  %v9178_v16 = vpop.f32.mrf.mxu1 }
 0x91a   : > { %9622 = vst [vmem:[%s15984_s17 + $0x440] sm:$0xff] %v9494_v0  ;;  %v9495_v51 = vmax.f32 %v9367_v49, 0.0  ;;  %v9368_v20 = vadd.f32 %v15971_v5, %v9177_v31  ;;  %v9179_v26 = vadd.f32 %v9178_v16, %v16351_v40  ;;  %v9704_v9 = vpack.c.bf16 %v9494_v0, %v9492_v36 }
 0x91b   : > { %v16481_v59 = vpop.f32.mrf.mxu0  ;;  %v9180_v35 = vpop.f32.mrf.mxu1 }
 0x91c   : > { %9623 = vst [vmem:[%s15984_s17 + $0x450] sm:$0xff] %v9495_v51  ;;  %v9496_v8 = vmax.f32 %v9368_v20, 0.0  ;;  %v9369_v55 = vadd.f32 %v15964_v32, %v9179_v26  ;;  %v9181_v44 = vadd.f32 %v9180_v35, %v16356_v45  ;;  %10066 = vmatprep.mubr.bf16.mxu0 %v9704_v9 }
 0x91d   : > { %v16486_v22 = vpop.f32.mrf.mxu0  ;;  %v9184_v27 = vpop.f32.mrf.mxu1  ;;  %10067 = vmatmul.mubr.bf16.gmra.mxu0 %v9703_v6 }
 0x91e   : > { %9624 = vst [vmem:[%s15984_s17 + $0x458] sm:$0xff] %v9496_v8  ;;  %v9497_v40 = vmax.f32 %v9369_v55, 0.0  ;;  %v9370_v17 = vadd.f32 %v15971_v5, %v9181_v44  ;;  %v9185_v34 = vadd.f32 %v9184_v27, %v16361_v1 }
 0x91f   : > { %v16491_v48 = vpop.f32.mrf.mxu0  ;;  %v9186_v57 = vpop.f32.mrf.mxu1 }
 0x920   : > { %9625 = vst [vmem:[%s15984_s17 + $0x468] sm:$0xff] %v9497_v40  ;;  %v9498_v3 = vmax.f32 %v9370_v17, 0.0  ;;  %v9371_v45 = vadd.f32 %v15964_v32, %v9185_v34  ;;  %v9187_v41 = vadd.f32 %v9186_v57, %v16366_v58  ;;  %v9705_v47 = vpack.c.bf16 %v9497_v40, %v9495_v51  ;;  %v16527_v40 = vld [vmem:[%s16823_s12] ss:$0 sm:$0xff] }
 0x921   : > { %v16496_v21 = vpop.f32.mrf.mxu0  ;;  %v9188_v30 = vpop.f32.mrf.mxu1 }
 0x922   : > { %9626 = vst [vmem:[%s15984_s17 + $0x470] sm:$0xff] %v9498_v3  ;;  %v9499_v39 = vmax.f32 %v9371_v45, 0.0  ;;  %v9372_v4 = vadd.f32 %v15971_v5, %v9187_v41  ;;  %v9189_v1 = vadd.f32 %v9188_v30, %v16371_v10  ;;  %v9706_v15 = vpack.c.bf16 %v9498_v3, %v9496_v8 }
 0x923   : > { %v16501_v36 = vpop.f32.mrf.mxu0  ;;  %v9190_v23 = vpop.f32.mrf.mxu1 }
 0x924   : > { %9627 = vst [vmem:[%s15984_s17 + $0x480] sm:$0xff] %v9499_v39  ;;  %v9500_v61 = vmax.f32 %v9372_v4, 0.0  ;;  %v9373_v58 = vadd.f32 %v15964_v32, %v9189_v1  ;;  %v9191_v2 = vadd.f32 %v9190_v23, %v16376_v33  ;;  %10074 = vmatprep.mubr.bf16.mxu0 %v9706_v15 }
 0x925   : > { %v16506_v38 = vpop.f32.mrf.mxu0  ;;  %v9194_v12 = vpop.f32.mrf.mxu1  ;;  %10075 = vmatmul.mubr.bf16.gmra.mxu0 %v9705_v47 }
 0x926   : > { %9628 = vst [vmem:[%s15984_s17 + $0x488] sm:$0xff] %v9500_v61  ;;  %v9501_v10 = vmax.f32 %v9373_v58, 0.0  ;;  %v9374_v29 = vadd.f32 %v15971_v5, %v9191_v2  ;;  %v9195_v52 = vadd.f32 %v9194_v12, %v16381_v53 }
 0x927   : > { %v16511_v0 = vpop.f32.mrf.mxu0  ;;  %v9196_v49 = vpop.f32.mrf.mxu1 }
 0x928   : > { %9629 = vst [vmem:[%s15984_s17 + $0x498] sm:$0xff] %v9501_v10  ;;  %v9502_v31 = vmax.f32 %v9374_v29, 0.0  ;;  %v9375_v33 = vadd.f32 %v15964_v32, %v9195_v52  ;;  %v9197_v16 = vadd.f32 %v9196_v49, %v16386_v62  ;;  %v9707_v53 = vpack.c.bf16 %v9501_v10, %v9499_v39 }
 0x929   : > { %v9198_v51 = vpop.f32.mrf.mxu1  ;;  %v16519_v35 = vpop.f32.mrf.mxu0 }
 0x92a   : > { %9630 = vst [vmem:[%s15984_s17 + $0x4a0] sm:$0xff] %v9502_v31  ;;  %v9503_v20 = vmax.f32 %v9375_v33, 0.0  ;;  %v9376_v26 = vadd.f32 %v15971_v5, %v9197_v16  ;;  %v9199_v9 = vadd.f32 %v9198_v51, %v16391_v50  ;;  %v9708_v6 = vpack.c.bf16 %v9502_v31, %v9500_v61 }
 0x92b   : > { %v9200_v8 = vpop.f32.mrf.mxu1 }
 0x92c   : > { %9631 = vst [vmem:[%s15984_s17 + $0x4b0] sm:$0xff] %v9503_v20  ;;  %v9504_v55 = vmax.f32 %v9376_v26, 0.0  ;;  %v9377_v44 = vadd.f32 %v15964_v32, %v9199_v9  ;;  %v9201_v62 = vadd.f32 %v9200_v8, %v16396_v42  ;;  %10082 = vmatprep.mubr.bf16.mxu0 %v9708_v6 }
 0x92d   : > { %v9204_v27 = vpop.f32.mrf.mxu1  ;;  %v9892_v50 = vpop.f32.mrf.mxu0  ;;  %10083 = vmatmul.mubr.bf16.gmra.mxu0 %v9707_v53 }
 0x92e   : > { %9632 = vst [vmem:[%s15984_s17 + $0x4b8] sm:$0xff] %v9504_v55  ;;  %v9505_v17 = vmax.f32 %v9377_v44, 0.0  ;;  %v9378_v34 = vadd.f32 %v15971_v5, %v9201_v62  ;;  %v9205_v57 = vadd.f32 %v9204_v27, %v16401_v24  ;;  %v9893_v30 = vadd.f32 %v16527_v40, %v9892_v50 }
 0x92f   : > { %v9206_v3 = vpop.f32.mrf.mxu1  ;;  %v9894_v45 = vpop.f32.mrf.mxu0 }
 0x930   : > { %9633 = vst [vmem:[%s15984_s17 + $0x4c8] sm:$0xff] %v9505_v17  ;;  %v9506_v42 = vmax.f32 %v9378_v34, 0.0  ;;  %v9379_v41 = vadd.f32 %v15964_v32, %v9205_v57  ;;  %v9207_v39 = vadd.f32 %v9206_v3, %v16406_v37  ;;  %v9709_v61 = vpack.c.bf16 %v9505_v17, %v9503_v20 }
 0x931   : > { %v9208_v4 = vpop.f32.mrf.mxu1  ;;  %v9895_v1 = vpop.f32.mrf.mxu0  ;;  %v10147_v10 = vmax.f32 %v9893_v30, 0.0 }
 0x932   : > { %9634 = vst [vmem:[%s15984_s17 + $0x4d0] sm:$0xff] %v9506_v42  ;;  %v9507_v15 = vmax.f32 %v9379_v41, 0.0  ;;  %v9209_v47 = vadd.f32 %v9208_v4, %v16411_v7  ;;  %v9896_v23 = vadd.f32 %v16527_v40, %v9895_v1  ;;  %v9710_v24 = vpack.c.bf16 %v9506_v42, %v9504_v55 }
 0x933   : > { %v9380_v58 = vadd.f32 %v15971_v5, %v9207_v39  ;;  %v9210_v2 = vpop.f32.mrf.mxu1  ;;  %v9897_v12 = vpop.f32.mrf.mxu0 }
 0x934   : > { %9635 = vst [vmem:[%s15984_s17 + $0x4e0] sm:$0xff] %v9507_v15  ;;  %v9381_v29 = vadd.f32 %v15964_v32, %v9209_v47  ;;  %v10148_v37 = vmax.f32 %v9896_v23, 0.0  ;;  %v9211_v52 = vadd.f32 %v9210_v2, %v16416_v13  ;;  %10090 = vmatprep.mubr.bf16.mxu0 %v9710_v24 }
 0x935   : > { %v9508_v49 = vmax.f32 %v9380_v58, 0.0  ;;  %v9214_v7 = vpop.f32.mrf.mxu1  ;;  %v9900_v31 = vpop.f32.mrf.mxu0  ;;  %10091 = vmatmul.mubr.bf16.gmra.mxu0 %v9709_v61 }
 0x936   : > { %v9509_v33 = vmax.f32 %v9381_v29, 0.0  ;;  %v10211_v16 = vpack.c.bf16 %v10148_v37, %v10147_v10  ;;  %v9382_v51 = vadd.f32 %v15971_v5, %v9211_v52  ;;  %v9215_v20 = vadd.f32 %v9214_v7, %v16421_v18 }
 0x937   : > { %9636 = vst [vmem:[%s15984_s17 + $0x4e8] sm:$0xff] %v9508_v49  ;;  %v9901_v26 = vadd.f32 %v16527_v40, %v9900_v31  ;;  %v9216_v9 = vpop.f32.mrf.mxu1  ;;  %v9902_v6 = vpop.f32.mrf.mxu0 }
 0x938   : > { %9637 = vst [vmem:[%s15984_s17 + $0x4f8] sm:$0xff] %v9509_v33  ;;  %v9510_v53 = vmax.f32 %v9382_v51, 0.0  ;;  %v9383_v13 = vadd.f32 %v15964_v32, %v9215_v20  ;;  %v9217_v8 = vadd.f32 %v9216_v9, %v16426_v46  ;;  %11878 = vmatprep.mubr.bf16.mxu1 %v10211_v16  ;;  %v9711_v17 = vpack.c.bf16 %v9509_v33, %v9507_v15 }
 0x939   : > { %v9218_v55 = vpop.f32.mrf.mxu1  ;;  %v9903_v44 = vpop.f32.mrf.mxu0  ;;  %v10149_v34 = vmax.f32 %v9901_v26, 0.0 }
 0x93a   : > { %9638 = vst [vmem:[%s15984_s17 + $0x500] sm:$0xff] %v9510_v53  ;;  %v9511_v62 = vmax.f32 %v9383_v13, 0.0  ;;  %v9384_v27 = vadd.f32 %v15971_v5, %v9217_v8  ;;  %v9219_v18 = vadd.f32 %v9218_v55, %v16431_v63  ;;  %v9904_v50 = vadd.f32 %v16527_v40, %v9903_v44 }
 0x93b   : > { %v9220_v57 = vpop.f32.mrf.mxu1  ;;  %v9905_v3 = vpop.f32.mrf.mxu0  ;;  %v9712_v45 = vpack.c.bf16 %v9510_v53, %v9508_v49 }
 0x93c   : > { %9639 = vst [vmem:[%s15984_s17 + $0x510] sm:$0xff] %v9511_v62  ;;  %v9512_v42 = vmax.f32 %v9384_v27, 0.0  ;;  %v9385_v46 = vadd.f32 %v15964_v32, %v9219_v18  ;;  %v10150_v41 = vmax.f32 %v9904_v50, 0.0  ;;  %v9221_v30 = vadd.f32 %v9220_v57, %v16436_v25 }
 0x93d   : > { %10098 = vmatprep.mubr.bf16.mxu0 %v9712_v45  ;;  %v9224_v39 = vpop.f32.mrf.mxu1  ;;  %v9908_v4 = vpop.f32.mrf.mxu0 }
 0x93e   : > { %9640 = vst [vmem:[%s15984_s17 + $0x518] sm:$0xff] %v9512_v42  ;;  %v9513_v63 = vmax.f32 %v9385_v46, 0.0  ;;  %v10212_v1 = vpack.c.bf16 %v10150_v41, %v10149_v34  ;;  %v9386_v15 = vadd.f32 %v15971_v5, %v9221_v30  ;;  %v9225_v47 = vadd.f32 %v9224_v39, %v16441_v43  ;;  %10099 = vmatmul.mubr.bf16.gmra.mxu0 %v9711_v17 }
 0x93f   : > { %v9909_v23 = vadd.f32 %v16527_v40, %v9908_v4  ;;  %v9226_v24 = vpop.f32.mrf.mxu1  ;;  %v9910_v61 = vpop.f32.mrf.mxu0 }
 0x940   : > { %9641 = vst [vmem:[%s15984_s17 + $0x528] sm:$0xff] %v9513_v63  ;;  %v9514_v58 = vmax.f32 %v9386_v15, 0.0  ;;  %v9387_v25 = vadd.f32 %v15964_v32, %v9225_v47  ;;  %v9227_v2 = vadd.f32 %v9226_v24, %v16446_v28  ;;  %11879 = vmatmul.mubr.bf16.vlgmr.msra.gmra.mxu1 %v10212_v1  ;;  %v9713_v49 = vpack.c.bf16 %v9513_v63, %v9511_v62 }
 0x941   : > { %v9228_v12 = vpop.f32.mrf.mxu1  ;;  %v9911_v10 = vpop.f32.mrf.mxu0  ;;  %v10151_v7 = vmax.f32 %v9909_v23, 0.0 }
 0x942   : > { %9642 = vst [vmem:[%s15984_s17 + $0x530] sm:$0xff] %v9514_v58  ;;  %v9515_v29 = vmax.f32 %v9387_v25, 0.0  ;;  %v9388_v37 = vadd.f32 %v15971_v5, %v9227_v2  ;;  %v9229_v43 = vadd.f32 %v9228_v12, %v16451_v11  ;;  %v9912_v52 = vadd.f32 %v16527_v40, %v9911_v10 }
 0x943   : > { %v9230_v31 = vpop.f32.mrf.mxu1  ;;  %v9913_v33 = vpop.f32.mrf.mxu0  ;;  %v9714_v16 = vpack.c.bf16 %v9514_v58, %v9512_v42 }
 0x944   : > { %9643 = vst [vmem:[%s15984_s17 + $0x540] sm:$0xff] %v9515_v29  ;;  %v9516_v51 = vmax.f32 %v9388_v37, 0.0  ;;  %v9389_v28 = vadd.f32 %v15964_v32, %v9229_v43  ;;  %v10152_v20 = vmax.f32 %v9912_v52, 0.0  ;;  %v9231_v26 = vadd.f32 %v9230_v31, %v16456_v54 }
 0x945   : > { %10106 = vmatprep.mubr.bf16.mxu0 %v9714_v16  ;;  %v9234_v9 = vpop.f32.mrf.mxu1  ;;  %v9916_v6 = vpop.f32.mrf.mxu0 }
 0x946   : > { %9644 = vst [vmem:[%s15984_s17 + $0x548] sm:$0xff] %v9516_v51  ;;  %v9517_v11 = vmax.f32 %v9389_v28, 0.0  ;;  %v10213_v53 = vpack.c.bf16 %v10152_v20, %v10151_v7  ;;  %v9390_v13 = vadd.f32 %v15971_v5, %v9231_v26  ;;  %v9235_v8 = vadd.f32 %v9234_v9, %v16461_v14  ;;  %10107 = vmatmul.mubr.bf16.gmra.mxu0 %v9713_v49 }
 0x947   : > { %v9917_v55 = vadd.f32 %v16527_v40, %v9916_v6  ;;  %v9236_v44 = vpop.f32.mrf.mxu1  ;;  %v9918_v62 = vpop.f32.mrf.mxu0 }
 0x948   : > { %9645 = vst [vmem:[%s15984_s17 + $0x558] sm:$0xff] %v9517_v11  ;;  %v9518_v27 = vmax.f32 %v9390_v13, 0.0  ;;  %v9391_v54 = vadd.f32 %v15964_v32, %v9235_v8  ;;  %v9237_v18 = vadd.f32 %v9236_v44, %v16466_v60  ;;  %11882 = vmatprep.mubr.bf16.mxu1 %v10213_v53  ;;  %v9715_v45 = vpack.c.bf16 %v9517_v11, %v9515_v29 }
 0x949   : > { %v9238_v50 = vpop.f32.mrf.mxu1  ;;  %v9919_v17 = vpop.f32.mrf.mxu0  ;;  %v10153_v42 = vmax.f32 %v9917_v55, 0.0 }
 0x94a   : > { %9646 = vst [vmem:[%s15984_s17 + $0x560] sm:$0xff] %v9518_v27  ;;  %v9519_v34 = vmax.f32 %v9391_v54, 0.0  ;;  %v9392_v57 = vadd.f32 %v15971_v5, %v9237_v18  ;;  %v9239_v14 = vadd.f32 %v9238_v50, %v16471_v19  ;;  %v9920_v3 = vadd.f32 %v16527_v40, %v9919_v17 }
 0x94b   : > { %v9240_v46 = vpop.f32.mrf.mxu1  ;;  %v9921_v41 = vpop.f32.mrf.mxu0  ;;  %v9716_v30 = vpack.c.bf16 %v9518_v27, %v9516_v51 }
 0x94c   : > { %9647 = vst [vmem:[%s15984_s17 + $0x570] sm:$0xff] %v9519_v34  ;;  %v9520_v39 = vmax.f32 %v9392_v57, 0.0  ;;  %v9393_v60 = vadd.f32 %v15964_v32, %v9239_v14  ;;  %v10154_v4 = vmax.f32 %v9920_v3, 0.0  ;;  %v9241_v63 = vadd.f32 %v9240_v46, %v16476_v56 }
 0x94d   : > { %10114 = vmatprep.mubr.bf16.mxu0 %v9716_v30  ;;  %v9244_v1 = vpop.f32.mrf.mxu1  ;;  %v9924_v15 = vpop.f32.mrf.mxu0 }
 0x94e   : > { %9648 = vst [vmem:[%s15984_s17 + $0x578] sm:$0xff] %v9520_v39  ;;  %v9521_v19 = vmax.f32 %v9393_v60, 0.0  ;;  %v10214_v47 = vpack.c.bf16 %v10154_v4, %v10153_v42  ;;  %v9394_v23 = vadd.f32 %v15971_v5, %v9241_v63  ;;  %v9245_v24 = vadd.f32 %v9244_v1, %v16481_v59  ;;  %10115 = vmatmul.mubr.bf16.gmra.mxu0 %v9715_v45 }
 0x94f   : > { %v9925_v61 = vadd.f32 %v16527_v40, %v9924_v15  ;;  %v9246_v58 = vpop.f32.mrf.mxu1  ;;  %v9926_v25 = vpop.f32.mrf.mxu0 }
 0x950   : > { %9649 = vst [vmem:[%s15984_s17 + $0x588] sm:$0xff] %v9521_v19  ;;  %v9522_v2 = vmax.f32 %v9394_v23, 0.0  ;;  %v9395_v56 = vadd.f32 %v15964_v32, %v9245_v24  ;;  %v9247_v12 = vadd.f32 %v9246_v58, %v16486_v22  ;;  %11883 = vmatmul.mubr.bf16.gmra.mxu1 %v10214_v47  ;;  %v9717_v49 = vpack.c.bf16 %v9521_v19, %v9519_v34 }
 0x951   : > { %v9248_v10 = vpop.f32.mrf.mxu1  ;;  %v9927_v29 = vpop.f32.mrf.mxu0  ;;  %v10155_v7 = vmax.f32 %v9925_v61, 0.0 }
 0x952   : > { %9650 = vst [vmem:[%s15984_s17 + $0x590] sm:$0xff] %v9522_v2  ;;  %v9523_v37 = vmax.f32 %v9395_v56, 0.0  ;;  %v9396_v43 = vadd.f32 %v15971_v5, %v9247_v12  ;;  %v9249_v59 = vadd.f32 %v9248_v10, %v16491_v48  ;;  %v9928_v52 = vadd.f32 %v16527_v40, %v9927_v29 }
 0x953   : > { %v9250_v31 = vpop.f32.mrf.mxu1  ;;  %v9929_v33 = vpop.f32.mrf.mxu0  ;;  %v9718_v16 = vpack.c.bf16 %v9522_v2, %v9520_v39 }
 0x954   : > { %9651 = vst [vmem:[%s15984_s17 + $0x5a0] sm:$0xff] %v9523_v37  ;;  %v9524_v51 = vmax.f32 %v9396_v43, 0.0  ;;  %v9397_v22 = vadd.f32 %v15964_v32, %v9249_v59  ;;  %v10156_v28 = vmax.f32 %v9928_v52, 0.0  ;;  %v9251_v20 = vadd.f32 %v9250_v31, %v16496_v21 }
 0x955   : > { %10122 = vmatprep.mubr.bf16.mxu0 %v9718_v16  ;;  %v9254_v26 = vpop.f32.mrf.mxu1  ;;  %v9932_v9 = vpop.f32.mrf.mxu0 }
 0x956   : > { %9652 = vst [vmem:[%s15984_s17 + $0x5a8] sm:$0xff] %v9524_v51  ;;  %v9525_v48 = vmax.f32 %v9397_v22, 0.0  ;;  %v10215_v6 = vpack.c.bf16 %v10156_v28, %v10155_v7  ;;  %v9398_v11 = vadd.f32 %v15971_v5, %v9251_v20  ;;  %v9255_v53 = vadd.f32 %v9254_v26, %v16501_v36  ;;  %10123 = vmatmul.mubr.bf16.gmra.mxu0 %v9717_v49 }
 0x957   : > { %v9933_v13 = vadd.f32 %v16527_v40, %v9932_v9  ;;  %v9256_v8 = vpop.f32.mrf.mxu1  ;;  %v9934_v55 = vpop.f32.mrf.mxu0 }
 0x958   : > { %9653 = vst [vmem:[%s15984_s17 + $0x5b8] sm:$0xff] %v9525_v48  ;;  %v9526_v44 = vmax.f32 %v9398_v11, 0.0  ;;  %v9399_v21 = vadd.f32 %v15964_v32, %v9255_v53  ;;  %v9257_v62 = vadd.f32 %v9256_v8, %v16506_v38  ;;  %11886 = vmatprep.mubr.bf16.mxu1 %v10215_v6  ;;  %v9719_v34 = vpack.c.bf16 %v9525_v48, %v9523_v37 }
 0x959   : > { %v9258_v27 = vpop.f32.mrf.mxu1  ;;  %v9935_v54 = vpop.f32.mrf.mxu0  ;;  %v10157_v57 = vmax.f32 %v9933_v13, 0.0 }
 0x95a   : > { %9654 = vst [vmem:[%s15984_s17 + $0x5c0] sm:$0xff] %v9526_v44  ;;  %v9527_v18 = vmax.f32 %v9399_v21, 0.0  ;;  %v9400_v36 = vadd.f32 %v15971_v5, %v9257_v62  ;;  %v9259_v50 = vadd.f32 %v9258_v27, %v16511_v0  ;;  %v9936_v17 = vadd.f32 %v16527_v40, %v9935_v54 }
 0x95b   : > { %v9260_v14 = vpop.f32.mrf.mxu1  ;;  %v9937_v3 = vpop.f32.mrf.mxu0  ;;  %v9720_v45 = vpack.c.bf16 %v9526_v44, %v9524_v51 }
 0x95c   : > { %9655 = vst [vmem:[%s15984_s17 + $0x5d0] sm:$0xff] %v9527_v18  ;;  %v9528_v38 = vmax.f32 %v9400_v36, 0.0  ;;  %v9401_v42 = vadd.f32 %v15964_v32, %v9259_v50  ;;  %v10158_v46 = vmax.f32 %v9936_v17, 0.0  ;;  %v9261_v41 = vadd.f32 %v9260_v14, %v16519_v35 }
 0x95d   : > { %10130 = vmatprep.mubr.bf16.mxu0 %v9720_v45  ;;  %v9940_v30 = vpop.f32.mrf.mxu0 }
 0x95e   : > { %9656 = vst [vmem:[%s15984_s17 + $0x5d8] sm:$0xff] %v9528_v38  ;;  %v9529_v0 = vmax.f32 %v9401_v42, 0.0  ;;  %v10216_v39 = vpack.c.bf16 %v10158_v46, %v10157_v57  ;;  %v9402_v60 = vadd.f32 %v15971_v5, %v9261_v41  ;;  %10131 = vmatmul.mubr.bf16.gmra.mxu0 %v9719_v34  ;;  %v9941_v1 = vadd.f32 %v16527_v40, %v9940_v30 }
 0x95f   : > { %v9942_v4 = vpop.f32.mrf.mxu0 }
 0x960   : > { %9657 = vst [vmem:[%s15984_s17 + $0x5e8] sm:$0xff] %v9529_v0  ;;  %v9530_v63 = vmax.f32 %v9402_v60, 0.0  ;;  %11887 = vmatmul.mubr.bf16.gmra.mxu1 %v10216_v39  ;;  %v9721_v47 = vpack.c.bf16 %v9529_v0, %v9527_v18  ;;  %v10159_v23 = vmax.f32 %v9941_v1, 0.0 }
 0x961   : > { %v9943_v15 = vpop.f32.mrf.mxu0 }
 0x962   : > { %9658 = vst [vmem:[%s15984_s17 + $0x5f0] sm:$0xff] %v9530_v63  ;;  %v9944_v32 = vadd.f32 %v16527_v40, %v9943_v15  ;;  %v9722_v19 = vpack.c.bf16 %v9530_v63, %v9528_v38 }
 0x963   : > { %v9945_v35 = vpop.f32.mrf.mxu0 }
 0x964   : > { %v10160_v24 = vmax.f32 %v9944_v32, 0.0  ;;  %10138 = vmatprep.mubr.bf16.mxu0 %v9722_v19 }
 0x965   : > { %v9948_v61 = vpop.f32.mrf.mxu0 }
 0x966   : > { %v10217_v58 = vpack.c.bf16 %v10160_v24, %v10159_v23  ;;  %10139 = vmatmul.mubr.bf16.gmra.mxu0 %v9721_v47  ;;  %v9949_v25 = vadd.f32 %v16527_v40, %v9948_v61 }
 0x967   : > { %v9950_v5 = vpop.f32.mrf.mxu0 }
 0x968   : > { %11890 = vmatprep.mubr.bf16.mxu1 %v10217_v58  ;;  %v10161_v10 = vmax.f32 %v9949_v25, 0.0 }
 0x969   : > { %v9951_v2 = vpop.f32.mrf.mxu0 }
 0x96a   : > { %v9952_v56 = vadd.f32 %v16527_v40, %v9951_v2 }
 0x96b   : > { %v9953_v12 = vpop.f32.mrf.mxu0 }
 0x96c   : > { %v10162_v29 = vmax.f32 %v9952_v56, 0.0 }
 0x96d   : > { %v9956_v37 = vpop.f32.mrf.mxu0 }
 0x96e   : > { %v10218_v43 = vpack.c.bf16 %v10162_v29, %v10161_v10  ;;  %v9957_v52 = vadd.f32 %v16527_v40, %v9956_v37 }
 0x96f   : > { %v9958_v59 = vpop.f32.mrf.mxu0 }
 0x970   : > { %11891 = vmatmul.mubr.bf16.gmra.mxu1 %v10218_v43  ;;  %v10163_v33 = vmax.f32 %v9957_v52, 0.0 }
 0x971   : > { %v9959_v49 = vpop.f32.mrf.mxu0 }
 0x972   : > { %v9960_v7 = vadd.f32 %v16527_v40, %v9959_v49 }
 0x973   : > { %v9961_v31 = vpop.f32.mrf.mxu0 }
 0x974   : > { %v10164_v16 = vmax.f32 %v9960_v7, 0.0 }
 0x975   : > { %v9964_v51 = vpop.f32.mrf.mxu0 }
 0x976   : > { %v10219_v22 = vpack.c.bf16 %v10164_v16, %v10163_v33  ;;  %v9965_v20 = vadd.f32 %v16527_v40, %v9964_v51 }
 0x977   : > { %v9966_v28 = vpop.f32.mrf.mxu0 }
 0x978   : > { %11894 = vmatprep.mubr.bf16.mxu1 %v10219_v22  ;;  %v10165_v6 = vmax.f32 %v9965_v20, 0.0 }
 0x979   : > { %v9967_v26 = vpop.f32.mrf.mxu0 }
 0x97a   : > { %v9968_v9 = vadd.f32 %v16527_v40, %v9967_v26 }
 0x97b   : > { %v9969_v48 = vpop.f32.mrf.mxu0 }
 0x97c   : > { %v10166_v11 = vmax.f32 %v9968_v9, 0.0 }
 0x97d   : > { %v9972_v53 = vpop.f32.mrf.mxu0 }
 0x97e   : > { %v10220_v13 = vpack.c.bf16 %v10166_v11, %v10165_v6  ;;  %v9973_v55 = vadd.f32 %v16527_v40, %v9972_v53 }
 0x97f   : > { %v9974_v8 = vpop.f32.mrf.mxu0 }
 0x980   : > { %11895 = vmatmul.mubr.bf16.gmra.mxu1 %v10220_v13  ;;  %v10167_v27 = vmax.f32 %v9973_v55, 0.0 }
 0x981   : > { %v9975_v44 = vpop.f32.mrf.mxu0 }
 0x982   : > { %v9976_v21 = vadd.f32 %v16527_v40, %v9975_v44 }
 0x983   : > { %v9977_v62 = vpop.f32.mrf.mxu0 }
 0x984   : > { %v10168_v54 = vmax.f32 %v9976_v21, 0.0 }
 0x985   : > { %v9980_v18 = vpop.f32.mrf.mxu0 }
 0x986   : > { %v10221_v36 = vpack.c.bf16 %v10168_v54, %v10167_v27  ;;  %v9981_v17 = vadd.f32 %v16527_v40, %v9980_v18 }
 0x987   : > { %v9982_v50 = vpop.f32.mrf.mxu0 }
 0x988   : > { %11898 = vmatprep.mubr.bf16.mxu1 %v10221_v36  ;;  %v10169_v3 = vmax.f32 %v9981_v17, 0.0 }
 0x989   : > { %v9983_v34 = vpop.f32.mrf.mxu0 }
 0x98a   : > { %v9984_v57 = vadd.f32 %v16527_v40, %v9983_v34 }
 0x98b   : > { %v9985_v14 = vpop.f32.mrf.mxu0 }
 0x98c   : > { %v10170_v45 = vmax.f32 %v9984_v57, 0.0 }
 0x98d   : > { %v9988_v38 = vpop.f32.mrf.mxu0 }
 0x98e   : > { %v10222_v42 = vpack.c.bf16 %v10170_v45, %v10169_v3  ;;  %v9989_v41 = vadd.f32 %v16527_v40, %v9988_v38 }
 0x98f   : > { %v9990_v46 = vpop.f32.mrf.mxu0 }
 0x990   : > { %11899 = vmatmul.mubr.bf16.gmra.mxu1 %v10222_v42  ;;  %v10171_v60 = vmax.f32 %v9989_v41, 0.0 }
 0x991   : > { %v9991_v30 = vpop.f32.mrf.mxu0 }
 0x992   : > { %v9992_v0 = vadd.f32 %v16527_v40, %v9991_v30 }
 0x993   : > { %v9993_v39 = vpop.f32.mrf.mxu0 }
 0x994   : > { %v10172_v4 = vmax.f32 %v9992_v0, 0.0 }
 0x995   : > { %v9996_v63 = vpop.f32.mrf.mxu0 }
 0x996   : > { %v10223_v1 = vpack.c.bf16 %v10172_v4, %v10171_v60  ;;  %v9997_v32 = vadd.f32 %v16527_v40, %v9996_v63 }
 0x997   : > { %v9998_v15 = vpop.f32.mrf.mxu0 }
 0x998   : > { %11902 = vmatprep.mubr.bf16.mxu1 %v10223_v1  ;;  %v10173_v23 = vmax.f32 %v9997_v32, 0.0 }
 0x999   : > { %v9999_v19 = vpop.f32.mrf.mxu0 }
 0x99a   : > { %v10000_v35 = vadd.f32 %v16527_v40, %v9999_v19 }
 0x99b   : > { %v10001_v47 = vpop.f32.mrf.mxu0 }
 0x99c   : > { %v10174_v24 = vmax.f32 %v10000_v35, 0.0 }
 0x99d   : > { %v10004_v61 = vpop.f32.mrf.mxu0 }
 0x99e   : > { %v10224_v58 = vpack.c.bf16 %v10174_v24, %v10173_v23  ;;  %v10005_v25 = vadd.f32 %v16527_v40, %v10004_v61 }
 0x99f   : > { %v10006_v5 = vpop.f32.mrf.mxu0 }
 0x9a0   : > { %11903 = vmatmul.mubr.bf16.gmra.mxu1 %v10224_v58  ;;  %v10175_v10 = vmax.f32 %v10005_v25, 0.0 }
 0x9a1   : > { %v10007_v2 = vpop.f32.mrf.mxu0 }
 0x9a2   : > { %v10008_v56 = vadd.f32 %v16527_v40, %v10007_v2 }
 0x9a3   : > { %v10009_v12 = vpop.f32.mrf.mxu0 }
 0x9a4   : > { %v10176_v29 = vmax.f32 %v10008_v56, 0.0 }
 0x9a5   : > { %v10012_v37 = vpop.f32.mrf.mxu0 }
 0x9a6   : > { %v10225_v43 = vpack.c.bf16 %v10176_v29, %v10175_v10  ;;  %v10013_v52 = vadd.f32 %v16527_v40, %v10012_v37 }
 0x9a7   : > { %v10014_v59 = vpop.f32.mrf.mxu0 }
 0x9a8   : > { %11906 = vmatprep.mubr.bf16.mxu1 %v10225_v43  ;;  %v10177_v33 = vmax.f32 %v10013_v52, 0.0 }
 0x9a9   : > { %v10015_v49 = vpop.f32.mrf.mxu0 }
 0x9aa   : > { %v10016_v7 = vadd.f32 %v16527_v40, %v10015_v49 }
 0x9ab   : > { %v10017_v31 = vpop.f32.mrf.mxu0 }
 0x9ac   : > { %v10178_v16 = vmax.f32 %v10016_v7, 0.0 }
 0x9ad   : > { %v10020_v51 = vpop.f32.mrf.mxu0 }
 0x9ae   : > { %v10226_v22 = vpack.c.bf16 %v10178_v16, %v10177_v33  ;;  %v10021_v20 = vadd.f32 %v16527_v40, %v10020_v51 }
 0x9af   : > { %v10022_v28 = vpop.f32.mrf.mxu0 }
 0x9b0   : > { %11907 = vmatmul.mubr.bf16.gmra.mxu1 %v10226_v22  ;;  %v10179_v6 = vmax.f32 %v10021_v20, 0.0 }
 0x9b1   : > { %v10023_v26 = vpop.f32.mrf.mxu0 }
 0x9b2   : > { %v10024_v9 = vadd.f32 %v16527_v40, %v10023_v26 }
 0x9b3   : > { %v10025_v48 = vpop.f32.mrf.mxu0 }
 0x9b4   : > { %v10180_v11 = vmax.f32 %v10024_v9, 0.0 }
 0x9b5   : > { %v10028_v53 = vpop.f32.mrf.mxu0 }
 0x9b6   : > { %v10227_v13 = vpack.c.bf16 %v10180_v11, %v10179_v6  ;;  %v10029_v55 = vadd.f32 %v16527_v40, %v10028_v53 }
 0x9b7   : > { %v10030_v8 = vpop.f32.mrf.mxu0 }
 0x9b8   : > { %11910 = vmatprep.mubr.bf16.mxu1 %v10227_v13  ;;  %v10181_v27 = vmax.f32 %v10029_v55, 0.0 }
 0x9b9   : > { %v10031_v44 = vpop.f32.mrf.mxu0 }
 0x9ba   : > { %v10032_v21 = vadd.f32 %v16527_v40, %v10031_v44 }
 0x9bb   : > { %v10033_v62 = vpop.f32.mrf.mxu0 }
 0x9bc   : > { %v10182_v54 = vmax.f32 %v10032_v21, 0.0 }
 0x9bd   : > { %v10036_v18 = vpop.f32.mrf.mxu0 }
 0x9be   : > { %v10228_v36 = vpack.c.bf16 %v10182_v54, %v10181_v27  ;;  %v10037_v17 = vadd.f32 %v16527_v40, %v10036_v18 }
 0x9bf   : > { %v10038_v50 = vpop.f32.mrf.mxu0 }
 0x9c0   : > { %11911 = vmatmul.mubr.bf16.gmra.mxu1 %v10228_v36  ;;  %v10183_v3 = vmax.f32 %v10037_v17, 0.0 }
 0x9c1   : > { %v10039_v34 = vpop.f32.mrf.mxu0 }
 0x9c2   : > { %v10040_v57 = vadd.f32 %v16527_v40, %v10039_v34 }
 0x9c3   : > { %v10041_v14 = vpop.f32.mrf.mxu0 }
 0x9c4   : > { %v10184_v45 = vmax.f32 %v10040_v57, 0.0 }
 0x9c5   : > { %v10044_v38 = vpop.f32.mrf.mxu0 }
 0x9c6   : > { %v10229_v42 = vpack.c.bf16 %v10184_v45, %v10183_v3  ;;  %v10045_v41 = vadd.f32 %v16527_v40, %v10044_v38 }
 0x9c7   : > { %v10046_v46 = vpop.f32.mrf.mxu0 }
 0x9c8   : > { %11914 = vmatprep.mubr.bf16.mxu1 %v10229_v42  ;;  %v10185_v60 = vmax.f32 %v10045_v41, 0.0  ;;  %v16660_v46 = vld [vmem:[%s16825_s14] ss:$0 sm:$0xff] }
 0x9c9   : > { %v10047_v30 = vpop.f32.mrf.mxu0 }
 0x9ca   : > { %v10048_v0 = vadd.f32 %v16527_v40, %v10047_v30 }
 0x9cb   : > { %v10049_v39 = vpop.f32.mrf.mxu0 }
 0x9cc   : > { %v10186_v4 = vmax.f32 %v10048_v0, 0.0 }
 0x9cd   : > { %v10052_v63 = vpop.f32.mrf.mxu0 }
 0x9ce   : > { %v10230_v1 = vpack.c.bf16 %v10186_v4, %v10185_v60  ;;  %v10053_v32 = vadd.f32 %v16527_v40, %v10052_v63 }
 0x9cf   : > { %v10054_v15 = vpop.f32.mrf.mxu0 }
 0x9d0   : > { %11915 = vmatmul.mubr.bf16.gmra.mxu1 %v10230_v1  ;;  %v10187_v23 = vmax.f32 %v10053_v32, 0.0 }
 0x9d1   : > { %v10055_v19 = vpop.f32.mrf.mxu0 }
 0x9d2   : > { %v10056_v35 = vadd.f32 %v16527_v40, %v10055_v19 }
 0x9d3   : > { %v10057_v47 = vpop.f32.mrf.mxu0 }
 0x9d4   : > { %v10188_v24 = vmax.f32 %v10056_v35, 0.0 }
 0x9d5   : > { %v10060_v61 = vpop.f32.mrf.mxu0 }
 0x9d6   : > { %v10231_v58 = vpack.c.bf16 %v10188_v24, %v10187_v23  ;;  %v10061_v25 = vadd.f32 %v16527_v40, %v10060_v61 }
 0x9d7   : > { %v10062_v5 = vpop.f32.mrf.mxu0 }
 0x9d8   : > { %11918 = vmatprep.mubr.bf16.mxu1 %v10231_v58  ;;  %v10189_v10 = vmax.f32 %v10061_v25, 0.0 }
 0x9d9   : > { %v10063_v2 = vpop.f32.mrf.mxu0 }
 0x9da   : > { %v10064_v56 = vadd.f32 %v16527_v40, %v10063_v2 }
 0x9db   : > { %v10065_v12 = vpop.f32.mrf.mxu0 }
 0x9dc   : > { %v10190_v29 = vmax.f32 %v10064_v56, 0.0 }
 0x9dd   : > { %v10068_v37 = vpop.f32.mrf.mxu0 }
 0x9de   : > { %v10232_v43 = vpack.c.bf16 %v10190_v29, %v10189_v10  ;;  %v10069_v52 = vadd.f32 %v16527_v40, %v10068_v37 }
 0x9df   : > { %v10070_v59 = vpop.f32.mrf.mxu0 }
 0x9e0   : > { %11919 = vmatmul.mubr.bf16.gmra.mxu1 %v10232_v43  ;;  %v10191_v33 = vmax.f32 %v10069_v52, 0.0 }
 0x9e1   : > { %v10071_v49 = vpop.f32.mrf.mxu0 }
 0x9e2   : > { %v10072_v7 = vadd.f32 %v16527_v40, %v10071_v49 }
 0x9e3   : > { %v10073_v31 = vpop.f32.mrf.mxu0 }
 0x9e4   : > { %v10192_v16 = vmax.f32 %v10072_v7, 0.0 }
 0x9e5   : > { %v10076_v51 = vpop.f32.mrf.mxu0 }
 0x9e6   : > { %v10233_v22 = vpack.c.bf16 %v10192_v16, %v10191_v33  ;;  %v10077_v20 = vadd.f32 %v16527_v40, %v10076_v51 }
 0x9e7   : > { %v10078_v28 = vpop.f32.mrf.mxu0 }
 0x9e8   : > { %11922 = vmatprep.mubr.bf16.mxu1 %v10233_v22  ;;  %v10193_v6 = vmax.f32 %v10077_v20, 0.0 }
 0x9e9   : > { %v10079_v26 = vpop.f32.mrf.mxu0 }
 0x9ea   : > { %v10080_v9 = vadd.f32 %v16527_v40, %v10079_v26 }
 0x9eb   : > { %v10081_v48 = vpop.f32.mrf.mxu0 }
 0x9ec   : > { %v10194_v11 = vmax.f32 %v10080_v9, 0.0 }
 0x9ed   : > { %v10084_v53 = vpop.f32.mrf.mxu0 }
 0x9ee   : > { %v10234_v13 = vpack.c.bf16 %v10194_v11, %v10193_v6  ;;  %v10085_v55 = vadd.f32 %v16527_v40, %v10084_v53 }
 0x9ef   : > { %v10086_v8 = vpop.f32.mrf.mxu0 }
 0x9f0   : > { %11923 = vmatmul.mubr.bf16.gmra.mxu1 %v10234_v13  ;;  %v10195_v27 = vmax.f32 %v10085_v55, 0.0 }
 0x9f1   : > { %v10087_v44 = vpop.f32.mrf.mxu0 }
 0x9f2   : > { %v10088_v21 = vadd.f32 %v16527_v40, %v10087_v44 }
 0x9f3   : > { %v10089_v62 = vpop.f32.mrf.mxu0 }
 0x9f4   : > { %v10196_v54 = vmax.f32 %v10088_v21, 0.0 }
 0x9f5   : > { %v10092_v18 = vpop.f32.mrf.mxu0 }
 0x9f6   : > { %v10235_v36 = vpack.c.bf16 %v10196_v54, %v10195_v27  ;;  %v10093_v17 = vadd.f32 %v16527_v40, %v10092_v18 }
 0x9f7   : > { %v10094_v50 = vpop.f32.mrf.mxu0 }
 0x9f8   : > { %11926 = vmatprep.mubr.bf16.mxu1 %v10235_v36  ;;  %v10197_v3 = vmax.f32 %v10093_v17, 0.0 }
 0x9f9   : > { %v10095_v34 = vpop.f32.mrf.mxu0 }
 0x9fa   : > { %v10096_v57 = vadd.f32 %v16527_v40, %v10095_v34 }
 0x9fb   : > { %v10097_v14 = vpop.f32.mrf.mxu0 }
 0x9fc   : > { %v10198_v45 = vmax.f32 %v10096_v57, 0.0 }
 0x9fe   : > { %v10236_v38 = vpack.c.bf16 %v10198_v45, %v10197_v3  ;;  %v10100_v42 = vpop.f32.mrf.mxu0 }
 0x9ff   : > { %v10101_v41 = vadd.f32 %v16527_v40, %v10100_v42 }
 0xa00   : > { %v10102_v30 = vpop.f32.mrf.mxu0  ;;  %v11880_v0 = vpop.f32.mrf.mxu1  ;;  %11927 = vmatmul.mubr.bf16.gmra.mxu1 %v10236_v38 }
 0xa01   : > { %v10357_v39 = vadd.f32 %v11880_v0, %v16660_v46  ;;  %v10199_v32 = vmax.f32 %v10101_v41, 0.0 }
 0xa02   : > { %v10103_v60 = vpop.f32.mrf.mxu0  ;;  %v10348_v4 = vpop.f32.mrf.mxu1 }
 0xa03   : > { %v11758_v63 = vmul.f32 -1.442695, %v10357_v39  ;;  %v10104_v1 = vadd.f32 %v16527_v40, %v10103_v60  ;;  %v10349_v15 = vadd.f32 %v16660_v46, %v10348_v4 }
 0xa04   : > { %v10105_v19 = vpop.f32.mrf.mxu0  ;;  %v11881_v35 = vpop.f32.mrf.mxu1 }
 0xa05   : > { %12560 = vpow2.f32 %v11758_v63  ;;  %v10200_v47 = vmax.f32 %v10104_v1, 0.0  ;;  %v11756_v23 = vmul.f32 -1.442695, %v10349_v15  ;;  %v10360_v24 = vadd.f32 %v11881_v35, %v16660_v46 }
 0xa06   : > { %v10108_v61 = vpop.f32.mrf.mxu0  ;;  %v10351_v58 = vpop.f32.mrf.mxu1 }
 0xa07   : > { %v10237_v5 = vpack.c.bf16 %v10200_v47, %v10199_v32  ;;  %12562 = vpow2.f32 %v11756_v23  ;;  %v11759_v25 = vmul.f32 -1.442695, %v10360_v24  ;;  %v10352_v2 = vadd.f32 %v16660_v46, %v10351_v58 }
 0xa08   : > { %v10110_v56 = vpop.f32.mrf.mxu0  ;;  %v10109_v12 = vadd.f32 %v16527_v40, %v10108_v61 }
 0xa09   : > { %12564 = vpow2.f32 %v11759_v25  ;;  %11930 = vmatprep.mubr.bf16.mxu1 %v10237_v5  ;;  %v11757_v10 = vmul.f32 -1.442695, %v10352_v2 }
 0xa0a   : > { %v10111_v29 = vpop.f32.mrf.mxu0  ;;  %v10201_v59 = vmax.f32 %v10109_v12, 0.0 }
 0xa0b   : > { %v10112_v37 = vadd.f32 %v16527_v40, %v10111_v29  ;;  %12566 = vpow2.f32 %v11757_v10 }
 0xa0c   : > { %v10113_v43 = vpop.f32.mrf.mxu0 }
 0xa0d   : > { %v10202_v52 = vmax.f32 %v10112_v37, 0.0 }
 0xa0e   : > { %v10116_v49 = vpop.f32.mrf.mxu0 }
 0xa0f   : > { %v10238_v7 = vpack.c.bf16 %v10202_v52, %v10201_v59  ;;  %v10117_v31 = vadd.f32 %v16527_v40, %v10116_v49 }
 0xa10   : > { %v10118_v33 = vpop.f32.mrf.mxu0  ;;  %v11884_v16 = vpop.f32.mrf.mxu1 }
 0xa11   : > { %v10373_v51 = vadd.f32 %v11884_v16, %v16660_v46  ;;  %11931 = vmatmul.mubr.bf16.gmra.mxu1 %v10238_v7  ;;  %v10203_v53 = vmax.f32 %v10117_v31, 0.0 }
 0xa12   : > { %v12561_v22 = vpop.eup %12560  ;;  %v10119_v28 = vpop.f32.mrf.mxu0 }
 0xa13   : > { %v10364_v20 = vpop.f32.mrf.mxu1  ;;  %v10797_v26 = vadd.f32 1.0, %v12561_v22  ;;  %v11762_v9 = vmul.f32 -1.442695, %v10373_v51  ;;  %v10120_v48 = vadd.f32 %v16527_v40, %v10119_v28 }
 0xa14   : > { %v10365_v6 = vadd.f32 %v16660_v46, %v10364_v20  ;;  %v12563_v11 = vpop.eup %12562  ;;  %v10121_v13 = vpop.f32.mrf.mxu0  ;;  %v12824_v20 = vld [vmem:[%s16823_s12] ss:$0 sm:$0xff] }
 0xa15   : > { %v11885_v8 = vpop.f32.mrf.mxu1  ;;  %12568 = vrcp.f32 %v10797_v26  ;;  %v10795_v55 = vadd.f32 1.0, %v12563_v11  ;;  %v10204_v44 = vmax.f32 %v10120_v48, 0.0 }
 0xa16   : > { %v11760_v21 = vmul.f32 -1.442695, %v10365_v6  ;;  %v12565_v62 = vpop.eup %12564  ;;  %12570 = vpow2.f32 %v11762_v9  ;;  %v10376_v27 = vadd.f32 %v11885_v8, %v16660_v46  ;;  %v10124_v54 = vpop.f32.mrf.mxu0 }
 0xa17   : > { %v10367_v18 = vpop.f32.mrf.mxu1  ;;  %12572 = vrcp.f32 %v10795_v55  ;;  %v10798_v36 = vadd.f32 1.0, %v12565_v62  ;;  %v10239_v50 = vpack.c.bf16 %v10204_v44, %v10203_v53  ;;  %v10125_v3 = vadd.f32 %v16527_v40, %v10124_v54 }
 0xa18   : > { %12574 = vpow2.f32 %v11760_v21  ;;  %v11763_v17 = vmul.f32 -1.442695, %v10376_v27  ;;  %v10368_v34 = vadd.f32 %v16660_v46, %v10367_v18  ;;  %v10126_v57 = vpop.f32.mrf.mxu0  ;;  %v12567_v14 = vpop.eup %12566 }
 0xa19   : > { %12576 = vrcp.f32 %v10798_v36  ;;  %11934 = vmatprep.mubr.bf16.mxu1 %v10239_v50  ;;  %v10796_v45 = vadd.f32 1.0, %v12567_v14  ;;  %v10205_v0 = vmax.f32 %v10125_v3, 0.0 }
 0xa1a   : > { %12578 = vpow2.f32 %v11763_v17  ;;  %v11761_v38 = vmul.f32 -1.442695, %v10368_v34  ;;  %v10127_v42 = vpop.f32.mrf.mxu0 }
 0xa1b   : > { %v10128_v41 = vadd.f32 %v16527_v40, %v10127_v42  ;;  %12580 = vrcp.f32 %v10796_v45 }
 0xa1c   : > { %v10129_v30 = vpop.f32.mrf.mxu0  ;;  %12582 = vpow2.f32 %v11761_v38 }
 0xa1d   : > { %v10206_v39 = vmax.f32 %v10128_v41, 0.0 }
 0xa1e   : > { %v10132_v60 = vpop.f32.mrf.mxu0 }
 0xa1f   : > { %v10240_v4 = vpack.c.bf16 %v10206_v39, %v10205_v0  ;;  %v10133_v63 = vadd.f32 %v16527_v40, %v10132_v60 }
 0xa20   : > { %v10134_v1 = vpop.f32.mrf.mxu0  ;;  %v11888_v15 = vpop.f32.mrf.mxu1 }
 0xa21   : > { %v10389_v32 = vadd.f32 %v11888_v15, %v16660_v46  ;;  %11935 = vmatmul.mubr.bf16.gmra.mxu1 %v10240_v4  ;;  %v10207_v2 = vmax.f32 %v10133_v63, 0.0 }
 0xa22   : > { %v12569_v19 = vpop.eup %12568  ;;  %v10135_v35 = vpop.f32.mrf.mxu0 }
 0xa23   : > { %v10380_v47 = vpop.f32.mrf.mxu1  ;;  %v12571_v23 = vpop.eup %12570  ;;  %10989 = vst [vmem:[%s15984_s17 + $0x40] sm:$0xff] %v12569_v19  ;;  %v11766_v24 = vmul.f32 -1.442695, %v10389_v32  ;;  %v10136_v61 = vadd.f32 %v16527_v40, %v10135_v35 }
 0xa24   : > { %v10381_v58 = vadd.f32 %v16660_v46, %v10380_v47  ;;  %v12573_v5 = vpop.eup %12572  ;;  %v10801_v25 = vadd.f32 1.0, %v12571_v23  ;;  %v10137_v56 = vpop.f32.mrf.mxu0 }
 0xa25   : > { %v11889_v12 = vpop.f32.mrf.mxu1  ;;  %v12575_v10 = vpop.eup %12574  ;;  %10987 = vst [vmem:[%s15984_s17 + $0x10] sm:$0xff] %v12573_v5  ;;  %12584 = vpow2.f32 %v11766_v24  ;;  %v10208_v29 = vmax.f32 %v10136_v61, 0.0 }
 0xa26   : > { %v11764_v37 = vmul.f32 -1.442695, %v10381_v58  ;;  %v10392_v43 = vadd.f32 %v11889_v12, %v16660_v46  ;;  %v12577_v59 = vpop.eup %12576  ;;  %12586 = vrcp.f32 %v10801_v25  ;;  %v10799_v52 = vadd.f32 1.0, %v12575_v10  ;;  %v10140_v49 = vpop.f32.mrf.mxu0 }
 0xa27   : > { %v10383_v40 = vpop.f32.mrf.mxu1  ;;  %v12579_v7 = vpop.eup %12578  ;;  %10990 = vst [vmem:[%s15984_s17 + $0x58] sm:$0xff] %v12577_v59  ;;  %v10241_v31 = vpack.c.bf16 %v10208_v29, %v10207_v2  ;;  %v10141_v26 = vadd.f32 %v12824_v20, %v10140_v49 }
 0xa28   : > { %12588 = vpow2.f32 %v11764_v37  ;;  %v11767_v33 = vmul.f32 -1.442695, %v10392_v43  ;;  %v10802_v16 = vadd.f32 1.0, %v12579_v7  ;;  %v10384_v51 = vadd.f32 %v16660_v46, %v10383_v40  ;;  %v10142_v22 = vpop.f32.mrf.mxu0  ;;  %v12581_v28 = vpop.eup %12580 }
 0xa29   : > { %12590 = vrcp.f32 %v10799_v52  ;;  %11938 = vmatprep.mubr.bf16.mxu1 %v10241_v31  ;;  %v12583_v9 = vpop.eup %12582  ;;  %10988 = vst [vmem:[%s15984_s17 + $0x28] sm:$0xff] %v12581_v28  ;;  %v10209_v8 = vmax.f32 %v10141_v26, 0.0 }
 0xa2a   : > { %12592 = vpow2.f32 %v11767_v33  ;;  %v11765_v48 = vmul.f32 -1.442695, %v10384_v51  ;;  %v10143_v6 = vpop.f32.mrf.mxu0  ;;  %v10800_v11 = vadd.f32 1.0, %v12583_v9 }
 0xa2b   : > { %12594 = vrcp.f32 %v10802_v16  ;;  %v10144_v53 = vadd.f32 %v12824_v20, %v10143_v6 }
 0xa2c   : > { %12596 = vpow2.f32 %v11765_v48  ;;  %v10145_v13 = vpop.f32.mrf.mxu0 }
 0xa2d   : > { %12598 = vrcp.f32 %v10800_v11  ;;  %v10210_v55 = vmax.f32 %v10144_v53, 0.0 }
 0xa2f   : > { %v10242_v44 = vpack.c.bf16 %v10210_v55, %v10209_v8 }
 0xa30   : > { %v11892_v21 = vpop.f32.mrf.mxu1 }
 0xa31   : > { %v10405_v62 = vadd.f32 %v11892_v21, %v16660_v46  ;;  %11939 = vmatmul.mubr.bf16.gmra.mxu1 %v10242_v44 }
 0xa32   : > { %v12585_v27 = vpop.eup %12584  ;;  %v10396_v54 = vpop.f32.mrf.mxu1 }
 0xa33   : > { %v12587_v18 = vpop.eup %12586  ;;  %v10805_v36 = vadd.f32 1.0, %v12585_v27  ;;  %v11770_v50 = vmul.f32 -1.442695, %v10405_v62  ;;  %v10397_v17 = vadd.f32 %v16660_v46, %v10396_v54 }
 0xa34   : > { %10993 = vst [vmem:[%s15984_s17 + $0xa0] sm:$0xff] %v12587_v18  ;;  %v11893_v57 = vpop.f32.mrf.mxu1 }
 0xa35   : > { %v12589_v34 = vpop.eup %12588  ;;  %12600 = vrcp.f32 %v10805_v36  ;;  %v11768_v45 = vmul.f32 -1.442695, %v10397_v17  ;;  %v10408_v38 = vadd.f32 %v11893_v57, %v16660_v46 }
 0xa36   : > { %v12591_v14 = vpop.eup %12590  ;;  %v10803_v3 = vadd.f32 1.0, %v12589_v34  ;;  %12602 = vpow2.f32 %v11770_v50  ;;  %v10399_v41 = vpop.f32.mrf.mxu1 }
 0xa37   : > { %v12593_v42 = vpop.eup %12592  ;;  %10991 = vst [vmem:[%s15984_s17 + $0x70] sm:$0xff] %v12591_v14  ;;  %v11771_v39 = vmul.f32 -1.442695, %v10408_v38  ;;  %v10400_v60 = vadd.f32 %v16660_v46, %v10399_v41 }
 0xa38   : > { %v12595_v30 = vpop.eup %12594  ;;  %12604 = vrcp.f32 %v10803_v3  ;;  %v10806_v0 = vadd.f32 1.0, %v12593_v42 }
 0xa39   : > { %10994 = vst [vmem:[%s15984_s17 + $0xb8] sm:$0xff] %v12595_v30  ;;  %12606 = vpow2.f32 %v11768_v45  ;;  %v12597_v4 = vpop.eup %12596  ;;  %v11769_v63 = vmul.f32 -1.442695, %v10400_v60 }
 0xa3a   : > { %12608 = vrcp.f32 %v10806_v0  ;;  %v12599_v1 = vpop.eup %12598  ;;  %v10804_v15 = vadd.f32 1.0, %v12597_v4 }
 0xa3b   : > { %12610 = vpow2.f32 %v11771_v39  ;;  %10992 = vst [vmem:[%s15984_s17 + $0x88] sm:$0xff] %v12599_v1 }
 0xa3c   : > { %12612 = vpow2.f32 %v11769_v63 }
 0xa3d   : > { %12614 = vrcp.f32 %v10804_v15 }
 0xa40   : > { %v11896_v32 = vpop.f32.mrf.mxu1 }
 0xa41   : > { %v10421_v19 = vadd.f32 %v11896_v32, %v16660_v46 }
 0xa42   : > { %v12601_v35 = vpop.eup %12600  ;;  %v10412_v47 = vpop.f32.mrf.mxu1 }
 0xa43   : > { %v12603_v23 = vpop.eup %12602  ;;  %10997 = vst [vmem:[%s15984_s17 + $0x100] sm:$0xff] %v12601_v35  ;;  %v11774_v24 = vmul.f32 -1.442695, %v10421_v19  ;;  %v10413_v61 = vadd.f32 %v16660_v46, %v10412_v47 }
 0xa44   : > { %v10809_v5 = vadd.f32 1.0, %v12603_v23  ;;  %v11897_v25 = vpop.f32.mrf.mxu1 }
 0xa45   : > { %v12605_v58 = vpop.eup %12604  ;;  %12616 = vpow2.f32 %v11774_v24  ;;  %v11772_v56 = vmul.f32 -1.442695, %v10413_v61  ;;  %v10424_v12 = vadd.f32 %v11897_v25, %v16660_v46 }
 0xa46   : > { %v12607_v2 = vpop.eup %12606  ;;  %10995 = vst [vmem:[%s15984_s17 + $0xd0] sm:$0xff] %v12605_v58  ;;  %12618 = vrcp.f32 %v10809_v5  ;;  %v10415_v37 = vpop.f32.mrf.mxu1 }
 0xa47   : > { %v12609_v10 = vpop.eup %12608  ;;  %v10807_v29 = vadd.f32 1.0, %v12607_v2  ;;  %12620 = vpow2.f32 %v11772_v56  ;;  %v11775_v59 = vmul.f32 -1.442695, %v10424_v12  ;;  %v10416_v52 = vadd.f32 %v16660_v46, %v10415_v37 }
 0xa48   : > { %v12611_v43 = vpop.eup %12610  ;;  %10998 = vst [vmem:[%s15984_s17 + $0x118] sm:$0xff] %v12609_v10 }
 0xa49   : > { %v12613_v49 = vpop.eup %12612  ;;  %12622 = vrcp.f32 %v10807_v29  ;;  %v10810_v40 = vadd.f32 1.0, %v12611_v43  ;;  %v11773_v33 = vmul.f32 -1.442695, %v10416_v52 }
 0xa4a   : > { %v12615_v7 = vpop.eup %12614  ;;  %v10808_v31 = vadd.f32 1.0, %v12613_v49  ;;  %12624 = vpow2.f32 %v11775_v59 }
 0xa4b   : > { %10996 = vst [vmem:[%s15984_s17 + $0xe8] sm:$0xff] %v12615_v7  ;;  %12626 = vrcp.f32 %v10810_v40 }
 0xa4c   : > { %12628 = vrcp.f32 %v10808_v31 }
 0xa4d   : > { %12630 = vpow2.f32 %v11773_v33 }
 0xa50   : > { %v11900_v16 = vpop.f32.mrf.mxu1 }
 0xa51   : > { %v10437_v51 = vadd.f32 %v11900_v16, %v16660_v46 }
 0xa52   : > { %v12617_v22 = vpop.eup %12616  ;;  %v10428_v28 = vpop.f32.mrf.mxu1 }
 0xa53   : > { %v12619_v20 = vpop.eup %12618  ;;  %v10813_v26 = vadd.f32 1.0, %v12617_v22  ;;  %v11778_v9 = vmul.f32 -1.442695, %v10437_v51  ;;  %v10429_v48 = vadd.f32 %v16660_v46, %v10428_v28 }
 0xa54   : > { %v12621_v6 = vpop.eup %12620  ;;  %11001 = vst [vmem:[%s15984_s17 + $0x160] sm:$0xff] %v12619_v20  ;;  %v11901_v11 = vpop.f32.mrf.mxu1 }
 0xa55   : > { %12632 = vrcp.f32 %v10813_v26  ;;  %v10811_v13 = vadd.f32 1.0, %v12621_v6  ;;  %v11776_v8 = vmul.f32 -1.442695, %v10429_v48  ;;  %v10440_v55 = vadd.f32 %v11901_v11, %v16660_v46 }
 0xa56   : > { %v12623_v53 = vpop.eup %12622  ;;  %12634 = vpow2.f32 %v11778_v9  ;;  %v10431_v21 = vpop.f32.mrf.mxu1 }
 0xa57   : > { %v12625_v44 = vpop.eup %12624  ;;  %10999 = vst [vmem:[%s15984_s17 + $0x130] sm:$0xff] %v12623_v53  ;;  %12636 = vrcp.f32 %v10811_v13  ;;  %v11779_v54 = vmul.f32 -1.442695, %v10440_v55  ;;  %v10432_v18 = vadd.f32 %v16660_v46, %v10431_v21 }
 0xa58   : > { %v12627_v62 = vpop.eup %12626  ;;  %v10814_v27 = vadd.f32 1.0, %v12625_v44  ;;  %12638 = vpow2.f32 %v11776_v8 }
 0xa59   : > { %v12629_v36 = vpop.eup %12628  ;;  %11002 = vst [vmem:[%s15984_s17 + $0x178] sm:$0xff] %v12627_v62  ;;  %v11777_v17 = vmul.f32 -1.442695, %v10432_v18 }
 0xa5a   : > { %v12631_v50 = vpop.eup %12630  ;;  %11000 = vst [vmem:[%s15984_s17 + $0x148] sm:$0xff] %v12629_v36  ;;  %12640 = vrcp.f32 %v10814_v27 }
 0xa5b   : > { %v10812_v34 = vadd.f32 1.0, %v12631_v50  ;;  %12642 = vpow2.f32 %v11779_v54 }
 0xa5c   : > { %12644 = vpow2.f32 %v11777_v17 }
 0xa5d   : > { %12646 = vrcp.f32 %v10812_v34 }
 0xa60   : > { %v11904_v57 = vpop.f32.mrf.mxu1 }
 0xa61   : > { %v10453_v14 = vadd.f32 %v11904_v57, %v16660_v46 }
 0xa62   : > { %v12633_v3 = vpop.eup %12632  ;;  %v10444_v45 = vpop.f32.mrf.mxu1 }
 0xa63   : > { %v12635_v38 = vpop.eup %12634  ;;  %11005 = vst [vmem:[%s15984_s17 + $0x1c0] sm:$0xff] %v12633_v3  ;;  %v11782_v42 = vmul.f32 -1.442695, %v10453_v14  ;;  %v10445_v41 = vadd.f32 %v16660_v46, %v10444_v45 }
 0xa64   : > { %v12637_v30 = vpop.eup %12636  ;;  %v10817_v0 = vadd.f32 1.0, %v12635_v38  ;;  %v11905_v39 = vpop.f32.mrf.mxu1 }
 0xa65   : > { %v12639_v60 = vpop.eup %12638  ;;  %11003 = vst [vmem:[%s15984_s17 + $0x190] sm:$0xff] %v12637_v30  ;;  %12648 = vpow2.f32 %v11782_v42  ;;  %v11780_v4 = vmul.f32 -1.442695, %v10445_v41  ;;  %v10456_v63 = vadd.f32 %v11905_v39, %v16660_v46 }
 0xa66   : > { %12650 = vrcp.f32 %v10817_v0  ;;  %v10815_v15 = vadd.f32 1.0, %v12639_v60  ;;  %v10447_v32 = vpop.f32.mrf.mxu1 }
 0xa67   : > { %v12641_v1 = vpop.eup %12640  ;;  %12652 = vpow2.f32 %v11780_v4  ;;  %v11783_v35 = vmul.f32 -1.442695, %v10456_v63  ;;  %v10448_v47 = vadd.f32 %v16660_v46, %v10447_v32 }
 0xa68   : > { %v12643_v19 = vpop.eup %12642  ;;  %11006 = vst [vmem:[%s15984_s17 + $0x1d8] sm:$0xff] %v12641_v1  ;;  %12654 = vrcp.f32 %v10815_v15 }
 0xa69   : > { %v12645_v23 = vpop.eup %12644  ;;  %v10818_v24 = vadd.f32 1.0, %v12643_v19  ;;  %12656 = vpow2.f32 %v11783_v35  ;;  %v11781_v5 = vmul.f32 -1.442695, %v10448_v47 }
 0xa6a   : > { %v12647_v61 = vpop.eup %12646  ;;  %v10816_v58 = vadd.f32 1.0, %v12645_v23 }
 0xa6b   : > { %11004 = vst [vmem:[%s15984_s17 + $0x1a8] sm:$0xff] %v12647_v61  ;;  %12658 = vrcp.f32 %v10818_v24 }
 0xa6c   : > { %12660 = vrcp.f32 %v10816_v58 }
 0xa6d   : > { %12662 = vpow2.f32 %v11781_v5 }
 0xa70   : > { %v11908_v25 = vpop.f32.mrf.mxu1 }
 0xa71   : > { %v10469_v2 = vadd.f32 %v11908_v25, %v16660_v46 }
 0xa72   : > { %v12649_v56 = vpop.eup %12648  ;;  %v10460_v12 = vpop.f32.mrf.mxu1 }
 0xa73   : > { %v12651_v10 = vpop.eup %12650  ;;  %v10821_v29 = vadd.f32 1.0, %v12649_v56  ;;  %v11786_v37 = vmul.f32 -1.442695, %v10469_v2  ;;  %v10461_v43 = vadd.f32 %v16660_v46, %v10460_v12 }
 0xa74   : > { %v12653_v59 = vpop.eup %12652  ;;  %11009 = vst [vmem:[%s15984_s17 + $0x220] sm:$0xff] %v12651_v10  ;;  %v11909_v52 = vpop.f32.mrf.mxu1 }
 0xa75   : > { %v12655_v49 = vpop.eup %12654  ;;  %12664 = vrcp.f32 %v10821_v29  ;;  %v10819_v40 = vadd.f32 1.0, %v12653_v59  ;;  %v11784_v7 = vmul.f32 -1.442695, %v10461_v43  ;;  %v10472_v31 = vadd.f32 %v11909_v52, %v16660_v46 }
 0xa76   : > { %v12657_v33 = vpop.eup %12656  ;;  %11007 = vst [vmem:[%s15984_s17 + $0x1f0] sm:$0xff] %v12655_v49  ;;  %12666 = vpow2.f32 %v11786_v37  ;;  %v10463_v16 = vpop.f32.mrf.mxu1 }
 0xa77   : > { %12668 = vrcp.f32 %v10819_v40  ;;  %v10822_v22 = vadd.f32 1.0, %v12657_v33  ;;  %v11787_v28 = vmul.f32 -1.442695, %v10472_v31  ;;  %v10464_v20 = vadd.f32 %v16660_v46, %v10463_v16 }
 0xa78   : > { %v12659_v51 = vpop.eup %12658  ;;  %12670 = vpow2.f32 %v11784_v7 }
 0xa79   : > { %v12661_v26 = vpop.eup %12660  ;;  %11010 = vst [vmem:[%s15984_s17 + $0x238] sm:$0xff] %v12659_v51  ;;  %12672 = vrcp.f32 %v10822_v22  ;;  %v11785_v48 = vmul.f32 -1.442695, %v10464_v20 }
 0xa7a   : > { %v12663_v9 = vpop.eup %12662  ;;  %11008 = vst [vmem:[%s15984_s17 + $0x208] sm:$0xff] %v12661_v26  ;;  %12674 = vpow2.f32 %v11787_v28 }
 0xa7b   : > { %v10820_v6 = vadd.f32 1.0, %v12663_v9  ;;  %12676 = vpow2.f32 %v11785_v48 }
 0xa7d   : > { %12678 = vrcp.f32 %v10820_v6 }
 0xa80   : > { %v11912_v11 = vpop.f32.mrf.mxu1 }
 0xa81   : > { %v10485_v53 = vadd.f32 %v11912_v11, %v16660_v46 }
 0xa82   : > { %v12665_v13 = vpop.eup %12664  ;;  %v10476_v8 = vpop.f32.mrf.mxu1 }
 0xa83   : > { %v12667_v55 = vpop.eup %12666  ;;  %11013 = vst [vmem:[%s15984_s17 + $0x280] sm:$0xff] %v12665_v13  ;;  %v11790_v44 = vmul.f32 -1.442695, %v10485_v53  ;;  %v10477_v21 = vadd.f32 %v16660_v46, %v10476_v8 }
 0xa84   : > { %v12669_v62 = vpop.eup %12668  ;;  %v10825_v27 = vadd.f32 1.0, %v12667_v55  ;;  %v11913_v54 = vpop.f32.mrf.mxu1 }
 0xa85   : > { %v12671_v18 = vpop.eup %12670  ;;  %11011 = vst [vmem:[%s15984_s17 + $0x250] sm:$0xff] %v12669_v62  ;;  %12680 = vpow2.f32 %v11790_v44  ;;  %v11788_v36 = vmul.f32 -1.442695, %v10477_v21  ;;  %v10488_v50 = vadd.f32 %v11913_v54, %v16660_v46 }
 0xa86   : > { %v12673_v17 = vpop.eup %12672  ;;  %12682 = vrcp.f32 %v10825_v27  ;;  %v10823_v34 = vadd.f32 1.0, %v12671_v18  ;;  %v10479_v57 = vpop.f32.mrf.mxu1 }
 0xa87   : > { %v12675_v14 = vpop.eup %12674  ;;  %11014 = vst [vmem:[%s15984_s17 + $0x298] sm:$0xff] %v12673_v17  ;;  %12684 = vpow2.f32 %v11788_v36  ;;  %v11791_v3 = vmul.f32 -1.442695, %v10488_v50  ;;  %v10480_v45 = vadd.f32 %v16660_v46, %v10479_v57 }
 0xa88   : > { %v12677_v38 = vpop.eup %12676  ;;  %12686 = vrcp.f32 %v10823_v34  ;;  %v10826_v42 = vadd.f32 1.0, %v12675_v14 }
 0xa89   : > { %v10824_v30 = vadd.f32 1.0, %v12677_v38  ;;  %12688 = vpow2.f32 %v11791_v3  ;;  %v11789_v0 = vmul.f32 -1.442695, %v10480_v45 }
 0xa8a   : > { %v12679_v41 = vpop.eup %12678  ;;  %12690 = vrcp.f32 %v10826_v42 }
 0xa8b   : > { %11012 = vst [vmem:[%s15984_s17 + $0x268] sm:$0xff] %v12679_v41  ;;  %12692 = vrcp.f32 %v10824_v30 }
 0xa8c   : > { %12694 = vpow2.f32 %v11789_v0 }
 0xa90   : > { %v11916_v39 = vpop.f32.mrf.mxu1 }
 0xa91   : > { %v10501_v60 = vadd.f32 %v11916_v39, %v16660_v46 }
 0xa92   : > { %v12681_v4 = vpop.eup %12680  ;;  %v10492_v63 = vpop.f32.mrf.mxu1 }
 0xa93   : > { %v12683_v1 = vpop.eup %12682  ;;  %v10829_v15 = vadd.f32 1.0, %v12681_v4  ;;  %v11794_v32 = vmul.f32 -1.442695, %v10501_v60  ;;  %v10493_v19 = vadd.f32 %v16660_v46, %v10492_v63 }
 0xa94   : > { %v12685_v35 = vpop.eup %12684  ;;  %11017 = vst [vmem:[%s15984_s17 + $0x2e0] sm:$0xff] %v12683_v1  ;;  %v11917_v47 = vpop.f32.mrf.mxu1 }
 0xa95   : > { %v12687_v23 = vpop.eup %12686  ;;  %12696 = vrcp.f32 %v10829_v15  ;;  %v10827_v24 = vadd.f32 1.0, %v12685_v35  ;;  %v11792_v61 = vmul.f32 -1.442695, %v10493_v19  ;;  %v10504_v58 = vadd.f32 %v11917_v47, %v16660_v46 }
 0xa96   : > { %v12689_v5 = vpop.eup %12688  ;;  %11015 = vst [vmem:[%s15984_s17 + $0x2b0] sm:$0xff] %v12687_v23  ;;  %12698 = vpow2.f32 %v11794_v32  ;;  %v10495_v25 = vpop.f32.mrf.mxu1 }
 0xa97   : > { %v12691_v2 = vpop.eup %12690  ;;  %12700 = vrcp.f32 %v10827_v24  ;;  %v10830_v56 = vadd.f32 1.0, %v12689_v5  ;;  %v11795_v12 = vmul.f32 -1.442695, %v10504_v58  ;;  %v10496_v10 = vadd.f32 %v16660_v46, %v10495_v25 }
 0xa98   : > { %v12693_v29 = vpop.eup %12692  ;;  %11018 = vst [vmem:[%s15984_s17 + $0x2f8] sm:$0xff] %v12691_v2  ;;  %12702 = vpow2.f32 %v11792_v61 }
 0xa99   : > { %v12695_v37 = vpop.eup %12694  ;;  %11016 = vst [vmem:[%s15984_s17 + $0x2c8] sm:$0xff] %v12693_v29  ;;  %12704 = vrcp.f32 %v10830_v56  ;;  %v11793_v43 = vmul.f32 -1.442695, %v10496_v10 }
 0xa9a   : > { %v10828_v59 = vadd.f32 1.0, %v12695_v37  ;;  %12706 = vpow2.f32 %v11795_v12 }
 0xa9b   : > { %12708 = vpow2.f32 %v11793_v43 }
 0xa9c   : > { %12710 = vrcp.f32 %v10828_v59 }
 0xaa0   : > { %v11920_v52 = vpop.f32.mrf.mxu1 }
 0xaa1   : > { %v10517_v49 = vadd.f32 %v11920_v52, %v16660_v46 }
 0xaa2   : > { %v12697_v40 = vpop.eup %12696  ;;  %v10508_v7 = vpop.f32.mrf.mxu1 }
 0xaa3   : > { %v12699_v31 = vpop.eup %12698  ;;  %11021 = vst [vmem:[%s15984_s17 + $0x340] sm:$0xff] %v12697_v40  ;;  %v11798_v33 = vmul.f32 -1.442695, %v10517_v49  ;;  %v10509_v16 = vadd.f32 %v16660_v46, %v10508_v7 }
 0xaa4   : > { %v12701_v51 = vpop.eup %12700  ;;  %v10833_v22 = vadd.f32 1.0, %v12699_v31  ;;  %v11921_v28 = vpop.f32.mrf.mxu1 }
 0xaa5   : > { %v12703_v20 = vpop.eup %12702  ;;  %11019 = vst [vmem:[%s15984_s17 + $0x310] sm:$0xff] %v12701_v51  ;;  %12712 = vpow2.f32 %v11798_v33  ;;  %v11796_v26 = vmul.f32 -1.442695, %v10509_v16  ;;  %v10520_v9 = vadd.f32 %v11921_v28, %v16660_v46 }
 0xaa6   : > { %v12705_v48 = vpop.eup %12704  ;;  %12714 = vrcp.f32 %v10833_v22  ;;  %v10831_v6 = vadd.f32 1.0, %v12703_v20  ;;  %v10511_v11 = vpop.f32.mrf.mxu1 }
 0xaa7   : > { %v12707_v53 = vpop.eup %12706  ;;  %11022 = vst [vmem:[%s15984_s17 + $0x358] sm:$0xff] %v12705_v48  ;;  %12716 = vpow2.f32 %v11796_v26  ;;  %v11799_v13 = vmul.f32 -1.442695, %v10520_v9  ;;  %v10512_v8 = vadd.f32 %v16660_v46, %v10511_v11 }
 0xaa8   : > { %v12709_v55 = vpop.eup %12708  ;;  %12718 = vrcp.f32 %v10831_v6  ;;  %v10834_v44 = vadd.f32 1.0, %v12707_v53 }
 0xaa9   : > { %v12711_v21 = vpop.eup %12710  ;;  %v10832_v62 = vadd.f32 1.0, %v12709_v55  ;;  %12720 = vpow2.f32 %v11799_v13  ;;  %v11797_v27 = vmul.f32 -1.442695, %v10512_v8 }
 0xaaa   : > { %11020 = vst [vmem:[%s15984_s17 + $0x328] sm:$0xff] %v12711_v21  ;;  %12722 = vrcp.f32 %v10834_v44 }
 0xaab   : > { %12724 = vrcp.f32 %v10832_v62 }
 0xaac   : > { %12726 = vpow2.f32 %v11797_v27  ;;  %v16778_v27 = vld [vmem:[%s16825_s14] ss:$0 sm:$0xff] }
 0xab0   : > { %v11924_v54 = vpop.f32.mrf.mxu1 }
 0xab1   : > { %v10533_v18 = vadd.f32 %v11924_v54, %v16660_v46 }
 0xab2   : > { %v12713_v36 = vpop.eup %12712  ;;  %v10524_v50 = vpop.f32.mrf.mxu1 }
 0xab3   : > { %v12715_v17 = vpop.eup %12714  ;;  %v10837_v34 = vadd.f32 1.0, %v12713_v36  ;;  %v11802_v57 = vmul.f32 -1.442695, %v10533_v18  ;;  %v10525_v14 = vadd.f32 %v16660_v46, %v10524_v50 }
 0xab4   : > { %v12717_v3 = vpop.eup %12716  ;;  %11025 = vst [vmem:[%s15984_s17 + $0x3a0] sm:$0xff] %v12715_v17  ;;  %v11925_v45 = vpop.f32.mrf.mxu1 }
 0xab5   : > { %v12719_v38 = vpop.eup %12718  ;;  %12728 = vrcp.f32 %v10837_v34  ;;  %v10835_v42 = vadd.f32 1.0, %v12717_v3  ;;  %v11800_v41 = vmul.f32 -1.442695, %v10525_v14  ;;  %v10536_v30 = vadd.f32 %v11925_v45, %v16660_v46 }
 0xab6   : > { %v12721_v0 = vpop.eup %12720  ;;  %11023 = vst [vmem:[%s15984_s17 + $0x370] sm:$0xff] %v12719_v38  ;;  %12730 = vpow2.f32 %v11802_v57  ;;  %v10527_v39 = vpop.f32.mrf.mxu1 }
 0xab7   : > { %v12723_v60 = vpop.eup %12722  ;;  %12732 = vrcp.f32 %v10835_v42  ;;  %v10838_v4 = vadd.f32 1.0, %v12721_v0  ;;  %v11803_v63 = vmul.f32 -1.442695, %v10536_v30  ;;  %v10528_v1 = vadd.f32 %v16660_v46, %v10527_v39 }
 0xab8   : > { %v12725_v15 = vpop.eup %12724  ;;  %11026 = vst [vmem:[%s15984_s17 + $0x3b8] sm:$0xff] %v12723_v60  ;;  %12734 = vpow2.f32 %v11800_v41 }
 0xab9   : > { %v12727_v32 = vpop.eup %12726  ;;  %11024 = vst [vmem:[%s15984_s17 + $0x388] sm:$0xff] %v12725_v15  ;;  %12736 = vrcp.f32 %v10838_v4  ;;  %v11801_v19 = vmul.f32 -1.442695, %v10528_v1 }
 0xaba   : > { %v10836_v35 = vadd.f32 1.0, %v12727_v32  ;;  %12738 = vpow2.f32 %v11803_v63 }
 0xabb   : > { %12740 = vpow2.f32 %v11801_v19 }
 0xabc   : > { %12742 = vrcp.f32 %v10836_v35 }
 0xac0   : > { %v11928_v47 = vpop.f32.mrf.mxu1 }
 0xac1   : > { %v10549_v23 = vadd.f32 %v11928_v47, %v16660_v46 }
 0xac2   : > { %v12729_v24 = vpop.eup %12728  ;;  %v10540_v61 = vpop.f32.mrf.mxu1 }
 0xac3   : > { %v12731_v58 = vpop.eup %12730  ;;  %11029 = vst [vmem:[%s15984_s17 + $0x400] sm:$0xff] %v12729_v24  ;;  %v11806_v5 = vmul.f32 -1.442695, %v10549_v23  ;;  %v10541_v25 = vadd.f32 %v16660_v46, %v10540_v61 }
 0xac4   : > { %v12733_v2 = vpop.eup %12732  ;;  %v10841_v56 = vadd.f32 1.0, %v12731_v58  ;;  %v11929_v12 = vpop.f32.mrf.mxu1 }
 0xac5   : > { %v12735_v10 = vpop.eup %12734  ;;  %11027 = vst [vmem:[%s15984_s17 + $0x3d0] sm:$0xff] %v12733_v2  ;;  %12744 = vpow2.f32 %v11806_v5  ;;  %v11804_v29 = vmul.f32 -1.442695, %v10541_v25  ;;  %v10552_v37 = vadd.f32 %v11929_v12, %v16660_v46 }
 0xac6   : > { %v12737_v43 = vpop.eup %12736  ;;  %12746 = vrcp.f32 %v10841_v56  ;;  %v10839_v59 = vadd.f32 1.0, %v12735_v10  ;;  %v10543_v52 = vpop.f32.mrf.mxu1 }
 0xac7   : > { %v12739_v49 = vpop.eup %12738  ;;  %11030 = vst [vmem:[%s15984_s17 + $0x418] sm:$0xff] %v12737_v43  ;;  %12748 = vpow2.f32 %v11804_v29  ;;  %v11807_v40 = vmul.f32 -1.442695, %v10552_v37  ;;  %v10544_v7 = vadd.f32 %v16660_v46, %v10543_v52 }
 0xac8   : > { %v12741_v31 = vpop.eup %12740  ;;  %12750 = vrcp.f32 %v10839_v59  ;;  %v10842_v33 = vadd.f32 1.0, %v12739_v49 }
 0xac9   : > { %v12743_v16 = vpop.eup %12742  ;;  %v10840_v51 = vadd.f32 1.0, %v12741_v31  ;;  %12752 = vpow2.f32 %v11807_v40  ;;  %v11805_v22 = vmul.f32 -1.442695, %v10544_v7 }
 0xaca   : > { %11028 = vst [vmem:[%s15984_s17 + $0x3e8] sm:$0xff] %v12743_v16  ;;  %12754 = vrcp.f32 %v10842_v33 }
 0xacb   : > { %12756 = vrcp.f32 %v10840_v51 }
 0xacc   : > { %12758 = vpow2.f32 %v11805_v22 }
 0xad1   : > { %v11932_v28 = vpop.f32.mrf.mxu1 }
 0xad2   : > { %v12745_v20 = vpop.eup %12744  ;;  %v10565_v26 = vadd.f32 %v11932_v28, %v16660_v46 }
 0xad3   : > { %v12747_v9 = vpop.eup %12746  ;;  %v10845_v48 = vadd.f32 1.0, %v12745_v20  ;;  %v10556_v6 = vpop.f32.mrf.mxu1 }
 0xad4   : > { %v12749_v11 = vpop.eup %12748  ;;  %11033 = vst [vmem:[%s15984_s17 + $0x460] sm:$0xff] %v12747_v9  ;;  %v11810_v53 = vmul.f32 -1.442695, %v10565_v26  ;;  %v10557_v13 = vadd.f32 %v16660_v46, %v10556_v6 }
 0xad5   : > { %v12751_v8 = vpop.eup %12750  ;;  %12760 = vrcp.f32 %v10845_v48  ;;  %v10843_v55 = vadd.f32 1.0, %v12749_v11  ;;  %v11933_v44 = vpop.f32.mrf.mxu1 }
 0xad6   : > { %v12753_v21 = vpop.eup %12752  ;;  %11031 = vst [vmem:[%s15984_s17 + $0x430] sm:$0xff] %v12751_v8  ;;  %12762 = vpow2.f32 %v11810_v53  ;;  %v11808_v62 = vmul.f32 -1.442695, %v10557_v13  ;;  %v10568_v54 = vadd.f32 %v16778_v27, %v11933_v44 }
 0xad7   : > { %v12755_v18 = vpop.eup %12754  ;;  %12764 = vrcp.f32 %v10843_v55  ;;  %v10846_v46 = vadd.f32 1.0, %v12753_v21  ;;  %v10559_v36 = vpop.f32.mrf.mxu1 }
 0xad8   : > { %v12757_v50 = vpop.eup %12756  ;;  %11034 = vst [vmem:[%s15984_s17 + $0x478] sm:$0xff] %v12755_v18  ;;  %12766 = vpow2.f32 %v11808_v62  ;;  %v11811_v17 = vmul.f32 -1.442695, %v10568_v54  ;;  %v10560_v34 = vadd.f32 %v16778_v27, %v10559_v36 }
 0xad9   : > { %v12759_v57 = vpop.eup %12758  ;;  %11032 = vst [vmem:[%s15984_s17 + $0x448] sm:$0xff] %v12757_v50  ;;  %12768 = vrcp.f32 %v10846_v46 }
 0xada   : > { %v10844_v14 = vadd.f32 1.0, %v12759_v57  ;;  %12770 = vpow2.f32 %v11811_v17  ;;  %v11809_v3 = vmul.f32 -1.442695, %v10560_v34 }
 0xadc   : > { %12772 = vrcp.f32 %v10844_v14 }
 0xadd   : > { %12774 = vpow2.f32 %v11809_v3 }
 0xae1   : > { %v11936_v45 = vpop.f32.mrf.mxu1 }
 0xae2   : > { %v12761_v38 = vpop.eup %12760  ;;  %v10581_v42 = vadd.f32 %v16778_v27, %v11936_v45 }
 0xae3   : > { %v12763_v41 = vpop.eup %12762  ;;  %11037 = vst [vmem:[%s15984_s17 + $0x4c0] sm:$0xff] %v12761_v38  ;;  %v10572_v30 = vpop.f32.mrf.mxu1 }
 0xae4   : > { %v12765_v0 = vpop.eup %12764  ;;  %v10849_v39 = vadd.f32 1.0, %v12763_v41  ;;  %v11814_v60 = vmul.f32 -1.442695, %v10581_v42  ;;  %v10573_v4 = vadd.f32 %v16778_v27, %v10572_v30 }
 0xae5   : > { %v12767_v63 = vpop.eup %12766  ;;  %11035 = vst [vmem:[%s15984_s17 + $0x490] sm:$0xff] %v12765_v0  ;;  %v11937_v1 = vpop.f32.mrf.mxu1 }
 0xae6   : > { %v12769_v15 = vpop.eup %12768  ;;  %12776 = vrcp.f32 %v10849_v39  ;;  %v10847_v32 = vadd.f32 1.0, %v12767_v63  ;;  %v11812_v19 = vmul.f32 -1.442695, %v10573_v4  ;;  %v10584_v35 = vadd.f32 %v16778_v27, %v11937_v1 }
 0xae7   : > { %v12771_v47 = vpop.eup %12770  ;;  %11038 = vst [vmem:[%s15984_s17 + $0x4d8] sm:$0xff] %v12769_v15  ;;  %12778 = vpow2.f32 %v11814_v60  ;;  %v10575_v23 = vpop.f32.mrf.mxu1 }
 0xae8   : > { %12780 = vrcp.f32 %v10847_v32  ;;  %v10850_v24 = vadd.f32 1.0, %v12771_v47  ;;  %v11815_v61 = vmul.f32 -1.442695, %v10584_v35  ;;  %v10576_v58 = vadd.f32 %v16778_v27, %v10575_v23 }
 0xae9   : > { %v12773_v5 = vpop.eup %12772  ;;  %12782 = vpow2.f32 %v11812_v19 }
 0xaea   : > { %v12775_v25 = vpop.eup %12774  ;;  %11036 = vst [vmem:[%s15984_s17 + $0x4a8] sm:$0xff] %v12773_v5  ;;  %12784 = vrcp.f32 %v10850_v24  ;;  %v11813_v2 = vmul.f32 -1.442695, %v10576_v58 }
 0xaeb   : > { %v10848_v56 = vadd.f32 1.0, %v12775_v25  ;;  %12786 = vpow2.f32 %v11815_v61 }
 0xaec   : > { %12788 = vpow2.f32 %v11813_v2 }
 0xaed   : > { %12790 = vrcp.f32 %v10848_v56 }
 0xaf1   : > { %v11940_v12 = vpop.f32.mrf.mxu1 }
 0xaf2   : > { %v10597_v10 = vadd.f32 %v16778_v27, %v11940_v12 }
 0xaf3   : > { %v12777_v29 = vpop.eup %12776  ;;  %v10588_v37 = vpop.f32.mrf.mxu1 }
 0xaf4   : > { %v12779_v43 = vpop.eup %12778  ;;  %11041 = vst [vmem:[%s15984_s17 + $0x520] sm:$0xff] %v12777_v29  ;;  %v11818_v59 = vmul.f32 -1.442695, %v10597_v10  ;;  %v10589_v52 = vadd.f32 %v16778_v27, %v10588_v37 }
 0xaf5   : > { %v12781_v49 = vpop.eup %12780  ;;  %v10853_v40 = vadd.f32 1.0, %v12779_v43  ;;  %v11941_v7 = vpop.f32.mrf.mxu1 }
 0xaf6   : > { %v12783_v31 = vpop.eup %12782  ;;  %11039 = vst [vmem:[%s15984_s17 + $0x4f0] sm:$0xff] %v12781_v49  ;;  %12792 = vpow2.f32 %v11818_v59  ;;  %v11816_v33 = vmul.f32 -1.442695, %v10589_v52  ;;  %v10600_v16 = vadd.f32 %v16778_v27, %v11941_v7 }
 0xaf7   : > { %v12785_v51 = vpop.eup %12784  ;;  %12794 = vrcp.f32 %v10853_v40  ;;  %v10851_v22 = vadd.f32 1.0, %v12783_v31  ;;  %v10591_v28 = vpop.f32.mrf.mxu1 }
 0xaf8   : > { %v12787_v20 = vpop.eup %12786  ;;  %11042 = vst [vmem:[%s15984_s17 + $0x538] sm:$0xff] %v12785_v51  ;;  %12796 = vpow2.f32 %v11816_v33  ;;  %v11819_v26 = vmul.f32 -1.442695, %v10600_v16  ;;  %v10592_v9 = vadd.f32 %v16778_v27, %v10591_v28 }
 0xaf9   : > { %v12789_v48 = vpop.eup %12788  ;;  %12798 = vrcp.f32 %v10851_v22  ;;  %v10854_v6 = vadd.f32 1.0, %v12787_v20 }
 0xafa   : > { %v12791_v11 = vpop.eup %12790  ;;  %v10852_v53 = vadd.f32 1.0, %v12789_v48  ;;  %12800 = vpow2.f32 %v11819_v26  ;;  %v11817_v13 = vmul.f32 -1.442695, %v10592_v9 }
 0xafb   : > { %11040 = vst [vmem:[%s15984_s17 + $0x508] sm:$0xff] %v12791_v11  ;;  %12802 = vrcp.f32 %v10854_v6 }
 0xafc   : > { %12804 = vrcp.f32 %v10852_v53 }
 0xafd   : > { %12806 = vpow2.f32 %v11817_v13 }
 0xb03   : > { %v12793_v8 = vpop.eup %12792 }
 0xb04   : > { %v12795_v55 = vpop.eup %12794  ;;  %v10857_v44 = vadd.f32 1.0, %v12793_v8 }
 0xb05   : > { %v12797_v21 = vpop.eup %12796  ;;  %11045 = vst [vmem:[%s15984_s17 + $0x580] sm:$0xff] %v12795_v55 }
 0xb06   : > { %v12799_v62 = vpop.eup %12798  ;;  %12808 = vrcp.f32 %v10857_v44  ;;  %v10855_v27 = vadd.f32 1.0, %v12797_v21 }
 0xb07   : > { %v12801_v54 = vpop.eup %12800  ;;  %11043 = vst [vmem:[%s15984_s17 + $0x550] sm:$0xff] %v12799_v62 }
 0xb08   : > { %v12803_v18 = vpop.eup %12802  ;;  %12810 = vrcp.f32 %v10855_v27  ;;  %v10858_v46 = vadd.f32 1.0, %v12801_v54 }
 0xb09   : > { %v12805_v36 = vpop.eup %12804  ;;  %11046 = vst [vmem:[%s15984_s17 + $0x598] sm:$0xff] %v12803_v18 }
 0xb0a   : > { %v12807_v50 = vpop.eup %12806  ;;  %11044 = vst [vmem:[%s15984_s17 + $0x568] sm:$0xff] %v12805_v36  ;;  %12812 = vrcp.f32 %v10858_v46 }
 0xb0b   : > { %v10856_v17 = vadd.f32 1.0, %v12807_v50 }
 0xb0d   : > { %12814 = vrcp.f32 %v10856_v17 }
 0xb13   : > { %v12809_v34 = vpop.eup %12808 }
 0xb14   : > { %11049 = vst [vmem:[%s15984_s17 + $0x5e0] sm:$0xff] %v12809_v34 }
 0xb15   : > { %v12811_v57 = vpop.eup %12810 }
 0xb16   : > { %11047 = vst [vmem:[%s15984_s17 + $0x5b0] sm:$0xff] %v12811_v57 }
 0xb17   : > { %v12813_v14 = vpop.eup %12812 }
 0xb18   : > { %11050 = vst [vmem:[%s15984_s17 + $0x5f8] sm:$0xff] %v12813_v14 }
 0xb1a   : > { %v12815_v3 = vpop.eup %12814 }
 0xb1b   : > { %11048 = vst [vmem:[%s15984_s17 + $0x5c8] sm:$0xff] %v12815_v3 }
 0xb1c PF: > { %s25_s18 = sadd.s32 1, %s12832_s18  }
 0xb1d   : > { %p22_p4 = scmp.ge.s32.totalorder %s25_s18, 4  }
 0xb1f   :  { %24 = sbr.rel (!%p22_p4) target bundleno = 1 (0x1), region = 125 }

</bundles_post_ra>
